<compile_context>
chip_gen: v7x
topology: tpu7x:2x2x1
jax: 0.10.0
libtpu: 0.0.40
codegen_flags: <defaults>
</compile_context>

<pallas_src>
import math
import jax
import jax.numpy as jnp
from jax.experimental import pallas as pl
from jax.experimental.pallas import tpu as pltpu


_PV_PER_LAYER = 18  # packed f32 vector rows per layer (see pack_decoder_params)


# ----------------------------- fused kernel --------------------------------

def _make_decoder_kernel(num_layers, nhead, d_model, batch_block, out_pad,
                         eps=1e-5):
    D = d_model
    dh = D // nhead
    scale = 1.0 / math.sqrt(dh)
    PV = _PV_PER_LAYER

    def _ln(x, g, b):
        mu = jnp.mean(x, axis=-1, keepdims=True)
        xc = x - mu
        var = jnp.mean(xc * xc, axis=-1, keepdims=True)
        return xc * jax.lax.rsqrt(var + eps) * g + b

    def kernel(tgt_ref, qp_ref, dep_ref, mem_ref, memp_ref,
               w_self_ref, w_q23_ref, w_qp_ref, w_kvdep_ref,
               w_kmem_ref, w_vomem_ref, w1_ref, b1_ref, w2_ref,
               pvec_ref, out_ref):
        f32 = jnp.float32
        bf16 = jnp.bfloat16

        def pv(i):
            # one packed f32 parameter row -> (1, D)
            return pvec_ref[pl.ds(i, 1), :]

        x = tgt_ref[0].astype(f32)                 # (RQ, D) residual stream
        qp_bf = qp_ref[0].astype(bf16)             # (RQ, D)
        dep_bf = dep_ref[0].astype(bf16)           # (RKd, D)
        mem_bf = mem_ref[0].astype(bf16)           # (RKm, D)
        memp_bf = memp_ref[0].astype(bf16)         # (RKm, D) (memory + pos)

        # ---- loop-invariant projections, fused across all layers ----
        # query_pos @ [Wq_self|Wk_self|Wq_dep|Wq_mem]  per layer
        qpz = jnp.dot(qp_bf, w_qp_ref[...], preferred_element_type=f32)
        # dep @ [Wk_dep | Wvo_dep]  per layer
        depz = jnp.dot(dep_bf, w_kvdep_ref[...], preferred_element_type=f32)
        # (memory+pos) @ Wk_mem  per layer,  memory @ Wvo_mem  per layer
        kmem = jnp.dot(memp_bf, w_kmem_ref[...], preferred_element_type=f32)
        vomem = jnp.dot(mem_bf, w_vomem_ref[...], preferred_element_type=f32)

        def attention(q, k, vo, bo):
            # q: (RQ, D) f32; k: (RK, D) f32; vo: (RK, nhead*D) f32 (Wv*Wo folded)
            Lq = q.shape[0] // batch_block
            Sk = k.shape[0] // batch_block
            outs = []
            for b in range(batch_block):
                qb = q[b * Lq:(b + 1) * Lq]
                kb = k[b * Sk:(b + 1) * Sk]
                vob = vo[b * Sk:(b + 1) * Sk]
                acc = None
                for h in range(nhead):
                    qh = qb[:, h * dh:(h + 1) * dh].astype(bf16)
                    kh = kb[:, h * dh:(h + 1) * dh].astype(bf16)
                    voh = vob[:, h * D:(h + 1) * D].astype(bf16)
                    s = jax.lax.dot_general(
                        qh, kh, (((1,), (1,)), ((), ())),
                        preferred_element_type=f32) * scale
                    s = s - jnp.max(s, axis=-1, keepdims=True)
                    p = jnp.exp(s)
                    p = p * pl.reciprocal(jnp.sum(p, axis=-1, keepdims=True),
                                          approx=True)
                    av = jnp.dot(p.astype(bf16), voh,
                                 preferred_element_type=f32)     # (Lq, D)
                    acc = av if acc is None else acc + av
                outs.append(acc)
            o = outs[0] if batch_block == 1 else jnp.concatenate(outs, axis=0)
            return o + bo                                        # (RQ, D)

        # TODO(synk): at real depth (NL>=6) replace this static unroll by a
        # layer grid axis / lax.fori_loop so live ranges stay bounded.
        for l in range(num_layers):
            base = l * PV
            q4 = l * 4 * D
            k5 = l * 5 * D

            # ---- 1) self-attention: q = k = x + query_pos, v = x ----
            xz = jnp.dot(x.astype(bf16), w_self_ref[l],
                         preferred_element_type=f32)             # (RQ, 6D)
            q_s = xz[:, 0:D] + qpz[:, q4:q4 + D] + pv(base + 0)
            k_s = xz[:, D:2 * D] + qpz[:, q4 + D:q4 + 2 * D] + pv(base + 1)
            vo_s = xz[:, 2 * D:6 * D]
            a = attention(q_s, k_s, vo_s, pv(base + 2))
            x = _ln(x + a, pv(base + 10), pv(base + 14))

            # ---- 2) cross-attention to depth features ----
            qd = (jnp.dot(x.astype(bf16), w_q23_ref[l, 0],
                          preferred_element_type=f32)
                  + qpz[:, q4 + 2 * D:q4 + 3 * D] + pv(base + 3))
            k_d = depz[:, k5:k5 + D] + pv(base + 4)
            vo_d = depz[:, k5 + D:k5 + 5 * D]
            a = attention(qd, k_d, vo_d, pv(base + 5))
            x = _ln(x + a, pv(base + 11), pv(base + 15))

            # ---- 3) cross-attention to encoder memory (+pos on keys) ----
            qm = (jnp.dot(x.astype(bf16), w_q23_ref[l, 1],
                          preferred_element_type=f32)
                  + qpz[:, q4 + 3 * D:q4 + 4 * D] + pv(base + 6))
            k_m = kmem[:, l * D:(l + 1) * D] + pv(base + 7)
            vo_m = vomem[:, l * 4 * D:(l + 1) * 4 * D]
            a = attention(qm, k_m, vo_m, pv(base + 8))
            x = _ln(x + a, pv(base + 12), pv(base + 16))

            # ---- 4) feed-forward ----
            h1 = jnp.dot(x.astype(bf16), w1_ref[l],
                         preferred_element_type=f32) + b1_ref[l]
            h1 = jnp.maximum(h1, 0.0)
            f = jnp.dot(h1.astype(bf16), w2_ref[l],
                        preferred_element_type=f32) + pv(base + 9)
            x = _ln(x + f, pv(base + 13), pv(base + 17))

        # final (stack) LayerNorm
        x = _ln(x, pv(num_layers * PV), pv(num_layers * PV + 1))

        # lane-dense store: pad feature dim to a multiple of 128
        if out_pad > D:
            x = jnp.concatenate(
                [x, jnp.zeros((x.shape[0], out_pad - D), f32)], axis=-1)
        out_ref[0] = x.astype(out_ref.dtype)

    return kernel


# ------------------------------ forward pass --------------------------------

def _default_batch_block(B):
    """Fold the whole batch into one invocation on single-TC parts (v5e/v6e);
    keep one batch element per grid step on v7x (two TensorCores)."""
    try:
        kind = jax.devices()[0].device_kind.lower()
    except Exception:
        kind = ""
    if "v7" in kind or "7x" in kind:
        return 1
    return B


def transformer_decoder_fwd(tgt, dep, memory, pos, query_pos, packed, nhead,
                            batch_block=None):
    """TransformerDecoder.forward with return_intermediate=False.

    tgt/query_pos: (L, B, D); dep/memory/pos: (S, B, D). Returns (1, L, B, D).
    """
    L, B, D = tgt.shape
    Sd = dep.shape[0]
    Sm = memory.shape[0]
    NL = packed["w1"].shape[0]
    F = packed["w1"].shape[2]

    if batch_block is None:
        batch_block = _default_batch_block(B)
    assert B % batch_block == 0
    grid_b = B // batch_block

    RQ = batch_block * L
    RKd = batch_block * Sd
    RKm = batch_block * Sm
    NPV = NL * _PV_PER_LAYER + 2
    out_pad = max(D, pl.cdiv(D, 128) * 128)

    # batch-first, then fold `batch_block` batch elements into rows.
    def fold(a, S):
        return jnp.transpose(a, (1, 0, 2)).reshape(grid_b, batch_block * S, D)

    tgt_f = fold(tgt, L)
    qp_f = fold(query_pos, L)
    dep_f = fold(dep, Sd)
    mem_f = fold(memory, Sm)
    memp_f = fold(memory + pos, Sm)     # hoisted loop-invariant add

    kernel = _make_decoder_kernel(NL, nhead, D, batch_block, out_pad)

    out_f = pl.pallas_call(
        kernel,
        out_shape=jax.ShapeDtypeStruct((grid_b, RQ, out_pad), tgt.dtype),
        grid=(grid_b,),
        in_specs=[
            pl.BlockSpec((1, RQ, D), lambda b: (b, 0, 0)),            # tgt
            pl.BlockSpec((1, RQ, D), lambda b: (b, 0, 0)),            # query_pos
            pl.BlockSpec((1, RKd, D), lambda b: (b, 0, 0)),           # dep
            pl.BlockSpec((1, RKm, D), lambda b: (b, 0, 0)),           # memory
            pl.BlockSpec((1, RKm, D), lambda b: (b, 0, 0)),           # memory+pos
            pl.BlockSpec((NL, D, 6 * D), lambda b: (0, 0, 0)),        # w_self
            pl.BlockSpec((NL, 2, D, D), lambda b: (0, 0, 0, 0)),      # w_q23
            pl.BlockSpec((D, NL * 4 * D), lambda b: (0, 0)),          # w_qp
            pl.BlockSpec((D, NL * 5 * D), lambda b: (0, 0)),          # w_kvdep
            pl.BlockSpec((D, NL * D), lambda b: (0, 0)),              # w_kmem
            pl.BlockSpec((D, NL * 4 * D), lambda b: (0, 0)),          # w_vomem
            pl.BlockSpec((NL, D, F), lambda b: (0, 0, 0)),            # ffn W1
            pl.BlockSpec((NL, 1, F), lambda b: (0, 0, 0)),            # ffn b1
            pl.BlockSpec((NL, F, D), lambda b: (0, 0, 0)),            # ffn W2
            pl.BlockSpec((NPV, D), lambda b: (0, 0)),                 # packed vecs
        ],
        out_specs=pl.BlockSpec((1, RQ, out_pad), lambda b: (b, 0, 0)),
        compiler_params=pltpu.CompilerParams(
            dimension_semantics=("parallel",),
            vmem_limit_bytes=32 * 1024 * 1024),
    )(tgt_f, qp_f, dep_f, mem_f, memp_f,
      packed["w_self"], packed["w_q23"], packed["w_qp"], packed["w_kvdep"],
      packed["w_kmem"], packed["w_vomem"], packed["w1"], packed["b1"],
      packed["w2"], packed["pvec"])

    out = out_f[..., :D].reshape(grid_b, batch_block, L, D).reshape(B, L, D)
    out = jnp.transpose(out, (1, 0, 2))     # back to (L, B, D)
    return out[None]                        # .unsqueeze(0)


# ------------------------------ param packing --------------------------------

def pack_decoder_params(layer_params, final_norm, nhead):
    """Fuse/stack per-layer params for the kernel.

    - Wv and Wo are folded per head (Wvo_h = Wv[:,h*dh:(h+1)*dh] @ Wo[h*dh:(h+1)*dh,:]),
      the value bias is folded into the output bias (bv @ Wo + bo).
    - All matmul weights pre-cast to bf16; biases / LayerNorm params stay f32
      and are packed into one (N, D) array (+ a separate (NL,1,F) for b1).
    """
    D = layer_params[0]["w1"].shape[0]
    dh = D // nhead
    bf = jnp.bfloat16

    def wvo(att):
        blocks = []
        for h in range(nhead):
            sl = slice(h * dh, (h + 1) * dh)
            blocks.append(att["wv"][:, sl] @ att["wo"][sl, :])   # (D, D)
        return jnp.concatenate(blocks, axis=1)                    # (D, nhead*D)

    def bo_fold(att):
        return att["bv"] @ att["wo"] + att["bo"]                  # (D,)

    w_self, w_q23, w1, b1, w2 = [], [], [], [], []
    wqp_c, wkvdep_c, wkmem_c, wvomem_c = [], [], [], []
    pvec_rows = []
    for p in layer_params:
        sa, da, ca = p["self_attn"], p["dep_attn"], p["cross_attn"]
        w_self.append(jnp.concatenate([sa["wq"], sa["wk"], wvo(sa)], axis=1))
        w_q23.append(jnp.stack([da["wq"], ca["wq"]]))
        wqp_c.append(jnp.concatenate([sa["wq"], sa["wk"], da["wq"], ca["wq"]],
                                     axis=1))
        wkvdep_c.append(jnp.concatenate([da["wk"], wvo(da)], axis=1))
        wkmem_c.append(ca["wk"])
        wvomem_c.append(wvo(ca))
        w1.append(p["w1"]); b1.append(p["b1"][None, :]); w2.append(p["w2"])
        pvec_rows += [
            sa["bq"], sa["bk"], bo_fold(sa),
            da["bq"], da["bk"], bo_fold(da),
            ca["bq"], ca["bk"], bo_fold(ca),
            p["b2"],
            p["norm1_g"], p["norm_dep_g"], p["norm2_g"], p["norm3_g"],
            p["norm1_b"], p["norm_dep_b"], p["norm2_b"], p["norm3_b"],
        ]
    pvec_rows += [final_norm["g"], final_norm["b"]]

    return dict(
        w_self=jnp.stack(w_self).astype(bf),                     # (NL, D, 6D)
        w_q23=jnp.stack(w_q23).astype(bf),                       # (NL, 2, D, D)
        w_qp=jnp.concatenate(wqp_c, axis=1).astype(bf),          # (D, NL*4D)
        w_kvdep=jnp.concatenate(wkvdep_c, axis=1).astype(bf),    # (D, NL*5D)
        w_kmem=jnp.concatenate(wkmem_c, axis=1).astype(bf),      # (D, NL*D)
        w_vomem=jnp.concatenate(wvomem_c, axis=1).astype(bf),    # (D, NL*4D)
        w1=jnp.stack(w1).astype(bf),                             # (NL, D, F)
        b1=jnp.stack(b1).astype(jnp.float32),                    # (NL, 1, F)
        w2=jnp.stack(w2).astype(bf),                             # (NL, F, D)
        pvec=jnp.stack(pvec_rows).astype(jnp.float32),           # (NL*18+2, D)
    )


# ------------------------- pure-JAX f32 reference ----------------------------

def _ref_mha(q_in, k_in, v_in, p, nhead):
    D = q_in.shape[-1]
    dh = D // nhead
    q = q_in @ p["wq"] + p["bq"]
    k = k_in @ p["wk"] + p["bk"]
    v = v_in @ p["wv"] + p["bv"]

    def split(t):
        B, L, _ = t.shape
        return t.reshape(B, L, nhead, dh).transpose(0, 2, 1, 3)

    qh, kh, vh = split(q), split(k), split(v)
    s = jnp.einsum("bhqd,bhkd->bhqk", qh, kh) / math.sqrt(dh)
    a = jax.nn.softmax(s, axis=-1)
    o = jnp.einsum("bhqk,bhkd->bhqd", a, vh)
    B, H, L, _ = o.shape
    o = o.transpose(0, 2, 1, 3).reshape(B, L, D)
    return o @ p["wo"] + p["bo"]


def reference_decoder(tgt, dep, memory, pos, query_pos, layer_params,
                      final_norm, nhead, eps=1e-5):
    def ln(x, g, b):
        mu = x.mean(-1, keepdims=True)
        var = ((x - mu) ** 2).mean(-1, keepdims=True)
        return (x - mu) * jax.lax.rsqrt(var + eps) * g + b

    x = jnp.transpose(tgt, (1, 0, 2))
    qp = jnp.transpose(query_pos, (1, 0, 2))
    dp = jnp.transpose(dep, (1, 0, 2))
    mem = jnp.transpose(memory, (1, 0, 2))
    memp = jnp.transpose(memory + pos, (1, 0, 2))
    for p in layer_params:
        a = _ref_mha(x + qp, x + qp, x, p["self_attn"], nhead)
        x = ln(x + a, p["norm1_g"], p["norm1_b"])
        a = _ref_mha(x + qp, dp, dp, p["dep_attn"], nhead)
        x = ln(x + a, p["norm_dep_g"], p["norm_dep_b"])
        a = _ref_mha(x + qp, memp, mem, p["cross_attn"], nhead)
        x = ln(x + a, p["norm2_g"], p["norm2_b"])
        h = jnp.maximum(x @ p["w1"] + p["b1"], 0.0)
        f = h @ p["w2"] + p["b2"]
        x = ln(x + f, p["norm3_g"], p["norm3_b"])
    x = ln(x, final_norm["g"], final_norm["b"])
    return jnp.transpose(x, (1, 0, 2))[None]


# ------------------------------ param init ----------------------------------

def _init_mha(key, D):
    ks = jax.random.split(key, 4)
    s = 0.02
    return {
        "wq": jax.random.normal(ks[0], (D, D), jnp.float32) * s,
        "bq": jnp.zeros((D,), jnp.float32),
        "wk": jax.random.normal(ks[1], (D, D), jnp.float32) * s,
        "bk": jnp.zeros((D,), jnp.float32),
        "wv": jax.random.normal(ks[2], (D, D), jnp.float32) * s,
        "bv": jnp.zeros((D,), jnp.float32),
        "wo": jax.random.normal(ks[3], (D, D), jnp.float32) * s,
        "bo": jnp.zeros((D,), jnp.float32),
    }


def _init_layer(key, D, F):
    ks = jax.random.split(key, 5)
    s = 0.02
    return {
        "self_attn": _init_mha(ks[0], D),
        "dep_attn": _init_mha(ks[1], D),
        "cross_attn": _init_mha(ks[2], D),
        "w1": jax.random.normal(ks[3], (D, F), jnp.float32) * s,
        "b1": jnp.zeros((F,), jnp.float32),
        "w2": jax.random.normal(ks[4], (F, D), jnp.float32) * s,
        "b2": jnp.zeros((D,), jnp.float32),
        "norm1_g": jnp.ones((D,), jnp.float32), "norm1_b": jnp.zeros((D,), jnp.float32),
        "norm_dep_g": jnp.ones((D,), jnp.float32), "norm_dep_b": jnp.zeros((D,), jnp.float32),
        "norm2_g": jnp.ones((D,), jnp.float32), "norm2_b": jnp.zeros((D,), jnp.float32),
        "norm3_g": jnp.ones((D,), jnp.float32), "norm3_b": jnp.zeros((D,), jnp.float32),
    }


# --------------------------------- main --------------------------------------

if __name__ == "__main__":
    D_MODEL = 32       # hidden
    NHEAD = 4          # heads (head_dim = 8)
    DIM_FF = 64        # feed-forward
    NUM_LAYERS = 2
    NUM_QUERIES = 8    # tgt length
    HW = 16            # memory / depth-feature length
    BATCH = 2

    root = jax.random.PRNGKey(0)
    k_in, k_par = jax.random.split(root)
    ki = jax.random.split(k_in, 5)

    tgt = jax.random.normal(ki[0], (NUM_QUERIES, BATCH, D_MODEL), jnp.float32)
    dep = jax.random.normal(ki[1], (HW, BATCH, D_MODEL), jnp.float32)
    memory = jax.random.normal(ki[2], (HW, BATCH, D_MODEL), jnp.float32)
    pos = jax.random.normal(ki[3], (HW, BATCH, D_MODEL), jnp.float32)
    query_pos = jax.random.normal(ki[4], (NUM_QUERIES, BATCH, D_MODEL), jnp.float32)

    kp = jax.random.split(k_par, NUM_LAYERS)
    layer_params = [_init_layer(kp[i], D_MODEL, DIM_FF) for i in range(NUM_LAYERS)]
    final_norm = {"g": jnp.ones((D_MODEL,), jnp.float32),
                  "b": jnp.zeros((D_MODEL,), jnp.float32)}

    packed = pack_decoder_params(layer_params, final_norm, NHEAD)

    # TODO(synk): tgt_mask / memory_mask / key-padding masks are None in the
    # reference call path used here; masked attention is not implemented.

    fwd = jax.jit(lambda t, d, m, p_, qp, pk: transformer_decoder_fwd(
        t, d, m, p_, qp, pk, NHEAD))

    out = fwd(tgt, dep, memory, pos, query_pos, packed)
    jax.block_until_ready(out)
    assert out.shape == (1, NUM_QUERIES, BATCH, D_MODEL)
    assert jnp.all(jnp.isfinite(out))

    # Correctness check against a pure-JAX f32 reference (bf16 drift tolerance).
    ref = reference_decoder(tgt, dep, memory, pos, query_pos,
                            layer_params, final_norm, NHEAD)
    err = float(jnp.max(jnp.abs(out - ref)))
    assert err < 5e-2, f"mismatch vs reference: max abs err = {err}"

    print("KERNEL_OK")
</pallas_src>

<mosaic_0001>
module attributes {stable_mosaic.version = 11 : i64} {
  func.func @kernel(%arg0: i32, %arg1: memref<1x16x32xf32, #tpu.memory_space<vmem>>, %arg2: memref<1x16x32xf32, #tpu.memory_space<vmem>>, %arg3: memref<1x32x32xf32, #tpu.memory_space<vmem>>, %arg4: memref<1x32x32xf32, #tpu.memory_space<vmem>>, %arg5: memref<1x32x32xf32, #tpu.memory_space<vmem>>, %arg6: memref<2x32x192xbf16, #tpu.memory_space<vmem>>, %arg7: memref<2x2x32x32xbf16, #tpu.memory_space<vmem>>, %arg8: memref<32x256xbf16, #tpu.memory_space<vmem>>, %arg9: memref<32x320xbf16, #tpu.memory_space<vmem>>, %arg10: memref<32x64xbf16, #tpu.memory_space<vmem>>, %arg11: memref<32x256xbf16, #tpu.memory_space<vmem>>, %arg12: memref<2x32x64xbf16, #tpu.memory_space<vmem>>, %arg13: memref<2x1x64xf32, #tpu.memory_space<vmem>>, %arg14: memref<2x64x32xbf16, #tpu.memory_space<vmem>>, %arg15: memref<38x32xf32, #tpu.memory_space<vmem>>, %arg16: memref<1x16x128xf32, #tpu.memory_space<vmem>>) attributes {dimension_semantics = [#tpu.dimension_semantics<parallel>], iteration_bounds = array<i64: 1>, scalar_prefetch = 0 : i64, scratch_operands = 0 : i64, tpu.core_type = #tpu.core_type<tc>, window_params = [{transform_indices = @transform_0, window_bounds = array<i64: 1, 16, 32>}, {transform_indices = @transform_1, window_bounds = array<i64: 1, 16, 32>}, {transform_indices = @transform_2, window_bounds = array<i64: 1, 32, 32>}, {transform_indices = @transform_3, window_bounds = array<i64: 1, 32, 32>}, {transform_indices = @transform_4, window_bounds = array<i64: 1, 32, 32>}, {pipeline_mode = #tpu.pipeline_mode<synchronous>, transform_indices = @transform_5, window_bounds = array<i64: 2, 32, 192>}, {pipeline_mode = #tpu.pipeline_mode<synchronous>, transform_indices = @transform_6, window_bounds = array<i64: 2, 2, 32, 32>}, {pipeline_mode = #tpu.pipeline_mode<synchronous>, transform_indices = @transform_7, window_bounds = array<i64: 32, 256>}, {pipeline_mode = #tpu.pipeline_mode<synchronous>, transform_indices = @transform_8, window_bounds = array<i64: 32, 320>}, {pipeline_mode = #tpu.pipeline_mode<synchronous>, transform_indices = @transform_9, window_bounds = array<i64: 32, 64>}, {pipeline_mode = #tpu.pipeline_mode<synchronous>, transform_indices = @transform_10, window_bounds = array<i64: 32, 256>}, {pipeline_mode = #tpu.pipeline_mode<synchronous>, transform_indices = @transform_11, window_bounds = array<i64: 2, 32, 64>}, {pipeline_mode = #tpu.pipeline_mode<synchronous>, transform_indices = @transform_12, window_bounds = array<i64: 2, 1, 64>}, {pipeline_mode = #tpu.pipeline_mode<synchronous>, transform_indices = @transform_13, window_bounds = array<i64: 2, 64, 32>}, {pipeline_mode = #tpu.pipeline_mode<synchronous>, transform_indices = @transform_14, window_bounds = array<i64: 38, 32>}, {transform_indices = @transform_15, window_bounds = array<i64: 1, 16, 128>}]} {
    %c0 = arith.constant 0 : index
    %c0_0 = arith.constant 0 : index
    %c0_1 = arith.constant 0 : index
    %0 = vector.load %arg1[%c0, %c0_0, %c0_1] : memref<1x16x32xf32, #tpu.memory_space<vmem>>, vector<1x16x32xf32>
    %1 = vector.shape_cast %0 : vector<1x16x32xf32> to vector<16x32xf32>
    %c0_2 = arith.constant 0 : index
    %c0_3 = arith.constant 0 : index
    %c0_4 = arith.constant 0 : index
    %2 = vector.load %arg2[%c0_2, %c0_3, %c0_4] : memref<1x16x32xf32, #tpu.memory_space<vmem>>, vector<1x16x32xf32>
    %3 = vector.shape_cast %2 : vector<1x16x32xf32> to vector<16x32xf32>
    %4 = arith.truncf %3 : vector<16x32xf32> to vector<16x32xbf16>
    %c0_5 = arith.constant 0 : index
    %c0_6 = arith.constant 0 : index
    %c0_7 = arith.constant 0 : index
    %5 = vector.load %arg3[%c0_5, %c0_6, %c0_7] : memref<1x32x32xf32, #tpu.memory_space<vmem>>, vector<1x32x32xf32>
    %6 = vector.shape_cast %5 : vector<1x32x32xf32> to vector<32x32xf32>
    %7 = arith.truncf %6 : vector<32x32xf32> to vector<32x32xbf16>
    %c0_8 = arith.constant 0 : index
    %c0_9 = arith.constant 0 : index
    %c0_10 = arith.constant 0 : index
    %8 = vector.load %arg4[%c0_8, %c0_9, %c0_10] : memref<1x32x32xf32, #tpu.memory_space<vmem>>, vector<1x32x32xf32>
    %9 = vector.shape_cast %8 : vector<1x32x32xf32> to vector<32x32xf32>
    %10 = arith.truncf %9 : vector<32x32xf32> to vector<32x32xbf16>
    %c0_11 = arith.constant 0 : index
    %c0_12 = arith.constant 0 : index
    %c0_13 = arith.constant 0 : index
    %11 = vector.load %arg5[%c0_11, %c0_12, %c0_13] : memref<1x32x32xf32, #tpu.memory_space<vmem>>, vector<1x32x32xf32>
    %12 = vector.shape_cast %11 : vector<1x32x32xf32> to vector<32x32xf32>
    %13 = arith.truncf %12 : vector<32x32xf32> to vector<32x32xbf16>
    %c0_14 = arith.constant 0 : index
    %c0_15 = arith.constant 0 : index
    %14 = vector.load %arg8[%c0_14, %c0_15] : memref<32x256xbf16, #tpu.memory_space<vmem>>, vector<32x256xbf16>
    %cst = arith.constant dense<0.000000e+00> : vector<16x256xf32>
    %15 = tpu.matmul %4, %14, %cst {dimension_numbers = #tpu.dot_dimension_numbers<[1], [0], [0], [1], [0, 0, 1, 1], [], []>} : vector<16x32xbf16>, vector<32x256xbf16>, vector<16x256xf32> -> vector<16x256xf32>
    %c0_16 = arith.constant 0 : index
    %c0_17 = arith.constant 0 : index
    %16 = vector.load %arg9[%c0_16, %c0_17] : memref<32x320xbf16, #tpu.memory_space<vmem>>, vector<32x320xbf16>
    %cst_18 = arith.constant dense<0.000000e+00> : vector<32x320xf32>
    %17 = tpu.matmul %7, %16, %cst_18 {dimension_numbers = #tpu.dot_dimension_numbers<[1], [0], [0], [1], [0, 0, 1, 1], [], []>} : vector<32x32xbf16>, vector<32x320xbf16>, vector<32x320xf32> -> vector<32x320xf32>
    %c0_19 = arith.constant 0 : index
    %c0_20 = arith.constant 0 : index
    %18 = vector.load %arg10[%c0_19, %c0_20] : memref<32x64xbf16, #tpu.memory_space<vmem>>, vector<32x64xbf16>
    %cst_21 = arith.constant dense<0.000000e+00> : vector<32x64xf32>
    %19 = tpu.matmul %13, %18, %cst_21 {dimension_numbers = #tpu.dot_dimension_numbers<[1], [0], [0], [1], [0, 0, 1, 1], [], []>} : vector<32x32xbf16>, vector<32x64xbf16>, vector<32x64xf32> -> vector<32x64xf32>
    %c0_22 = arith.constant 0 : index
    %c0_23 = arith.constant 0 : index
    %20 = vector.load %arg11[%c0_22, %c0_23] : memref<32x256xbf16, #tpu.memory_space<vmem>>, vector<32x256xbf16>
    %cst_24 = arith.constant dense<0.000000e+00> : vector<32x256xf32>
    %21 = tpu.matmul %10, %20, %cst_24 {dimension_numbers = #tpu.dot_dimension_numbers<[1], [0], [0], [1], [0, 0, 1, 1], [], []>} : vector<32x32xbf16>, vector<32x256xbf16>, vector<32x256xf32> -> vector<32x256xf32>
    %22 = arith.truncf %1 : vector<16x32xf32> to vector<16x32xbf16>
    %c0_25 = arith.constant 0 : index
    %c0_26 = arith.constant 0 : index
    %c0_27 = arith.constant 0 : index
    %23 = vector.load %arg6[%c0_25, %c0_26, %c0_27] : memref<2x32x192xbf16, #tpu.memory_space<vmem>>, vector<1x32x192xbf16>
    %24 = vector.shape_cast %23 : vector<1x32x192xbf16> to vector<32x192xbf16>
    %cst_28 = arith.constant dense<0.000000e+00> : vector<16x192xf32>
    %25 = tpu.matmul %22, %24, %cst_28 {dimension_numbers = #tpu.dot_dimension_numbers<[1], [0], [0], [1], [0, 0, 1, 1], [], []>} : vector<16x32xbf16>, vector<32x192xbf16>, vector<16x192xf32> -> vector<16x192xf32>
    %26 = vector.extract_strided_slice %25 {offsets = [0, 0], sizes = [16, 32], strides = [1, 1]} : vector<16x192xf32> to vector<16x32xf32>
    %27 = vector.extract_strided_slice %15 {offsets = [0, 0], sizes = [16, 32], strides = [1, 1]} : vector<16x256xf32> to vector<16x32xf32>
    %28 = arith.addf %26, %27 : vector<16x32xf32>
    %c0_29 = arith.constant 0 : index
    %c0_30 = arith.constant 0 : index
    %29 = vector.load %arg15[%c0_29, %c0_30] : memref<38x32xf32, #tpu.memory_space<vmem>>, vector<1x32xf32>
    %30 = vector.broadcast %29 : vector<1x32xf32> to vector<16x32xf32>
    %31 = arith.addf %28, %30 : vector<16x32xf32>
    %32 = vector.extract_strided_slice %25 {offsets = [0, 32], sizes = [16, 32], strides = [1, 1]} : vector<16x192xf32> to vector<16x32xf32>
    %33 = vector.extract_strided_slice %15 {offsets = [0, 32], sizes = [16, 32], strides = [1, 1]} : vector<16x256xf32> to vector<16x32xf32>
    %34 = arith.addf %32, %33 : vector<16x32xf32>
    %c1 = arith.constant 1 : index
    %c0_31 = arith.constant 0 : index
    %35 = vector.load %arg15[%c1, %c0_31] : memref<38x32xf32, #tpu.memory_space<vmem>>, vector<1x32xf32>
    %36 = vector.broadcast %35 : vector<1x32xf32> to vector<16x32xf32>
    %37 = arith.addf %34, %36 : vector<16x32xf32>
    %38 = vector.extract_strided_slice %25 {offsets = [0, 64], sizes = [16, 128], strides = [1, 1]} : vector<16x192xf32> to vector<16x128xf32>
    %c2 = arith.constant 2 : index
    %c0_32 = arith.constant 0 : index
    %39 = vector.load %arg15[%c2, %c0_32] : memref<38x32xf32, #tpu.memory_space<vmem>>, vector<1x32xf32>
    %40 = vector.extract_strided_slice %31 {offsets = [0, 0], sizes = [8, 32], strides = [1, 1]} : vector<16x32xf32> to vector<8x32xf32>
    %41 = vector.extract_strided_slice %37 {offsets = [0, 0], sizes = [8, 32], strides = [1, 1]} : vector<16x32xf32> to vector<8x32xf32>
    %42 = vector.extract_strided_slice %38 {offsets = [0, 0], sizes = [8, 128], strides = [1, 1]} : vector<16x128xf32> to vector<8x128xf32>
    %43 = vector.extract_strided_slice %40 {offsets = [0, 0], sizes = [8, 8], strides = [1, 1]} : vector<8x32xf32> to vector<8x8xf32>
    %44 = arith.truncf %43 : vector<8x8xf32> to vector<8x8xbf16>
    %45 = vector.extract_strided_slice %41 {offsets = [0, 0], sizes = [8, 8], strides = [1, 1]} : vector<8x32xf32> to vector<8x8xf32>
    %46 = arith.truncf %45 : vector<8x8xf32> to vector<8x8xbf16>
    %47 = vector.extract_strided_slice %42 {offsets = [0, 0], sizes = [8, 32], strides = [1, 1]} : vector<8x128xf32> to vector<8x32xf32>
    %48 = arith.truncf %47 : vector<8x32xf32> to vector<8x32xbf16>
    %cst_33 = arith.constant dense<0.000000e+00> : vector<8x8xf32>
    %49 = tpu.matmul %44, %46, %cst_33 {dimension_numbers = #tpu.dot_dimension_numbers<[1], [1], [0], [0], [0, 0, 1, 0], [], []>} : vector<8x8xbf16>, vector<8x8xbf16>, vector<8x8xf32> -> vector<8x8xf32>
    %cst_34 = arith.constant 0.353553385 : f32
    %50 = vector.broadcast %cst_34 : f32 to vector<8x8xf32>
    %51 = arith.mulf %49, %50 : vector<8x8xf32>
    %cst_35 = arith.constant dense<0xFF800000> : vector<8xf32>
    %52 = vector.multi_reduction <maximumf>, %51, %cst_35 [1] : vector<8x8xf32> to vector<8xf32>
    %53 = vector.shape_cast %52 : vector<8xf32> to vector<8x1xf32>
    %54 = vector.broadcast %53 : vector<8x1xf32> to vector<8x8xf32>
    %55 = arith.subf %51, %54 : vector<8x8xf32>
    %56 = math.exp %55 : vector<8x8xf32>
    %cst_36 = arith.constant dense<0.000000e+00> : vector<8xf32>
    %57 = vector.multi_reduction <add>, %56, %cst_36 [1] : vector<8x8xf32> to vector<8xf32>
    %58 = vector.shape_cast %57 : vector<8xf32> to vector<8x1xf32>
    %59 = tpu.reciprocal %58 {approx = true} : vector<8x1xf32> -> vector<8x1xf32>
    %60 = vector.broadcast %59 : vector<8x1xf32> to vector<8x8xf32>
    %61 = arith.mulf %56, %60 : vector<8x8xf32>
    %62 = arith.truncf %61 : vector<8x8xf32> to vector<8x8xbf16>
    %cst_37 = arith.constant dense<0.000000e+00> : vector<8x32xf32>
    %63 = tpu.matmul %62, %48, %cst_37 {dimension_numbers = #tpu.dot_dimension_numbers<[1], [0], [0], [1], [0, 0, 1, 1], [], []>} : vector<8x8xbf16>, vector<8x32xbf16>, vector<8x32xf32> -> vector<8x32xf32>
    %64 = vector.extract_strided_slice %40 {offsets = [0, 8], sizes = [8, 8], strides = [1, 1]} : vector<8x32xf32> to vector<8x8xf32>
    %65 = arith.truncf %64 : vector<8x8xf32> to vector<8x8xbf16>
    %66 = vector.extract_strided_slice %41 {offsets = [0, 8], sizes = [8, 8], strides = [1, 1]} : vector<8x32xf32> to vector<8x8xf32>
    %67 = arith.truncf %66 : vector<8x8xf32> to vector<8x8xbf16>
    %68 = vector.extract_strided_slice %42 {offsets = [0, 32], sizes = [8, 32], strides = [1, 1]} : vector<8x128xf32> to vector<8x32xf32>
    %69 = arith.truncf %68 : vector<8x32xf32> to vector<8x32xbf16>
    %cst_38 = arith.constant dense<0.000000e+00> : vector<8x8xf32>
    %70 = tpu.matmul %65, %67, %cst_38 {dimension_numbers = #tpu.dot_dimension_numbers<[1], [1], [0], [0], [0, 0, 1, 0], [], []>} : vector<8x8xbf16>, vector<8x8xbf16>, vector<8x8xf32> -> vector<8x8xf32>
    %cst_39 = arith.constant 0.353553385 : f32
    %71 = vector.broadcast %cst_39 : f32 to vector<8x8xf32>
    %72 = arith.mulf %70, %71 : vector<8x8xf32>
    %cst_40 = arith.constant dense<0xFF800000> : vector<8xf32>
    %73 = vector.multi_reduction <maximumf>, %72, %cst_40 [1] : vector<8x8xf32> to vector<8xf32>
    %74 = vector.shape_cast %73 : vector<8xf32> to vector<8x1xf32>
    %75 = vector.broadcast %74 : vector<8x1xf32> to vector<8x8xf32>
    %76 = arith.subf %72, %75 : vector<8x8xf32>
    %77 = math.exp %76 : vector<8x8xf32>
    %cst_41 = arith.constant dense<0.000000e+00> : vector<8xf32>
    %78 = vector.multi_reduction <add>, %77, %cst_41 [1] : vector<8x8xf32> to vector<8xf32>
    %79 = vector.shape_cast %78 : vector<8xf32> to vector<8x1xf32>
    %80 = tpu.reciprocal %79 {approx = true} : vector<8x1xf32> -> vector<8x1xf32>
    %81 = vector.broadcast %80 : vector<8x1xf32> to vector<8x8xf32>
    %82 = arith.mulf %77, %81 : vector<8x8xf32>
    %83 = arith.truncf %82 : vector<8x8xf32> to vector<8x8xbf16>
    %cst_42 = arith.constant dense<0.000000e+00> : vector<8x32xf32>
    %84 = tpu.matmul %83, %69, %cst_42 {dimension_numbers = #tpu.dot_dimension_numbers<[1], [0], [0], [1], [0, 0, 1, 1], [], []>} : vector<8x8xbf16>, vector<8x32xbf16>, vector<8x32xf32> -> vector<8x32xf32>
    %85 = arith.addf %63, %84 : vector<8x32xf32>
    %86 = vector.extract_strided_slice %40 {offsets = [0, 16], sizes = [8, 8], strides = [1, 1]} : vector<8x32xf32> to vector<8x8xf32>
    %87 = arith.truncf %86 : vector<8x8xf32> to vector<8x8xbf16>
    %88 = vector.extract_strided_slice %41 {offsets = [0, 16], sizes = [8, 8], strides = [1, 1]} : vector<8x32xf32> to vector<8x8xf32>
    %89 = arith.truncf %88 : vector<8x8xf32> to vector<8x8xbf16>
    %90 = vector.extract_strided_slice %42 {offsets = [0, 64], sizes = [8, 32], strides = [1, 1]} : vector<8x128xf32> to vector<8x32xf32>
    %91 = arith.truncf %90 : vector<8x32xf32> to vector<8x32xbf16>
    %cst_43 = arith.constant dense<0.000000e+00> : vector<8x8xf32>
    %92 = tpu.matmul %87, %89, %cst_43 {dimension_numbers = #tpu.dot_dimension_numbers<[1], [1], [0], [0], [0, 0, 1, 0], [], []>} : vector<8x8xbf16>, vector<8x8xbf16>, vector<8x8xf32> -> vector<8x8xf32>
    %cst_44 = arith.constant 0.353553385 : f32
    %93 = vector.broadcast %cst_44 : f32 to vector<8x8xf32>
    %94 = arith.mulf %92, %93 : vector<8x8xf32>
    %cst_45 = arith.constant dense<0xFF800000> : vector<8xf32>
    %95 = vector.multi_reduction <maximumf>, %94, %cst_45 [1] : vector<8x8xf32> to vector<8xf32>
    %96 = vector.shape_cast %95 : vector<8xf32> to vector<8x1xf32>
    %97 = vector.broadcast %96 : vector<8x1xf32> to vector<8x8xf32>
    %98 = arith.subf %94, %97 : vector<8x8xf32>
    %99 = math.exp %98 : vector<8x8xf32>
    %cst_46 = arith.constant dense<0.000000e+00> : vector<8xf32>
    %100 = vector.multi_reduction <add>, %99, %cst_46 [1] : vector<8x8xf32> to vector<8xf32>
    %101 = vector.shape_cast %100 : vector<8xf32> to vector<8x1xf32>
    %102 = tpu.reciprocal %101 {approx = true} : vector<8x1xf32> -> vector<8x1xf32>
    %103 = vector.broadcast %102 : vector<8x1xf32> to vector<8x8xf32>
    %104 = arith.mulf %99, %103 : vector<8x8xf32>
    %105 = arith.truncf %104 : vector<8x8xf32> to vector<8x8xbf16>
    %cst_47 = arith.constant dense<0.000000e+00> : vector<8x32xf32>
    %106 = tpu.matmul %105, %91, %cst_47 {dimension_numbers = #tpu.dot_dimension_numbers<[1], [0], [0], [1], [0, 0, 1, 1], [], []>} : vector<8x8xbf16>, vector<8x32xbf16>, vector<8x32xf32> -> vector<8x32xf32>
    %107 = arith.addf %85, %106 : vector<8x32xf32>
    %108 = vector.extract_strided_slice %40 {offsets = [0, 24], sizes = [8, 8], strides = [1, 1]} : vector<8x32xf32> to vector<8x8xf32>
    %109 = arith.truncf %108 : vector<8x8xf32> to vector<8x8xbf16>
    %110 = vector.extract_strided_slice %41 {offsets = [0, 24], sizes = [8, 8], strides = [1, 1]} : vector<8x32xf32> to vector<8x8xf32>
    %111 = arith.truncf %110 : vector<8x8xf32> to vector<8x8xbf16>
    %112 = vector.extract_strided_slice %42 {offsets = [0, 96], sizes = [8, 32], strides = [1, 1]} : vector<8x128xf32> to vector<8x32xf32>
    %113 = arith.truncf %112 : vector<8x32xf32> to vector<8x32xbf16>
    %cst_48 = arith.constant dense<0.000000e+00> : vector<8x8xf32>
    %114 = tpu.matmul %109, %111, %cst_48 {dimension_numbers = #tpu.dot_dimension_numbers<[1], [1], [0], [0], [0, 0, 1, 0], [], []>} : vector<8x8xbf16>, vector<8x8xbf16>, vector<8x8xf32> -> vector<8x8xf32>
    %cst_49 = arith.constant 0.353553385 : f32
    %115 = vector.broadcast %cst_49 : f32 to vector<8x8xf32>
    %116 = arith.mulf %114, %115 : vector<8x8xf32>
    %cst_50 = arith.constant dense<0xFF800000> : vector<8xf32>
    %117 = vector.multi_reduction <maximumf>, %116, %cst_50 [1] : vector<8x8xf32> to vector<8xf32>
    %118 = vector.shape_cast %117 : vector<8xf32> to vector<8x1xf32>
    %119 = vector.broadcast %118 : vector<8x1xf32> to vector<8x8xf32>
    %120 = arith.subf %116, %119 : vector<8x8xf32>
    %121 = math.exp %120 : vector<8x8xf32>
    %cst_51 = arith.constant dense<0.000000e+00> : vector<8xf32>
    %122 = vector.multi_reduction <add>, %121, %cst_51 [1] : vector<8x8xf32> to vector<8xf32>
    %123 = vector.shape_cast %122 : vector<8xf32> to vector<8x1xf32>
    %124 = tpu.reciprocal %123 {approx = true} : vector<8x1xf32> -> vector<8x1xf32>
    %125 = vector.broadcast %124 : vector<8x1xf32> to vector<8x8xf32>
    %126 = arith.mulf %121, %125 : vector<8x8xf32>
    %127 = arith.truncf %126 : vector<8x8xf32> to vector<8x8xbf16>
    %cst_52 = arith.constant dense<0.000000e+00> : vector<8x32xf32>
    %128 = tpu.matmul %127, %113, %cst_52 {dimension_numbers = #tpu.dot_dimension_numbers<[1], [0], [0], [1], [0, 0, 1, 1], [], []>} : vector<8x8xbf16>, vector<8x32xbf16>, vector<8x32xf32> -> vector<8x32xf32>
    %129 = arith.addf %107, %128 : vector<8x32xf32>
    %130 = vector.extract_strided_slice %31 {offsets = [8, 0], sizes = [8, 32], strides = [1, 1]} : vector<16x32xf32> to vector<8x32xf32>
    %131 = vector.extract_strided_slice %37 {offsets = [8, 0], sizes = [8, 32], strides = [1, 1]} : vector<16x32xf32> to vector<8x32xf32>
    %132 = vector.extract_strided_slice %38 {offsets = [8, 0], sizes = [8, 128], strides = [1, 1]} : vector<16x128xf32> to vector<8x128xf32>
    %133 = vector.extract_strided_slice %130 {offsets = [0, 0], sizes = [8, 8], strides = [1, 1]} : vector<8x32xf32> to vector<8x8xf32>
    %134 = arith.truncf %133 : vector<8x8xf32> to vector<8x8xbf16>
    %135 = vector.extract_strided_slice %131 {offsets = [0, 0], sizes = [8, 8], strides = [1, 1]} : vector<8x32xf32> to vector<8x8xf32>
    %136 = arith.truncf %135 : vector<8x8xf32> to vector<8x8xbf16>
    %137 = vector.extract_strided_slice %132 {offsets = [0, 0], sizes = [8, 32], strides = [1, 1]} : vector<8x128xf32> to vector<8x32xf32>
    %138 = arith.truncf %137 : vector<8x32xf32> to vector<8x32xbf16>
    %cst_53 = arith.constant dense<0.000000e+00> : vector<8x8xf32>
    %139 = tpu.matmul %134, %136, %cst_53 {dimension_numbers = #tpu.dot_dimension_numbers<[1], [1], [0], [0], [0, 0, 1, 0], [], []>} : vector<8x8xbf16>, vector<8x8xbf16>, vector<8x8xf32> -> vector<8x8xf32>
    %cst_54 = arith.constant 0.353553385 : f32
    %140 = vector.broadcast %cst_54 : f32 to vector<8x8xf32>
    %141 = arith.mulf %139, %140 : vector<8x8xf32>
    %cst_55 = arith.constant dense<0xFF800000> : vector<8xf32>
    %142 = vector.multi_reduction <maximumf>, %141, %cst_55 [1] : vector<8x8xf32> to vector<8xf32>
    %143 = vector.shape_cast %142 : vector<8xf32> to vector<8x1xf32>
    %144 = vector.broadcast %143 : vector<8x1xf32> to vector<8x8xf32>
    %145 = arith.subf %141, %144 : vector<8x8xf32>
    %146 = math.exp %145 : vector<8x8xf32>
    %cst_56 = arith.constant dense<0.000000e+00> : vector<8xf32>
    %147 = vector.multi_reduction <add>, %146, %cst_56 [1] : vector<8x8xf32> to vector<8xf32>
    %148 = vector.shape_cast %147 : vector<8xf32> to vector<8x1xf32>
    %149 = tpu.reciprocal %148 {approx = true} : vector<8x1xf32> -> vector<8x1xf32>
    %150 = vector.broadcast %149 : vector<8x1xf32> to vector<8x8xf32>
    %151 = arith.mulf %146, %150 : vector<8x8xf32>
    %152 = arith.truncf %151 : vector<8x8xf32> to vector<8x8xbf16>
    %cst_57 = arith.constant dense<0.000000e+00> : vector<8x32xf32>
    %153 = tpu.matmul %152, %138, %cst_57 {dimension_numbers = #tpu.dot_dimension_numbers<[1], [0], [0], [1], [0, 0, 1, 1], [], []>} : vector<8x8xbf16>, vector<8x32xbf16>, vector<8x32xf32> -> vector<8x32xf32>
    %154 = vector.extract_strided_slice %130 {offsets = [0, 8], sizes = [8, 8], strides = [1, 1]} : vector<8x32xf32> to vector<8x8xf32>
    %155 = arith.truncf %154 : vector<8x8xf32> to vector<8x8xbf16>
    %156 = vector.extract_strided_slice %131 {offsets = [0, 8], sizes = [8, 8], strides = [1, 1]} : vector<8x32xf32> to vector<8x8xf32>
    %157 = arith.truncf %156 : vector<8x8xf32> to vector<8x8xbf16>
    %158 = vector.extract_strided_slice %132 {offsets = [0, 32], sizes = [8, 32], strides = [1, 1]} : vector<8x128xf32> to vector<8x32xf32>
    %159 = arith.truncf %158 : vector<8x32xf32> to vector<8x32xbf16>
    %cst_58 = arith.constant dense<0.000000e+00> : vector<8x8xf32>
    %160 = tpu.matmul %155, %157, %cst_58 {dimension_numbers = #tpu.dot_dimension_numbers<[1], [1], [0], [0], [0, 0, 1, 0], [], []>} : vector<8x8xbf16>, vector<8x8xbf16>, vector<8x8xf32> -> vector<8x8xf32>
    %cst_59 = arith.constant 0.353553385 : f32
    %161 = vector.broadcast %cst_59 : f32 to vector<8x8xf32>
    %162 = arith.mulf %160, %161 : vector<8x8xf32>
    %cst_60 = arith.constant dense<0xFF800000> : vector<8xf32>
    %163 = vector.multi_reduction <maximumf>, %162, %cst_60 [1] : vector<8x8xf32> to vector<8xf32>
    %164 = vector.shape_cast %163 : vector<8xf32> to vector<8x1xf32>
    %165 = vector.broadcast %164 : vector<8x1xf32> to vector<8x8xf32>
    %166 = arith.subf %162, %165 : vector<8x8xf32>
    %167 = math.exp %166 : vector<8x8xf32>
    %cst_61 = arith.constant dense<0.000000e+00> : vector<8xf32>
    %168 = vector.multi_reduction <add>, %167, %cst_61 [1] : vector<8x8xf32> to vector<8xf32>
    %169 = vector.shape_cast %168 : vector<8xf32> to vector<8x1xf32>
    %170 = tpu.reciprocal %169 {approx = true} : vector<8x1xf32> -> vector<8x1xf32>
    %171 = vector.broadcast %170 : vector<8x1xf32> to vector<8x8xf32>
    %172 = arith.mulf %167, %171 : vector<8x8xf32>
    %173 = arith.truncf %172 : vector<8x8xf32> to vector<8x8xbf16>
    %cst_62 = arith.constant dense<0.000000e+00> : vector<8x32xf32>
    %174 = tpu.matmul %173, %159, %cst_62 {dimension_numbers = #tpu.dot_dimension_numbers<[1], [0], [0], [1], [0, 0, 1, 1], [], []>} : vector<8x8xbf16>, vector<8x32xbf16>, vector<8x32xf32> -> vector<8x32xf32>
    %175 = arith.addf %153, %174 : vector<8x32xf32>
    %176 = vector.extract_strided_slice %130 {offsets = [0, 16], sizes = [8, 8], strides = [1, 1]} : vector<8x32xf32> to vector<8x8xf32>
    %177 = arith.truncf %176 : vector<8x8xf32> to vector<8x8xbf16>
    %178 = vector.extract_strided_slice %131 {offsets = [0, 16], sizes = [8, 8], strides = [1, 1]} : vector<8x32xf32> to vector<8x8xf32>
    %179 = arith.truncf %178 : vector<8x8xf32> to vector<8x8xbf16>
    %180 = vector.extract_strided_slice %132 {offsets = [0, 64], sizes = [8, 32], strides = [1, 1]} : vector<8x128xf32> to vector<8x32xf32>
    %181 = arith.truncf %180 : vector<8x32xf32> to vector<8x32xbf16>
    %cst_63 = arith.constant dense<0.000000e+00> : vector<8x8xf32>
    %182 = tpu.matmul %177, %179, %cst_63 {dimension_numbers = #tpu.dot_dimension_numbers<[1], [1], [0], [0], [0, 0, 1, 0], [], []>} : vector<8x8xbf16>, vector<8x8xbf16>, vector<8x8xf32> -> vector<8x8xf32>
    %cst_64 = arith.constant 0.353553385 : f32
    %183 = vector.broadcast %cst_64 : f32 to vector<8x8xf32>
    %184 = arith.mulf %182, %183 : vector<8x8xf32>
    %cst_65 = arith.constant dense<0xFF800000> : vector<8xf32>
    %185 = vector.multi_reduction <maximumf>, %184, %cst_65 [1] : vector<8x8xf32> to vector<8xf32>
    %186 = vector.shape_cast %185 : vector<8xf32> to vector<8x1xf32>
    %187 = vector.broadcast %186 : vector<8x1xf32> to vector<8x8xf32>
    %188 = arith.subf %184, %187 : vector<8x8xf32>
    %189 = math.exp %188 : vector<8x8xf32>
    %cst_66 = arith.constant dense<0.000000e+00> : vector<8xf32>
    %190 = vector.multi_reduction <add>, %189, %cst_66 [1] : vector<8x8xf32> to vector<8xf32>
    %191 = vector.shape_cast %190 : vector<8xf32> to vector<8x1xf32>
    %192 = tpu.reciprocal %191 {approx = true} : vector<8x1xf32> -> vector<8x1xf32>
    %193 = vector.broadcast %192 : vector<8x1xf32> to vector<8x8xf32>
    %194 = arith.mulf %189, %193 : vector<8x8xf32>
    %195 = arith.truncf %194 : vector<8x8xf32> to vector<8x8xbf16>
    %cst_67 = arith.constant dense<0.000000e+00> : vector<8x32xf32>
    %196 = tpu.matmul %195, %181, %cst_67 {dimension_numbers = #tpu.dot_dimension_numbers<[1], [0], [0], [1], [0, 0, 1, 1], [], []>} : vector<8x8xbf16>, vector<8x32xbf16>, vector<8x32xf32> -> vector<8x32xf32>
    %197 = arith.addf %175, %196 : vector<8x32xf32>
    %198 = vector.extract_strided_slice %130 {offsets = [0, 24], sizes = [8, 8], strides = [1, 1]} : vector<8x32xf32> to vector<8x8xf32>
    %199 = arith.truncf %198 : vector<8x8xf32> to vector<8x8xbf16>
    %200 = vector.extract_strided_slice %131 {offsets = [0, 24], sizes = [8, 8], strides = [1, 1]} : vector<8x32xf32> to vector<8x8xf32>
    %201 = arith.truncf %200 : vector<8x8xf32> to vector<8x8xbf16>
    %202 = vector.extract_strided_slice %132 {offsets = [0, 96], sizes = [8, 32], strides = [1, 1]} : vector<8x128xf32> to vector<8x32xf32>
    %203 = arith.truncf %202 : vector<8x32xf32> to vector<8x32xbf16>
    %cst_68 = arith.constant dense<0.000000e+00> : vector<8x8xf32>
    %204 = tpu.matmul %199, %201, %cst_68 {dimension_numbers = #tpu.dot_dimension_numbers<[1], [1], [0], [0], [0, 0, 1, 0], [], []>} : vector<8x8xbf16>, vector<8x8xbf16>, vector<8x8xf32> -> vector<8x8xf32>
    %cst_69 = arith.constant 0.353553385 : f32
    %205 = vector.broadcast %cst_69 : f32 to vector<8x8xf32>
    %206 = arith.mulf %204, %205 : vector<8x8xf32>
    %cst_70 = arith.constant dense<0xFF800000> : vector<8xf32>
    %207 = vector.multi_reduction <maximumf>, %206, %cst_70 [1] : vector<8x8xf32> to vector<8xf32>
    %208 = vector.shape_cast %207 : vector<8xf32> to vector<8x1xf32>
    %209 = vector.broadcast %208 : vector<8x1xf32> to vector<8x8xf32>
    %210 = arith.subf %206, %209 : vector<8x8xf32>
    %211 = math.exp %210 : vector<8x8xf32>
    %cst_71 = arith.constant dense<0.000000e+00> : vector<8xf32>
    %212 = vector.multi_reduction <add>, %211, %cst_71 [1] : vector<8x8xf32> to vector<8xf32>
    %213 = vector.shape_cast %212 : vector<8xf32> to vector<8x1xf32>
    %214 = tpu.reciprocal %213 {approx = true} : vector<8x1xf32> -> vector<8x1xf32>
    %215 = vector.broadcast %214 : vector<8x1xf32> to vector<8x8xf32>
    %216 = arith.mulf %211, %215 : vector<8x8xf32>
    %217 = arith.truncf %216 : vector<8x8xf32> to vector<8x8xbf16>
    %cst_72 = arith.constant dense<0.000000e+00> : vector<8x32xf32>
    %218 = tpu.matmul %217, %203, %cst_72 {dimension_numbers = #tpu.dot_dimension_numbers<[1], [0], [0], [1], [0, 0, 1, 1], [], []>} : vector<8x8xbf16>, vector<8x32xbf16>, vector<8x32xf32> -> vector<8x32xf32>
    %219 = arith.addf %197, %218 : vector<8x32xf32>
    %220 = tpu.concatenate %129, %219 in 0 : vector<8x32xf32>, vector<8x32xf32> -> vector<16x32xf32>
    %221 = vector.broadcast %39 : vector<1x32xf32> to vector<16x32xf32>
    %222 = arith.addf %220, %221 : vector<16x32xf32>
    %223 = arith.addf %1, %222 : vector<16x32xf32>
    %c10 = arith.constant 10 : index
    %c0_73 = arith.constant 0 : index
    %224 = vector.load %arg15[%c10, %c0_73] : memref<38x32xf32, #tpu.memory_space<vmem>>, vector<1x32xf32>
    %c14 = arith.constant 14 : index
    %c0_74 = arith.constant 0 : index
    %225 = vector.load %arg15[%c14, %c0_74] : memref<38x32xf32, #tpu.memory_space<vmem>>, vector<1x32xf32>
    %cst_75 = arith.constant dense<0.000000e+00> : vector<16xf32>
    %226 = vector.multi_reduction <add>, %223, %cst_75 [1] : vector<16x32xf32> to vector<16xf32>
    %227 = vector.shape_cast %226 : vector<16xf32> to vector<16x1xf32>
    %cst_76 = arith.constant 3.200000e+01 : f32
    %228 = vector.broadcast %cst_76 : f32 to vector<16x1xf32>
    %229 = arith.divf %227, %228 : vector<16x1xf32>
    %230 = vector.broadcast %229 : vector<16x1xf32> to vector<16x32xf32>
    %231 = arith.subf %223, %230 : vector<16x32xf32>
    %232 = arith.mulf %231, %231 : vector<16x32xf32>
    %cst_77 = arith.constant dense<0.000000e+00> : vector<16xf32>
    %233 = vector.multi_reduction <add>, %232, %cst_77 [1] : vector<16x32xf32> to vector<16xf32>
    %234 = vector.shape_cast %233 : vector<16xf32> to vector<16x1xf32>
    %cst_78 = arith.constant 3.200000e+01 : f32
    %235 = vector.broadcast %cst_78 : f32 to vector<16x1xf32>
    %236 = arith.divf %234, %235 : vector<16x1xf32>
    %cst_79 = arith.constant 9.99999974E-6 : f32
    %237 = vector.broadcast %cst_79 : f32 to vector<16x1xf32>
    %238 = arith.addf %236, %237 : vector<16x1xf32>
    %239 = math.rsqrt %238 : vector<16x1xf32>
    %240 = vector.broadcast %239 : vector<16x1xf32> to vector<16x32xf32>
    %241 = arith.mulf %231, %240 : vector<16x32xf32>
    %242 = vector.broadcast %224 : vector<1x32xf32> to vector<16x32xf32>
    %243 = arith.mulf %241, %242 : vector<16x32xf32>
    %244 = vector.broadcast %225 : vector<1x32xf32> to vector<16x32xf32>
    %245 = arith.addf %243, %244 : vector<16x32xf32>
    %246 = arith.truncf %245 : vector<16x32xf32> to vector<16x32xbf16>
    %c0_80 = arith.constant 0 : index
    %c0_81 = arith.constant 0 : index
    %c0_82 = arith.constant 0 : index
    %c0_83 = arith.constant 0 : index
    %247 = vector.load %arg7[%c0_80, %c0_81, %c0_82, %c0_83] : memref<2x2x32x32xbf16, #tpu.memory_space<vmem>>, vector<1x1x32x32xbf16>
    %248 = vector.shape_cast %247 : vector<1x1x32x32xbf16> to vector<32x32xbf16>
    %cst_84 = arith.constant dense<0.000000e+00> : vector<16x32xf32>
    %249 = tpu.matmul %246, %248, %cst_84 {dimension_numbers = #tpu.dot_dimension_numbers<[1], [0], [0], [1], [0, 0, 1, 1], [], []>} : vector<16x32xbf16>, vector<32x32xbf16>, vector<16x32xf32> -> vector<16x32xf32>
    %250 = vector.extract_strided_slice %15 {offsets = [0, 64], sizes = [16, 32], strides = [1, 1]} : vector<16x256xf32> to vector<16x32xf32>
    %251 = arith.addf %249, %250 : vector<16x32xf32>
    %c3 = arith.constant 3 : index
    %c0_85 = arith.constant 0 : index
    %252 = vector.load %arg15[%c3, %c0_85] : memref<38x32xf32, #tpu.memory_space<vmem>>, vector<1x32xf32>
    %253 = vector.broadcast %252 : vector<1x32xf32> to vector<16x32xf32>
    %254 = arith.addf %251, %253 : vector<16x32xf32>
    %255 = vector.extract_strided_slice %17 {offsets = [0, 0], sizes = [32, 32], strides = [1, 1]} : vector<32x320xf32> to vector<32x32xf32>
    %c4 = arith.constant 4 : index
    %c0_86 = arith.constant 0 : index
    %256 = vector.load %arg15[%c4, %c0_86] : memref<38x32xf32, #tpu.memory_space<vmem>>, vector<1x32xf32>
    %257 = vector.broadcast %256 : vector<1x32xf32> to vector<32x32xf32>
    %258 = arith.addf %255, %257 : vector<32x32xf32>
    %259 = vector.extract_strided_slice %17 {offsets = [0, 32], sizes = [32, 128], strides = [1, 1]} : vector<32x320xf32> to vector<32x128xf32>
    %c5 = arith.constant 5 : index
    %c0_87 = arith.constant 0 : index
    %260 = vector.load %arg15[%c5, %c0_87] : memref<38x32xf32, #tpu.memory_space<vmem>>, vector<1x32xf32>
    %261 = vector.extract_strided_slice %254 {offsets = [0, 0], sizes = [8, 32], strides = [1, 1]} : vector<16x32xf32> to vector<8x32xf32>
    %262 = vector.extract_strided_slice %258 {offsets = [0, 0], sizes = [16, 32], strides = [1, 1]} : vector<32x32xf32> to vector<16x32xf32>
    %263 = vector.extract_strided_slice %259 {offsets = [0, 0], sizes = [16, 128], strides = [1, 1]} : vector<32x128xf32> to vector<16x128xf32>
    %264 = vector.extract_strided_slice %261 {offsets = [0, 0], sizes = [8, 8], strides = [1, 1]} : vector<8x32xf32> to vector<8x8xf32>
    %265 = arith.truncf %264 : vector<8x8xf32> to vector<8x8xbf16>
    %266 = vector.extract_strided_slice %262 {offsets = [0, 0], sizes = [16, 8], strides = [1, 1]} : vector<16x32xf32> to vector<16x8xf32>
    %267 = arith.truncf %266 : vector<16x8xf32> to vector<16x8xbf16>
    %268 = vector.extract_strided_slice %263 {offsets = [0, 0], sizes = [16, 32], strides = [1, 1]} : vector<16x128xf32> to vector<16x32xf32>
    %269 = arith.truncf %268 : vector<16x32xf32> to vector<16x32xbf16>
    %cst_88 = arith.constant dense<0.000000e+00> : vector<8x16xf32>
    %270 = tpu.matmul %265, %267, %cst_88 {dimension_numbers = #tpu.dot_dimension_numbers<[1], [1], [0], [0], [0, 0, 1, 0], [], []>} : vector<8x8xbf16>, vector<16x8xbf16>, vector<8x16xf32> -> vector<8x16xf32>
    %cst_89 = arith.constant 0.353553385 : f32
    %271 = vector.broadcast %cst_89 : f32 to vector<8x16xf32>
    %272 = arith.mulf %270, %271 : vector<8x16xf32>
    %cst_90 = arith.constant dense<0xFF800000> : vector<8xf32>
    %273 = vector.multi_reduction <maximumf>, %272, %cst_90 [1] : vector<8x16xf32> to vector<8xf32>
    %274 = vector.shape_cast %273 : vector<8xf32> to vector<8x1xf32>
    %275 = vector.broadcast %274 : vector<8x1xf32> to vector<8x16xf32>
    %276 = arith.subf %272, %275 : vector<8x16xf32>
    %277 = math.exp %276 : vector<8x16xf32>
    %cst_91 = arith.constant dense<0.000000e+00> : vector<8xf32>
    %278 = vector.multi_reduction <add>, %277, %cst_91 [1] : vector<8x16xf32> to vector<8xf32>
    %279 = vector.shape_cast %278 : vector<8xf32> to vector<8x1xf32>
    %280 = tpu.reciprocal %279 {approx = true} : vector<8x1xf32> -> vector<8x1xf32>
    %281 = vector.broadcast %280 : vector<8x1xf32> to vector<8x16xf32>
    %282 = arith.mulf %277, %281 : vector<8x16xf32>
    %283 = arith.truncf %282 : vector<8x16xf32> to vector<8x16xbf16>
    %cst_92 = arith.constant dense<0.000000e+00> : vector<8x32xf32>
    %284 = tpu.matmul %283, %269, %cst_92 {dimension_numbers = #tpu.dot_dimension_numbers<[1], [0], [0], [1], [0, 0, 1, 1], [], []>} : vector<8x16xbf16>, vector<16x32xbf16>, vector<8x32xf32> -> vector<8x32xf32>
    %285 = vector.extract_strided_slice %261 {offsets = [0, 8], sizes = [8, 8], strides = [1, 1]} : vector<8x32xf32> to vector<8x8xf32>
    %286 = arith.truncf %285 : vector<8x8xf32> to vector<8x8xbf16>
    %287 = vector.extract_strided_slice %262 {offsets = [0, 8], sizes = [16, 8], strides = [1, 1]} : vector<16x32xf32> to vector<16x8xf32>
    %288 = arith.truncf %287 : vector<16x8xf32> to vector<16x8xbf16>
    %289 = vector.extract_strided_slice %263 {offsets = [0, 32], sizes = [16, 32], strides = [1, 1]} : vector<16x128xf32> to vector<16x32xf32>
    %290 = arith.truncf %289 : vector<16x32xf32> to vector<16x32xbf16>
    %cst_93 = arith.constant dense<0.000000e+00> : vector<8x16xf32>
    %291 = tpu.matmul %286, %288, %cst_93 {dimension_numbers = #tpu.dot_dimension_numbers<[1], [1], [0], [0], [0, 0, 1, 0], [], []>} : vector<8x8xbf16>, vector<16x8xbf16>, vector<8x16xf32> -> vector<8x16xf32>
    %cst_94 = arith.constant 0.353553385 : f32
    %292 = vector.broadcast %cst_94 : f32 to vector<8x16xf32>
    %293 = arith.mulf %291, %292 : vector<8x16xf32>
    %cst_95 = arith.constant dense<0xFF800000> : vector<8xf32>
    %294 = vector.multi_reduction <maximumf>, %293, %cst_95 [1] : vector<8x16xf32> to vector<8xf32>
    %295 = vector.shape_cast %294 : vector<8xf32> to vector<8x1xf32>
    %296 = vector.broadcast %295 : vector<8x1xf32> to vector<8x16xf32>
    %297 = arith.subf %293, %296 : vector<8x16xf32>
    %298 = math.exp %297 : vector<8x16xf32>
    %cst_96 = arith.constant dense<0.000000e+00> : vector<8xf32>
    %299 = vector.multi_reduction <add>, %298, %cst_96 [1] : vector<8x16xf32> to vector<8xf32>
    %300 = vector.shape_cast %299 : vector<8xf32> to vector<8x1xf32>
    %301 = tpu.reciprocal %300 {approx = true} : vector<8x1xf32> -> vector<8x1xf32>
    %302 = vector.broadcast %301 : vector<8x1xf32> to vector<8x16xf32>
    %303 = arith.mulf %298, %302 : vector<8x16xf32>
    %304 = arith.truncf %303 : vector<8x16xf32> to vector<8x16xbf16>
    %cst_97 = arith.constant dense<0.000000e+00> : vector<8x32xf32>
    %305 = tpu.matmul %304, %290, %cst_97 {dimension_numbers = #tpu.dot_dimension_numbers<[1], [0], [0], [1], [0, 0, 1, 1], [], []>} : vector<8x16xbf16>, vector<16x32xbf16>, vector<8x32xf32> -> vector<8x32xf32>
    %306 = arith.addf %284, %305 : vector<8x32xf32>
    %307 = vector.extract_strided_slice %261 {offsets = [0, 16], sizes = [8, 8], strides = [1, 1]} : vector<8x32xf32> to vector<8x8xf32>
    %308 = arith.truncf %307 : vector<8x8xf32> to vector<8x8xbf16>
    %309 = vector.extract_strided_slice %262 {offsets = [0, 16], sizes = [16, 8], strides = [1, 1]} : vector<16x32xf32> to vector<16x8xf32>
    %310 = arith.truncf %309 : vector<16x8xf32> to vector<16x8xbf16>
    %311 = vector.extract_strided_slice %263 {offsets = [0, 64], sizes = [16, 32], strides = [1, 1]} : vector<16x128xf32> to vector<16x32xf32>
    %312 = arith.truncf %311 : vector<16x32xf32> to vector<16x32xbf16>
    %cst_98 = arith.constant dense<0.000000e+00> : vector<8x16xf32>
    %313 = tpu.matmul %308, %310, %cst_98 {dimension_numbers = #tpu.dot_dimension_numbers<[1], [1], [0], [0], [0, 0, 1, 0], [], []>} : vector<8x8xbf16>, vector<16x8xbf16>, vector<8x16xf32> -> vector<8x16xf32>
    %cst_99 = arith.constant 0.353553385 : f32
    %314 = vector.broadcast %cst_99 : f32 to vector<8x16xf32>
    %315 = arith.mulf %313, %314 : vector<8x16xf32>
    %cst_100 = arith.constant dense<0xFF800000> : vector<8xf32>
    %316 = vector.multi_reduction <maximumf>, %315, %cst_100 [1] : vector<8x16xf32> to vector<8xf32>
    %317 = vector.shape_cast %316 : vector<8xf32> to vector<8x1xf32>
    %318 = vector.broadcast %317 : vector<8x1xf32> to vector<8x16xf32>
    %319 = arith.subf %315, %318 : vector<8x16xf32>
    %320 = math.exp %319 : vector<8x16xf32>
    %cst_101 = arith.constant dense<0.000000e+00> : vector<8xf32>
    %321 = vector.multi_reduction <add>, %320, %cst_101 [1] : vector<8x16xf32> to vector<8xf32>
    %322 = vector.shape_cast %321 : vector<8xf32> to vector<8x1xf32>
    %323 = tpu.reciprocal %322 {approx = true} : vector<8x1xf32> -> vector<8x1xf32>
    %324 = vector.broadcast %323 : vector<8x1xf32> to vector<8x16xf32>
    %325 = arith.mulf %320, %324 : vector<8x16xf32>
    %326 = arith.truncf %325 : vector<8x16xf32> to vector<8x16xbf16>
    %cst_102 = arith.constant dense<0.000000e+00> : vector<8x32xf32>
    %327 = tpu.matmul %326, %312, %cst_102 {dimension_numbers = #tpu.dot_dimension_numbers<[1], [0], [0], [1], [0, 0, 1, 1], [], []>} : vector<8x16xbf16>, vector<16x32xbf16>, vector<8x32xf32> -> vector<8x32xf32>
    %328 = arith.addf %306, %327 : vector<8x32xf32>
    %329 = vector.extract_strided_slice %261 {offsets = [0, 24], sizes = [8, 8], strides = [1, 1]} : vector<8x32xf32> to vector<8x8xf32>
    %330 = arith.truncf %329 : vector<8x8xf32> to vector<8x8xbf16>
    %331 = vector.extract_strided_slice %262 {offsets = [0, 24], sizes = [16, 8], strides = [1, 1]} : vector<16x32xf32> to vector<16x8xf32>
    %332 = arith.truncf %331 : vector<16x8xf32> to vector<16x8xbf16>
    %333 = vector.extract_strided_slice %263 {offsets = [0, 96], sizes = [16, 32], strides = [1, 1]} : vector<16x128xf32> to vector<16x32xf32>
    %334 = arith.truncf %333 : vector<16x32xf32> to vector<16x32xbf16>
    %cst_103 = arith.constant dense<0.000000e+00> : vector<8x16xf32>
    %335 = tpu.matmul %330, %332, %cst_103 {dimension_numbers = #tpu.dot_dimension_numbers<[1], [1], [0], [0], [0, 0, 1, 0], [], []>} : vector<8x8xbf16>, vector<16x8xbf16>, vector<8x16xf32> -> vector<8x16xf32>
    %cst_104 = arith.constant 0.353553385 : f32
    %336 = vector.broadcast %cst_104 : f32 to vector<8x16xf32>
    %337 = arith.mulf %335, %336 : vector<8x16xf32>
    %cst_105 = arith.constant dense<0xFF800000> : vector<8xf32>
    %338 = vector.multi_reduction <maximumf>, %337, %cst_105 [1] : vector<8x16xf32> to vector<8xf32>
    %339 = vector.shape_cast %338 : vector<8xf32> to vector<8x1xf32>
    %340 = vector.broadcast %339 : vector<8x1xf32> to vector<8x16xf32>
    %341 = arith.subf %337, %340 : vector<8x16xf32>
    %342 = math.exp %341 : vector<8x16xf32>
    %cst_106 = arith.constant dense<0.000000e+00> : vector<8xf32>
    %343 = vector.multi_reduction <add>, %342, %cst_106 [1] : vector<8x16xf32> to vector<8xf32>
    %344 = vector.shape_cast %343 : vector<8xf32> to vector<8x1xf32>
    %345 = tpu.reciprocal %344 {approx = true} : vector<8x1xf32> -> vector<8x1xf32>
    %346 = vector.broadcast %345 : vector<8x1xf32> to vector<8x16xf32>
    %347 = arith.mulf %342, %346 : vector<8x16xf32>
    %348 = arith.truncf %347 : vector<8x16xf32> to vector<8x16xbf16>
    %cst_107 = arith.constant dense<0.000000e+00> : vector<8x32xf32>
    %349 = tpu.matmul %348, %334, %cst_107 {dimension_numbers = #tpu.dot_dimension_numbers<[1], [0], [0], [1], [0, 0, 1, 1], [], []>} : vector<8x16xbf16>, vector<16x32xbf16>, vector<8x32xf32> -> vector<8x32xf32>
    %350 = arith.addf %328, %349 : vector<8x32xf32>
    %351 = vector.extract_strided_slice %254 {offsets = [8, 0], sizes = [8, 32], strides = [1, 1]} : vector<16x32xf32> to vector<8x32xf32>
    %352 = vector.extract_strided_slice %258 {offsets = [16, 0], sizes = [16, 32], strides = [1, 1]} : vector<32x32xf32> to vector<16x32xf32>
    %353 = vector.extract_strided_slice %259 {offsets = [16, 0], sizes = [16, 128], strides = [1, 1]} : vector<32x128xf32> to vector<16x128xf32>
    %354 = vector.extract_strided_slice %351 {offsets = [0, 0], sizes = [8, 8], strides = [1, 1]} : vector<8x32xf32> to vector<8x8xf32>
    %355 = arith.truncf %354 : vector<8x8xf32> to vector<8x8xbf16>
    %356 = vector.extract_strided_slice %352 {offsets = [0, 0], sizes = [16, 8], strides = [1, 1]} : vector<16x32xf32> to vector<16x8xf32>
    %357 = arith.truncf %356 : vector<16x8xf32> to vector<16x8xbf16>
    %358 = vector.extract_strided_slice %353 {offsets = [0, 0], sizes = [16, 32], strides = [1, 1]} : vector<16x128xf32> to vector<16x32xf32>
    %359 = arith.truncf %358 : vector<16x32xf32> to vector<16x32xbf16>
    %cst_108 = arith.constant dense<0.000000e+00> : vector<8x16xf32>
    %360 = tpu.matmul %355, %357, %cst_108 {dimension_numbers = #tpu.dot_dimension_numbers<[1], [1], [0], [0], [0, 0, 1, 0], [], []>} : vector<8x8xbf16>, vector<16x8xbf16>, vector<8x16xf32> -> vector<8x16xf32>
    %cst_109 = arith.constant 0.353553385 : f32
    %361 = vector.broadcast %cst_109 : f32 to vector<8x16xf32>
    %362 = arith.mulf %360, %361 : vector<8x16xf32>
    %cst_110 = arith.constant dense<0xFF800000> : vector<8xf32>
    %363 = vector.multi_reduction <maximumf>, %362, %cst_110 [1] : vector<8x16xf32> to vector<8xf32>
    %364 = vector.shape_cast %363 : vector<8xf32> to vector<8x1xf32>
    %365 = vector.broadcast %364 : vector<8x1xf32> to vector<8x16xf32>
    %366 = arith.subf %362, %365 : vector<8x16xf32>
    %367 = math.exp %366 : vector<8x16xf32>
    %cst_111 = arith.constant dense<0.000000e+00> : vector<8xf32>
    %368 = vector.multi_reduction <add>, %367, %cst_111 [1] : vector<8x16xf32> to vector<8xf32>
    %369 = vector.shape_cast %368 : vector<8xf32> to vector<8x1xf32>
    %370 = tpu.reciprocal %369 {approx = true} : vector<8x1xf32> -> vector<8x1xf32>
    %371 = vector.broadcast %370 : vector<8x1xf32> to vector<8x16xf32>
    %372 = arith.mulf %367, %371 : vector<8x16xf32>
    %373 = arith.truncf %372 : vector<8x16xf32> to vector<8x16xbf16>
    %cst_112 = arith.constant dense<0.000000e+00> : vector<8x32xf32>
    %374 = tpu.matmul %373, %359, %cst_112 {dimension_numbers = #tpu.dot_dimension_numbers<[1], [0], [0], [1], [0, 0, 1, 1], [], []>} : vector<8x16xbf16>, vector<16x32xbf16>, vector<8x32xf32> -> vector<8x32xf32>
    %375 = vector.extract_strided_slice %351 {offsets = [0, 8], sizes = [8, 8], strides = [1, 1]} : vector<8x32xf32> to vector<8x8xf32>
    %376 = arith.truncf %375 : vector<8x8xf32> to vector<8x8xbf16>
    %377 = vector.extract_strided_slice %352 {offsets = [0, 8], sizes = [16, 8], strides = [1, 1]} : vector<16x32xf32> to vector<16x8xf32>
    %378 = arith.truncf %377 : vector<16x8xf32> to vector<16x8xbf16>
    %379 = vector.extract_strided_slice %353 {offsets = [0, 32], sizes = [16, 32], strides = [1, 1]} : vector<16x128xf32> to vector<16x32xf32>
    %380 = arith.truncf %379 : vector<16x32xf32> to vector<16x32xbf16>
    %cst_113 = arith.constant dense<0.000000e+00> : vector<8x16xf32>
    %381 = tpu.matmul %376, %378, %cst_113 {dimension_numbers = #tpu.dot_dimension_numbers<[1], [1], [0], [0], [0, 0, 1, 0], [], []>} : vector<8x8xbf16>, vector<16x8xbf16>, vector<8x16xf32> -> vector<8x16xf32>
    %cst_114 = arith.constant 0.353553385 : f32
    %382 = vector.broadcast %cst_114 : f32 to vector<8x16xf32>
    %383 = arith.mulf %381, %382 : vector<8x16xf32>
    %cst_115 = arith.constant dense<0xFF800000> : vector<8xf32>
    %384 = vector.multi_reduction <maximumf>, %383, %cst_115 [1] : vector<8x16xf32> to vector<8xf32>
    %385 = vector.shape_cast %384 : vector<8xf32> to vector<8x1xf32>
    %386 = vector.broadcast %385 : vector<8x1xf32> to vector<8x16xf32>
    %387 = arith.subf %383, %386 : vector<8x16xf32>
    %388 = math.exp %387 : vector<8x16xf32>
    %cst_116 = arith.constant dense<0.000000e+00> : vector<8xf32>
    %389 = vector.multi_reduction <add>, %388, %cst_116 [1] : vector<8x16xf32> to vector<8xf32>
    %390 = vector.shape_cast %389 : vector<8xf32> to vector<8x1xf32>
    %391 = tpu.reciprocal %390 {approx = true} : vector<8x1xf32> -> vector<8x1xf32>
    %392 = vector.broadcast %391 : vector<8x1xf32> to vector<8x16xf32>
    %393 = arith.mulf %388, %392 : vector<8x16xf32>
    %394 = arith.truncf %393 : vector<8x16xf32> to vector<8x16xbf16>
    %cst_117 = arith.constant dense<0.000000e+00> : vector<8x32xf32>
    %395 = tpu.matmul %394, %380, %cst_117 {dimension_numbers = #tpu.dot_dimension_numbers<[1], [0], [0], [1], [0, 0, 1, 1], [], []>} : vector<8x16xbf16>, vector<16x32xbf16>, vector<8x32xf32> -> vector<8x32xf32>
    %396 = arith.addf %374, %395 : vector<8x32xf32>
    %397 = vector.extract_strided_slice %351 {offsets = [0, 16], sizes = [8, 8], strides = [1, 1]} : vector<8x32xf32> to vector<8x8xf32>
    %398 = arith.truncf %397 : vector<8x8xf32> to vector<8x8xbf16>
    %399 = vector.extract_strided_slice %352 {offsets = [0, 16], sizes = [16, 8], strides = [1, 1]} : vector<16x32xf32> to vector<16x8xf32>
    %400 = arith.truncf %399 : vector<16x8xf32> to vector<16x8xbf16>
    %401 = vector.extract_strided_slice %353 {offsets = [0, 64], sizes = [16, 32], strides = [1, 1]} : vector<16x128xf32> to vector<16x32xf32>
    %402 = arith.truncf %401 : vector<16x32xf32> to vector<16x32xbf16>
    %cst_118 = arith.constant dense<0.000000e+00> : vector<8x16xf32>
    %403 = tpu.matmul %398, %400, %cst_118 {dimension_numbers = #tpu.dot_dimension_numbers<[1], [1], [0], [0], [0, 0, 1, 0], [], []>} : vector<8x8xbf16>, vector<16x8xbf16>, vector<8x16xf32> -> vector<8x16xf32>
    %cst_119 = arith.constant 0.353553385 : f32
    %404 = vector.broadcast %cst_119 : f32 to vector<8x16xf32>
    %405 = arith.mulf %403, %404 : vector<8x16xf32>
    %cst_120 = arith.constant dense<0xFF800000> : vector<8xf32>
    %406 = vector.multi_reduction <maximumf>, %405, %cst_120 [1] : vector<8x16xf32> to vector<8xf32>
    %407 = vector.shape_cast %406 : vector<8xf32> to vector<8x1xf32>
    %408 = vector.broadcast %407 : vector<8x1xf32> to vector<8x16xf32>
    %409 = arith.subf %405, %408 : vector<8x16xf32>
    %410 = math.exp %409 : vector<8x16xf32>
    %cst_121 = arith.constant dense<0.000000e+00> : vector<8xf32>
    %411 = vector.multi_reduction <add>, %410, %cst_121 [1] : vector<8x16xf32> to vector<8xf32>
    %412 = vector.shape_cast %411 : vector<8xf32> to vector<8x1xf32>
    %413 = tpu.reciprocal %412 {approx = true} : vector<8x1xf32> -> vector<8x1xf32>
    %414 = vector.broadcast %413 : vector<8x1xf32> to vector<8x16xf32>
    %415 = arith.mulf %410, %414 : vector<8x16xf32>
    %416 = arith.truncf %415 : vector<8x16xf32> to vector<8x16xbf16>
    %cst_122 = arith.constant dense<0.000000e+00> : vector<8x32xf32>
    %417 = tpu.matmul %416, %402, %cst_122 {dimension_numbers = #tpu.dot_dimension_numbers<[1], [0], [0], [1], [0, 0, 1, 1], [], []>} : vector<8x16xbf16>, vector<16x32xbf16>, vector<8x32xf32> -> vector<8x32xf32>
    %418 = arith.addf %396, %417 : vector<8x32xf32>
    %419 = vector.extract_strided_slice %351 {offsets = [0, 24], sizes = [8, 8], strides = [1, 1]} : vector<8x32xf32> to vector<8x8xf32>
    %420 = arith.truncf %419 : vector<8x8xf32> to vector<8x8xbf16>
    %421 = vector.extract_strided_slice %352 {offsets = [0, 24], sizes = [16, 8], strides = [1, 1]} : vector<16x32xf32> to vector<16x8xf32>
    %422 = arith.truncf %421 : vector<16x8xf32> to vector<16x8xbf16>
    %423 = vector.extract_strided_slice %353 {offsets = [0, 96], sizes = [16, 32], strides = [1, 1]} : vector<16x128xf32> to vector<16x32xf32>
    %424 = arith.truncf %423 : vector<16x32xf32> to vector<16x32xbf16>
    %cst_123 = arith.constant dense<0.000000e+00> : vector<8x16xf32>
    %425 = tpu.matmul %420, %422, %cst_123 {dimension_numbers = #tpu.dot_dimension_numbers<[1], [1], [0], [0], [0, 0, 1, 0], [], []>} : vector<8x8xbf16>, vector<16x8xbf16>, vector<8x16xf32> -> vector<8x16xf32>
    %cst_124 = arith.constant 0.353553385 : f32
    %426 = vector.broadcast %cst_124 : f32 to vector<8x16xf32>
    %427 = arith.mulf %425, %426 : vector<8x16xf32>
    %cst_125 = arith.constant dense<0xFF800000> : vector<8xf32>
    %428 = vector.multi_reduction <maximumf>, %427, %cst_125 [1] : vector<8x16xf32> to vector<8xf32>
    %429 = vector.shape_cast %428 : vector<8xf32> to vector<8x1xf32>
    %430 = vector.broadcast %429 : vector<8x1xf32> to vector<8x16xf32>
    %431 = arith.subf %427, %430 : vector<8x16xf32>
    %432 = math.exp %431 : vector<8x16xf32>
    %cst_126 = arith.constant dense<0.000000e+00> : vector<8xf32>
    %433 = vector.multi_reduction <add>, %432, %cst_126 [1] : vector<8x16xf32> to vector<8xf32>
    %434 = vector.shape_cast %433 : vector<8xf32> to vector<8x1xf32>
    %435 = tpu.reciprocal %434 {approx = true} : vector<8x1xf32> -> vector<8x1xf32>
    %436 = vector.broadcast %435 : vector<8x1xf32> to vector<8x16xf32>
    %437 = arith.mulf %432, %436 : vector<8x16xf32>
    %438 = arith.truncf %437 : vector<8x16xf32> to vector<8x16xbf16>
    %cst_127 = arith.constant dense<0.000000e+00> : vector<8x32xf32>
    %439 = tpu.matmul %438, %424, %cst_127 {dimension_numbers = #tpu.dot_dimension_numbers<[1], [0], [0], [1], [0, 0, 1, 1], [], []>} : vector<8x16xbf16>, vector<16x32xbf16>, vector<8x32xf32> -> vector<8x32xf32>
    %440 = arith.addf %418, %439 : vector<8x32xf32>
    %441 = tpu.concatenate %350, %440 in 0 : vector<8x32xf32>, vector<8x32xf32> -> vector<16x32xf32>
    %442 = vector.broadcast %260 : vector<1x32xf32> to vector<16x32xf32>
    %443 = arith.addf %441, %442 : vector<16x32xf32>
    %444 = arith.addf %245, %443 : vector<16x32xf32>
    %c11 = arith.constant 11 : index
    %c0_128 = arith.constant 0 : index
    %445 = vector.load %arg15[%c11, %c0_128] : memref<38x32xf32, #tpu.memory_space<vmem>>, vector<1x32xf32>
    %c15 = arith.constant 15 : index
    %c0_129 = arith.constant 0 : index
    %446 = vector.load %arg15[%c15, %c0_129] : memref<38x32xf32, #tpu.memory_space<vmem>>, vector<1x32xf32>
    %cst_130 = arith.constant dense<0.000000e+00> : vector<16xf32>
    %447 = vector.multi_reduction <add>, %444, %cst_130 [1] : vector<16x32xf32> to vector<16xf32>
    %448 = vector.shape_cast %447 : vector<16xf32> to vector<16x1xf32>
    %cst_131 = arith.constant 3.200000e+01 : f32
    %449 = vector.broadcast %cst_131 : f32 to vector<16x1xf32>
    %450 = arith.divf %448, %449 : vector<16x1xf32>
    %451 = vector.broadcast %450 : vector<16x1xf32> to vector<16x32xf32>
    %452 = arith.subf %444, %451 : vector<16x32xf32>
    %453 = arith.mulf %452, %452 : vector<16x32xf32>
    %cst_132 = arith.constant dense<0.000000e+00> : vector<16xf32>
    %454 = vector.multi_reduction <add>, %453, %cst_132 [1] : vector<16x32xf32> to vector<16xf32>
    %455 = vector.shape_cast %454 : vector<16xf32> to vector<16x1xf32>
    %cst_133 = arith.constant 3.200000e+01 : f32
    %456 = vector.broadcast %cst_133 : f32 to vector<16x1xf32>
    %457 = arith.divf %455, %456 : vector<16x1xf32>
    %cst_134 = arith.constant 9.99999974E-6 : f32
    %458 = vector.broadcast %cst_134 : f32 to vector<16x1xf32>
    %459 = arith.addf %457, %458 : vector<16x1xf32>
    %460 = math.rsqrt %459 : vector<16x1xf32>
    %461 = vector.broadcast %460 : vector<16x1xf32> to vector<16x32xf32>
    %462 = arith.mulf %452, %461 : vector<16x32xf32>
    %463 = vector.broadcast %445 : vector<1x32xf32> to vector<16x32xf32>
    %464 = arith.mulf %462, %463 : vector<16x32xf32>
    %465 = vector.broadcast %446 : vector<1x32xf32> to vector<16x32xf32>
    %466 = arith.addf %464, %465 : vector<16x32xf32>
    %467 = arith.truncf %466 : vector<16x32xf32> to vector<16x32xbf16>
    %c0_135 = arith.constant 0 : index
    %c1_136 = arith.constant 1 : index
    %c0_137 = arith.constant 0 : index
    %c0_138 = arith.constant 0 : index
    %468 = vector.load %arg7[%c0_135, %c1_136, %c0_137, %c0_138] : memref<2x2x32x32xbf16, #tpu.memory_space<vmem>>, vector<1x1x32x32xbf16>
    %469 = vector.shape_cast %468 : vector<1x1x32x32xbf16> to vector<32x32xbf16>
    %cst_139 = arith.constant dense<0.000000e+00> : vector<16x32xf32>
    %470 = tpu.matmul %467, %469, %cst_139 {dimension_numbers = #tpu.dot_dimension_numbers<[1], [0], [0], [1], [0, 0, 1, 1], [], []>} : vector<16x32xbf16>, vector<32x32xbf16>, vector<16x32xf32> -> vector<16x32xf32>
    %471 = vector.extract_strided_slice %15 {offsets = [0, 96], sizes = [16, 32], strides = [1, 1]} : vector<16x256xf32> to vector<16x32xf32>
    %472 = arith.addf %470, %471 : vector<16x32xf32>
    %c6 = arith.constant 6 : index
    %c0_140 = arith.constant 0 : index
    %473 = vector.load %arg15[%c6, %c0_140] : memref<38x32xf32, #tpu.memory_space<vmem>>, vector<1x32xf32>
    %474 = vector.broadcast %473 : vector<1x32xf32> to vector<16x32xf32>
    %475 = arith.addf %472, %474 : vector<16x32xf32>
    %476 = vector.extract_strided_slice %19 {offsets = [0, 0], sizes = [32, 32], strides = [1, 1]} : vector<32x64xf32> to vector<32x32xf32>
    %c7 = arith.constant 7 : index
    %c0_141 = arith.constant 0 : index
    %477 = vector.load %arg15[%c7, %c0_141] : memref<38x32xf32, #tpu.memory_space<vmem>>, vector<1x32xf32>
    %478 = vector.broadcast %477 : vector<1x32xf32> to vector<32x32xf32>
    %479 = arith.addf %476, %478 : vector<32x32xf32>
    %480 = vector.extract_strided_slice %21 {offsets = [0, 0], sizes = [32, 128], strides = [1, 1]} : vector<32x256xf32> to vector<32x128xf32>
    %c8 = arith.constant 8 : index
    %c0_142 = arith.constant 0 : index
    %481 = vector.load %arg15[%c8, %c0_142] : memref<38x32xf32, #tpu.memory_space<vmem>>, vector<1x32xf32>
    %482 = vector.extract_strided_slice %475 {offsets = [0, 0], sizes = [8, 32], strides = [1, 1]} : vector<16x32xf32> to vector<8x32xf32>
    %483 = vector.extract_strided_slice %479 {offsets = [0, 0], sizes = [16, 32], strides = [1, 1]} : vector<32x32xf32> to vector<16x32xf32>
    %484 = vector.extract_strided_slice %480 {offsets = [0, 0], sizes = [16, 128], strides = [1, 1]} : vector<32x128xf32> to vector<16x128xf32>
    %485 = vector.extract_strided_slice %482 {offsets = [0, 0], sizes = [8, 8], strides = [1, 1]} : vector<8x32xf32> to vector<8x8xf32>
    %486 = arith.truncf %485 : vector<8x8xf32> to vector<8x8xbf16>
    %487 = vector.extract_strided_slice %483 {offsets = [0, 0], sizes = [16, 8], strides = [1, 1]} : vector<16x32xf32> to vector<16x8xf32>
    %488 = arith.truncf %487 : vector<16x8xf32> to vector<16x8xbf16>
    %489 = vector.extract_strided_slice %484 {offsets = [0, 0], sizes = [16, 32], strides = [1, 1]} : vector<16x128xf32> to vector<16x32xf32>
    %490 = arith.truncf %489 : vector<16x32xf32> to vector<16x32xbf16>
    %cst_143 = arith.constant dense<0.000000e+00> : vector<8x16xf32>
    %491 = tpu.matmul %486, %488, %cst_143 {dimension_numbers = #tpu.dot_dimension_numbers<[1], [1], [0], [0], [0, 0, 1, 0], [], []>} : vector<8x8xbf16>, vector<16x8xbf16>, vector<8x16xf32> -> vector<8x16xf32>
    %cst_144 = arith.constant 0.353553385 : f32
    %492 = vector.broadcast %cst_144 : f32 to vector<8x16xf32>
    %493 = arith.mulf %491, %492 : vector<8x16xf32>
    %cst_145 = arith.constant dense<0xFF800000> : vector<8xf32>
    %494 = vector.multi_reduction <maximumf>, %493, %cst_145 [1] : vector<8x16xf32> to vector<8xf32>
    %495 = vector.shape_cast %494 : vector<8xf32> to vector<8x1xf32>
    %496 = vector.broadcast %495 : vector<8x1xf32> to vector<8x16xf32>
    %497 = arith.subf %493, %496 : vector<8x16xf32>
    %498 = math.exp %497 : vector<8x16xf32>
    %cst_146 = arith.constant dense<0.000000e+00> : vector<8xf32>
    %499 = vector.multi_reduction <add>, %498, %cst_146 [1] : vector<8x16xf32> to vector<8xf32>
    %500 = vector.shape_cast %499 : vector<8xf32> to vector<8x1xf32>
    %501 = tpu.reciprocal %500 {approx = true} : vector<8x1xf32> -> vector<8x1xf32>
    %502 = vector.broadcast %501 : vector<8x1xf32> to vector<8x16xf32>
    %503 = arith.mulf %498, %502 : vector<8x16xf32>
    %504 = arith.truncf %503 : vector<8x16xf32> to vector<8x16xbf16>
    %cst_147 = arith.constant dense<0.000000e+00> : vector<8x32xf32>
    %505 = tpu.matmul %504, %490, %cst_147 {dimension_numbers = #tpu.dot_dimension_numbers<[1], [0], [0], [1], [0, 0, 1, 1], [], []>} : vector<8x16xbf16>, vector<16x32xbf16>, vector<8x32xf32> -> vector<8x32xf32>
    %506 = vector.extract_strided_slice %482 {offsets = [0, 8], sizes = [8, 8], strides = [1, 1]} : vector<8x32xf32> to vector<8x8xf32>
    %507 = arith.truncf %506 : vector<8x8xf32> to vector<8x8xbf16>
    %508 = vector.extract_strided_slice %483 {offsets = [0, 8], sizes = [16, 8], strides = [1, 1]} : vector<16x32xf32> to vector<16x8xf32>
    %509 = arith.truncf %508 : vector<16x8xf32> to vector<16x8xbf16>
    %510 = vector.extract_strided_slice %484 {offsets = [0, 32], sizes = [16, 32], strides = [1, 1]} : vector<16x128xf32> to vector<16x32xf32>
    %511 = arith.truncf %510 : vector<16x32xf32> to vector<16x32xbf16>
    %cst_148 = arith.constant dense<0.000000e+00> : vector<8x16xf32>
    %512 = tpu.matmul %507, %509, %cst_148 {dimension_numbers = #tpu.dot_dimension_numbers<[1], [1], [0], [0], [0, 0, 1, 0], [], []>} : vector<8x8xbf16>, vector<16x8xbf16>, vector<8x16xf32> -> vector<8x16xf32>
    %cst_149 = arith.constant 0.353553385 : f32
    %513 = vector.broadcast %cst_149 : f32 to vector<8x16xf32>
    %514 = arith.mulf %512, %513 : vector<8x16xf32>
    %cst_150 = arith.constant dense<0xFF800000> : vector<8xf32>
    %515 = vector.multi_reduction <maximumf>, %514, %cst_150 [1] : vector<8x16xf32> to vector<8xf32>
    %516 = vector.shape_cast %515 : vector<8xf32> to vector<8x1xf32>
    %517 = vector.broadcast %516 : vector<8x1xf32> to vector<8x16xf32>
    %518 = arith.subf %514, %517 : vector<8x16xf32>
    %519 = math.exp %518 : vector<8x16xf32>
    %cst_151 = arith.constant dense<0.000000e+00> : vector<8xf32>
    %520 = vector.multi_reduction <add>, %519, %cst_151 [1] : vector<8x16xf32> to vector<8xf32>
    %521 = vector.shape_cast %520 : vector<8xf32> to vector<8x1xf32>
    %522 = tpu.reciprocal %521 {approx = true} : vector<8x1xf32> -> vector<8x1xf32>
    %523 = vector.broadcast %522 : vector<8x1xf32> to vector<8x16xf32>
    %524 = arith.mulf %519, %523 : vector<8x16xf32>
    %525 = arith.truncf %524 : vector<8x16xf32> to vector<8x16xbf16>
    %cst_152 = arith.constant dense<0.000000e+00> : vector<8x32xf32>
    %526 = tpu.matmul %525, %511, %cst_152 {dimension_numbers = #tpu.dot_dimension_numbers<[1], [0], [0], [1], [0, 0, 1, 1], [], []>} : vector<8x16xbf16>, vector<16x32xbf16>, vector<8x32xf32> -> vector<8x32xf32>
    %527 = arith.addf %505, %526 : vector<8x32xf32>
    %528 = vector.extract_strided_slice %482 {offsets = [0, 16], sizes = [8, 8], strides = [1, 1]} : vector<8x32xf32> to vector<8x8xf32>
    %529 = arith.truncf %528 : vector<8x8xf32> to vector<8x8xbf16>
    %530 = vector.extract_strided_slice %483 {offsets = [0, 16], sizes = [16, 8], strides = [1, 1]} : vector<16x32xf32> to vector<16x8xf32>
    %531 = arith.truncf %530 : vector<16x8xf32> to vector<16x8xbf16>
    %532 = vector.extract_strided_slice %484 {offsets = [0, 64], sizes = [16, 32], strides = [1, 1]} : vector<16x128xf32> to vector<16x32xf32>
    %533 = arith.truncf %532 : vector<16x32xf32> to vector<16x32xbf16>
    %cst_153 = arith.constant dense<0.000000e+00> : vector<8x16xf32>
    %534 = tpu.matmul %529, %531, %cst_153 {dimension_numbers = #tpu.dot_dimension_numbers<[1], [1], [0], [0], [0, 0, 1, 0], [], []>} : vector<8x8xbf16>, vector<16x8xbf16>, vector<8x16xf32> -> vector<8x16xf32>
    %cst_154 = arith.constant 0.353553385 : f32
    %535 = vector.broadcast %cst_154 : f32 to vector<8x16xf32>
    %536 = arith.mulf %534, %535 : vector<8x16xf32>
    %cst_155 = arith.constant dense<0xFF800000> : vector<8xf32>
    %537 = vector.multi_reduction <maximumf>, %536, %cst_155 [1] : vector<8x16xf32> to vector<8xf32>
    %538 = vector.shape_cast %537 : vector<8xf32> to vector<8x1xf32>
    %539 = vector.broadcast %538 : vector<8x1xf32> to vector<8x16xf32>
    %540 = arith.subf %536, %539 : vector<8x16xf32>
    %541 = math.exp %540 : vector<8x16xf32>
    %cst_156 = arith.constant dense<0.000000e+00> : vector<8xf32>
    %542 = vector.multi_reduction <add>, %541, %cst_156 [1] : vector<8x16xf32> to vector<8xf32>
    %543 = vector.shape_cast %542 : vector<8xf32> to vector<8x1xf32>
    %544 = tpu.reciprocal %543 {approx = true} : vector<8x1xf32> -> vector<8x1xf32>
    %545 = vector.broadcast %544 : vector<8x1xf32> to vector<8x16xf32>
    %546 = arith.mulf %541, %545 : vector<8x16xf32>
    %547 = arith.truncf %546 : vector<8x16xf32> to vector<8x16xbf16>
    %cst_157 = arith.constant dense<0.000000e+00> : vector<8x32xf32>
    %548 = tpu.matmul %547, %533, %cst_157 {dimension_numbers = #tpu.dot_dimension_numbers<[1], [0], [0], [1], [0, 0, 1, 1], [], []>} : vector<8x16xbf16>, vector<16x32xbf16>, vector<8x32xf32> -> vector<8x32xf32>
    %549 = arith.addf %527, %548 : vector<8x32xf32>
    %550 = vector.extract_strided_slice %482 {offsets = [0, 24], sizes = [8, 8], strides = [1, 1]} : vector<8x32xf32> to vector<8x8xf32>
    %551 = arith.truncf %550 : vector<8x8xf32> to vector<8x8xbf16>
    %552 = vector.extract_strided_slice %483 {offsets = [0, 24], sizes = [16, 8], strides = [1, 1]} : vector<16x32xf32> to vector<16x8xf32>
    %553 = arith.truncf %552 : vector<16x8xf32> to vector<16x8xbf16>
    %554 = vector.extract_strided_slice %484 {offsets = [0, 96], sizes = [16, 32], strides = [1, 1]} : vector<16x128xf32> to vector<16x32xf32>
    %555 = arith.truncf %554 : vector<16x32xf32> to vector<16x32xbf16>
    %cst_158 = arith.constant dense<0.000000e+00> : vector<8x16xf32>
    %556 = tpu.matmul %551, %553, %cst_158 {dimension_numbers = #tpu.dot_dimension_numbers<[1], [1], [0], [0], [0, 0, 1, 0], [], []>} : vector<8x8xbf16>, vector<16x8xbf16>, vector<8x16xf32> -> vector<8x16xf32>
    %cst_159 = arith.constant 0.353553385 : f32
    %557 = vector.broadcast %cst_159 : f32 to vector<8x16xf32>
    %558 = arith.mulf %556, %557 : vector<8x16xf32>
    %cst_160 = arith.constant dense<0xFF800000> : vector<8xf32>
    %559 = vector.multi_reduction <maximumf>, %558, %cst_160 [1] : vector<8x16xf32> to vector<8xf32>
    %560 = vector.shape_cast %559 : vector<8xf32> to vector<8x1xf32>
    %561 = vector.broadcast %560 : vector<8x1xf32> to vector<8x16xf32>
    %562 = arith.subf %558, %561 : vector<8x16xf32>
    %563 = math.exp %562 : vector<8x16xf32>
    %cst_161 = arith.constant dense<0.000000e+00> : vector<8xf32>
    %564 = vector.multi_reduction <add>, %563, %cst_161 [1] : vector<8x16xf32> to vector<8xf32>
    %565 = vector.shape_cast %564 : vector<8xf32> to vector<8x1xf32>
    %566 = tpu.reciprocal %565 {approx = true} : vector<8x1xf32> -> vector<8x1xf32>
    %567 = vector.broadcast %566 : vector<8x1xf32> to vector<8x16xf32>
    %568 = arith.mulf %563, %567 : vector<8x16xf32>
    %569 = arith.truncf %568 : vector<8x16xf32> to vector<8x16xbf16>
    %cst_162 = arith.constant dense<0.000000e+00> : vector<8x32xf32>
    %570 = tpu.matmul %569, %555, %cst_162 {dimension_numbers = #tpu.dot_dimension_numbers<[1], [0], [0], [1], [0, 0, 1, 1], [], []>} : vector<8x16xbf16>, vector<16x32xbf16>, vector<8x32xf32> -> vector<8x32xf32>
    %571 = arith.addf %549, %570 : vector<8x32xf32>
    %572 = vector.extract_strided_slice %475 {offsets = [8, 0], sizes = [8, 32], strides = [1, 1]} : vector<16x32xf32> to vector<8x32xf32>
    %573 = vector.extract_strided_slice %479 {offsets = [16, 0], sizes = [16, 32], strides = [1, 1]} : vector<32x32xf32> to vector<16x32xf32>
    %574 = vector.extract_strided_slice %480 {offsets = [16, 0], sizes = [16, 128], strides = [1, 1]} : vector<32x128xf32> to vector<16x128xf32>
    %575 = vector.extract_strided_slice %572 {offsets = [0, 0], sizes = [8, 8], strides = [1, 1]} : vector<8x32xf32> to vector<8x8xf32>
    %576 = arith.truncf %575 : vector<8x8xf32> to vector<8x8xbf16>
    %577 = vector.extract_strided_slice %573 {offsets = [0, 0], sizes = [16, 8], strides = [1, 1]} : vector<16x32xf32> to vector<16x8xf32>
    %578 = arith.truncf %577 : vector<16x8xf32> to vector<16x8xbf16>
    %579 = vector.extract_strided_slice %574 {offsets = [0, 0], sizes = [16, 32], strides = [1, 1]} : vector<16x128xf32> to vector<16x32xf32>
    %580 = arith.truncf %579 : vector<16x32xf32> to vector<16x32xbf16>
    %cst_163 = arith.constant dense<0.000000e+00> : vector<8x16xf32>
    %581 = tpu.matmul %576, %578, %cst_163 {dimension_numbers = #tpu.dot_dimension_numbers<[1], [1], [0], [0], [0, 0, 1, 0], [], []>} : vector<8x8xbf16>, vector<16x8xbf16>, vector<8x16xf32> -> vector<8x16xf32>
    %cst_164 = arith.constant 0.353553385 : f32
    %582 = vector.broadcast %cst_164 : f32 to vector<8x16xf32>
    %583 = arith.mulf %581, %582 : vector<8x16xf32>
    %cst_165 = arith.constant dense<0xFF800000> : vector<8xf32>
    %584 = vector.multi_reduction <maximumf>, %583, %cst_165 [1] : vector<8x16xf32> to vector<8xf32>
    %585 = vector.shape_cast %584 : vector<8xf32> to vector<8x1xf32>
    %586 = vector.broadcast %585 : vector<8x1xf32> to vector<8x16xf32>
    %587 = arith.subf %583, %586 : vector<8x16xf32>
    %588 = math.exp %587 : vector<8x16xf32>
    %cst_166 = arith.constant dense<0.000000e+00> : vector<8xf32>
    %589 = vector.multi_reduction <add>, %588, %cst_166 [1] : vector<8x16xf32> to vector<8xf32>
    %590 = vector.shape_cast %589 : vector<8xf32> to vector<8x1xf32>
    %591 = tpu.reciprocal %590 {approx = true} : vector<8x1xf32> -> vector<8x1xf32>
    %592 = vector.broadcast %591 : vector<8x1xf32> to vector<8x16xf32>
    %593 = arith.mulf %588, %592 : vector<8x16xf32>
    %594 = arith.truncf %593 : vector<8x16xf32> to vector<8x16xbf16>
    %cst_167 = arith.constant dense<0.000000e+00> : vector<8x32xf32>
    %595 = tpu.matmul %594, %580, %cst_167 {dimension_numbers = #tpu.dot_dimension_numbers<[1], [0], [0], [1], [0, 0, 1, 1], [], []>} : vector<8x16xbf16>, vector<16x32xbf16>, vector<8x32xf32> -> vector<8x32xf32>
    %596 = vector.extract_strided_slice %572 {offsets = [0, 8], sizes = [8, 8], strides = [1, 1]} : vector<8x32xf32> to vector<8x8xf32>
    %597 = arith.truncf %596 : vector<8x8xf32> to vector<8x8xbf16>
    %598 = vector.extract_strided_slice %573 {offsets = [0, 8], sizes = [16, 8], strides = [1, 1]} : vector<16x32xf32> to vector<16x8xf32>
    %599 = arith.truncf %598 : vector<16x8xf32> to vector<16x8xbf16>
    %600 = vector.extract_strided_slice %574 {offsets = [0, 32], sizes = [16, 32], strides = [1, 1]} : vector<16x128xf32> to vector<16x32xf32>
    %601 = arith.truncf %600 : vector<16x32xf32> to vector<16x32xbf16>
    %cst_168 = arith.constant dense<0.000000e+00> : vector<8x16xf32>
    %602 = tpu.matmul %597, %599, %cst_168 {dimension_numbers = #tpu.dot_dimension_numbers<[1], [1], [0], [0], [0, 0, 1, 0], [], []>} : vector<8x8xbf16>, vector<16x8xbf16>, vector<8x16xf32> -> vector<8x16xf32>
    %cst_169 = arith.constant 0.353553385 : f32
    %603 = vector.broadcast %cst_169 : f32 to vector<8x16xf32>
    %604 = arith.mulf %602, %603 : vector<8x16xf32>
    %cst_170 = arith.constant dense<0xFF800000> : vector<8xf32>
    %605 = vector.multi_reduction <maximumf>, %604, %cst_170 [1] : vector<8x16xf32> to vector<8xf32>
    %606 = vector.shape_cast %605 : vector<8xf32> to vector<8x1xf32>
    %607 = vector.broadcast %606 : vector<8x1xf32> to vector<8x16xf32>
    %608 = arith.subf %604, %607 : vector<8x16xf32>
    %609 = math.exp %608 : vector<8x16xf32>
    %cst_171 = arith.constant dense<0.000000e+00> : vector<8xf32>
    %610 = vector.multi_reduction <add>, %609, %cst_171 [1] : vector<8x16xf32> to vector<8xf32>
    %611 = vector.shape_cast %610 : vector<8xf32> to vector<8x1xf32>
    %612 = tpu.reciprocal %611 {approx = true} : vector<8x1xf32> -> vector<8x1xf32>
    %613 = vector.broadcast %612 : vector<8x1xf32> to vector<8x16xf32>
    %614 = arith.mulf %609, %613 : vector<8x16xf32>
    %615 = arith.truncf %614 : vector<8x16xf32> to vector<8x16xbf16>
    %cst_172 = arith.constant dense<0.000000e+00> : vector<8x32xf32>
    %616 = tpu.matmul %615, %601, %cst_172 {dimension_numbers = #tpu.dot_dimension_numbers<[1], [0], [0], [1], [0, 0, 1, 1], [], []>} : vector<8x16xbf16>, vector<16x32xbf16>, vector<8x32xf32> -> vector<8x32xf32>
    %617 = arith.addf %595, %616 : vector<8x32xf32>
    %618 = vector.extract_strided_slice %572 {offsets = [0, 16], sizes = [8, 8], strides = [1, 1]} : vector<8x32xf32> to vector<8x8xf32>
    %619 = arith.truncf %618 : vector<8x8xf32> to vector<8x8xbf16>
    %620 = vector.extract_strided_slice %573 {offsets = [0, 16], sizes = [16, 8], strides = [1, 1]} : vector<16x32xf32> to vector<16x8xf32>
    %621 = arith.truncf %620 : vector<16x8xf32> to vector<16x8xbf16>
    %622 = vector.extract_strided_slice %574 {offsets = [0, 64], sizes = [16, 32], strides = [1, 1]} : vector<16x128xf32> to vector<16x32xf32>
    %623 = arith.truncf %622 : vector<16x32xf32> to vector<16x32xbf16>
    %cst_173 = arith.constant dense<0.000000e+00> : vector<8x16xf32>
    %624 = tpu.matmul %619, %621, %cst_173 {dimension_numbers = #tpu.dot_dimension_numbers<[1], [1], [0], [0], [0, 0, 1, 0], [], []>} : vector<8x8xbf16>, vector<16x8xbf16>, vector<8x16xf32> -> vector<8x16xf32>
    %cst_174 = arith.constant 0.353553385 : f32
    %625 = vector.broadcast %cst_174 : f32 to vector<8x16xf32>
    %626 = arith.mulf %624, %625 : vector<8x16xf32>
    %cst_175 = arith.constant dense<0xFF800000> : vector<8xf32>
    %627 = vector.multi_reduction <maximumf>, %626, %cst_175 [1] : vector<8x16xf32> to vector<8xf32>
    %628 = vector.shape_cast %627 : vector<8xf32> to vector<8x1xf32>
    %629 = vector.broadcast %628 : vector<8x1xf32> to vector<8x16xf32>
    %630 = arith.subf %626, %629 : vector<8x16xf32>
    %631 = math.exp %630 : vector<8x16xf32>
    %cst_176 = arith.constant dense<0.000000e+00> : vector<8xf32>
    %632 = vector.multi_reduction <add>, %631, %cst_176 [1] : vector<8x16xf32> to vector<8xf32>
    %633 = vector.shape_cast %632 : vector<8xf32> to vector<8x1xf32>
    %634 = tpu.reciprocal %633 {approx = true} : vector<8x1xf32> -> vector<8x1xf32>
    %635 = vector.broadcast %634 : vector<8x1xf32> to vector<8x16xf32>
    %636 = arith.mulf %631, %635 : vector<8x16xf32>
    %637 = arith.truncf %636 : vector<8x16xf32> to vector<8x16xbf16>
    %cst_177 = arith.constant dense<0.000000e+00> : vector<8x32xf32>
    %638 = tpu.matmul %637, %623, %cst_177 {dimension_numbers = #tpu.dot_dimension_numbers<[1], [0], [0], [1], [0, 0, 1, 1], [], []>} : vector<8x16xbf16>, vector<16x32xbf16>, vector<8x32xf32> -> vector<8x32xf32>
    %639 = arith.addf %617, %638 : vector<8x32xf32>
    %640 = vector.extract_strided_slice %572 {offsets = [0, 24], sizes = [8, 8], strides = [1, 1]} : vector<8x32xf32> to vector<8x8xf32>
    %641 = arith.truncf %640 : vector<8x8xf32> to vector<8x8xbf16>
    %642 = vector.extract_strided_slice %573 {offsets = [0, 24], sizes = [16, 8], strides = [1, 1]} : vector<16x32xf32> to vector<16x8xf32>
    %643 = arith.truncf %642 : vector<16x8xf32> to vector<16x8xbf16>
    %644 = vector.extract_strided_slice %574 {offsets = [0, 96], sizes = [16, 32], strides = [1, 1]} : vector<16x128xf32> to vector<16x32xf32>
    %645 = arith.truncf %644 : vector<16x32xf32> to vector<16x32xbf16>
    %cst_178 = arith.constant dense<0.000000e+00> : vector<8x16xf32>
    %646 = tpu.matmul %641, %643, %cst_178 {dimension_numbers = #tpu.dot_dimension_numbers<[1], [1], [0], [0], [0, 0, 1, 0], [], []>} : vector<8x8xbf16>, vector<16x8xbf16>, vector<8x16xf32> -> vector<8x16xf32>
    %cst_179 = arith.constant 0.353553385 : f32
    %647 = vector.broadcast %cst_179 : f32 to vector<8x16xf32>
    %648 = arith.mulf %646, %647 : vector<8x16xf32>
    %cst_180 = arith.constant dense<0xFF800000> : vector<8xf32>
    %649 = vector.multi_reduction <maximumf>, %648, %cst_180 [1] : vector<8x16xf32> to vector<8xf32>
    %650 = vector.shape_cast %649 : vector<8xf32> to vector<8x1xf32>
    %651 = vector.broadcast %650 : vector<8x1xf32> to vector<8x16xf32>
    %652 = arith.subf %648, %651 : vector<8x16xf32>
    %653 = math.exp %652 : vector<8x16xf32>
    %cst_181 = arith.constant dense<0.000000e+00> : vector<8xf32>
    %654 = vector.multi_reduction <add>, %653, %cst_181 [1] : vector<8x16xf32> to vector<8xf32>
    %655 = vector.shape_cast %654 : vector<8xf32> to vector<8x1xf32>
    %656 = tpu.reciprocal %655 {approx = true} : vector<8x1xf32> -> vector<8x1xf32>
    %657 = vector.broadcast %656 : vector<8x1xf32> to vector<8x16xf32>
    %658 = arith.mulf %653, %657 : vector<8x16xf32>
    %659 = arith.truncf %658 : vector<8x16xf32> to vector<8x16xbf16>
    %cst_182 = arith.constant dense<0.000000e+00> : vector<8x32xf32>
    %660 = tpu.matmul %659, %645, %cst_182 {dimension_numbers = #tpu.dot_dimension_numbers<[1], [0], [0], [1], [0, 0, 1, 1], [], []>} : vector<8x16xbf16>, vector<16x32xbf16>, vector<8x32xf32> -> vector<8x32xf32>
    %661 = arith.addf %639, %660 : vector<8x32xf32>
    %662 = tpu.concatenate %571, %661 in 0 : vector<8x32xf32>, vector<8x32xf32> -> vector<16x32xf32>
    %663 = vector.broadcast %481 : vector<1x32xf32> to vector<16x32xf32>
    %664 = arith.addf %662, %663 : vector<16x32xf32>
    %665 = arith.addf %466, %664 : vector<16x32xf32>
    %c12 = arith.constant 12 : index
    %c0_183 = arith.constant 0 : index
    %666 = vector.load %arg15[%c12, %c0_183] : memref<38x32xf32, #tpu.memory_space<vmem>>, vector<1x32xf32>
    %c16 = arith.constant 16 : index
    %c0_184 = arith.constant 0 : index
    %667 = vector.load %arg15[%c16, %c0_184] : memref<38x32xf32, #tpu.memory_space<vmem>>, vector<1x32xf32>
    %cst_185 = arith.constant dense<0.000000e+00> : vector<16xf32>
    %668 = vector.multi_reduction <add>, %665, %cst_185 [1] : vector<16x32xf32> to vector<16xf32>
    %669 = vector.shape_cast %668 : vector<16xf32> to vector<16x1xf32>
    %cst_186 = arith.constant 3.200000e+01 : f32
    %670 = vector.broadcast %cst_186 : f32 to vector<16x1xf32>
    %671 = arith.divf %669, %670 : vector<16x1xf32>
    %672 = vector.broadcast %671 : vector<16x1xf32> to vector<16x32xf32>
    %673 = arith.subf %665, %672 : vector<16x32xf32>
    %674 = arith.mulf %673, %673 : vector<16x32xf32>
    %cst_187 = arith.constant dense<0.000000e+00> : vector<16xf32>
    %675 = vector.multi_reduction <add>, %674, %cst_187 [1] : vector<16x32xf32> to vector<16xf32>
    %676 = vector.shape_cast %675 : vector<16xf32> to vector<16x1xf32>
    %cst_188 = arith.constant 3.200000e+01 : f32
    %677 = vector.broadcast %cst_188 : f32 to vector<16x1xf32>
    %678 = arith.divf %676, %677 : vector<16x1xf32>
    %cst_189 = arith.constant 9.99999974E-6 : f32
    %679 = vector.broadcast %cst_189 : f32 to vector<16x1xf32>
    %680 = arith.addf %678, %679 : vector<16x1xf32>
    %681 = math.rsqrt %680 : vector<16x1xf32>
    %682 = vector.broadcast %681 : vector<16x1xf32> to vector<16x32xf32>
    %683 = arith.mulf %673, %682 : vector<16x32xf32>
    %684 = vector.broadcast %666 : vector<1x32xf32> to vector<16x32xf32>
    %685 = arith.mulf %683, %684 : vector<16x32xf32>
    %686 = vector.broadcast %667 : vector<1x32xf32> to vector<16x32xf32>
    %687 = arith.addf %685, %686 : vector<16x32xf32>
    %688 = arith.truncf %687 : vector<16x32xf32> to vector<16x32xbf16>
    %c0_190 = arith.constant 0 : index
    %c0_191 = arith.constant 0 : index
    %c0_192 = arith.constant 0 : index
    %689 = vector.load %arg12[%c0_190, %c0_191, %c0_192] : memref<2x32x64xbf16, #tpu.memory_space<vmem>>, vector<1x32x64xbf16>
    %690 = vector.shape_cast %689 : vector<1x32x64xbf16> to vector<32x64xbf16>
    %cst_193 = arith.constant dense<0.000000e+00> : vector<16x64xf32>
    %691 = tpu.matmul %688, %690, %cst_193 {dimension_numbers = #tpu.dot_dimension_numbers<[1], [0], [0], [1], [0, 0, 1, 1], [], []>} : vector<16x32xbf16>, vector<32x64xbf16>, vector<16x64xf32> -> vector<16x64xf32>
    %c0_194 = arith.constant 0 : index
    %c0_195 = arith.constant 0 : index
    %c0_196 = arith.constant 0 : index
    %692 = vector.load %arg13[%c0_194, %c0_195, %c0_196] : memref<2x1x64xf32, #tpu.memory_space<vmem>>, vector<1x1x64xf32>
    %693 = vector.shape_cast %692 : vector<1x1x64xf32> to vector<1x64xf32>
    %694 = vector.broadcast %693 : vector<1x64xf32> to vector<16x64xf32>
    %695 = arith.addf %691, %694 : vector<16x64xf32>
    %cst_197 = arith.constant 0.000000e+00 : f32
    %696 = vector.broadcast %cst_197 : f32 to vector<16x64xf32>
    %697 = arith.maximumf %695, %696 : vector<16x64xf32>
    %698 = arith.truncf %697 : vector<16x64xf32> to vector<16x64xbf16>
    %c0_198 = arith.constant 0 : index
    %c0_199 = arith.constant 0 : index
    %c0_200 = arith.constant 0 : index
    %699 = vector.load %arg14[%c0_198, %c0_199, %c0_200] : memref<2x64x32xbf16, #tpu.memory_space<vmem>>, vector<1x64x32xbf16>
    %700 = vector.shape_cast %699 : vector<1x64x32xbf16> to vector<64x32xbf16>
    %cst_201 = arith.constant dense<0.000000e+00> : vector<16x32xf32>
    %701 = tpu.matmul %698, %700, %cst_201 {dimension_numbers = #tpu.dot_dimension_numbers<[1], [0], [0], [1], [0, 0, 1, 1], [], []>} : vector<16x64xbf16>, vector<64x32xbf16>, vector<16x32xf32> -> vector<16x32xf32>
    %c9 = arith.constant 9 : index
    %c0_202 = arith.constant 0 : index
    %702 = vector.load %arg15[%c9, %c0_202] : memref<38x32xf32, #tpu.memory_space<vmem>>, vector<1x32xf32>
    %703 = vector.broadcast %702 : vector<1x32xf32> to vector<16x32xf32>
    %704 = arith.addf %701, %703 : vector<16x32xf32>
    %705 = arith.addf %687, %704 : vector<16x32xf32>
    %c13 = arith.constant 13 : index
    %c0_203 = arith.constant 0 : index
    %706 = vector.load %arg15[%c13, %c0_203] : memref<38x32xf32, #tpu.memory_space<vmem>>, vector<1x32xf32>
    %c17 = arith.constant 17 : index
    %c0_204 = arith.constant 0 : index
    %707 = vector.load %arg15[%c17, %c0_204] : memref<38x32xf32, #tpu.memory_space<vmem>>, vector<1x32xf32>
    %cst_205 = arith.constant dense<0.000000e+00> : vector<16xf32>
    %708 = vector.multi_reduction <add>, %705, %cst_205 [1] : vector<16x32xf32> to vector<16xf32>
    %709 = vector.shape_cast %708 : vector<16xf32> to vector<16x1xf32>
    %cst_206 = arith.constant 3.200000e+01 : f32
    %710 = vector.broadcast %cst_206 : f32 to vector<16x1xf32>
    %711 = arith.divf %709, %710 : vector<16x1xf32>
    %712 = vector.broadcast %711 : vector<16x1xf32> to vector<16x32xf32>
    %713 = arith.subf %705, %712 : vector<16x32xf32>
    %714 = arith.mulf %713, %713 : vector<16x32xf32>
    %cst_207 = arith.constant dense<0.000000e+00> : vector<16xf32>
    %715 = vector.multi_reduction <add>, %714, %cst_207 [1] : vector<16x32xf32> to vector<16xf32>
    %716 = vector.shape_cast %715 : vector<16xf32> to vector<16x1xf32>
    %cst_208 = arith.constant 3.200000e+01 : f32
    %717 = vector.broadcast %cst_208 : f32 to vector<16x1xf32>
    %718 = arith.divf %716, %717 : vector<16x1xf32>
    %cst_209 = arith.constant 9.99999974E-6 : f32
    %719 = vector.broadcast %cst_209 : f32 to vector<16x1xf32>
    %720 = arith.addf %718, %719 : vector<16x1xf32>
    %721 = math.rsqrt %720 : vector<16x1xf32>
    %722 = vector.broadcast %721 : vector<16x1xf32> to vector<16x32xf32>
    %723 = arith.mulf %713, %722 : vector<16x32xf32>
    %724 = vector.broadcast %706 : vector<1x32xf32> to vector<16x32xf32>
    %725 = arith.mulf %723, %724 : vector<16x32xf32>
    %726 = vector.broadcast %707 : vector<1x32xf32> to vector<16x32xf32>
    %727 = arith.addf %725, %726 : vector<16x32xf32>
    %728 = arith.truncf %727 : vector<16x32xf32> to vector<16x32xbf16>
    %c1_210 = arith.constant 1 : index
    %c0_211 = arith.constant 0 : index
    %c0_212 = arith.constant 0 : index
    %729 = vector.load %arg6[%c1_210, %c0_211, %c0_212] : memref<2x32x192xbf16, #tpu.memory_space<vmem>>, vector<1x32x192xbf16>
    %730 = vector.shape_cast %729 : vector<1x32x192xbf16> to vector<32x192xbf16>
    %cst_213 = arith.constant dense<0.000000e+00> : vector<16x192xf32>
    %731 = tpu.matmul %728, %730, %cst_213 {dimension_numbers = #tpu.dot_dimension_numbers<[1], [0], [0], [1], [0, 0, 1, 1], [], []>} : vector<16x32xbf16>, vector<32x192xbf16>, vector<16x192xf32> -> vector<16x192xf32>
    %732 = vector.extract_strided_slice %731 {offsets = [0, 0], sizes = [16, 32], strides = [1, 1]} : vector<16x192xf32> to vector<16x32xf32>
    %733 = vector.extract_strided_slice %15 {offsets = [0, 128], sizes = [16, 32], strides = [1, 1]} : vector<16x256xf32> to vector<16x32xf32>
    %734 = arith.addf %732, %733 : vector<16x32xf32>
    %c18 = arith.constant 18 : index
    %c0_214 = arith.constant 0 : index
    %735 = vector.load %arg15[%c18, %c0_214] : memref<38x32xf32, #tpu.memory_space<vmem>>, vector<1x32xf32>
    %736 = vector.broadcast %735 : vector<1x32xf32> to vector<16x32xf32>
    %737 = arith.addf %734, %736 : vector<16x32xf32>
    %738 = vector.extract_strided_slice %731 {offsets = [0, 32], sizes = [16, 32], strides = [1, 1]} : vector<16x192xf32> to vector<16x32xf32>
    %739 = vector.extract_strided_slice %15 {offsets = [0, 160], sizes = [16, 32], strides = [1, 1]} : vector<16x256xf32> to vector<16x32xf32>
    %740 = arith.addf %738, %739 : vector<16x32xf32>
    %c19 = arith.constant 19 : index
    %c0_215 = arith.constant 0 : index
    %741 = vector.load %arg15[%c19, %c0_215] : memref<38x32xf32, #tpu.memory_space<vmem>>, vector<1x32xf32>
    %742 = vector.broadcast %741 : vector<1x32xf32> to vector<16x32xf32>
    %743 = arith.addf %740, %742 : vector<16x32xf32>
    %744 = vector.extract_strided_slice %731 {offsets = [0, 64], sizes = [16, 128], strides = [1, 1]} : vector<16x192xf32> to vector<16x128xf32>
    %c20 = arith.constant 20 : index
    %c0_216 = arith.constant 0 : index
    %745 = vector.load %arg15[%c20, %c0_216] : memref<38x32xf32, #tpu.memory_space<vmem>>, vector<1x32xf32>
    %746 = vector.extract_strided_slice %737 {offsets = [0, 0], sizes = [8, 32], strides = [1, 1]} : vector<16x32xf32> to vector<8x32xf32>
    %747 = vector.extract_strided_slice %743 {offsets = [0, 0], sizes = [8, 32], strides = [1, 1]} : vector<16x32xf32> to vector<8x32xf32>
    %748 = vector.extract_strided_slice %744 {offsets = [0, 0], sizes = [8, 128], strides = [1, 1]} : vector<16x128xf32> to vector<8x128xf32>
    %749 = vector.extract_strided_slice %746 {offsets = [0, 0], sizes = [8, 8], strides = [1, 1]} : vector<8x32xf32> to vector<8x8xf32>
    %750 = arith.truncf %749 : vector<8x8xf32> to vector<8x8xbf16>
    %751 = vector.extract_strided_slice %747 {offsets = [0, 0], sizes = [8, 8], strides = [1, 1]} : vector<8x32xf32> to vector<8x8xf32>
    %752 = arith.truncf %751 : vector<8x8xf32> to vector<8x8xbf16>
    %753 = vector.extract_strided_slice %748 {offsets = [0, 0], sizes = [8, 32], strides = [1, 1]} : vector<8x128xf32> to vector<8x32xf32>
    %754 = arith.truncf %753 : vector<8x32xf32> to vector<8x32xbf16>
    %cst_217 = arith.constant dense<0.000000e+00> : vector<8x8xf32>
    %755 = tpu.matmul %750, %752, %cst_217 {dimension_numbers = #tpu.dot_dimension_numbers<[1], [1], [0], [0], [0, 0, 1, 0], [], []>} : vector<8x8xbf16>, vector<8x8xbf16>, vector<8x8xf32> -> vector<8x8xf32>
    %cst_218 = arith.constant 0.353553385 : f32
    %756 = vector.broadcast %cst_218 : f32 to vector<8x8xf32>
    %757 = arith.mulf %755, %756 : vector<8x8xf32>
    %cst_219 = arith.constant dense<0xFF800000> : vector<8xf32>
    %758 = vector.multi_reduction <maximumf>, %757, %cst_219 [1] : vector<8x8xf32> to vector<8xf32>
    %759 = vector.shape_cast %758 : vector<8xf32> to vector<8x1xf32>
    %760 = vector.broadcast %759 : vector<8x1xf32> to vector<8x8xf32>
    %761 = arith.subf %757, %760 : vector<8x8xf32>
    %762 = math.exp %761 : vector<8x8xf32>
    %cst_220 = arith.constant dense<0.000000e+00> : vector<8xf32>
    %763 = vector.multi_reduction <add>, %762, %cst_220 [1] : vector<8x8xf32> to vector<8xf32>
    %764 = vector.shape_cast %763 : vector<8xf32> to vector<8x1xf32>
    %765 = tpu.reciprocal %764 {approx = true} : vector<8x1xf32> -> vector<8x1xf32>
    %766 = vector.broadcast %765 : vector<8x1xf32> to vector<8x8xf32>
    %767 = arith.mulf %762, %766 : vector<8x8xf32>
    %768 = arith.truncf %767 : vector<8x8xf32> to vector<8x8xbf16>
    %cst_221 = arith.constant dense<0.000000e+00> : vector<8x32xf32>
    %769 = tpu.matmul %768, %754, %cst_221 {dimension_numbers = #tpu.dot_dimension_numbers<[1], [0], [0], [1], [0, 0, 1, 1], [], []>} : vector<8x8xbf16>, vector<8x32xbf16>, vector<8x32xf32> -> vector<8x32xf32>
    %770 = vector.extract_strided_slice %746 {offsets = [0, 8], sizes = [8, 8], strides = [1, 1]} : vector<8x32xf32> to vector<8x8xf32>
    %771 = arith.truncf %770 : vector<8x8xf32> to vector<8x8xbf16>
    %772 = vector.extract_strided_slice %747 {offsets = [0, 8], sizes = [8, 8], strides = [1, 1]} : vector<8x32xf32> to vector<8x8xf32>
    %773 = arith.truncf %772 : vector<8x8xf32> to vector<8x8xbf16>
    %774 = vector.extract_strided_slice %748 {offsets = [0, 32], sizes = [8, 32], strides = [1, 1]} : vector<8x128xf32> to vector<8x32xf32>
    %775 = arith.truncf %774 : vector<8x32xf32> to vector<8x32xbf16>
    %cst_222 = arith.constant dense<0.000000e+00> : vector<8x8xf32>
    %776 = tpu.matmul %771, %773, %cst_222 {dimension_numbers = #tpu.dot_dimension_numbers<[1], [1], [0], [0], [0, 0, 1, 0], [], []>} : vector<8x8xbf16>, vector<8x8xbf16>, vector<8x8xf32> -> vector<8x8xf32>
    %cst_223 = arith.constant 0.353553385 : f32
    %777 = vector.broadcast %cst_223 : f32 to vector<8x8xf32>
    %778 = arith.mulf %776, %777 : vector<8x8xf32>
    %cst_224 = arith.constant dense<0xFF800000> : vector<8xf32>
    %779 = vector.multi_reduction <maximumf>, %778, %cst_224 [1] : vector<8x8xf32> to vector<8xf32>
    %780 = vector.shape_cast %779 : vector<8xf32> to vector<8x1xf32>
    %781 = vector.broadcast %780 : vector<8x1xf32> to vector<8x8xf32>
    %782 = arith.subf %778, %781 : vector<8x8xf32>
    %783 = math.exp %782 : vector<8x8xf32>
    %cst_225 = arith.constant dense<0.000000e+00> : vector<8xf32>
    %784 = vector.multi_reduction <add>, %783, %cst_225 [1] : vector<8x8xf32> to vector<8xf32>
    %785 = vector.shape_cast %784 : vector<8xf32> to vector<8x1xf32>
    %786 = tpu.reciprocal %785 {approx = true} : vector<8x1xf32> -> vector<8x1xf32>
    %787 = vector.broadcast %786 : vector<8x1xf32> to vector<8x8xf32>
    %788 = arith.mulf %783, %787 : vector<8x8xf32>
    %789 = arith.truncf %788 : vector<8x8xf32> to vector<8x8xbf16>
    %cst_226 = arith.constant dense<0.000000e+00> : vector<8x32xf32>
    %790 = tpu.matmul %789, %775, %cst_226 {dimension_numbers = #tpu.dot_dimension_numbers<[1], [0], [0], [1], [0, 0, 1, 1], [], []>} : vector<8x8xbf16>, vector<8x32xbf16>, vector<8x32xf32> -> vector<8x32xf32>
    %791 = arith.addf %769, %790 : vector<8x32xf32>
    %792 = vector.extract_strided_slice %746 {offsets = [0, 16], sizes = [8, 8], strides = [1, 1]} : vector<8x32xf32> to vector<8x8xf32>
    %793 = arith.truncf %792 : vector<8x8xf32> to vector<8x8xbf16>
    %794 = vector.extract_strided_slice %747 {offsets = [0, 16], sizes = [8, 8], strides = [1, 1]} : vector<8x32xf32> to vector<8x8xf32>
    %795 = arith.truncf %794 : vector<8x8xf32> to vector<8x8xbf16>
    %796 = vector.extract_strided_slice %748 {offsets = [0, 64], sizes = [8, 32], strides = [1, 1]} : vector<8x128xf32> to vector<8x32xf32>
    %797 = arith.truncf %796 : vector<8x32xf32> to vector<8x32xbf16>
    %cst_227 = arith.constant dense<0.000000e+00> : vector<8x8xf32>
    %798 = tpu.matmul %793, %795, %cst_227 {dimension_numbers = #tpu.dot_dimension_numbers<[1], [1], [0], [0], [0, 0, 1, 0], [], []>} : vector<8x8xbf16>, vector<8x8xbf16>, vector<8x8xf32> -> vector<8x8xf32>
    %cst_228 = arith.constant 0.353553385 : f32
    %799 = vector.broadcast %cst_228 : f32 to vector<8x8xf32>
    %800 = arith.mulf %798, %799 : vector<8x8xf32>
    %cst_229 = arith.constant dense<0xFF800000> : vector<8xf32>
    %801 = vector.multi_reduction <maximumf>, %800, %cst_229 [1] : vector<8x8xf32> to vector<8xf32>
    %802 = vector.shape_cast %801 : vector<8xf32> to vector<8x1xf32>
    %803 = vector.broadcast %802 : vector<8x1xf32> to vector<8x8xf32>
    %804 = arith.subf %800, %803 : vector<8x8xf32>
    %805 = math.exp %804 : vector<8x8xf32>
    %cst_230 = arith.constant dense<0.000000e+00> : vector<8xf32>
    %806 = vector.multi_reduction <add>, %805, %cst_230 [1] : vector<8x8xf32> to vector<8xf32>
    %807 = vector.shape_cast %806 : vector<8xf32> to vector<8x1xf32>
    %808 = tpu.reciprocal %807 {approx = true} : vector<8x1xf32> -> vector<8x1xf32>
    %809 = vector.broadcast %808 : vector<8x1xf32> to vector<8x8xf32>
    %810 = arith.mulf %805, %809 : vector<8x8xf32>
    %811 = arith.truncf %810 : vector<8x8xf32> to vector<8x8xbf16>
    %cst_231 = arith.constant dense<0.000000e+00> : vector<8x32xf32>
    %812 = tpu.matmul %811, %797, %cst_231 {dimension_numbers = #tpu.dot_dimension_numbers<[1], [0], [0], [1], [0, 0, 1, 1], [], []>} : vector<8x8xbf16>, vector<8x32xbf16>, vector<8x32xf32> -> vector<8x32xf32>
    %813 = arith.addf %791, %812 : vector<8x32xf32>
    %814 = vector.extract_strided_slice %746 {offsets = [0, 24], sizes = [8, 8], strides = [1, 1]} : vector<8x32xf32> to vector<8x8xf32>
    %815 = arith.truncf %814 : vector<8x8xf32> to vector<8x8xbf16>
    %816 = vector.extract_strided_slice %747 {offsets = [0, 24], sizes = [8, 8], strides = [1, 1]} : vector<8x32xf32> to vector<8x8xf32>
    %817 = arith.truncf %816 : vector<8x8xf32> to vector<8x8xbf16>
    %818 = vector.extract_strided_slice %748 {offsets = [0, 96], sizes = [8, 32], strides = [1, 1]} : vector<8x128xf32> to vector<8x32xf32>
    %819 = arith.truncf %818 : vector<8x32xf32> to vector<8x32xbf16>
    %cst_232 = arith.constant dense<0.000000e+00> : vector<8x8xf32>
    %820 = tpu.matmul %815, %817, %cst_232 {dimension_numbers = #tpu.dot_dimension_numbers<[1], [1], [0], [0], [0, 0, 1, 0], [], []>} : vector<8x8xbf16>, vector<8x8xbf16>, vector<8x8xf32> -> vector<8x8xf32>
    %cst_233 = arith.constant 0.353553385 : f32
    %821 = vector.broadcast %cst_233 : f32 to vector<8x8xf32>
    %822 = arith.mulf %820, %821 : vector<8x8xf32>
    %cst_234 = arith.constant dense<0xFF800000> : vector<8xf32>
    %823 = vector.multi_reduction <maximumf>, %822, %cst_234 [1] : vector<8x8xf32> to vector<8xf32>
    %824 = vector.shape_cast %823 : vector<8xf32> to vector<8x1xf32>
    %825 = vector.broadcast %824 : vector<8x1xf32> to vector<8x8xf32>
    %826 = arith.subf %822, %825 : vector<8x8xf32>
    %827 = math.exp %826 : vector<8x8xf32>
    %cst_235 = arith.constant dense<0.000000e+00> : vector<8xf32>
    %828 = vector.multi_reduction <add>, %827, %cst_235 [1] : vector<8x8xf32> to vector<8xf32>
    %829 = vector.shape_cast %828 : vector<8xf32> to vector<8x1xf32>
    %830 = tpu.reciprocal %829 {approx = true} : vector<8x1xf32> -> vector<8x1xf32>
    %831 = vector.broadcast %830 : vector<8x1xf32> to vector<8x8xf32>
    %832 = arith.mulf %827, %831 : vector<8x8xf32>
    %833 = arith.truncf %832 : vector<8x8xf32> to vector<8x8xbf16>
    %cst_236 = arith.constant dense<0.000000e+00> : vector<8x32xf32>
    %834 = tpu.matmul %833, %819, %cst_236 {dimension_numbers = #tpu.dot_dimension_numbers<[1], [0], [0], [1], [0, 0, 1, 1], [], []>} : vector<8x8xbf16>, vector<8x32xbf16>, vector<8x32xf32> -> vector<8x32xf32>
    %835 = arith.addf %813, %834 : vector<8x32xf32>
    %836 = vector.extract_strided_slice %737 {offsets = [8, 0], sizes = [8, 32], strides = [1, 1]} : vector<16x32xf32> to vector<8x32xf32>
    %837 = vector.extract_strided_slice %743 {offsets = [8, 0], sizes = [8, 32], strides = [1, 1]} : vector<16x32xf32> to vector<8x32xf32>
    %838 = vector.extract_strided_slice %744 {offsets = [8, 0], sizes = [8, 128], strides = [1, 1]} : vector<16x128xf32> to vector<8x128xf32>
    %839 = vector.extract_strided_slice %836 {offsets = [0, 0], sizes = [8, 8], strides = [1, 1]} : vector<8x32xf32> to vector<8x8xf32>
    %840 = arith.truncf %839 : vector<8x8xf32> to vector<8x8xbf16>
    %841 = vector.extract_strided_slice %837 {offsets = [0, 0], sizes = [8, 8], strides = [1, 1]} : vector<8x32xf32> to vector<8x8xf32>
    %842 = arith.truncf %841 : vector<8x8xf32> to vector<8x8xbf16>
    %843 = vector.extract_strided_slice %838 {offsets = [0, 0], sizes = [8, 32], strides = [1, 1]} : vector<8x128xf32> to vector<8x32xf32>
    %844 = arith.truncf %843 : vector<8x32xf32> to vector<8x32xbf16>
    %cst_237 = arith.constant dense<0.000000e+00> : vector<8x8xf32>
    %845 = tpu.matmul %840, %842, %cst_237 {dimension_numbers = #tpu.dot_dimension_numbers<[1], [1], [0], [0], [0, 0, 1, 0], [], []>} : vector<8x8xbf16>, vector<8x8xbf16>, vector<8x8xf32> -> vector<8x8xf32>
    %cst_238 = arith.constant 0.353553385 : f32
    %846 = vector.broadcast %cst_238 : f32 to vector<8x8xf32>
    %847 = arith.mulf %845, %846 : vector<8x8xf32>
    %cst_239 = arith.constant dense<0xFF800000> : vector<8xf32>
    %848 = vector.multi_reduction <maximumf>, %847, %cst_239 [1] : vector<8x8xf32> to vector<8xf32>
    %849 = vector.shape_cast %848 : vector<8xf32> to vector<8x1xf32>
    %850 = vector.broadcast %849 : vector<8x1xf32> to vector<8x8xf32>
    %851 = arith.subf %847, %850 : vector<8x8xf32>
    %852 = math.exp %851 : vector<8x8xf32>
    %cst_240 = arith.constant dense<0.000000e+00> : vector<8xf32>
    %853 = vector.multi_reduction <add>, %852, %cst_240 [1] : vector<8x8xf32> to vector<8xf32>
    %854 = vector.shape_cast %853 : vector<8xf32> to vector<8x1xf32>
    %855 = tpu.reciprocal %854 {approx = true} : vector<8x1xf32> -> vector<8x1xf32>
    %856 = vector.broadcast %855 : vector<8x1xf32> to vector<8x8xf32>
    %857 = arith.mulf %852, %856 : vector<8x8xf32>
    %858 = arith.truncf %857 : vector<8x8xf32> to vector<8x8xbf16>
    %cst_241 = arith.constant dense<0.000000e+00> : vector<8x32xf32>
    %859 = tpu.matmul %858, %844, %cst_241 {dimension_numbers = #tpu.dot_dimension_numbers<[1], [0], [0], [1], [0, 0, 1, 1], [], []>} : vector<8x8xbf16>, vector<8x32xbf16>, vector<8x32xf32> -> vector<8x32xf32>
    %860 = vector.extract_strided_slice %836 {offsets = [0, 8], sizes = [8, 8], strides = [1, 1]} : vector<8x32xf32> to vector<8x8xf32>
    %861 = arith.truncf %860 : vector<8x8xf32> to vector<8x8xbf16>
    %862 = vector.extract_strided_slice %837 {offsets = [0, 8], sizes = [8, 8], strides = [1, 1]} : vector<8x32xf32> to vector<8x8xf32>
    %863 = arith.truncf %862 : vector<8x8xf32> to vector<8x8xbf16>
    %864 = vector.extract_strided_slice %838 {offsets = [0, 32], sizes = [8, 32], strides = [1, 1]} : vector<8x128xf32> to vector<8x32xf32>
    %865 = arith.truncf %864 : vector<8x32xf32> to vector<8x32xbf16>
    %cst_242 = arith.constant dense<0.000000e+00> : vector<8x8xf32>
    %866 = tpu.matmul %861, %863, %cst_242 {dimension_numbers = #tpu.dot_dimension_numbers<[1], [1], [0], [0], [0, 0, 1, 0], [], []>} : vector<8x8xbf16>, vector<8x8xbf16>, vector<8x8xf32> -> vector<8x8xf32>
    %cst_243 = arith.constant 0.353553385 : f32
    %867 = vector.broadcast %cst_243 : f32 to vector<8x8xf32>
    %868 = arith.mulf %866, %867 : vector<8x8xf32>
    %cst_244 = arith.constant dense<0xFF800000> : vector<8xf32>
    %869 = vector.multi_reduction <maximumf>, %868, %cst_244 [1] : vector<8x8xf32> to vector<8xf32>
    %870 = vector.shape_cast %869 : vector<8xf32> to vector<8x1xf32>
    %871 = vector.broadcast %870 : vector<8x1xf32> to vector<8x8xf32>
    %872 = arith.subf %868, %871 : vector<8x8xf32>
    %873 = math.exp %872 : vector<8x8xf32>
    %cst_245 = arith.constant dense<0.000000e+00> : vector<8xf32>
    %874 = vector.multi_reduction <add>, %873, %cst_245 [1] : vector<8x8xf32> to vector<8xf32>
    %875 = vector.shape_cast %874 : vector<8xf32> to vector<8x1xf32>
    %876 = tpu.reciprocal %875 {approx = true} : vector<8x1xf32> -> vector<8x1xf32>
    %877 = vector.broadcast %876 : vector<8x1xf32> to vector<8x8xf32>
    %878 = arith.mulf %873, %877 : vector<8x8xf32>
    %879 = arith.truncf %878 : vector<8x8xf32> to vector<8x8xbf16>
    %cst_246 = arith.constant dense<0.000000e+00> : vector<8x32xf32>
    %880 = tpu.matmul %879, %865, %cst_246 {dimension_numbers = #tpu.dot_dimension_numbers<[1], [0], [0], [1], [0, 0, 1, 1], [], []>} : vector<8x8xbf16>, vector<8x32xbf16>, vector<8x32xf32> -> vector<8x32xf32>
    %881 = arith.addf %859, %880 : vector<8x32xf32>
    %882 = vector.extract_strided_slice %836 {offsets = [0, 16], sizes = [8, 8], strides = [1, 1]} : vector<8x32xf32> to vector<8x8xf32>
    %883 = arith.truncf %882 : vector<8x8xf32> to vector<8x8xbf16>
    %884 = vector.extract_strided_slice %837 {offsets = [0, 16], sizes = [8, 8], strides = [1, 1]} : vector<8x32xf32> to vector<8x8xf32>
    %885 = arith.truncf %884 : vector<8x8xf32> to vector<8x8xbf16>
    %886 = vector.extract_strided_slice %838 {offsets = [0, 64], sizes = [8, 32], strides = [1, 1]} : vector<8x128xf32> to vector<8x32xf32>
    %887 = arith.truncf %886 : vector<8x32xf32> to vector<8x32xbf16>
    %cst_247 = arith.constant dense<0.000000e+00> : vector<8x8xf32>
    %888 = tpu.matmul %883, %885, %cst_247 {dimension_numbers = #tpu.dot_dimension_numbers<[1], [1], [0], [0], [0, 0, 1, 0], [], []>} : vector<8x8xbf16>, vector<8x8xbf16>, vector<8x8xf32> -> vector<8x8xf32>
    %cst_248 = arith.constant 0.353553385 : f32
    %889 = vector.broadcast %cst_248 : f32 to vector<8x8xf32>
    %890 = arith.mulf %888, %889 : vector<8x8xf32>
    %cst_249 = arith.constant dense<0xFF800000> : vector<8xf32>
    %891 = vector.multi_reduction <maximumf>, %890, %cst_249 [1] : vector<8x8xf32> to vector<8xf32>
    %892 = vector.shape_cast %891 : vector<8xf32> to vector<8x1xf32>
    %893 = vector.broadcast %892 : vector<8x1xf32> to vector<8x8xf32>
    %894 = arith.subf %890, %893 : vector<8x8xf32>
    %895 = math.exp %894 : vector<8x8xf32>
    %cst_250 = arith.constant dense<0.000000e+00> : vector<8xf32>
    %896 = vector.multi_reduction <add>, %895, %cst_250 [1] : vector<8x8xf32> to vector<8xf32>
    %897 = vector.shape_cast %896 : vector<8xf32> to vector<8x1xf32>
    %898 = tpu.reciprocal %897 {approx = true} : vector<8x1xf32> -> vector<8x1xf32>
    %899 = vector.broadcast %898 : vector<8x1xf32> to vector<8x8xf32>
    %900 = arith.mulf %895, %899 : vector<8x8xf32>
    %901 = arith.truncf %900 : vector<8x8xf32> to vector<8x8xbf16>
    %cst_251 = arith.constant dense<0.000000e+00> : vector<8x32xf32>
    %902 = tpu.matmul %901, %887, %cst_251 {dimension_numbers = #tpu.dot_dimension_numbers<[1], [0], [0], [1], [0, 0, 1, 1], [], []>} : vector<8x8xbf16>, vector<8x32xbf16>, vector<8x32xf32> -> vector<8x32xf32>
    %903 = arith.addf %881, %902 : vector<8x32xf32>
    %904 = vector.extract_strided_slice %836 {offsets = [0, 24], sizes = [8, 8], strides = [1, 1]} : vector<8x32xf32> to vector<8x8xf32>
    %905 = arith.truncf %904 : vector<8x8xf32> to vector<8x8xbf16>
    %906 = vector.extract_strided_slice %837 {offsets = [0, 24], sizes = [8, 8], strides = [1, 1]} : vector<8x32xf32> to vector<8x8xf32>
    %907 = arith.truncf %906 : vector<8x8xf32> to vector<8x8xbf16>
    %908 = vector.extract_strided_slice %838 {offsets = [0, 96], sizes = [8, 32], strides = [1, 1]} : vector<8x128xf32> to vector<8x32xf32>
    %909 = arith.truncf %908 : vector<8x32xf32> to vector<8x32xbf16>
    %cst_252 = arith.constant dense<0.000000e+00> : vector<8x8xf32>
    %910 = tpu.matmul %905, %907, %cst_252 {dimension_numbers = #tpu.dot_dimension_numbers<[1], [1], [0], [0], [0, 0, 1, 0], [], []>} : vector<8x8xbf16>, vector<8x8xbf16>, vector<8x8xf32> -> vector<8x8xf32>
    %cst_253 = arith.constant 0.353553385 : f32
    %911 = vector.broadcast %cst_253 : f32 to vector<8x8xf32>
    %912 = arith.mulf %910, %911 : vector<8x8xf32>
    %cst_254 = arith.constant dense<0xFF800000> : vector<8xf32>
    %913 = vector.multi_reduction <maximumf>, %912, %cst_254 [1] : vector<8x8xf32> to vector<8xf32>
    %914 = vector.shape_cast %913 : vector<8xf32> to vector<8x1xf32>
    %915 = vector.broadcast %914 : vector<8x1xf32> to vector<8x8xf32>
    %916 = arith.subf %912, %915 : vector<8x8xf32>
    %917 = math.exp %916 : vector<8x8xf32>
    %cst_255 = arith.constant dense<0.000000e+00> : vector<8xf32>
    %918 = vector.multi_reduction <add>, %917, %cst_255 [1] : vector<8x8xf32> to vector<8xf32>
    %919 = vector.shape_cast %918 : vector<8xf32> to vector<8x1xf32>
    %920 = tpu.reciprocal %919 {approx = true} : vector<8x1xf32> -> vector<8x1xf32>
    %921 = vector.broadcast %920 : vector<8x1xf32> to vector<8x8xf32>
    %922 = arith.mulf %917, %921 : vector<8x8xf32>
    %923 = arith.truncf %922 : vector<8x8xf32> to vector<8x8xbf16>
    %cst_256 = arith.constant dense<0.000000e+00> : vector<8x32xf32>
    %924 = tpu.matmul %923, %909, %cst_256 {dimension_numbers = #tpu.dot_dimension_numbers<[1], [0], [0], [1], [0, 0, 1, 1], [], []>} : vector<8x8xbf16>, vector<8x32xbf16>, vector<8x32xf32> -> vector<8x32xf32>
    %925 = arith.addf %903, %924 : vector<8x32xf32>
    %926 = tpu.concatenate %835, %925 in 0 : vector<8x32xf32>, vector<8x32xf32> -> vector<16x32xf32>
    %927 = vector.broadcast %745 : vector<1x32xf32> to vector<16x32xf32>
    %928 = arith.addf %926, %927 : vector<16x32xf32>
    %929 = arith.addf %727, %928 : vector<16x32xf32>
    %c28 = arith.constant 28 : index
    %c0_257 = arith.constant 0 : index
    %930 = vector.load %arg15[%c28, %c0_257] : memref<38x32xf32, #tpu.memory_space<vmem>>, vector<1x32xf32>
    %c32 = arith.constant 32 : index
    %c0_258 = arith.constant 0 : index
    %931 = vector.load %arg15[%c32, %c0_258] : memref<38x32xf32, #tpu.memory_space<vmem>>, vector<1x32xf32>
    %cst_259 = arith.constant dense<0.000000e+00> : vector<16xf32>
    %932 = vector.multi_reduction <add>, %929, %cst_259 [1] : vector<16x32xf32> to vector<16xf32>
    %933 = vector.shape_cast %932 : vector<16xf32> to vector<16x1xf32>
    %cst_260 = arith.constant 3.200000e+01 : f32
    %934 = vector.broadcast %cst_260 : f32 to vector<16x1xf32>
    %935 = arith.divf %933, %934 : vector<16x1xf32>
    %936 = vector.broadcast %935 : vector<16x1xf32> to vector<16x32xf32>
    %937 = arith.subf %929, %936 : vector<16x32xf32>
    %938 = arith.mulf %937, %937 : vector<16x32xf32>
    %cst_261 = arith.constant dense<0.000000e+00> : vector<16xf32>
    %939 = vector.multi_reduction <add>, %938, %cst_261 [1] : vector<16x32xf32> to vector<16xf32>
    %940 = vector.shape_cast %939 : vector<16xf32> to vector<16x1xf32>
    %cst_262 = arith.constant 3.200000e+01 : f32
    %941 = vector.broadcast %cst_262 : f32 to vector<16x1xf32>
    %942 = arith.divf %940, %941 : vector<16x1xf32>
    %cst_263 = arith.constant 9.99999974E-6 : f32
    %943 = vector.broadcast %cst_263 : f32 to vector<16x1xf32>
    %944 = arith.addf %942, %943 : vector<16x1xf32>
    %945 = math.rsqrt %944 : vector<16x1xf32>
    %946 = vector.broadcast %945 : vector<16x1xf32> to vector<16x32xf32>
    %947 = arith.mulf %937, %946 : vector<16x32xf32>
    %948 = vector.broadcast %930 : vector<1x32xf32> to vector<16x32xf32>
    %949 = arith.mulf %947, %948 : vector<16x32xf32>
    %950 = vector.broadcast %931 : vector<1x32xf32> to vector<16x32xf32>
    %951 = arith.addf %949, %950 : vector<16x32xf32>
    %952 = arith.truncf %951 : vector<16x32xf32> to vector<16x32xbf16>
    %c1_264 = arith.constant 1 : index
    %c0_265 = arith.constant 0 : index
    %c0_266 = arith.constant 0 : index
    %c0_267 = arith.constant 0 : index
    %953 = vector.load %arg7[%c1_264, %c0_265, %c0_266, %c0_267] : memref<2x2x32x32xbf16, #tpu.memory_space<vmem>>, vector<1x1x32x32xbf16>
    %954 = vector.shape_cast %953 : vector<1x1x32x32xbf16> to vector<32x32xbf16>
    %cst_268 = arith.constant dense<0.000000e+00> : vector<16x32xf32>
    %955 = tpu.matmul %952, %954, %cst_268 {dimension_numbers = #tpu.dot_dimension_numbers<[1], [0], [0], [1], [0, 0, 1, 1], [], []>} : vector<16x32xbf16>, vector<32x32xbf16>, vector<16x32xf32> -> vector<16x32xf32>
    %956 = vector.extract_strided_slice %15 {offsets = [0, 192], sizes = [16, 32], strides = [1, 1]} : vector<16x256xf32> to vector<16x32xf32>
    %957 = arith.addf %955, %956 : vector<16x32xf32>
    %c21 = arith.constant 21 : index
    %c0_269 = arith.constant 0 : index
    %958 = vector.load %arg15[%c21, %c0_269] : memref<38x32xf32, #tpu.memory_space<vmem>>, vector<1x32xf32>
    %959 = vector.broadcast %958 : vector<1x32xf32> to vector<16x32xf32>
    %960 = arith.addf %957, %959 : vector<16x32xf32>
    %961 = vector.extract_strided_slice %17 {offsets = [0, 160], sizes = [32, 32], strides = [1, 1]} : vector<32x320xf32> to vector<32x32xf32>
    %c22 = arith.constant 22 : index
    %c0_270 = arith.constant 0 : index
    %962 = vector.load %arg15[%c22, %c0_270] : memref<38x32xf32, #tpu.memory_space<vmem>>, vector<1x32xf32>
    %963 = vector.broadcast %962 : vector<1x32xf32> to vector<32x32xf32>
    %964 = arith.addf %961, %963 : vector<32x32xf32>
    %965 = vector.extract_strided_slice %17 {offsets = [0, 192], sizes = [32, 128], strides = [1, 1]} : vector<32x320xf32> to vector<32x128xf32>
    %c23 = arith.constant 23 : index
    %c0_271 = arith.constant 0 : index
    %966 = vector.load %arg15[%c23, %c0_271] : memref<38x32xf32, #tpu.memory_space<vmem>>, vector<1x32xf32>
    %967 = vector.extract_strided_slice %960 {offsets = [0, 0], sizes = [8, 32], strides = [1, 1]} : vector<16x32xf32> to vector<8x32xf32>
    %968 = vector.extract_strided_slice %964 {offsets = [0, 0], sizes = [16, 32], strides = [1, 1]} : vector<32x32xf32> to vector<16x32xf32>
    %969 = vector.extract_strided_slice %965 {offsets = [0, 0], sizes = [16, 128], strides = [1, 1]} : vector<32x128xf32> to vector<16x128xf32>
    %970 = vector.extract_strided_slice %967 {offsets = [0, 0], sizes = [8, 8], strides = [1, 1]} : vector<8x32xf32> to vector<8x8xf32>
    %971 = arith.truncf %970 : vector<8x8xf32> to vector<8x8xbf16>
    %972 = vector.extract_strided_slice %968 {offsets = [0, 0], sizes = [16, 8], strides = [1, 1]} : vector<16x32xf32> to vector<16x8xf32>
    %973 = arith.truncf %972 : vector<16x8xf32> to vector<16x8xbf16>
    %974 = vector.extract_strided_slice %969 {offsets = [0, 0], sizes = [16, 32], strides = [1, 1]} : vector<16x128xf32> to vector<16x32xf32>
    %975 = arith.truncf %974 : vector<16x32xf32> to vector<16x32xbf16>
    %cst_272 = arith.constant dense<0.000000e+00> : vector<8x16xf32>
    %976 = tpu.matmul %971, %973, %cst_272 {dimension_numbers = #tpu.dot_dimension_numbers<[1], [1], [0], [0], [0, 0, 1, 0], [], []>} : vector<8x8xbf16>, vector<16x8xbf16>, vector<8x16xf32> -> vector<8x16xf32>
    %cst_273 = arith.constant 0.353553385 : f32
    %977 = vector.broadcast %cst_273 : f32 to vector<8x16xf32>
    %978 = arith.mulf %976, %977 : vector<8x16xf32>
    %cst_274 = arith.constant dense<0xFF800000> : vector<8xf32>
    %979 = vector.multi_reduction <maximumf>, %978, %cst_274 [1] : vector<8x16xf32> to vector<8xf32>
    %980 = vector.shape_cast %979 : vector<8xf32> to vector<8x1xf32>
    %981 = vector.broadcast %980 : vector<8x1xf32> to vector<8x16xf32>
    %982 = arith.subf %978, %981 : vector<8x16xf32>
    %983 = math.exp %982 : vector<8x16xf32>
    %cst_275 = arith.constant dense<0.000000e+00> : vector<8xf32>
    %984 = vector.multi_reduction <add>, %983, %cst_275 [1] : vector<8x16xf32> to vector<8xf32>
    %985 = vector.shape_cast %984 : vector<8xf32> to vector<8x1xf32>
    %986 = tpu.reciprocal %985 {approx = true} : vector<8x1xf32> -> vector<8x1xf32>
    %987 = vector.broadcast %986 : vector<8x1xf32> to vector<8x16xf32>
    %988 = arith.mulf %983, %987 : vector<8x16xf32>
    %989 = arith.truncf %988 : vector<8x16xf32> to vector<8x16xbf16>
    %cst_276 = arith.constant dense<0.000000e+00> : vector<8x32xf32>
    %990 = tpu.matmul %989, %975, %cst_276 {dimension_numbers = #tpu.dot_dimension_numbers<[1], [0], [0], [1], [0, 0, 1, 1], [], []>} : vector<8x16xbf16>, vector<16x32xbf16>, vector<8x32xf32> -> vector<8x32xf32>
    %991 = vector.extract_strided_slice %967 {offsets = [0, 8], sizes = [8, 8], strides = [1, 1]} : vector<8x32xf32> to vector<8x8xf32>
    %992 = arith.truncf %991 : vector<8x8xf32> to vector<8x8xbf16>
    %993 = vector.extract_strided_slice %968 {offsets = [0, 8], sizes = [16, 8], strides = [1, 1]} : vector<16x32xf32> to vector<16x8xf32>
    %994 = arith.truncf %993 : vector<16x8xf32> to vector<16x8xbf16>
    %995 = vector.extract_strided_slice %969 {offsets = [0, 32], sizes = [16, 32], strides = [1, 1]} : vector<16x128xf32> to vector<16x32xf32>
    %996 = arith.truncf %995 : vector<16x32xf32> to vector<16x32xbf16>
    %cst_277 = arith.constant dense<0.000000e+00> : vector<8x16xf32>
    %997 = tpu.matmul %992, %994, %cst_277 {dimension_numbers = #tpu.dot_dimension_numbers<[1], [1], [0], [0], [0, 0, 1, 0], [], []>} : vector<8x8xbf16>, vector<16x8xbf16>, vector<8x16xf32> -> vector<8x16xf32>
    %cst_278 = arith.constant 0.353553385 : f32
    %998 = vector.broadcast %cst_278 : f32 to vector<8x16xf32>
    %999 = arith.mulf %997, %998 : vector<8x16xf32>
    %cst_279 = arith.constant dense<0xFF800000> : vector<8xf32>
    %1000 = vector.multi_reduction <maximumf>, %999, %cst_279 [1] : vector<8x16xf32> to vector<8xf32>
    %1001 = vector.shape_cast %1000 : vector<8xf32> to vector<8x1xf32>
    %1002 = vector.broadcast %1001 : vector<8x1xf32> to vector<8x16xf32>
    %1003 = arith.subf %999, %1002 : vector<8x16xf32>
    %1004 = math.exp %1003 : vector<8x16xf32>
    %cst_280 = arith.constant dense<0.000000e+00> : vector<8xf32>
    %1005 = vector.multi_reduction <add>, %1004, %cst_280 [1] : vector<8x16xf32> to vector<8xf32>
    %1006 = vector.shape_cast %1005 : vector<8xf32> to vector<8x1xf32>
    %1007 = tpu.reciprocal %1006 {approx = true} : vector<8x1xf32> -> vector<8x1xf32>
    %1008 = vector.broadcast %1007 : vector<8x1xf32> to vector<8x16xf32>
    %1009 = arith.mulf %1004, %1008 : vector<8x16xf32>
    %1010 = arith.truncf %1009 : vector<8x16xf32> to vector<8x16xbf16>
    %cst_281 = arith.constant dense<0.000000e+00> : vector<8x32xf32>
    %1011 = tpu.matmul %1010, %996, %cst_281 {dimension_numbers = #tpu.dot_dimension_numbers<[1], [0], [0], [1], [0, 0, 1, 1], [], []>} : vector<8x16xbf16>, vector<16x32xbf16>, vector<8x32xf32> -> vector<8x32xf32>
    %1012 = arith.addf %990, %1011 : vector<8x32xf32>
    %1013 = vector.extract_strided_slice %967 {offsets = [0, 16], sizes = [8, 8], strides = [1, 1]} : vector<8x32xf32> to vector<8x8xf32>
    %1014 = arith.truncf %1013 : vector<8x8xf32> to vector<8x8xbf16>
    %1015 = vector.extract_strided_slice %968 {offsets = [0, 16], sizes = [16, 8], strides = [1, 1]} : vector<16x32xf32> to vector<16x8xf32>
    %1016 = arith.truncf %1015 : vector<16x8xf32> to vector<16x8xbf16>
    %1017 = vector.extract_strided_slice %969 {offsets = [0, 64], sizes = [16, 32], strides = [1, 1]} : vector<16x128xf32> to vector<16x32xf32>
    %1018 = arith.truncf %1017 : vector<16x32xf32> to vector<16x32xbf16>
    %cst_282 = arith.constant dense<0.000000e+00> : vector<8x16xf32>
    %1019 = tpu.matmul %1014, %1016, %cst_282 {dimension_numbers = #tpu.dot_dimension_numbers<[1], [1], [0], [0], [0, 0, 1, 0], [], []>} : vector<8x8xbf16>, vector<16x8xbf16>, vector<8x16xf32> -> vector<8x16xf32>
    %cst_283 = arith.constant 0.353553385 : f32
    %1020 = vector.broadcast %cst_283 : f32 to vector<8x16xf32>
    %1021 = arith.mulf %1019, %1020 : vector<8x16xf32>
    %cst_284 = arith.constant dense<0xFF800000> : vector<8xf32>
    %1022 = vector.multi_reduction <maximumf>, %1021, %cst_284 [1] : vector<8x16xf32> to vector<8xf32>
    %1023 = vector.shape_cast %1022 : vector<8xf32> to vector<8x1xf32>
    %1024 = vector.broadcast %1023 : vector<8x1xf32> to vector<8x16xf32>
    %1025 = arith.subf %1021, %1024 : vector<8x16xf32>
    %1026 = math.exp %1025 : vector<8x16xf32>
    %cst_285 = arith.constant dense<0.000000e+00> : vector<8xf32>
    %1027 = vector.multi_reduction <add>, %1026, %cst_285 [1] : vector<8x16xf32> to vector<8xf32>
    %1028 = vector.shape_cast %1027 : vector<8xf32> to vector<8x1xf32>
    %1029 = tpu.reciprocal %1028 {approx = true} : vector<8x1xf32> -> vector<8x1xf32>
    %1030 = vector.broadcast %1029 : vector<8x1xf32> to vector<8x16xf32>
    %1031 = arith.mulf %1026, %1030 : vector<8x16xf32>
    %1032 = arith.truncf %1031 : vector<8x16xf32> to vector<8x16xbf16>
    %cst_286 = arith.constant dense<0.000000e+00> : vector<8x32xf32>
    %1033 = tpu.matmul %1032, %1018, %cst_286 {dimension_numbers = #tpu.dot_dimension_numbers<[1], [0], [0], [1], [0, 0, 1, 1], [], []>} : vector<8x16xbf16>, vector<16x32xbf16>, vector<8x32xf32> -> vector<8x32xf32>
    %1034 = arith.addf %1012, %1033 : vector<8x32xf32>
    %1035 = vector.extract_strided_slice %967 {offsets = [0, 24], sizes = [8, 8], strides = [1, 1]} : vector<8x32xf32> to vector<8x8xf32>
    %1036 = arith.truncf %1035 : vector<8x8xf32> to vector<8x8xbf16>
    %1037 = vector.extract_strided_slice %968 {offsets = [0, 24], sizes = [16, 8], strides = [1, 1]} : vector<16x32xf32> to vector<16x8xf32>
    %1038 = arith.truncf %1037 : vector<16x8xf32> to vector<16x8xbf16>
    %1039 = vector.extract_strided_slice %969 {offsets = [0, 96], sizes = [16, 32], strides = [1, 1]} : vector<16x128xf32> to vector<16x32xf32>
    %1040 = arith.truncf %1039 : vector<16x32xf32> to vector<16x32xbf16>
    %cst_287 = arith.constant dense<0.000000e+00> : vector<8x16xf32>
    %1041 = tpu.matmul %1036, %1038, %cst_287 {dimension_numbers = #tpu.dot_dimension_numbers<[1], [1], [0], [0], [0, 0, 1, 0], [], []>} : vector<8x8xbf16>, vector<16x8xbf16>, vector<8x16xf32> -> vector<8x16xf32>
    %cst_288 = arith.constant 0.353553385 : f32
    %1042 = vector.broadcast %cst_288 : f32 to vector<8x16xf32>
    %1043 = arith.mulf %1041, %1042 : vector<8x16xf32>
    %cst_289 = arith.constant dense<0xFF800000> : vector<8xf32>
    %1044 = vector.multi_reduction <maximumf>, %1043, %cst_289 [1] : vector<8x16xf32> to vector<8xf32>
    %1045 = vector.shape_cast %1044 : vector<8xf32> to vector<8x1xf32>
    %1046 = vector.broadcast %1045 : vector<8x1xf32> to vector<8x16xf32>
    %1047 = arith.subf %1043, %1046 : vector<8x16xf32>
    %1048 = math.exp %1047 : vector<8x16xf32>
    %cst_290 = arith.constant dense<0.000000e+00> : vector<8xf32>
    %1049 = vector.multi_reduction <add>, %1048, %cst_290 [1] : vector<8x16xf32> to vector<8xf32>
    %1050 = vector.shape_cast %1049 : vector<8xf32> to vector<8x1xf32>
    %1051 = tpu.reciprocal %1050 {approx = true} : vector<8x1xf32> -> vector<8x1xf32>
    %1052 = vector.broadcast %1051 : vector<8x1xf32> to vector<8x16xf32>
    %1053 = arith.mulf %1048, %1052 : vector<8x16xf32>
    %1054 = arith.truncf %1053 : vector<8x16xf32> to vector<8x16xbf16>
    %cst_291 = arith.constant dense<0.000000e+00> : vector<8x32xf32>
    %1055 = tpu.matmul %1054, %1040, %cst_291 {dimension_numbers = #tpu.dot_dimension_numbers<[1], [0], [0], [1], [0, 0, 1, 1], [], []>} : vector<8x16xbf16>, vector<16x32xbf16>, vector<8x32xf32> -> vector<8x32xf32>
    %1056 = arith.addf %1034, %1055 : vector<8x32xf32>
    %1057 = vector.extract_strided_slice %960 {offsets = [8, 0], sizes = [8, 32], strides = [1, 1]} : vector<16x32xf32> to vector<8x32xf32>
    %1058 = vector.extract_strided_slice %964 {offsets = [16, 0], sizes = [16, 32], strides = [1, 1]} : vector<32x32xf32> to vector<16x32xf32>
    %1059 = vector.extract_strided_slice %965 {offsets = [16, 0], sizes = [16, 128], strides = [1, 1]} : vector<32x128xf32> to vector<16x128xf32>
    %1060 = vector.extract_strided_slice %1057 {offsets = [0, 0], sizes = [8, 8], strides = [1, 1]} : vector<8x32xf32> to vector<8x8xf32>
    %1061 = arith.truncf %1060 : vector<8x8xf32> to vector<8x8xbf16>
    %1062 = vector.extract_strided_slice %1058 {offsets = [0, 0], sizes = [16, 8], strides = [1, 1]} : vector<16x32xf32> to vector<16x8xf32>
    %1063 = arith.truncf %1062 : vector<16x8xf32> to vector<16x8xbf16>
    %1064 = vector.extract_strided_slice %1059 {offsets = [0, 0], sizes = [16, 32], strides = [1, 1]} : vector<16x128xf32> to vector<16x32xf32>
    %1065 = arith.truncf %1064 : vector<16x32xf32> to vector<16x32xbf16>
    %cst_292 = arith.constant dense<0.000000e+00> : vector<8x16xf32>
    %1066 = tpu.matmul %1061, %1063, %cst_292 {dimension_numbers = #tpu.dot_dimension_numbers<[1], [1], [0], [0], [0, 0, 1, 0], [], []>} : vector<8x8xbf16>, vector<16x8xbf16>, vector<8x16xf32> -> vector<8x16xf32>
    %cst_293 = arith.constant 0.353553385 : f32
    %1067 = vector.broadcast %cst_293 : f32 to vector<8x16xf32>
    %1068 = arith.mulf %1066, %1067 : vector<8x16xf32>
    %cst_294 = arith.constant dense<0xFF800000> : vector<8xf32>
    %1069 = vector.multi_reduction <maximumf>, %1068, %cst_294 [1] : vector<8x16xf32> to vector<8xf32>
    %1070 = vector.shape_cast %1069 : vector<8xf32> to vector<8x1xf32>
    %1071 = vector.broadcast %1070 : vector<8x1xf32> to vector<8x16xf32>
    %1072 = arith.subf %1068, %1071 : vector<8x16xf32>
    %1073 = math.exp %1072 : vector<8x16xf32>
    %cst_295 = arith.constant dense<0.000000e+00> : vector<8xf32>
    %1074 = vector.multi_reduction <add>, %1073, %cst_295 [1] : vector<8x16xf32> to vector<8xf32>
    %1075 = vector.shape_cast %1074 : vector<8xf32> to vector<8x1xf32>
    %1076 = tpu.reciprocal %1075 {approx = true} : vector<8x1xf32> -> vector<8x1xf32>
    %1077 = vector.broadcast %1076 : vector<8x1xf32> to vector<8x16xf32>
    %1078 = arith.mulf %1073, %1077 : vector<8x16xf32>
    %1079 = arith.truncf %1078 : vector<8x16xf32> to vector<8x16xbf16>
    %cst_296 = arith.constant dense<0.000000e+00> : vector<8x32xf32>
    %1080 = tpu.matmul %1079, %1065, %cst_296 {dimension_numbers = #tpu.dot_dimension_numbers<[1], [0], [0], [1], [0, 0, 1, 1], [], []>} : vector<8x16xbf16>, vector<16x32xbf16>, vector<8x32xf32> -> vector<8x32xf32>
    %1081 = vector.extract_strided_slice %1057 {offsets = [0, 8], sizes = [8, 8], strides = [1, 1]} : vector<8x32xf32> to vector<8x8xf32>
    %1082 = arith.truncf %1081 : vector<8x8xf32> to vector<8x8xbf16>
    %1083 = vector.extract_strided_slice %1058 {offsets = [0, 8], sizes = [16, 8], strides = [1, 1]} : vector<16x32xf32> to vector<16x8xf32>
    %1084 = arith.truncf %1083 : vector<16x8xf32> to vector<16x8xbf16>
    %1085 = vector.extract_strided_slice %1059 {offsets = [0, 32], sizes = [16, 32], strides = [1, 1]} : vector<16x128xf32> to vector<16x32xf32>
    %1086 = arith.truncf %1085 : vector<16x32xf32> to vector<16x32xbf16>
    %cst_297 = arith.constant dense<0.000000e+00> : vector<8x16xf32>
    %1087 = tpu.matmul %1082, %1084, %cst_297 {dimension_numbers = #tpu.dot_dimension_numbers<[1], [1], [0], [0], [0, 0, 1, 0], [], []>} : vector<8x8xbf16>, vector<16x8xbf16>, vector<8x16xf32> -> vector<8x16xf32>
    %cst_298 = arith.constant 0.353553385 : f32
    %1088 = vector.broadcast %cst_298 : f32 to vector<8x16xf32>
    %1089 = arith.mulf %1087, %1088 : vector<8x16xf32>
    %cst_299 = arith.constant dense<0xFF800000> : vector<8xf32>
    %1090 = vector.multi_reduction <maximumf>, %1089, %cst_299 [1] : vector<8x16xf32> to vector<8xf32>
    %1091 = vector.shape_cast %1090 : vector<8xf32> to vector<8x1xf32>
    %1092 = vector.broadcast %1091 : vector<8x1xf32> to vector<8x16xf32>
    %1093 = arith.subf %1089, %1092 : vector<8x16xf32>
    %1094 = math.exp %1093 : vector<8x16xf32>
    %cst_300 = arith.constant dense<0.000000e+00> : vector<8xf32>
    %1095 = vector.multi_reduction <add>, %1094, %cst_300 [1] : vector<8x16xf32> to vector<8xf32>
    %1096 = vector.shape_cast %1095 : vector<8xf32> to vector<8x1xf32>
    %1097 = tpu.reciprocal %1096 {approx = true} : vector<8x1xf32> -> vector<8x1xf32>
    %1098 = vector.broadcast %1097 : vector<8x1xf32> to vector<8x16xf32>
    %1099 = arith.mulf %1094, %1098 : vector<8x16xf32>
    %1100 = arith.truncf %1099 : vector<8x16xf32> to vector<8x16xbf16>
    %cst_301 = arith.constant dense<0.000000e+00> : vector<8x32xf32>
    %1101 = tpu.matmul %1100, %1086, %cst_301 {dimension_numbers = #tpu.dot_dimension_numbers<[1], [0], [0], [1], [0, 0, 1, 1], [], []>} : vector<8x16xbf16>, vector<16x32xbf16>, vector<8x32xf32> -> vector<8x32xf32>
    %1102 = arith.addf %1080, %1101 : vector<8x32xf32>
    %1103 = vector.extract_strided_slice %1057 {offsets = [0, 16], sizes = [8, 8], strides = [1, 1]} : vector<8x32xf32> to vector<8x8xf32>
    %1104 = arith.truncf %1103 : vector<8x8xf32> to vector<8x8xbf16>
    %1105 = vector.extract_strided_slice %1058 {offsets = [0, 16], sizes = [16, 8], strides = [1, 1]} : vector<16x32xf32> to vector<16x8xf32>
    %1106 = arith.truncf %1105 : vector<16x8xf32> to vector<16x8xbf16>
    %1107 = vector.extract_strided_slice %1059 {offsets = [0, 64], sizes = [16, 32], strides = [1, 1]} : vector<16x128xf32> to vector<16x32xf32>
    %1108 = arith.truncf %1107 : vector<16x32xf32> to vector<16x32xbf16>
    %cst_302 = arith.constant dense<0.000000e+00> : vector<8x16xf32>
    %1109 = tpu.matmul %1104, %1106, %cst_302 {dimension_numbers = #tpu.dot_dimension_numbers<[1], [1], [0], [0], [0, 0, 1, 0], [], []>} : vector<8x8xbf16>, vector<16x8xbf16>, vector<8x16xf32> -> vector<8x16xf32>
    %cst_303 = arith.constant 0.353553385 : f32
    %1110 = vector.broadcast %cst_303 : f32 to vector<8x16xf32>
    %1111 = arith.mulf %1109, %1110 : vector<8x16xf32>
    %cst_304 = arith.constant dense<0xFF800000> : vector<8xf32>
    %1112 = vector.multi_reduction <maximumf>, %1111, %cst_304 [1] : vector<8x16xf32> to vector<8xf32>
    %1113 = vector.shape_cast %1112 : vector<8xf32> to vector<8x1xf32>
    %1114 = vector.broadcast %1113 : vector<8x1xf32> to vector<8x16xf32>
    %1115 = arith.subf %1111, %1114 : vector<8x16xf32>
    %1116 = math.exp %1115 : vector<8x16xf32>
    %cst_305 = arith.constant dense<0.000000e+00> : vector<8xf32>
    %1117 = vector.multi_reduction <add>, %1116, %cst_305 [1] : vector<8x16xf32> to vector<8xf32>
    %1118 = vector.shape_cast %1117 : vector<8xf32> to vector<8x1xf32>
    %1119 = tpu.reciprocal %1118 {approx = true} : vector<8x1xf32> -> vector<8x1xf32>
    %1120 = vector.broadcast %1119 : vector<8x1xf32> to vector<8x16xf32>
    %1121 = arith.mulf %1116, %1120 : vector<8x16xf32>
    %1122 = arith.truncf %1121 : vector<8x16xf32> to vector<8x16xbf16>
    %cst_306 = arith.constant dense<0.000000e+00> : vector<8x32xf32>
    %1123 = tpu.matmul %1122, %1108, %cst_306 {dimension_numbers = #tpu.dot_dimension_numbers<[1], [0], [0], [1], [0, 0, 1, 1], [], []>} : vector<8x16xbf16>, vector<16x32xbf16>, vector<8x32xf32> -> vector<8x32xf32>
    %1124 = arith.addf %1102, %1123 : vector<8x32xf32>
    %1125 = vector.extract_strided_slice %1057 {offsets = [0, 24], sizes = [8, 8], strides = [1, 1]} : vector<8x32xf32> to vector<8x8xf32>
    %1126 = arith.truncf %1125 : vector<8x8xf32> to vector<8x8xbf16>
    %1127 = vector.extract_strided_slice %1058 {offsets = [0, 24], sizes = [16, 8], strides = [1, 1]} : vector<16x32xf32> to vector<16x8xf32>
    %1128 = arith.truncf %1127 : vector<16x8xf32> to vector<16x8xbf16>
    %1129 = vector.extract_strided_slice %1059 {offsets = [0, 96], sizes = [16, 32], strides = [1, 1]} : vector<16x128xf32> to vector<16x32xf32>
    %1130 = arith.truncf %1129 : vector<16x32xf32> to vector<16x32xbf16>
    %cst_307 = arith.constant dense<0.000000e+00> : vector<8x16xf32>
    %1131 = tpu.matmul %1126, %1128, %cst_307 {dimension_numbers = #tpu.dot_dimension_numbers<[1], [1], [0], [0], [0, 0, 1, 0], [], []>} : vector<8x8xbf16>, vector<16x8xbf16>, vector<8x16xf32> -> vector<8x16xf32>
    %cst_308 = arith.constant 0.353553385 : f32
    %1132 = vector.broadcast %cst_308 : f32 to vector<8x16xf32>
    %1133 = arith.mulf %1131, %1132 : vector<8x16xf32>
    %cst_309 = arith.constant dense<0xFF800000> : vector<8xf32>
    %1134 = vector.multi_reduction <maximumf>, %1133, %cst_309 [1] : vector<8x16xf32> to vector<8xf32>
    %1135 = vector.shape_cast %1134 : vector<8xf32> to vector<8x1xf32>
    %1136 = vector.broadcast %1135 : vector<8x1xf32> to vector<8x16xf32>
    %1137 = arith.subf %1133, %1136 : vector<8x16xf32>
    %1138 = math.exp %1137 : vector<8x16xf32>
    %cst_310 = arith.constant dense<0.000000e+00> : vector<8xf32>
    %1139 = vector.multi_reduction <add>, %1138, %cst_310 [1] : vector<8x16xf32> to vector<8xf32>
    %1140 = vector.shape_cast %1139 : vector<8xf32> to vector<8x1xf32>
    %1141 = tpu.reciprocal %1140 {approx = true} : vector<8x1xf32> -> vector<8x1xf32>
    %1142 = vector.broadcast %1141 : vector<8x1xf32> to vector<8x16xf32>
    %1143 = arith.mulf %1138, %1142 : vector<8x16xf32>
    %1144 = arith.truncf %1143 : vector<8x16xf32> to vector<8x16xbf16>
    %cst_311 = arith.constant dense<0.000000e+00> : vector<8x32xf32>
    %1145 = tpu.matmul %1144, %1130, %cst_311 {dimension_numbers = #tpu.dot_dimension_numbers<[1], [0], [0], [1], [0, 0, 1, 1], [], []>} : vector<8x16xbf16>, vector<16x32xbf16>, vector<8x32xf32> -> vector<8x32xf32>
    %1146 = arith.addf %1124, %1145 : vector<8x32xf32>
    %1147 = tpu.concatenate %1056, %1146 in 0 : vector<8x32xf32>, vector<8x32xf32> -> vector<16x32xf32>
    %1148 = vector.broadcast %966 : vector<1x32xf32> to vector<16x32xf32>
    %1149 = arith.addf %1147, %1148 : vector<16x32xf32>
    %1150 = arith.addf %951, %1149 : vector<16x32xf32>
    %c29 = arith.constant 29 : index
    %c0_312 = arith.constant 0 : index
    %1151 = vector.load %arg15[%c29, %c0_312] : memref<38x32xf32, #tpu.memory_space<vmem>>, vector<1x32xf32>
    %c33 = arith.constant 33 : index
    %c0_313 = arith.constant 0 : index
    %1152 = vector.load %arg15[%c33, %c0_313] : memref<38x32xf32, #tpu.memory_space<vmem>>, vector<1x32xf32>
    %cst_314 = arith.constant dense<0.000000e+00> : vector<16xf32>
    %1153 = vector.multi_reduction <add>, %1150, %cst_314 [1] : vector<16x32xf32> to vector<16xf32>
    %1154 = vector.shape_cast %1153 : vector<16xf32> to vector<16x1xf32>
    %cst_315 = arith.constant 3.200000e+01 : f32
    %1155 = vector.broadcast %cst_315 : f32 to vector<16x1xf32>
    %1156 = arith.divf %1154, %1155 : vector<16x1xf32>
    %1157 = vector.broadcast %1156 : vector<16x1xf32> to vector<16x32xf32>
    %1158 = arith.subf %1150, %1157 : vector<16x32xf32>
    %1159 = arith.mulf %1158, %1158 : vector<16x32xf32>
    %cst_316 = arith.constant dense<0.000000e+00> : vector<16xf32>
    %1160 = vector.multi_reduction <add>, %1159, %cst_316 [1] : vector<16x32xf32> to vector<16xf32>
    %1161 = vector.shape_cast %1160 : vector<16xf32> to vector<16x1xf32>
    %cst_317 = arith.constant 3.200000e+01 : f32
    %1162 = vector.broadcast %cst_317 : f32 to vector<16x1xf32>
    %1163 = arith.divf %1161, %1162 : vector<16x1xf32>
    %cst_318 = arith.constant 9.99999974E-6 : f32
    %1164 = vector.broadcast %cst_318 : f32 to vector<16x1xf32>
    %1165 = arith.addf %1163, %1164 : vector<16x1xf32>
    %1166 = math.rsqrt %1165 : vector<16x1xf32>
    %1167 = vector.broadcast %1166 : vector<16x1xf32> to vector<16x32xf32>
    %1168 = arith.mulf %1158, %1167 : vector<16x32xf32>
    %1169 = vector.broadcast %1151 : vector<1x32xf32> to vector<16x32xf32>
    %1170 = arith.mulf %1168, %1169 : vector<16x32xf32>
    %1171 = vector.broadcast %1152 : vector<1x32xf32> to vector<16x32xf32>
    %1172 = arith.addf %1170, %1171 : vector<16x32xf32>
    %1173 = arith.truncf %1172 : vector<16x32xf32> to vector<16x32xbf16>
    %c1_319 = arith.constant 1 : index
    %c1_320 = arith.constant 1 : index
    %c0_321 = arith.constant 0 : index
    %c0_322 = arith.constant 0 : index
    %1174 = vector.load %arg7[%c1_319, %c1_320, %c0_321, %c0_322] : memref<2x2x32x32xbf16, #tpu.memory_space<vmem>>, vector<1x1x32x32xbf16>
    %1175 = vector.shape_cast %1174 : vector<1x1x32x32xbf16> to vector<32x32xbf16>
    %cst_323 = arith.constant dense<0.000000e+00> : vector<16x32xf32>
    %1176 = tpu.matmul %1173, %1175, %cst_323 {dimension_numbers = #tpu.dot_dimension_numbers<[1], [0], [0], [1], [0, 0, 1, 1], [], []>} : vector<16x32xbf16>, vector<32x32xbf16>, vector<16x32xf32> -> vector<16x32xf32>
    %1177 = vector.extract_strided_slice %15 {offsets = [0, 224], sizes = [16, 32], strides = [1, 1]} : vector<16x256xf32> to vector<16x32xf32>
    %1178 = arith.addf %1176, %1177 : vector<16x32xf32>
    %c24 = arith.constant 24 : index
    %c0_324 = arith.constant 0 : index
    %1179 = vector.load %arg15[%c24, %c0_324] : memref<38x32xf32, #tpu.memory_space<vmem>>, vector<1x32xf32>
    %1180 = vector.broadcast %1179 : vector<1x32xf32> to vector<16x32xf32>
    %1181 = arith.addf %1178, %1180 : vector<16x32xf32>
    %1182 = vector.extract_strided_slice %19 {offsets = [0, 32], sizes = [32, 32], strides = [1, 1]} : vector<32x64xf32> to vector<32x32xf32>
    %c25 = arith.constant 25 : index
    %c0_325 = arith.constant 0 : index
    %1183 = vector.load %arg15[%c25, %c0_325] : memref<38x32xf32, #tpu.memory_space<vmem>>, vector<1x32xf32>
    %1184 = vector.broadcast %1183 : vector<1x32xf32> to vector<32x32xf32>
    %1185 = arith.addf %1182, %1184 : vector<32x32xf32>
    %1186 = vector.extract_strided_slice %21 {offsets = [0, 128], sizes = [32, 128], strides = [1, 1]} : vector<32x256xf32> to vector<32x128xf32>
    %c26 = arith.constant 26 : index
    %c0_326 = arith.constant 0 : index
    %1187 = vector.load %arg15[%c26, %c0_326] : memref<38x32xf32, #tpu.memory_space<vmem>>, vector<1x32xf32>
    %1188 = vector.extract_strided_slice %1181 {offsets = [0, 0], sizes = [8, 32], strides = [1, 1]} : vector<16x32xf32> to vector<8x32xf32>
    %1189 = vector.extract_strided_slice %1185 {offsets = [0, 0], sizes = [16, 32], strides = [1, 1]} : vector<32x32xf32> to vector<16x32xf32>
    %1190 = vector.extract_strided_slice %1186 {offsets = [0, 0], sizes = [16, 128], strides = [1, 1]} : vector<32x128xf32> to vector<16x128xf32>
    %1191 = vector.extract_strided_slice %1188 {offsets = [0, 0], sizes = [8, 8], strides = [1, 1]} : vector<8x32xf32> to vector<8x8xf32>
    %1192 = arith.truncf %1191 : vector<8x8xf32> to vector<8x8xbf16>
    %1193 = vector.extract_strided_slice %1189 {offsets = [0, 0], sizes = [16, 8], strides = [1, 1]} : vector<16x32xf32> to vector<16x8xf32>
    %1194 = arith.truncf %1193 : vector<16x8xf32> to vector<16x8xbf16>
    %1195 = vector.extract_strided_slice %1190 {offsets = [0, 0], sizes = [16, 32], strides = [1, 1]} : vector<16x128xf32> to vector<16x32xf32>
    %1196 = arith.truncf %1195 : vector<16x32xf32> to vector<16x32xbf16>
    %cst_327 = arith.constant dense<0.000000e+00> : vector<8x16xf32>
    %1197 = tpu.matmul %1192, %1194, %cst_327 {dimension_numbers = #tpu.dot_dimension_numbers<[1], [1], [0], [0], [0, 0, 1, 0], [], []>} : vector<8x8xbf16>, vector<16x8xbf16>, vector<8x16xf32> -> vector<8x16xf32>
    %cst_328 = arith.constant 0.353553385 : f32
    %1198 = vector.broadcast %cst_328 : f32 to vector<8x16xf32>
    %1199 = arith.mulf %1197, %1198 : vector<8x16xf32>
    %cst_329 = arith.constant dense<0xFF800000> : vector<8xf32>
    %1200 = vector.multi_reduction <maximumf>, %1199, %cst_329 [1] : vector<8x16xf32> to vector<8xf32>
    %1201 = vector.shape_cast %1200 : vector<8xf32> to vector<8x1xf32>
    %1202 = vector.broadcast %1201 : vector<8x1xf32> to vector<8x16xf32>
    %1203 = arith.subf %1199, %1202 : vector<8x16xf32>
    %1204 = math.exp %1203 : vector<8x16xf32>
    %cst_330 = arith.constant dense<0.000000e+00> : vector<8xf32>
    %1205 = vector.multi_reduction <add>, %1204, %cst_330 [1] : vector<8x16xf32> to vector<8xf32>
    %1206 = vector.shape_cast %1205 : vector<8xf32> to vector<8x1xf32>
    %1207 = tpu.reciprocal %1206 {approx = true} : vector<8x1xf32> -> vector<8x1xf32>
    %1208 = vector.broadcast %1207 : vector<8x1xf32> to vector<8x16xf32>
    %1209 = arith.mulf %1204, %1208 : vector<8x16xf32>
    %1210 = arith.truncf %1209 : vector<8x16xf32> to vector<8x16xbf16>
    %cst_331 = arith.constant dense<0.000000e+00> : vector<8x32xf32>
    %1211 = tpu.matmul %1210, %1196, %cst_331 {dimension_numbers = #tpu.dot_dimension_numbers<[1], [0], [0], [1], [0, 0, 1, 1], [], []>} : vector<8x16xbf16>, vector<16x32xbf16>, vector<8x32xf32> -> vector<8x32xf32>
    %1212 = vector.extract_strided_slice %1188 {offsets = [0, 8], sizes = [8, 8], strides = [1, 1]} : vector<8x32xf32> to vector<8x8xf32>
    %1213 = arith.truncf %1212 : vector<8x8xf32> to vector<8x8xbf16>
    %1214 = vector.extract_strided_slice %1189 {offsets = [0, 8], sizes = [16, 8], strides = [1, 1]} : vector<16x32xf32> to vector<16x8xf32>
    %1215 = arith.truncf %1214 : vector<16x8xf32> to vector<16x8xbf16>
    %1216 = vector.extract_strided_slice %1190 {offsets = [0, 32], sizes = [16, 32], strides = [1, 1]} : vector<16x128xf32> to vector<16x32xf32>
    %1217 = arith.truncf %1216 : vector<16x32xf32> to vector<16x32xbf16>
    %cst_332 = arith.constant dense<0.000000e+00> : vector<8x16xf32>
    %1218 = tpu.matmul %1213, %1215, %cst_332 {dimension_numbers = #tpu.dot_dimension_numbers<[1], [1], [0], [0], [0, 0, 1, 0], [], []>} : vector<8x8xbf16>, vector<16x8xbf16>, vector<8x16xf32> -> vector<8x16xf32>
    %cst_333 = arith.constant 0.353553385 : f32
    %1219 = vector.broadcast %cst_333 : f32 to vector<8x16xf32>
    %1220 = arith.mulf %1218, %1219 : vector<8x16xf32>
    %cst_334 = arith.constant dense<0xFF800000> : vector<8xf32>
    %1221 = vector.multi_reduction <maximumf>, %1220, %cst_334 [1] : vector<8x16xf32> to vector<8xf32>
    %1222 = vector.shape_cast %1221 : vector<8xf32> to vector<8x1xf32>
    %1223 = vector.broadcast %1222 : vector<8x1xf32> to vector<8x16xf32>
    %1224 = arith.subf %1220, %1223 : vector<8x16xf32>
    %1225 = math.exp %1224 : vector<8x16xf32>
    %cst_335 = arith.constant dense<0.000000e+00> : vector<8xf32>
    %1226 = vector.multi_reduction <add>, %1225, %cst_335 [1] : vector<8x16xf32> to vector<8xf32>
    %1227 = vector.shape_cast %1226 : vector<8xf32> to vector<8x1xf32>
    %1228 = tpu.reciprocal %1227 {approx = true} : vector<8x1xf32> -> vector<8x1xf32>
    %1229 = vector.broadcast %1228 : vector<8x1xf32> to vector<8x16xf32>
    %1230 = arith.mulf %1225, %1229 : vector<8x16xf32>
    %1231 = arith.truncf %1230 : vector<8x16xf32> to vector<8x16xbf16>
    %cst_336 = arith.constant dense<0.000000e+00> : vector<8x32xf32>
    %1232 = tpu.matmul %1231, %1217, %cst_336 {dimension_numbers = #tpu.dot_dimension_numbers<[1], [0], [0], [1], [0, 0, 1, 1], [], []>} : vector<8x16xbf16>, vector<16x32xbf16>, vector<8x32xf32> -> vector<8x32xf32>
    %1233 = arith.addf %1211, %1232 : vector<8x32xf32>
    %1234 = vector.extract_strided_slice %1188 {offsets = [0, 16], sizes = [8, 8], strides = [1, 1]} : vector<8x32xf32> to vector<8x8xf32>
    %1235 = arith.truncf %1234 : vector<8x8xf32> to vector<8x8xbf16>
    %1236 = vector.extract_strided_slice %1189 {offsets = [0, 16], sizes = [16, 8], strides = [1, 1]} : vector<16x32xf32> to vector<16x8xf32>
    %1237 = arith.truncf %1236 : vector<16x8xf32> to vector<16x8xbf16>
    %1238 = vector.extract_strided_slice %1190 {offsets = [0, 64], sizes = [16, 32], strides = [1, 1]} : vector<16x128xf32> to vector<16x32xf32>
    %1239 = arith.truncf %1238 : vector<16x32xf32> to vector<16x32xbf16>
    %cst_337 = arith.constant dense<0.000000e+00> : vector<8x16xf32>
    %1240 = tpu.matmul %1235, %1237, %cst_337 {dimension_numbers = #tpu.dot_dimension_numbers<[1], [1], [0], [0], [0, 0, 1, 0], [], []>} : vector<8x8xbf16>, vector<16x8xbf16>, vector<8x16xf32> -> vector<8x16xf32>
    %cst_338 = arith.constant 0.353553385 : f32
    %1241 = vector.broadcast %cst_338 : f32 to vector<8x16xf32>
    %1242 = arith.mulf %1240, %1241 : vector<8x16xf32>
    %cst_339 = arith.constant dense<0xFF800000> : vector<8xf32>
    %1243 = vector.multi_reduction <maximumf>, %1242, %cst_339 [1] : vector<8x16xf32> to vector<8xf32>
    %1244 = vector.shape_cast %1243 : vector<8xf32> to vector<8x1xf32>
    %1245 = vector.broadcast %1244 : vector<8x1xf32> to vector<8x16xf32>
    %1246 = arith.subf %1242, %1245 : vector<8x16xf32>
    %1247 = math.exp %1246 : vector<8x16xf32>
    %cst_340 = arith.constant dense<0.000000e+00> : vector<8xf32>
    %1248 = vector.multi_reduction <add>, %1247, %cst_340 [1] : vector<8x16xf32> to vector<8xf32>
    %1249 = vector.shape_cast %1248 : vector<8xf32> to vector<8x1xf32>
    %1250 = tpu.reciprocal %1249 {approx = true} : vector<8x1xf32> -> vector<8x1xf32>
    %1251 = vector.broadcast %1250 : vector<8x1xf32> to vector<8x16xf32>
    %1252 = arith.mulf %1247, %1251 : vector<8x16xf32>
    %1253 = arith.truncf %1252 : vector<8x16xf32> to vector<8x16xbf16>
    %cst_341 = arith.constant dense<0.000000e+00> : vector<8x32xf32>
    %1254 = tpu.matmul %1253, %1239, %cst_341 {dimension_numbers = #tpu.dot_dimension_numbers<[1], [0], [0], [1], [0, 0, 1, 1], [], []>} : vector<8x16xbf16>, vector<16x32xbf16>, vector<8x32xf32> -> vector<8x32xf32>
    %1255 = arith.addf %1233, %1254 : vector<8x32xf32>
    %1256 = vector.extract_strided_slice %1188 {offsets = [0, 24], sizes = [8, 8], strides = [1, 1]} : vector<8x32xf32> to vector<8x8xf32>
    %1257 = arith.truncf %1256 : vector<8x8xf32> to vector<8x8xbf16>
    %1258 = vector.extract_strided_slice %1189 {offsets = [0, 24], sizes = [16, 8], strides = [1, 1]} : vector<16x32xf32> to vector<16x8xf32>
    %1259 = arith.truncf %1258 : vector<16x8xf32> to vector<16x8xbf16>
    %1260 = vector.extract_strided_slice %1190 {offsets = [0, 96], sizes = [16, 32], strides = [1, 1]} : vector<16x128xf32> to vector<16x32xf32>
    %1261 = arith.truncf %1260 : vector<16x32xf32> to vector<16x32xbf16>
    %cst_342 = arith.constant dense<0.000000e+00> : vector<8x16xf32>
    %1262 = tpu.matmul %1257, %1259, %cst_342 {dimension_numbers = #tpu.dot_dimension_numbers<[1], [1], [0], [0], [0, 0, 1, 0], [], []>} : vector<8x8xbf16>, vector<16x8xbf16>, vector<8x16xf32> -> vector<8x16xf32>
    %cst_343 = arith.constant 0.353553385 : f32
    %1263 = vector.broadcast %cst_343 : f32 to vector<8x16xf32>
    %1264 = arith.mulf %1262, %1263 : vector<8x16xf32>
    %cst_344 = arith.constant dense<0xFF800000> : vector<8xf32>
    %1265 = vector.multi_reduction <maximumf>, %1264, %cst_344 [1] : vector<8x16xf32> to vector<8xf32>
    %1266 = vector.shape_cast %1265 : vector<8xf32> to vector<8x1xf32>
    %1267 = vector.broadcast %1266 : vector<8x1xf32> to vector<8x16xf32>
    %1268 = arith.subf %1264, %1267 : vector<8x16xf32>
    %1269 = math.exp %1268 : vector<8x16xf32>
    %cst_345 = arith.constant dense<0.000000e+00> : vector<8xf32>
    %1270 = vector.multi_reduction <add>, %1269, %cst_345 [1] : vector<8x16xf32> to vector<8xf32>
    %1271 = vector.shape_cast %1270 : vector<8xf32> to vector<8x1xf32>
    %1272 = tpu.reciprocal %1271 {approx = true} : vector<8x1xf32> -> vector<8x1xf32>
    %1273 = vector.broadcast %1272 : vector<8x1xf32> to vector<8x16xf32>
    %1274 = arith.mulf %1269, %1273 : vector<8x16xf32>
    %1275 = arith.truncf %1274 : vector<8x16xf32> to vector<8x16xbf16>
    %cst_346 = arith.constant dense<0.000000e+00> : vector<8x32xf32>
    %1276 = tpu.matmul %1275, %1261, %cst_346 {dimension_numbers = #tpu.dot_dimension_numbers<[1], [0], [0], [1], [0, 0, 1, 1], [], []>} : vector<8x16xbf16>, vector<16x32xbf16>, vector<8x32xf32> -> vector<8x32xf32>
    %1277 = arith.addf %1255, %1276 : vector<8x32xf32>
    %1278 = vector.extract_strided_slice %1181 {offsets = [8, 0], sizes = [8, 32], strides = [1, 1]} : vector<16x32xf32> to vector<8x32xf32>
    %1279 = vector.extract_strided_slice %1185 {offsets = [16, 0], sizes = [16, 32], strides = [1, 1]} : vector<32x32xf32> to vector<16x32xf32>
    %1280 = vector.extract_strided_slice %1186 {offsets = [16, 0], sizes = [16, 128], strides = [1, 1]} : vector<32x128xf32> to vector<16x128xf32>
    %1281 = vector.extract_strided_slice %1278 {offsets = [0, 0], sizes = [8, 8], strides = [1, 1]} : vector<8x32xf32> to vector<8x8xf32>
    %1282 = arith.truncf %1281 : vector<8x8xf32> to vector<8x8xbf16>
    %1283 = vector.extract_strided_slice %1279 {offsets = [0, 0], sizes = [16, 8], strides = [1, 1]} : vector<16x32xf32> to vector<16x8xf32>
    %1284 = arith.truncf %1283 : vector<16x8xf32> to vector<16x8xbf16>
    %1285 = vector.extract_strided_slice %1280 {offsets = [0, 0], sizes = [16, 32], strides = [1, 1]} : vector<16x128xf32> to vector<16x32xf32>
    %1286 = arith.truncf %1285 : vector<16x32xf32> to vector<16x32xbf16>
    %cst_347 = arith.constant dense<0.000000e+00> : vector<8x16xf32>
    %1287 = tpu.matmul %1282, %1284, %cst_347 {dimension_numbers = #tpu.dot_dimension_numbers<[1], [1], [0], [0], [0, 0, 1, 0], [], []>} : vector<8x8xbf16>, vector<16x8xbf16>, vector<8x16xf32> -> vector<8x16xf32>
    %cst_348 = arith.constant 0.353553385 : f32
    %1288 = vector.broadcast %cst_348 : f32 to vector<8x16xf32>
    %1289 = arith.mulf %1287, %1288 : vector<8x16xf32>
    %cst_349 = arith.constant dense<0xFF800000> : vector<8xf32>
    %1290 = vector.multi_reduction <maximumf>, %1289, %cst_349 [1] : vector<8x16xf32> to vector<8xf32>
    %1291 = vector.shape_cast %1290 : vector<8xf32> to vector<8x1xf32>
    %1292 = vector.broadcast %1291 : vector<8x1xf32> to vector<8x16xf32>
    %1293 = arith.subf %1289, %1292 : vector<8x16xf32>
    %1294 = math.exp %1293 : vector<8x16xf32>
    %cst_350 = arith.constant dense<0.000000e+00> : vector<8xf32>
    %1295 = vector.multi_reduction <add>, %1294, %cst_350 [1] : vector<8x16xf32> to vector<8xf32>
    %1296 = vector.shape_cast %1295 : vector<8xf32> to vector<8x1xf32>
    %1297 = tpu.reciprocal %1296 {approx = true} : vector<8x1xf32> -> vector<8x1xf32>
    %1298 = vector.broadcast %1297 : vector<8x1xf32> to vector<8x16xf32>
    %1299 = arith.mulf %1294, %1298 : vector<8x16xf32>
    %1300 = arith.truncf %1299 : vector<8x16xf32> to vector<8x16xbf16>
    %cst_351 = arith.constant dense<0.000000e+00> : vector<8x32xf32>
    %1301 = tpu.matmul %1300, %1286, %cst_351 {dimension_numbers = #tpu.dot_dimension_numbers<[1], [0], [0], [1], [0, 0, 1, 1], [], []>} : vector<8x16xbf16>, vector<16x32xbf16>, vector<8x32xf32> -> vector<8x32xf32>
    %1302 = vector.extract_strided_slice %1278 {offsets = [0, 8], sizes = [8, 8], strides = [1, 1]} : vector<8x32xf32> to vector<8x8xf32>
    %1303 = arith.truncf %1302 : vector<8x8xf32> to vector<8x8xbf16>
    %1304 = vector.extract_strided_slice %1279 {offsets = [0, 8], sizes = [16, 8], strides = [1, 1]} : vector<16x32xf32> to vector<16x8xf32>
    %1305 = arith.truncf %1304 : vector<16x8xf32> to vector<16x8xbf16>
    %1306 = vector.extract_strided_slice %1280 {offsets = [0, 32], sizes = [16, 32], strides = [1, 1]} : vector<16x128xf32> to vector<16x32xf32>
    %1307 = arith.truncf %1306 : vector<16x32xf32> to vector<16x32xbf16>
    %cst_352 = arith.constant dense<0.000000e+00> : vector<8x16xf32>
    %1308 = tpu.matmul %1303, %1305, %cst_352 {dimension_numbers = #tpu.dot_dimension_numbers<[1], [1], [0], [0], [0, 0, 1, 0], [], []>} : vector<8x8xbf16>, vector<16x8xbf16>, vector<8x16xf32> -> vector<8x16xf32>
    %cst_353 = arith.constant 0.353553385 : f32
    %1309 = vector.broadcast %cst_353 : f32 to vector<8x16xf32>
    %1310 = arith.mulf %1308, %1309 : vector<8x16xf32>
    %cst_354 = arith.constant dense<0xFF800000> : vector<8xf32>
    %1311 = vector.multi_reduction <maximumf>, %1310, %cst_354 [1] : vector<8x16xf32> to vector<8xf32>
    %1312 = vector.shape_cast %1311 : vector<8xf32> to vector<8x1xf32>
    %1313 = vector.broadcast %1312 : vector<8x1xf32> to vector<8x16xf32>
    %1314 = arith.subf %1310, %1313 : vector<8x16xf32>
    %1315 = math.exp %1314 : vector<8x16xf32>
    %cst_355 = arith.constant dense<0.000000e+00> : vector<8xf32>
    %1316 = vector.multi_reduction <add>, %1315, %cst_355 [1] : vector<8x16xf32> to vector<8xf32>
    %1317 = vector.shape_cast %1316 : vector<8xf32> to vector<8x1xf32>
    %1318 = tpu.reciprocal %1317 {approx = true} : vector<8x1xf32> -> vector<8x1xf32>
    %1319 = vector.broadcast %1318 : vector<8x1xf32> to vector<8x16xf32>
    %1320 = arith.mulf %1315, %1319 : vector<8x16xf32>
    %1321 = arith.truncf %1320 : vector<8x16xf32> to vector<8x16xbf16>
    %cst_356 = arith.constant dense<0.000000e+00> : vector<8x32xf32>
    %1322 = tpu.matmul %1321, %1307, %cst_356 {dimension_numbers = #tpu.dot_dimension_numbers<[1], [0], [0], [1], [0, 0, 1, 1], [], []>} : vector<8x16xbf16>, vector<16x32xbf16>, vector<8x32xf32> -> vector<8x32xf32>
    %1323 = arith.addf %1301, %1322 : vector<8x32xf32>
    %1324 = vector.extract_strided_slice %1278 {offsets = [0, 16], sizes = [8, 8], strides = [1, 1]} : vector<8x32xf32> to vector<8x8xf32>
    %1325 = arith.truncf %1324 : vector<8x8xf32> to vector<8x8xbf16>
    %1326 = vector.extract_strided_slice %1279 {offsets = [0, 16], sizes = [16, 8], strides = [1, 1]} : vector<16x32xf32> to vector<16x8xf32>
    %1327 = arith.truncf %1326 : vector<16x8xf32> to vector<16x8xbf16>
    %1328 = vector.extract_strided_slice %1280 {offsets = [0, 64], sizes = [16, 32], strides = [1, 1]} : vector<16x128xf32> to vector<16x32xf32>
    %1329 = arith.truncf %1328 : vector<16x32xf32> to vector<16x32xbf16>
    %cst_357 = arith.constant dense<0.000000e+00> : vector<8x16xf32>
    %1330 = tpu.matmul %1325, %1327, %cst_357 {dimension_numbers = #tpu.dot_dimension_numbers<[1], [1], [0], [0], [0, 0, 1, 0], [], []>} : vector<8x8xbf16>, vector<16x8xbf16>, vector<8x16xf32> -> vector<8x16xf32>
    %cst_358 = arith.constant 0.353553385 : f32
    %1331 = vector.broadcast %cst_358 : f32 to vector<8x16xf32>
    %1332 = arith.mulf %1330, %1331 : vector<8x16xf32>
    %cst_359 = arith.constant dense<0xFF800000> : vector<8xf32>
    %1333 = vector.multi_reduction <maximumf>, %1332, %cst_359 [1] : vector<8x16xf32> to vector<8xf32>
    %1334 = vector.shape_cast %1333 : vector<8xf32> to vector<8x1xf32>
    %1335 = vector.broadcast %1334 : vector<8x1xf32> to vector<8x16xf32>
    %1336 = arith.subf %1332, %1335 : vector<8x16xf32>
    %1337 = math.exp %1336 : vector<8x16xf32>
    %cst_360 = arith.constant dense<0.000000e+00> : vector<8xf32>
    %1338 = vector.multi_reduction <add>, %1337, %cst_360 [1] : vector<8x16xf32> to vector<8xf32>
    %1339 = vector.shape_cast %1338 : vector<8xf32> to vector<8x1xf32>
    %1340 = tpu.reciprocal %1339 {approx = true} : vector<8x1xf32> -> vector<8x1xf32>
    %1341 = vector.broadcast %1340 : vector<8x1xf32> to vector<8x16xf32>
    %1342 = arith.mulf %1337, %1341 : vector<8x16xf32>
    %1343 = arith.truncf %1342 : vector<8x16xf32> to vector<8x16xbf16>
    %cst_361 = arith.constant dense<0.000000e+00> : vector<8x32xf32>
    %1344 = tpu.matmul %1343, %1329, %cst_361 {dimension_numbers = #tpu.dot_dimension_numbers<[1], [0], [0], [1], [0, 0, 1, 1], [], []>} : vector<8x16xbf16>, vector<16x32xbf16>, vector<8x32xf32> -> vector<8x32xf32>
    %1345 = arith.addf %1323, %1344 : vector<8x32xf32>
    %1346 = vector.extract_strided_slice %1278 {offsets = [0, 24], sizes = [8, 8], strides = [1, 1]} : vector<8x32xf32> to vector<8x8xf32>
    %1347 = arith.truncf %1346 : vector<8x8xf32> to vector<8x8xbf16>
    %1348 = vector.extract_strided_slice %1279 {offsets = [0, 24], sizes = [16, 8], strides = [1, 1]} : vector<16x32xf32> to vector<16x8xf32>
    %1349 = arith.truncf %1348 : vector<16x8xf32> to vector<16x8xbf16>
    %1350 = vector.extract_strided_slice %1280 {offsets = [0, 96], sizes = [16, 32], strides = [1, 1]} : vector<16x128xf32> to vector<16x32xf32>
    %1351 = arith.truncf %1350 : vector<16x32xf32> to vector<16x32xbf16>
    %cst_362 = arith.constant dense<0.000000e+00> : vector<8x16xf32>
    %1352 = tpu.matmul %1347, %1349, %cst_362 {dimension_numbers = #tpu.dot_dimension_numbers<[1], [1], [0], [0], [0, 0, 1, 0], [], []>} : vector<8x8xbf16>, vector<16x8xbf16>, vector<8x16xf32> -> vector<8x16xf32>
    %cst_363 = arith.constant 0.353553385 : f32
    %1353 = vector.broadcast %cst_363 : f32 to vector<8x16xf32>
    %1354 = arith.mulf %1352, %1353 : vector<8x16xf32>
    %cst_364 = arith.constant dense<0xFF800000> : vector<8xf32>
    %1355 = vector.multi_reduction <maximumf>, %1354, %cst_364 [1] : vector<8x16xf32> to vector<8xf32>
    %1356 = vector.shape_cast %1355 : vector<8xf32> to vector<8x1xf32>
    %1357 = vector.broadcast %1356 : vector<8x1xf32> to vector<8x16xf32>
    %1358 = arith.subf %1354, %1357 : vector<8x16xf32>
    %1359 = math.exp %1358 : vector<8x16xf32>
    %cst_365 = arith.constant dense<0.000000e+00> : vector<8xf32>
    %1360 = vector.multi_reduction <add>, %1359, %cst_365 [1] : vector<8x16xf32> to vector<8xf32>
    %1361 = vector.shape_cast %1360 : vector<8xf32> to vector<8x1xf32>
    %1362 = tpu.reciprocal %1361 {approx = true} : vector<8x1xf32> -> vector<8x1xf32>
    %1363 = vector.broadcast %1362 : vector<8x1xf32> to vector<8x16xf32>
    %1364 = arith.mulf %1359, %1363 : vector<8x16xf32>
    %1365 = arith.truncf %1364 : vector<8x16xf32> to vector<8x16xbf16>
    %cst_366 = arith.constant dense<0.000000e+00> : vector<8x32xf32>
    %1366 = tpu.matmul %1365, %1351, %cst_366 {dimension_numbers = #tpu.dot_dimension_numbers<[1], [0], [0], [1], [0, 0, 1, 1], [], []>} : vector<8x16xbf16>, vector<16x32xbf16>, vector<8x32xf32> -> vector<8x32xf32>
    %1367 = arith.addf %1345, %1366 : vector<8x32xf32>
    %1368 = tpu.concatenate %1277, %1367 in 0 : vector<8x32xf32>, vector<8x32xf32> -> vector<16x32xf32>
    %1369 = vector.broadcast %1187 : vector<1x32xf32> to vector<16x32xf32>
    %1370 = arith.addf %1368, %1369 : vector<16x32xf32>
    %1371 = arith.addf %1172, %1370 : vector<16x32xf32>
    %c30 = arith.constant 30 : index
    %c0_367 = arith.constant 0 : index
    %1372 = vector.load %arg15[%c30, %c0_367] : memref<38x32xf32, #tpu.memory_space<vmem>>, vector<1x32xf32>
    %c34 = arith.constant 34 : index
    %c0_368 = arith.constant 0 : index
    %1373 = vector.load %arg15[%c34, %c0_368] : memref<38x32xf32, #tpu.memory_space<vmem>>, vector<1x32xf32>
    %cst_369 = arith.constant dense<0.000000e+00> : vector<16xf32>
    %1374 = vector.multi_reduction <add>, %1371, %cst_369 [1] : vector<16x32xf32> to vector<16xf32>
    %1375 = vector.shape_cast %1374 : vector<16xf32> to vector<16x1xf32>
    %cst_370 = arith.constant 3.200000e+01 : f32
    %1376 = vector.broadcast %cst_370 : f32 to vector<16x1xf32>
    %1377 = arith.divf %1375, %1376 : vector<16x1xf32>
    %1378 = vector.broadcast %1377 : vector<16x1xf32> to vector<16x32xf32>
    %1379 = arith.subf %1371, %1378 : vector<16x32xf32>
    %1380 = arith.mulf %1379, %1379 : vector<16x32xf32>
    %cst_371 = arith.constant dense<0.000000e+00> : vector<16xf32>
    %1381 = vector.multi_reduction <add>, %1380, %cst_371 [1] : vector<16x32xf32> to vector<16xf32>
    %1382 = vector.shape_cast %1381 : vector<16xf32> to vector<16x1xf32>
    %cst_372 = arith.constant 3.200000e+01 : f32
    %1383 = vector.broadcast %cst_372 : f32 to vector<16x1xf32>
    %1384 = arith.divf %1382, %1383 : vector<16x1xf32>
    %cst_373 = arith.constant 9.99999974E-6 : f32
    %1385 = vector.broadcast %cst_373 : f32 to vector<16x1xf32>
    %1386 = arith.addf %1384, %1385 : vector<16x1xf32>
    %1387 = math.rsqrt %1386 : vector<16x1xf32>
    %1388 = vector.broadcast %1387 : vector<16x1xf32> to vector<16x32xf32>
    %1389 = arith.mulf %1379, %1388 : vector<16x32xf32>
    %1390 = vector.broadcast %1372 : vector<1x32xf32> to vector<16x32xf32>
    %1391 = arith.mulf %1389, %1390 : vector<16x32xf32>
    %1392 = vector.broadcast %1373 : vector<1x32xf32> to vector<16x32xf32>
    %1393 = arith.addf %1391, %1392 : vector<16x32xf32>
    %1394 = arith.truncf %1393 : vector<16x32xf32> to vector<16x32xbf16>
    %c1_374 = arith.constant 1 : index
    %c0_375 = arith.constant 0 : index
    %c0_376 = arith.constant 0 : index
    %1395 = vector.load %arg12[%c1_374, %c0_375, %c0_376] : memref<2x32x64xbf16, #tpu.memory_space<vmem>>, vector<1x32x64xbf16>
    %1396 = vector.shape_cast %1395 : vector<1x32x64xbf16> to vector<32x64xbf16>
    %cst_377 = arith.constant dense<0.000000e+00> : vector<16x64xf32>
    %1397 = tpu.matmul %1394, %1396, %cst_377 {dimension_numbers = #tpu.dot_dimension_numbers<[1], [0], [0], [1], [0, 0, 1, 1], [], []>} : vector<16x32xbf16>, vector<32x64xbf16>, vector<16x64xf32> -> vector<16x64xf32>
    %c1_378 = arith.constant 1 : index
    %c0_379 = arith.constant 0 : index
    %c0_380 = arith.constant 0 : index
    %1398 = vector.load %arg13[%c1_378, %c0_379, %c0_380] : memref<2x1x64xf32, #tpu.memory_space<vmem>>, vector<1x1x64xf32>
    %1399 = vector.shape_cast %1398 : vector<1x1x64xf32> to vector<1x64xf32>
    %1400 = vector.broadcast %1399 : vector<1x64xf32> to vector<16x64xf32>
    %1401 = arith.addf %1397, %1400 : vector<16x64xf32>
    %cst_381 = arith.constant 0.000000e+00 : f32
    %1402 = vector.broadcast %cst_381 : f32 to vector<16x64xf32>
    %1403 = arith.maximumf %1401, %1402 : vector<16x64xf32>
    %1404 = arith.truncf %1403 : vector<16x64xf32> to vector<16x64xbf16>
    %c1_382 = arith.constant 1 : index
    %c0_383 = arith.constant 0 : index
    %c0_384 = arith.constant 0 : index
    %1405 = vector.load %arg14[%c1_382, %c0_383, %c0_384] : memref<2x64x32xbf16, #tpu.memory_space<vmem>>, vector<1x64x32xbf16>
    %1406 = vector.shape_cast %1405 : vector<1x64x32xbf16> to vector<64x32xbf16>
    %cst_385 = arith.constant dense<0.000000e+00> : vector<16x32xf32>
    %1407 = tpu.matmul %1404, %1406, %cst_385 {dimension_numbers = #tpu.dot_dimension_numbers<[1], [0], [0], [1], [0, 0, 1, 1], [], []>} : vector<16x64xbf16>, vector<64x32xbf16>, vector<16x32xf32> -> vector<16x32xf32>
    %c27 = arith.constant 27 : index
    %c0_386 = arith.constant 0 : index
    %1408 = vector.load %arg15[%c27, %c0_386] : memref<38x32xf32, #tpu.memory_space<vmem>>, vector<1x32xf32>
    %1409 = vector.broadcast %1408 : vector<1x32xf32> to vector<16x32xf32>
    %1410 = arith.addf %1407, %1409 : vector<16x32xf32>
    %1411 = arith.addf %1393, %1410 : vector<16x32xf32>
    %c31 = arith.constant 31 : index
    %c0_387 = arith.constant 0 : index
    %1412 = vector.load %arg15[%c31, %c0_387] : memref<38x32xf32, #tpu.memory_space<vmem>>, vector<1x32xf32>
    %c35 = arith.constant 35 : index
    %c0_388 = arith.constant 0 : index
    %1413 = vector.load %arg15[%c35, %c0_388] : memref<38x32xf32, #tpu.memory_space<vmem>>, vector<1x32xf32>
    %cst_389 = arith.constant dense<0.000000e+00> : vector<16xf32>
    %1414 = vector.multi_reduction <add>, %1411, %cst_389 [1] : vector<16x32xf32> to vector<16xf32>
    %1415 = vector.shape_cast %1414 : vector<16xf32> to vector<16x1xf32>
    %cst_390 = arith.constant 3.200000e+01 : f32
    %1416 = vector.broadcast %cst_390 : f32 to vector<16x1xf32>
    %1417 = arith.divf %1415, %1416 : vector<16x1xf32>
    %1418 = vector.broadcast %1417 : vector<16x1xf32> to vector<16x32xf32>
    %1419 = arith.subf %1411, %1418 : vector<16x32xf32>
    %1420 = arith.mulf %1419, %1419 : vector<16x32xf32>
    %cst_391 = arith.constant dense<0.000000e+00> : vector<16xf32>
    %1421 = vector.multi_reduction <add>, %1420, %cst_391 [1] : vector<16x32xf32> to vector<16xf32>
    %1422 = vector.shape_cast %1421 : vector<16xf32> to vector<16x1xf32>
    %cst_392 = arith.constant 3.200000e+01 : f32
    %1423 = vector.broadcast %cst_392 : f32 to vector<16x1xf32>
    %1424 = arith.divf %1422, %1423 : vector<16x1xf32>
    %cst_393 = arith.constant 9.99999974E-6 : f32
    %1425 = vector.broadcast %cst_393 : f32 to vector<16x1xf32>
    %1426 = arith.addf %1424, %1425 : vector<16x1xf32>
    %1427 = math.rsqrt %1426 : vector<16x1xf32>
    %1428 = vector.broadcast %1427 : vector<16x1xf32> to vector<16x32xf32>
    %1429 = arith.mulf %1419, %1428 : vector<16x32xf32>
    %1430 = vector.broadcast %1412 : vector<1x32xf32> to vector<16x32xf32>
    %1431 = arith.mulf %1429, %1430 : vector<16x32xf32>
    %1432 = vector.broadcast %1413 : vector<1x32xf32> to vector<16x32xf32>
    %1433 = arith.addf %1431, %1432 : vector<16x32xf32>
    %c36 = arith.constant 36 : index
    %c0_394 = arith.constant 0 : index
    %1434 = vector.load %arg15[%c36, %c0_394] : memref<38x32xf32, #tpu.memory_space<vmem>>, vector<1x32xf32>
    %c37 = arith.constant 37 : index
    %c0_395 = arith.constant 0 : index
    %1435 = vector.load %arg15[%c37, %c0_395] : memref<38x32xf32, #tpu.memory_space<vmem>>, vector<1x32xf32>
    %cst_396 = arith.constant dense<0.000000e+00> : vector<16xf32>
    %1436 = vector.multi_reduction <add>, %1433, %cst_396 [1] : vector<16x32xf32> to vector<16xf32>
    %1437 = vector.shape_cast %1436 : vector<16xf32> to vector<16x1xf32>
    %cst_397 = arith.constant 3.200000e+01 : f32
    %1438 = vector.broadcast %cst_397 : f32 to vector<16x1xf32>
    %1439 = arith.divf %1437, %1438 : vector<16x1xf32>
    %1440 = vector.broadcast %1439 : vector<16x1xf32> to vector<16x32xf32>
    %1441 = arith.subf %1433, %1440 : vector<16x32xf32>
    %1442 = arith.mulf %1441, %1441 : vector<16x32xf32>
    %cst_398 = arith.constant dense<0.000000e+00> : vector<16xf32>
    %1443 = vector.multi_reduction <add>, %1442, %cst_398 [1] : vector<16x32xf32> to vector<16xf32>
    %1444 = vector.shape_cast %1443 : vector<16xf32> to vector<16x1xf32>
    %cst_399 = arith.constant 3.200000e+01 : f32
    %1445 = vector.broadcast %cst_399 : f32 to vector<16x1xf32>
    %1446 = arith.divf %1444, %1445 : vector<16x1xf32>
    %cst_400 = arith.constant 9.99999974E-6 : f32
    %1447 = vector.broadcast %cst_400 : f32 to vector<16x1xf32>
    %1448 = arith.addf %1446, %1447 : vector<16x1xf32>
    %1449 = math.rsqrt %1448 : vector<16x1xf32>
    %1450 = vector.broadcast %1449 : vector<16x1xf32> to vector<16x32xf32>
    %1451 = arith.mulf %1441, %1450 : vector<16x32xf32>
    %1452 = vector.broadcast %1434 : vector<1x32xf32> to vector<16x32xf32>
    %1453 = arith.mulf %1451, %1452 : vector<16x32xf32>
    %1454 = vector.broadcast %1435 : vector<1x32xf32> to vector<16x32xf32>
    %1455 = arith.addf %1453, %1454 : vector<16x32xf32>
    %cst_401 = arith.constant 0.000000e+00 : f32
    %1456 = vector.broadcast %cst_401 : f32 to vector<16x96xf32>
    %1457 = tpu.concatenate %1455, %1456 in 1 : vector<16x32xf32>, vector<16x96xf32> -> vector<16x128xf32>
    %c0_402 = arith.constant 0 : index
    %c0_403 = arith.constant 0 : index
    %c0_404 = arith.constant 0 : index
    %1458 = vector.load %arg16[%c0_402, %c0_403, %c0_404] : memref<1x16x128xf32, #tpu.memory_space<vmem>>, vector<1x16x128xf32>
    %1459 = vector.shape_cast %1458 : vector<1x16x128xf32> to vector<16x128xf32>
    %1460 = vector.shape_cast %1457 : vector<16x128xf32> to vector<1x16x128xf32>
    tpu.vector_store %arg16[%c0_402, %c0_403, %c0_404], %1460 {strides = array<i32>} : memref<1x16x128xf32, #tpu.memory_space<vmem>>, vector<1x16x128xf32>,
    return
  }
  func.func @transform_0(%arg0: i32) -> (i32, i32, i32) {
    %c0_i32 = arith.constant 0 : i32
    %c0_i32_0 = arith.constant 0 : i32
    %c0_i32_1 = arith.constant 0 : i32
    return %arg0, %c0_i32, %c0_i32_0 : i32, i32, i32
  }
  func.func @transform_1(%arg0: i32) -> (i32, i32, i32) {
    %c0_i32 = arith.constant 0 : i32
    %c0_i32_0 = arith.constant 0 : i32
    %c0_i32_1 = arith.constant 0 : i32
    return %arg0, %c0_i32, %c0_i32_0 : i32, i32, i32
  }
  func.func @transform_2(%arg0: i32) -> (i32, i32, i32) {
    %c0_i32 = arith.constant 0 : i32
    %c0_i32_0 = arith.constant 0 : i32
    %c0_i32_1 = arith.constant 0 : i32
    return %arg0, %c0_i32, %c0_i32_0 : i32, i32, i32
  }
  func.func @transform_3(%arg0: i32) -> (i32, i32, i32) {
    %c0_i32 = arith.constant 0 : i32
    %c0_i32_0 = arith.constant 0 : i32
    %c0_i32_1 = arith.constant 0 : i32
    return %arg0, %c0_i32, %c0_i32_0 : i32, i32, i32
  }
  func.func @transform_4(%arg0: i32) -> (i32, i32, i32) {
    %c0_i32 = arith.constant 0 : i32
    %c0_i32_0 = arith.constant 0 : i32
    %c0_i32_1 = arith.constant 0 : i32
    return %arg0, %c0_i32, %c0_i32_0 : i32, i32, i32
  }
  func.func @transform_5(%arg0: i32) -> (i32, i32, i32) {
    %c0_i32 = arith.constant 0 : i32
    %c0_i32_0 = arith.constant 0 : i32
    %c0_i32_1 = arith.constant 0 : i32
    %c0_i32_2 = arith.constant 0 : i32
    return %c0_i32, %c0_i32_0, %c0_i32_1 : i32, i32, i32
  }
  func.func @transform_6(%arg0: i32) -> (i32, i32, i32, i32) {
    %c0_i32 = arith.constant 0 : i32
    %c0_i32_0 = arith.constant 0 : i32
    %c0_i32_1 = arith.constant 0 : i32
    %c0_i32_2 = arith.constant 0 : i32
    %c0_i32_3 = arith.constant 0 : i32
    return %c0_i32, %c0_i32_0, %c0_i32_1, %c0_i32_2 : i32, i32, i32, i32
  }
  func.func @transform_7(%arg0: i32) -> (i32, i32) {
    %c0_i32 = arith.constant 0 : i32
    %c0_i32_0 = arith.constant 0 : i32
    %c0_i32_1 = arith.constant 0 : i32
    return %c0_i32, %c0_i32_0 : i32, i32
  }
  func.func @transform_8(%arg0: i32) -> (i32, i32) {
    %c0_i32 = arith.constant 0 : i32
    %c0_i32_0 = arith.constant 0 : i32
    %c0_i32_1 = arith.constant 0 : i32
    return %c0_i32, %c0_i32_0 : i32, i32
  }
  func.func @transform_9(%arg0: i32) -> (i32, i32) {
    %c0_i32 = arith.constant 0 : i32
    %c0_i32_0 = arith.constant 0 : i32
    %c0_i32_1 = arith.constant 0 : i32
    return %c0_i32, %c0_i32_0 : i32, i32
  }
  func.func @transform_10(%arg0: i32) -> (i32, i32) {
    %c0_i32 = arith.constant 0 : i32
    %c0_i32_0 = arith.constant 0 : i32
    %c0_i32_1 = arith.constant 0 : i32
    return %c0_i32, %c0_i32_0 : i32, i32
  }
  func.func @transform_11(%arg0: i32) -> (i32, i32, i32) {
    %c0_i32 = arith.constant 0 : i32
    %c0_i32_0 = arith.constant 0 : i32
    %c0_i32_1 = arith.constant 0 : i32
    %c0_i32_2 = arith.constant 0 : i32
    return %c0_i32, %c0_i32_0, %c0_i32_1 : i32, i32, i32
  }
  func.func @transform_12(%arg0: i32) -> (i32, i32, i32) {
    %c0_i32 = arith.constant 0 : i32
    %c0_i32_0 = arith.constant 0 : i32
    %c0_i32_1 = arith.constant 0 : i32
    %c0_i32_2 = arith.constant 0 : i32
    return %c0_i32, %c0_i32_0, %c0_i32_1 : i32, i32, i32
  }
  func.func @transform_13(%arg0: i32) -> (i32, i32, i32) {
    %c0_i32 = arith.constant 0 : i32
    %c0_i32_0 = arith.constant 0 : i32
    %c0_i32_1 = arith.constant 0 : i32
    %c0_i32_2 = arith.constant 0 : i32
    return %c0_i32, %c0_i32_0, %c0_i32_1 : i32, i32, i32
  }
  func.func @transform_14(%arg0: i32) -> (i32, i32) {
    %c0_i32 = arith.constant 0 : i32
    %c0_i32_0 = arith.constant 0 : i32
    %c0_i32_1 = arith.constant 0 : i32
    return %c0_i32, %c0_i32_0 : i32, i32
  }
  func.func @transform_15(%arg0: i32) -> (i32, i32, i32) {
    %c0_i32 = arith.constant 0 : i32
    %c0_i32_0 = arith.constant 0 : i32
    %c0_i32_1 = arith.constant 0 : i32
    return %arg0, %c0_i32, %c0_i32_0 : i32, i32, i32
  }
}

</mosaic_0001>

<bundles_post_ra>
// kernel: _lambda_.1
= control target key start
LH: loop header
LB: loop body
LE: loop exit
PB: predicated region body
PF: predicated region fallthrough
CT: control target
= control target key end

     0   :  { %v8437_v1 = vmov 0   ;;  %vm98_vm0 = vcmask 261120   ;;  %s8438_s18 = smov 32   ;;  %v8439_v61 = vmov 0.0   ;;  %vm8440_vm1 = vmmov 0   ;;  %s8443_s23 = smov 80   ;;  %s10026_s7 = inlined_call_operand.vmem [shape: bf16[32,256], index: 7, kind: input, shape index: {}]   ;;  %s10027_s1 = inlined_call_operand.vmem [shape: f32[1,16,32], index: 1, kind: input, shape index: {}]   ;;  %s10028_s8 = inlined_call_operand.vmem [shape: bf16[32,320], index: 8, kind: input, shape index: {}]   ;;  %s10029_s2 = inlined_call_operand.vmem [shape: f32[1,32,32], index: 2, kind: input, shape index: {}]   ;;  %s10030_s9 = inlined_call_operand.vmem [shape: bf16[32,64], index: 9, kind: input, shape index: {}]   ;;  %s10031_s4 = inlined_call_operand.vmem [shape: f32[1,32,32], index: 4, kind: input, shape index: {}]   ;;  %s10032_s5 = inlined_call_operand.vmem [shape: bf16[2,32,192], index: 5, kind: input, shape index: {}]   ;;  %s10033_s14 = inlined_call_operand.vmem [shape: f32[38,32], index: 14, kind: input, shape index: {}]   ;;  %s10034_s0 = inlined_call_operand.vmem [shape: f32[1,16,32], index: 0, kind: input, shape index: {}]   ;;  %s10035_s10 = inlined_call_operand.vmem [shape: bf16[32,256], index: 10, kind: input, shape index: {}]   ;;  %s10036_s3 = inlined_call_operand.vmem [shape: f32[1,32,32], index: 3, kind: input, shape index: {}]   ;;  %s10037_s6 = inlined_call_operand.vmem [shape: bf16[2,2,32,32], index: 6, kind: input, shape index: {}]   ;;  %s10038_s11 = inlined_call_operand.vmem [shape: bf16[2,32,64], index: 11, kind: input, shape index: {}]   ;;  %s10039_s13 = inlined_call_operand.vmem [shape: bf16[2,64,32], index: 13, kind: input, shape index: {}]   ;;  %s10040_s12 = inlined_call_operand.vmem [shape: f32[2,1,64], index: 12, kind: input, shape index: {}]   ;;  %s10041_s15 = inlined_call_operand.vmem [shape: f32[1,16,128], index: 15, kind: output, shape index: {}]  }
   0x1   :  { %v8155_v0 = vld [vmem:[%s10026_s7 + $0x4] ss:$8 sps:$4 sm:$0xff]   ;;  %134 = vmatprep.mubr.bf16.mxu0 %v8437_v1  ;;  %223 = vmatprep.mubr.bf16.mxu1 %v8437_v1  ;;  %v8157_v2 = vld [vmem:[%s10026_s7] ss:$8 sps:$4 sm:$0xff]   ;;  %v8158_v3 = vld [vmem:[%s10026_s7 + $0x14] ss:$8 sps:$4 sm:$0xff]  }
   0x2   :  { %102 = vmatprep.subr.bf16.mxu0 %v8155_v0  ;;  %v8160_v4 = vld [vmem:[%s10026_s7 + $0x10] ss:$8 sps:$4 sm:$0xff]   ;;  %v53_v5 = vld [vmem:[%s10027_s1] sm:$0xff]  ;;  %v54_v6 = vld [vmem:[%s10027_s1 + $0x8] sm:$0xff]  ;;  %s8441_s1 = smov 88   ;;  %vm545_vm2 = vcmask 64512  }
   0x3   :  { %103 = vmatpush1.bf16.msra.mxu0 %v8157_v2  ;;  %v8161_v7 = vld [vmem:[%s10028_s8 + $0x8] ss:$12 sps:$4 sm:$0xff]   ;;  %v56_v8 = vld [vmem:[%s10029_s2] sm:$0xff]  ;;  %v55_v10 = vpack.c.bf16 %v54_v6, %v53_v5  ;;  %v59_v14 = vld [vmem:[%s10029_s2 + $0x18] sm:$0xff]  ;;  %s8445_s24 = smov 96   ;;  %s8446_s25 = smov 112  }
   0x4   :  { %104 = vmatprep.subr.bf16.mxu0 %v8158_v3  ;;  %v57_v9 = vld [vmem:[%s10029_s2 + $0x8] sm:$0xff]  ;;  %v58_v13 = vld [vmem:[%s10029_s2 + $0x10] sm:$0xff]  ;;  %v8163_v15 = vld [vmem:[%s10030_s9] sm:$0xff]   ;;  %s8447_s26 = smov 104   ;;  %vm675_vm3 = vcmask 1043456   ;;  %vm1626_vm4 = vcmask 130048  }
   0x5   :  { %v60_v11 = vpack.c.bf16 %v57_v9, %v56_v8  ;;  %v8162_v12 = vld [vmem:[%s10028_s8 + $0x20] ss:$12 sps:$4 sm:$0xff]   ;;  %v61_v19 = vpack.c.bf16 %v59_v14, %v58_v13  ;;  %v70_v22 = vld [vmem:[%s10031_s4 + $0x10] sm:$0xff]  ;;  %v71_v23 = vld [vmem:[%s10031_s4 + $0x18] sm:$0xff]  ;;  %vm3616_vm5 = vcmask 523264  }
   0x6   :  { %v68_v16 = vld [vmem:[%s10031_s4] sm:$0xff]  ;;  %v69_v17 = vld [vmem:[%s10031_s4 + $0x8] sm:$0xff]  ;;  %v73_v25 = vpack.c.bf16 %v71_v23, %v70_v22  ;;  %v8170_v27 = vld [vmem:[%s10032_s5 + $0x14] ss:$8 sps:$4 sm:$0xff]  }
   0x7   :  { %105 = vmatpush1.bf16.msra.mxu0 %v8160_v4  ;;  %v7054_v18 = vld [vmem:[%s10033_s14 + $0x1] ss:$0 sm:$0xff]  ;;  %v72_v20 = vpack.c.bf16 %v69_v17, %v68_v16  ;;  %v8164_v21 = vld [vmem:[%s10030_s9 + $0x8] sm:$0xff]   ;;  %v8168_v28 = vld [vmem:[%s10032_s5 + $0x10] ss:$8 sps:$4 sm:$0xff]   ;;  %s8444_s9 = smov 72  }
   0x8   :  { %7479 = vmatprep.subr.bf16.mxu0 %v8161_v7  ;;  %533 = vrot.lane.b32.xlu0 %v7054_v18, %s8438_s18  ;;  %v8167_v24 = vld [vmem:[%s10032_s5 + $0x4] ss:$8 sps:$4 sm:$0xff]   ;;  %v8165_v26 = vld [vmem:[%s10032_s5] ss:$8 sps:$4 sm:$0xff]   ;;  %v8182_v38 = vld [vmem:[%s10035_s10 + $0x14] ss:$8 sps:$4 sm:$0xff]  }
   0x9   :  { %v8610_v29 = vld [vmem:[%s10034_s0] sm:$0xff]  ;;  %v8615_v30 = vld [vmem:[%s10034_s0 + $0x8] sm:$0xff]  ;;  %v8180_v39 = vld [vmem:[%s10035_s10 + $0x10] ss:$8 sps:$4 sm:$0xff]   ;;  %s8442_s0 = smov 120  }
   0xa   :  { %7027 = vmatmul.mubr.msk.bf16.vlgmr.msra.gmra.mrb[0].mxu0 %vm98_vm0, %v55_v10  ;;  %v447_v31 = vpack.c.bf16 %v8615_v30, %v8610_v29  ;;  %v8171_v32 = vld [vmem:[%s10028_s8 + $0x4] ss:$12 sps:$4 sm:$0xff]   ;;  %v8173_v33 = vld [vmem:[%s10028_s8] ss:$12 sps:$4 sm:$0xff]   ;;  %v8174_v34 = vld [vmem:[%s10028_s8 + $0x1c] ss:$12 sps:$4 sm:$0xff]  }
   0xb   :  { %7480 = vmatpush3.bf16.msra.mxu0 %v8161_v7  ;;  %7483 = vmatprep.mubr.msk.bf16.mxu0 %vm98_vm0, %v60_v11  ;;  %v8176_v35 = vld [vmem:[%s10028_s8 + $0x18] ss:$12 sps:$4 sm:$0xff]   ;;  %v8177_v37 = vld [vmem:[%s10035_s10] ss:$8 sps:$4 sm:$0xff]   ;;  %v64_v53 = vld [vmem:[%s10036_s3 + $0x10] sm:$0xff]  ;;  %s8448_s8 = smov 64  }
   0xc   :  { %7481 = vmatprep.subr.bf16.mxu0 %v8162_v12  ;;  %191 = vmatprep.subr.bf16.mxu1 %v8171_v32  ;;  %v8179_v36 = vld [vmem:[%s10035_s10 + $0x4] ss:$8 sps:$4 sm:$0xff]   ;;  %v65_v54 = vld [vmem:[%s10036_s3 + $0x18] sm:$0xff]  ;;  %v7053_v6 = vld [vmem:[%s10033_s14] ss:$0 sm:$0xff] }
   0xd   :  { %192 = vmatpush1.bf16.msra.mxu1 %v8173_v33  ;;  %v62_v40 = vld [vmem:[%s10036_s3] sm:$0xff]  ;;  %v63_v41 = vld [vmem:[%s10036_s3 + $0x8] sm:$0xff]  ;;  %v67_v55 = vpack.c.bf16 %v65_v54, %v64_v53 }
   0xe   :  { %193 = vmatprep.subr.bf16.mxu1 %v8174_v34  ;;  %v66_v42 = vpack.c.bf16 %v63_v41, %v62_v40  ;;  %v7106_v56 = vld [vmem:[%s10033_s14 + $0x7] ss:$0 sm:$0xff]  ;;  %v7078_v18 = vld [vmem:[%s10033_s14 + $0x4] ss:$0 sm:$0xff] }
   0xf   :  { %7482 = vmatpush3.bf16.msra.mxu0 %v8162_v12 }
  0x10   :  { %7487 = vmatprep.subr.bf16.mxu0 %v8163_v15 }
  0x11   :  { %194 = vmatpush1.bf16.msra.mxu1 %v8176_v35 }
  0x12   :  { %7484 = vmatmul.mubr.msk.bf16.vlgmr.msra.gmra.mrb[4].mxu0 %vm98_vm0, %v61_v19  ;;  %394 = vmatprep.subr.bf16.mxu1 %v8179_v36 }
  0x13   :  { %7488 = vmatpush3.bf16.msra.mxu0 %v8163_v15  ;;  %7491 = vmatprep.mubr.msk.bf16.mxu0 %vm98_vm0, %v72_v20 }
  0x14   :  { %7489 = vmatprep.subr.bf16.mxu0 %v8164_v21  ;;  %7034 = vmatmul.mubr.msk.bf16.vlgmr.msra.gmra.mrb[0].mxu1 %vm98_vm0, %v60_v11 }
  0x15   :  { %233 = vmatprep.mubr.bf16.mxu1 %v8437_v1  ;;  %395 = vmatpush1.bf16.msra.mxu1 %v8177_v37 }
  0x16   :  { %396 = vmatprep.subr.bf16.mxu1 %v8182_v38 }
  0x17   :  { %7490 = vmatpush3.bf16.msra.mxu0 %v8164_v21 }
  0x18   :  { %475 = vmatprep.subr.bf16.mxu0 %v8167_v24 }
  0x19   :  { %397 = vmatpush1.bf16.msra.mxu1 %v8180_v39 }
  0x1a   :  { %7492 = vmatmul.mubr.msk.bf16.vlgmr.msra.gmra.mrb[8].mxu0 %vm98_vm0, %v73_v25  ;;  %7501 = vmatprep.subr.bf16.mxu1 %v8439_v61 }
  0x1b   :  { %476 = vmatpush1.bf16.msra.mxu0 %v8165_v26  ;;  %507 = vmatprep.mubr.bf16.mxu0 %v8437_v1 }
  0x1c   :  { %477 = vmatprep.subr.bf16.mxu0 %v8170_v27  ;;  %7035 = vmatmul.mubr.msk.bf16.gmra.mrb[4].mxu1 %vm98_vm0, %v61_v19 }
  0x1d   :  { %426 = vmatprep.mubr.bf16.mxu1 %v8437_v1 }
  0x1f   :  { %478 = vmatpush1.bf16.msra.mxu0 %v8168_v28 }
  0x20   :  { %7495 = vmatprep.subr.bf16.mxu0 %v8439_v61 }
  0x22   :  { %7052 = vmatmul.mubr.msk.bf16.vlgmr.msra.gmra.mrb[12].mxu0 %vm98_vm0, %v447_v31 }
  0x23   :  { %7497 = vmatprep.mubr.msk.bf16.mxu0 %vm8440_vm1, %v8439_v61 }
  0x24   :  { %7046 = vmatmul.mubr.msk.bf16.vlgmr.msra.gmra.mrb[8].mxu1 %vm98_vm0, %v66_v42 }
  0x25   :  { %436 = vmatprep.mubr.bf16.mxu1 %v8437_v1 }
  0x2c   :  { %7047 = vmatmul.mubr.msk.bf16.gmra.mrb[12].mxu1 %vm98_vm0, %v67_v55 }
  0x2d   :  { %7503 = vmatprep.mubr.msk.bf16.mxu1 %vm8440_vm1, %v8439_v61 }
  0x7a   :  { %v8703_v7 = vpop.permute.xlu0 %533 }
  0xdd   :  { %v8656_v43 = vpop.f32.mrb[0].mxu0 }
  0xde   :  { %v8658_v44 = vpop.f32.mrb[1].mxu0 }
  0xdf   :  { %v8660_v45 = vpop.f32.mrb[2].mxu0 }
  0xe0   :  { %v8662_v46 = vpop.f32.mrb[3].mxu0 }
  0xe5   :  { %v7485_v47 = vpop.f32.mrb[4].mxu0 }
  0xe6   :  { %v278_v48 = vpop.f32.mrb[5].mxu0 }
  0xe7   :  { %v7486_v49 = vpop.f32.mrb[6].mxu0  ;;  %v225_v19 = vpop.f32.mrb[0].mxu1 }
  0xe8   :  { %v8664_v50 = vpack.c.bf16 %v7486_v49, %v7485_v47  ;;  %v281_v51 = vpop.f32.mrb[7].mxu0  ;;  %v1571_v20 = vadd.f32 %v7078_v18, %v225_v19  ;;  %v8731_v21 = vpop.f32.mrb[1].mxu1 }
  0xe9   :  { %v8666_v52 = vpack.c.bf16 %v281_v51, %v278_v48  ;;  %v229_v22 = vpop.f32.mrb[2].mxu1 }
  0xea   :  { %v1572_v23 = vadd.f32 %v7078_v18, %v229_v22  ;;  %v8733_v24 = vpack.c.bf16 %v229_v22, %v225_v19  ;;  %v8735_v25 = vpop.f32.mrb[3].mxu1 }
  0xeb   :  { %v8739_v26 = vpack.c.bf16 %v8735_v25, %v8731_v21 }
  0xec   :  { %v8741_v27 = vpack.c.bf16 %v1572_v23, %v1571_v20 }
  0xed   :  { %v8678_v57 = vpop.f32.mrb[8].mxu0 }
  0xee   :  { %v2583_v58 = vadd.f32 %v8678_v57, %v7106_v56  ;;  %v8681_v59 = vpop.f32.mrb[9].mxu0 }
  0xef   :  { %v8683_v60 = vpop.f32.mrb[10].mxu0  ;;  %v2581_v0 = vadd.f32 %v7106_v56, %v8681_v59  ;;  %v235_v28 = vpop.f32.mrb[4].mxu1 }
  0xf0   :  { %v2584_v62 = vadd.f32 %v8683_v60, %v7106_v56  ;;  %v8688_v63 = vpop.f32.mrb[11].mxu0  ;;  %v1573_v31 = vadd.f32 %v7078_v18, %v235_v28  ;;  %v8743_v32 = vpop.f32.mrb[5].mxu1 }
  0xf1   :  { %v2582_v2 = vadd.f32 %v7106_v56, %v8688_v63  ;;  %v239_v33 = vpop.f32.mrb[6].mxu1 }
  0xf2   :  { %v8696_v3 = vpack.c.bf16 %v2584_v62, %v2583_v58  ;;  %v1574_v34 = vadd.f32 %v7078_v18, %v239_v33  ;;  %v8745_v35 = vpack.c.bf16 %v239_v33, %v235_v28  ;;  %v8747_v36 = vpop.f32.mrb[7].mxu1 }
  0xf3   :  { %v8698_v4 = vpack.c.bf16 %v2582_v2, %v2581_v0  ;;  %v8751_v37 = vpack.c.bf16 %v8747_v36, %v8743_v32 }
  0xf4   :  { %v8753_v38 = vpack.c.bf16 %v1574_v34, %v1573_v31 }
  0xf5   :  { %v509_v5 = vpop.f32.mrb[12].mxu0 }
  0xf6   :  { %v518_v8 = vadd.f32 %v509_v5, %v8656_v43  ;;  %v8706_v9 = vpop.f32.mrb[13].mxu0  ;;  %v8769_v19 = vpack.c.bf16 %v509_v5, %v509_v5 }
  0xf7   :  { %v8708_v10 = vpop.f32.mrb[14].mxu0  ;;  %v428_v39 = vpop.f32.mrb[8].mxu1 }
  0xf8   :  { %v525_v11 = vadd.f32 %v7053_v6, %v518_v8  ;;  %v536_v12 = vadd.f32 %v8703_v7, %v518_v8  ;;  %v8713_v13 = vadd.f32 %v8708_v10, %v8660_v45  ;;  %v8715_v14 = vpop.f32.mrb[15].mxu0  ;;  %v430_v40 = vpop.f32.mrb[9].mxu1 }
  0xf9   :  { %v432_v41 = vpop.f32.mrb[10].mxu1 }
  0xfa   :  { %v8717_v15 = vpack.c.bf16 %v525_v11, %v525_v11  ;;  %v8719_v16 = vpack.c.bf16 %v536_v12, %v536_v12  ;;  %v8722_v17 = vadd.f32 %v7053_v6, %v8713_v13  ;;  %v8755_v42 = vpack.c.bf16 %v432_v41, %v428_v39  ;;  %v434_v47 = vpop.f32.mrb[11].mxu1 }
  0xfb   :  { %v8757_v48 = vpack.c.bf16 %v434_v47, %v430_v40 }
  0xfc   :  { %608 = vrot.lane.b32.xlu0 %v8719_v16, %s8441_s1  ;;  %606 = vrot.lane.b32.xlu1 %v8717_v15, %s8442_s0 }
  0xff   :  { %v438_v54 = vpop.f32.mrb[12].mxu1 }
 0x100   :  { %v440_v55 = vpop.f32.mrb[13].mxu1 }
 0x101   :  { %v442_v56 = vpop.f32.mrb[14].mxu1 }
 0x102   :  { %v8764_v58 = vpack.c.bf16 %v442_v56, %v438_v54  ;;  %v444_v62 = vpop.f32.mrb[15].mxu1 }
 0x103   :  { %v8766_v0 = vpack.c.bf16 %v444_v62, %v440_v55 }
 0x16e   :  { %v609_v49 = vpop.permute.xlu0 %608  ;;  %v607_v53 = vpop.permute.xlu1 %606 }
 0x16f   :  { %v614_v51 = vsel %vm545_vm2, %v609_v49, 0 }
 0x170   :  { %7502 = vmatpush3.bf16.xpose.msra.mxu1 %v614_v51 }
 0x171   :  { %7513 = vmatprep.subr.bf16.mxu1 %v8439_v61 }
 0x177   :  { %7504 = vmatmul.mubr.msk.bf16.vlgmr.msra.gmra.mrb[16].mxu1 %vm545_vm2, %v607_v53 }
 0x178   :  { %7515 = vmatprep.mubr.msk.bf16.mxu1 %vm8440_vm1, %v8439_v61 }
 0x24a   :  { %v650_v2 = vpop.f32.mrb[16].mxu1 }
 0x24b   :  { %v656_v6 = vmul.f32 0.35355338, %v650_v2  ;;  %v7505_v8 = vpop.f32.mrb[17].mxu1 }
 0x24c   :  { %v653_v11 = vpop.f32.mrb[18].mxu1 }
 0x24d   :  { %v7506_v12 = vpop.f32.mrb[19].mxu1  ;;  %v657_v18 = vsel %vm545_vm2, %v656_v6, -inf }
 0x24e   :  { %658 = vmax.xlane.f32.xlu1 %v657_v18 }
 0x25f   :  { %670 = vrot.lane.b32.xlu1 %v8769_v19, %s8438_s18 }
 0x263   :  { %770 = vrot.lane.b32.xlu1 %v8719_v16, %s8443_s23 }
 0x267   :  { %880 = vrot.lane.b32.xlu1 %v8719_v16, %s8444_s9 }
 0x2db   :  { %v659_v20 = vpop.xlane.xlu1 %658 }
 0x2dc   :  { %v660_v22 = vsub.f32 %v656_v6, %v659_v20 }
 0x2de   :  { %v661_v23 = vmul.f32 1.442695, %v660_v22 }
 0x2df   :  { %v671_v39 = vpop.permute.xlu1 %670 }
 0x2e0   :  { %8209 = vpow2.f32 %v661_v23 }
 0x2e3   :  { %v771_v47 = vpop.permute.xlu1 %770 }
 0x2e4   :  { %v776_v51 = vsel %vm545_vm2, %v771_v47, 0 }
 0x2ea   :  { %v8210_v28 = vpop.eup %8209 }
 0x2eb   :  { %v663_v31 = vsel %vm545_vm2, %v8210_v28, 0.0 }
 0x2ec   :  { %664 = vadd.xlane.f32.xlu0 %v663_v31 }
 0x302   :  { %543 = vrot.lane.b32.xlu0 %v8719_v16, %s8445_s24  ;;  %v677_v16 = vsel %vm675_vm3, %v671_v39, 0 }
 0x306   :  { %768 = vrot.lane.b32.xlu0 %v8717_v15, %s8446_s25 }
 0x30a   :  { %878 = vrot.lane.b32.xlu0 %v8717_v15, %s8447_s26 }
 0x379   :  { %v665_v5 = vpop.xlane.xlu0 %664 }
 0x37a   :  { %8211 = vrcp.f32 %v665_v5 }
 0x37d   :  { %v544_v33 = vpop.permute.xlu0 %543 }
 0x37e   :  { %v550_v34 = vsel %vm545_vm2, %v544_v33, 0 }
 0x37f   :  { %7496 = vmatpush3.bf16.xpose.msra.mxu0 %v550_v34 }
 0x380   :  { %7507 = vmatprep.subr.bf16.mxu0 %v8439_v61 }
 0x381   :  { %v769_v53 = vpop.permute.xlu0 %768 }
 0x384   :  { %v8212_v40 = vpop.eup %8211 }
 0x385   :  { %v667_v41 = vmul.f32 %v8212_v40, %v8210_v28  ;;  %v879_v55 = vpop.permute.xlu0 %878 }
 0x386   :  { %7498 = vmatmul.mubr.msk.bf16.vlgmr.msra.gmra.mrb[16].mxu0 %vm545_vm2, %v8717_v15  ;;  %v881_v15 = vpop.permute.xlu1 %880 }
 0x387   :  { %7508 = vmatpush3.bf16.msra.mxu0 %v677_v16  ;;  %7509 = vmatprep.mubr.msk.bf16.mxu0 %vm8440_vm1, %v8439_v61  ;;  %v668_v49 = vpack.c.bf16 %v667_v41, %v667_v41  ;;  %v886_v54 = vsel %vm545_vm2, %v881_v15, 0 }
 0x388   :  { %7519 = vmatprep.subr.bf16.mxu0 %v8439_v61 }
 0x38e   :  { %7510 = vmatmul.mubr.msk.bf16.vlgmr.msra.gmra.mrb[20].mxu0 %vm545_vm2, %v668_v49 }
 0x38f   :  { %7521 = vmatprep.mubr.msk.bf16.mxu0 %vm8440_vm1, %v8439_v61 }
 0x390   :  { %7520 = vmatpush3.bf16.xpose.msra.mxu0 %v776_v51 }
 0x391   :  { %7531 = vmatprep.subr.bf16.mxu0 %v8439_v61 }
 0x397   :  { %7522 = vmatmul.mubr.msk.bf16.vlgmr.msra.gmra.mrb[24].mxu0 %vm545_vm2, %v769_v53 }
 0x398   :  { %7532 = vmatpush3.bf16.xpose.msra.mxu0 %v886_v54  ;;  %7533 = vmatprep.mubr.msk.bf16.mxu0 %vm8440_vm1, %v8439_v61 }
 0x399   :  { %7543 = vmatprep.subr.bf16.mxu0 %v8439_v61 }
 0x39f   :  { %7534 = vmatmul.mubr.msk.bf16.vlgmr.msra.gmra.mrb[28].mxu0 %vm545_vm2, %v879_v55 }
 0x3a0   :  { %7545 = vmatprep.mubr.msk.bf16.mxu0 %vm8440_vm1, %v8439_v61 }
 0x459   :  { %v586_v56 = vpop.f32.mrb[16].mxu0 }
 0x45a   :  { %v592_v62 = vmul.f32 0.35355338, %v586_v56  ;;  %v7499_v2 = vpop.f32.mrb[17].mxu0 }
 0x45b   :  { %v589_v6 = vpop.f32.mrb[18].mxu0 }
 0x45c   :  { %v7500_v8 = vpop.f32.mrb[19].mxu0  ;;  %v593_v11 = vsel %vm545_vm2, %v592_v62, -inf }
 0x45d   :  { %594 = vmax.xlane.f32.xlu1 %v593_v11  ;;  %v767_v11 = vpack.c.bf16 %v8706_v9, %v8706_v9 }
 0x461   :  { %v8806_v12 = vpop.f32.mrb[20].mxu0 }
 0x462   :  { %v7511_v18 = vpop.f32.mrb[21].mxu0 }
 0x463   :  { %v716_v20 = vpop.f32.mrb[22].mxu0 }
 0x464   :  { %v7512_v22 = vpop.f32.mrb[23].mxu0 }
 0x46a   :  { %v812_v23 = vpop.f32.mrb[24].mxu0 }
 0x46b   :  { %v818_v28 = vmul.f32 0.35355338, %v812_v23  ;;  %v7523_v31 = vpop.f32.mrb[25].mxu0  ;;  %v8819_v23 = vpack.c.bf16 %v8722_v17, %v8722_v17 }
 0x46c   :  { %v815_v5 = vpop.f32.mrb[26].mxu0  ;;  %v537_v31 = vadd.f32 %v8703_v7, %v8713_v13  ;;  %v835_v7 = vsel %vm675_vm3, %v767_v11, 0 }
 0x46d   :  { %v7524_v33 = vpop.f32.mrb[27].mxu0  ;;  %v819_v34 = vsel %vm545_vm2, %v818_v28, -inf }
 0x46e   :  { %820 = vmax.xlane.f32.xlu0 %v819_v34  ;;  %v8826_v5 = vpack.c.bf16 %v537_v31, %v537_v31 }
 0x472   :  { %v922_v39 = vpop.f32.mrb[28].mxu0 }
 0x473   :  { %v928_v40 = vmul.f32 0.35355338, %v922_v39  ;;  %v7535_v16 = vpop.f32.mrb[29].mxu0 }
 0x474   :  { %v925_v41 = vpop.f32.mrb[30].mxu0 }
 0x475   :  { %v7536_v47 = vpop.f32.mrb[31].mxu0  ;;  %v929_v49 = vsel %vm545_vm2, %v928_v40, -inf }
 0x476   :  { %930 = vmax.xlane.f32.xlu0 %v929_v49 }
 0x4ea   :  { %v595_v51 = vpop.xlane.xlu1 %594 }
 0x4eb   :  { %v596_v15 = vsub.f32 %v592_v62, %v595_v51 }
 0x4ed   :  { %v597_v53 = vmul.f32 1.442695, %v596_v15 }
 0x4ef   :  { %8213 = vpow2.f32 %v597_v53 }
 0x4f9   :  { %v8214_v54 = vpop.eup %8213 }
 0x4fa   :  { %v599_v55 = vsel %vm545_vm2, %v8214_v54, 0.0 }
 0x4fb   :  { %600 = vadd.xlane.f32.xlu1 %v599_v55  ;;  %v821_v56 = vpop.xlane.xlu0 %820 }
 0x4fc   :  { %v822_v2 = vsub.f32 %v818_v28, %v821_v56 }
 0x4fe   :  { %v823_v6 = vmul.f32 1.442695, %v822_v2 }
 0x500   :  { %8215 = vpow2.f32 %v823_v6 }
 0x503   :  { %v931_v62 = vpop.xlane.xlu0 %930 }
 0x504   :  { %v932_v20 = vsub.f32 %v928_v40, %v931_v62 }
 0x506   :  { %v933_v22 = vmul.f32 1.442695, %v932_v20 }
 0x508   :  { %8217 = vpow2.f32 %v933_v22 }
 0x50a   :  { %v8216_v8 = vpop.eup %8215 }
 0x50b   :  { %v825_v18 = vsel %vm545_vm2, %v8216_v8, 0.0 }
 0x50c   :  { %942 = vrot.lane.b32.xlu1 %v767_v11, %s8445_s24  ;;  %826 = vadd.xlane.f32.xlu0 %v825_v18 }
 0x512   :  { %v8218_v9 = vpop.eup %8217 }
 0x513   :  { %v935_v28 = vsel %vm545_vm2, %v8218_v9, 0.0 }
 0x522   :  { %719 = vrot.lane.b32.xlu0 %v8769_v19, %s8448_s8 }
 0x526   :  { %1057 = vrot.lane.b32.xlu0 %v8819_v23, %s8442_s0 }
 0x530   :  { %936 = vadd.xlane.f32.xlu1 %v935_v28 }
 0x541   :  { %1059 = vrot.lane.b32.xlu1 %v8826_v5, %s8441_s1 }
 0x588   :  { %v601_v19 = vpop.xlane.xlu1 %600 }
 0x589   :  { %8219 = vrcp.f32 %v601_v19 }
 0x58c   :  { %v943_v47 = vpop.permute.xlu1 %942 }
 0x58d   :  { %v948_v51 = vsel %vm675_vm3, %v943_v47, 0 }
 0x593   :  { %v8220_v33 = vpop.eup %8219 }
 0x594   :  { %v603_v34 = vmul.f32 %v8220_v33, %v8214_v54 }
 0x596   :  { %v604_v16 = vpack.c.bf16 %v603_v34, %v603_v34 }
 0x599   :  { %v827_v17 = vpop.xlane.xlu0 %826 }
 0x59a   :  { %8221 = vrcp.f32 %v827_v17 }
 0x59d   :  { %v720_v39 = vpop.permute.xlu0 %719 }
 0x59e   :  { %v725_v40 = vsel %vm675_vm3, %v720_v39, 0 }
 0x59f   :  { %7514 = vmatpush3.bf16.msra.mxu1 %v725_v40 }
 0x5a0   :  { %7525 = vmatprep.subr.bf16.mxu1 %v8439_v61 }
 0x5a1   :  { %v1058_v6 = vpop.permute.xlu0 %1057 }
 0x5a2   :  { %7516 = vmatmul.mubr.msk.bf16.vlgmr.msra.gmra.mrb[20].mxu1 %vm545_vm2, %v604_v16 }
 0x5a3   :  { %7526 = vmatpush3.bf16.msra.mxu1 %v835_v7  ;;  %7527 = vmatprep.mubr.msk.bf16.mxu1 %vm8440_vm1, %v8439_v61 }
 0x5a4   :  { %v8222_v13 = vpop.eup %8221  ;;  %7537 = vmatprep.subr.bf16.mxu1 %v8439_v61 }
 0x5a5   :  { %v829_v41 = vmul.f32 %v8222_v13, %v8216_v8 }
 0x5a7   :  { %v830_v49 = vpack.c.bf16 %v829_v41, %v829_v41 }
 0x5aa   :  { %7528 = vmatmul.mubr.msk.bf16.vlgmr.msra.gmra.mrb[24].mxu1 %vm545_vm2, %v830_v49  ;;  %v8856_v49 = vpack.c.bf16 %v8708_v10, %v8708_v10 }
 0x5ab   :  { %7538 = vmatpush3.bf16.msra.mxu1 %v948_v51  ;;  %7539 = vmatprep.mubr.msk.bf16.mxu1 %vm8440_vm1, %v8439_v61 }
 0x5ac   :  { %7549 = vmatprep.subr.bf16.mxu1 %v8439_v61 }
 0x5bd   :  { %v937_v15 = vpop.xlane.xlu1 %936 }
 0x5be   :  { %8223 = vrcp.f32 %v937_v15 }
 0x5c1   :  { %v1060_v55 = vpop.permute.xlu1 %1059 }
 0x5c2   :  { %v1065_v2 = vsel %vm545_vm2, %v1060_v55, 0 }
 0x5c8   :  { %v8224_v53 = vpop.eup %8223 }
 0x5c9   :  { %v939_v54 = vmul.f32 %v8224_v53, %v8218_v9 }
 0x5cb   :  { %v940_v56 = vpack.c.bf16 %v939_v54, %v939_v54 }
 0x5cd   :  { %7540 = vmatmul.mubr.msk.bf16.vlgmr.msra.gmra.mrb[28].mxu1 %vm545_vm2, %v940_v56 }
 0x5ce   :  { %7550 = vmatpush3.bf16.xpose.msra.mxu1 %v1065_v2  ;;  %7551 = vmatprep.mubr.msk.bf16.mxu1 %vm8440_vm1, %v8439_v61 }
 0x5cf   :  { %7561 = vmatprep.subr.bf16.mxu1 %v8439_v61 }
 0x5d5   :  { %7552 = vmatmul.mubr.msk.bf16.vlgmr.msra.gmra.mrb[32].mxu1 %vm545_vm2, %v1058_v6 }
 0x5d6   :  { %7563 = vmatprep.mubr.msk.bf16.mxu1 %vm8440_vm1, %v8439_v61 }
 0x675   :  { %v761_v8 = vpop.f32.mrb[20].mxu1 }
 0x676   :  { %v762_v11 = vadd.f32 %v761_v8, %v8806_v12  ;;  %v7517_v18 = vpop.f32.mrb[21].mxu1 }
 0x677   :  { %v764_v62 = vpop.f32.mrb[22].mxu1 }
 0x678   :  { %v7518_v20 = vpop.f32.mrb[23].mxu1 }
 0x67d   :  { %v871_v22 = vpop.f32.mrb[24].mxu1 }
 0x67e   :  { %v877_v9 = vadd.f32 %v871_v22, %v762_v11  ;;  %v7529_v28 = vpop.f32.mrb[25].mxu1 }
 0x67f   :  { %v874_v31 = vpop.f32.mrb[26].mxu1 }
 0x680   :  { %v7530_v19 = vpop.f32.mrb[27].mxu1 }
 0x6a0   :  { %v984_v33 = vpop.f32.mrb[28].mxu1 }
 0x6a1   :  { %v8851_v17 = vadd.f32 %v984_v33, %v877_v9  ;;  %v7541_v34 = vpop.f32.mrb[29].mxu1 }
 0x6a2   :  { %v987_v39 = vpop.f32.mrb[30].mxu1 }
 0x6a3   :  { %v7542_v40 = vpop.f32.mrb[31].mxu1 }
 0x6a8   :  { %v1101_v16 = vpop.f32.mrb[32].mxu1 }
 0x6a9   :  { %v1107_v7 = vmul.f32 0.35355338, %v1101_v16  ;;  %v7553_v13 = vpop.f32.mrb[33].mxu1 }
 0x6aa   :  { %v1104_v41 = vpop.f32.mrb[34].mxu1 }
 0x6ab   :  { %v7554_v47 = vpop.f32.mrb[35].mxu1  ;;  %v1108_v12 = vsel %vm545_vm2, %v1107_v7, -inf }
 0x6ac   :  { %1109 = vmax.xlane.f32.xlu1 %v1108_v12 }
 0x6bd   :  { %1121 = vrot.lane.b32.xlu1 %v8856_v49, %s8438_s18 }
 0x6c1   :  { %1220 = vrot.lane.b32.xlu1 %v8826_v5, %s8443_s23 }
 0x6c5   :  { %1330 = vrot.lane.b32.xlu1 %v8826_v5, %s8444_s9 }
 0x739   :  { %v1110_v51 = vpop.xlane.xlu1 %1109 }
 0x73a   :  { %v1111_v15 = vsub.f32 %v1107_v7, %v1110_v51 }
 0x73c   :  { %v1112_v53 = vmul.f32 1.442695, %v1111_v15 }
 0x73d   :  { %v1122_v6 = vpop.permute.xlu1 %1121 }
 0x73e   :  { %8225 = vpow2.f32 %v1112_v53  ;;  %v1127_v11 = vsel %vm675_vm3, %v1122_v6, 0 }
 0x741   :  { %v1221_v18 = vpop.permute.xlu1 %1220 }
 0x742   :  { %v1226_v20 = vsel %vm545_vm2, %v1221_v18, 0 }
 0x748   :  { %v8226_v54 = vpop.eup %8225 }
 0x749   :  { %v1114_v55 = vsel %vm545_vm2, %v8226_v54, 0.0 }
 0x74a   :  { %1115 = vadd.xlane.f32.xlu0 %v1114_v55 }
 0x760   :  { %995 = vrot.lane.b32.xlu0 %v8826_v5, %s8445_s24 }
 0x764   :  { %1218 = vrot.lane.b32.xlu0 %v8819_v23, %s8446_s25 }
 0x768   :  { %1328 = vrot.lane.b32.xlu0 %v8819_v23, %s8447_s26 }
 0x7d7   :  { %v1116_v10 = vpop.xlane.xlu0 %1115 }
 0x7d8   :  { %8227 = vrcp.f32 %v1116_v10 }
 0x7db   :  { %v996_v56 = vpop.permute.xlu0 %995 }
 0x7dc   :  { %v1001_v2 = vsel %vm545_vm2, %v996_v56, 0 }
 0x7dd   :  { %7544 = vmatpush3.bf16.xpose.msra.mxu0 %v1001_v2 }
 0x7de   :  { %7555 = vmatprep.subr.bf16.mxu0 %v8439_v61 }
 0x7df   :  { %v1219_v22 = vpop.permute.xlu0 %1218 }
 0x7e2   :  { %v8228_v8 = vpop.eup %8227 }
 0x7e3   :  { %v1118_v5 = vmul.f32 %v8228_v8, %v8226_v54  ;;  %v1329_v28 = vpop.permute.xlu0 %1328 }
 0x7e4   :  { %7546 = vmatmul.mubr.msk.bf16.vlgmr.msra.gmra.mrb[32].mxu0 %vm545_vm2, %v8819_v23  ;;  %v1331_v23 = vpop.permute.xlu1 %1330 }
 0x7e5   :  { %7556 = vmatpush3.bf16.msra.mxu0 %v1127_v11  ;;  %7557 = vmatprep.mubr.msk.bf16.mxu0 %vm8440_vm1, %v8439_v61  ;;  %v1119_v62 = vpack.c.bf16 %v1118_v5, %v1118_v5  ;;  %v1336_v9 = vsel %vm545_vm2, %v1331_v23, 0 }
 0x7e6   :  { %7567 = vmatprep.subr.bf16.mxu0 %v8439_v61 }
 0x7ec   :  { %7558 = vmatmul.mubr.msk.bf16.vlgmr.msra.gmra.mrb[36].mxu0 %vm545_vm2, %v1119_v62 }
 0x7ed   :  { %7569 = vmatprep.mubr.msk.bf16.mxu0 %vm8440_vm1, %v8439_v61 }
 0x7ee   :  { %7568 = vmatpush3.bf16.xpose.msra.mxu0 %v1226_v20 }
 0x7ef   :  { %7579 = vmatprep.subr.bf16.mxu0 %v8439_v61 }
 0x7f5   :  { %7570 = vmatmul.mubr.msk.bf16.vlgmr.msra.gmra.mrb[40].mxu0 %vm545_vm2, %v1219_v22 }
 0x7f6   :  { %7580 = vmatpush3.bf16.xpose.msra.mxu0 %v1336_v9  ;;  %7581 = vmatprep.mubr.msk.bf16.mxu0 %vm8440_vm1, %v8439_v61 }
 0x7f7   :  { %7591 = vmatprep.subr.bf16.mxu0 %v8439_v61 }
 0x7fd   :  { %7582 = vmatmul.mubr.msk.bf16.vlgmr.msra.gmra.mrb[44].mxu0 %vm545_vm2, %v1329_v28 }
 0x7fe   :  { %7595 = vmatprep.mubr.msk.bf16.mxu0 %vm8440_vm1, %v8439_v61 }
 0x8b7   :  { %v1037_v31 = vpop.f32.mrb[32].mxu0 }
 0x8b8   :  { %v1043_v19 = vmul.f32 0.35355338, %v1037_v31  ;;  %v7547_v33 = vpop.f32.mrb[33].mxu0 }
 0x8b9   :  { %v1040_v34 = vpop.f32.mrb[34].mxu0 }
 0x8ba   :  { %v7548_v39 = vpop.f32.mrb[35].mxu0  ;;  %v1044_v40 = vsel %vm545_vm2, %v1043_v19, -inf }
 0x8bb   :  { %1045 = vmax.xlane.f32.xlu1 %v1044_v40 }
 0x8bf   :  { %v8893_v16 = vpop.f32.mrb[36].mxu0 }
 0x8c0   :  { %v7559_v7 = vpop.f32.mrb[37].mxu0 }
 0x8c1   :  { %v1166_v13 = vpop.f32.mrb[38].mxu0  ;;  %v1217_v7 = vpack.c.bf16 %v8715_v14, %v8715_v14 }
 0x8c2   :  { %v7560_v41 = vpop.f32.mrb[39].mxu0  ;;  %v7071_v13 = vld [vmem:[%s10033_s14 + $0x2] ss:$0 sm:$0xff] }
 0x8c3   :  { %v1445_v41 = vadd.f32 %v7071_v13, %v8851_v17  ;;  %v1285_v17 = vsel %vm675_vm3, %v1217_v7, 0 }
 0x8c8   :  { %v1262_v47 = vpop.f32.mrb[40].mxu0 }
 0x8c9   :  { %v1268_v12 = vmul.f32 0.35355338, %v1262_v47  ;;  %v7571_v51 = vpop.f32.mrb[41].mxu0  ;;  %v1447_v47 = vadd.f32 %v1445_v41, %v8610_v29 }
 0x8ca   :  { %v1265_v15 = vpop.f32.mrb[42].mxu0 }
 0x8cb   :  { %v7572_v53 = vpop.f32.mrb[43].mxu0  ;;  %v1269_v54 = vsel %vm545_vm2, %v1268_v12, -inf }
 0x8cc   :  { %1270 = vmax.xlane.f32.xlu0 %v1269_v54 }
 0x8d0   :  { %v1372_v55 = vpop.f32.mrb[44].mxu0 }
 0x8d1   :  { %v1378_v10 = vmul.f32 0.35355338, %v1372_v55  ;;  %v7583_v56 = vpop.f32.mrb[45].mxu0 }
 0x8d2   :  { %v1375_v2 = vpop.f32.mrb[46].mxu0 }
 0x8d3   :  { %v7584_v6 = vpop.f32.mrb[47].mxu0  ;;  %v1379_v8 = vsel %vm545_vm2, %v1378_v10, -inf }
 0x8d4   :  { %1380 = vmax.xlane.f32.xlu0 %v1379_v8 }
 0x948   :  { %v1046_v11 = vpop.xlane.xlu1 %1045 }
 0x949   :  { %v1047_v5 = vsub.f32 %v1043_v19, %v1046_v11 }
 0x94b   :  { %v1048_v18 = vmul.f32 1.442695, %v1047_v5 }
 0x94d   :  { %8229 = vpow2.f32 %v1048_v18 }
 0x957   :  { %v8230_v62 = vpop.eup %8229 }
 0x958   :  { %v1050_v20 = vsel %vm545_vm2, %v8230_v62, 0.0 }
 0x959   :  { %1051 = vadd.xlane.f32.xlu1 %v1050_v20  ;;  %v1271_v23 = vpop.xlane.xlu0 %1270 }
 0x95a   :  { %v1272_v22 = vsub.f32 %v1268_v12, %v1271_v23  ;;  %v1451_v12 = vsel %vm98_vm0, %v1447_v47, 0.0 }
 0x95c   :  { %v1273_v9 = vmul.f32 1.442695, %v1272_v22 }
 0x95e   :  { %8231 = vpow2.f32 %v1273_v9 }
 0x961   :  { %v1381_v28 = vpop.xlane.xlu0 %1380 }
 0x962   :  { %v1382_v31 = vsub.f32 %v1378_v10, %v1381_v28 }
 0x964   :  { %v1383_v33 = vmul.f32 1.442695, %v1382_v31 }
 0x966   :  { %8233 = vpow2.f32 %v1383_v33 }
 0x968   :  { %v8232_v34 = vpop.eup %8231 }
 0x969   :  { %v1275_v39 = vsel %vm545_vm2, %v8232_v34, 0.0 }
 0x96a   :  { %1276 = vadd.xlane.f32.xlu0 %v1275_v39 }
 0x970   :  { %v8234_v40 = vpop.eup %8233 }
 0x971   :  { %v1385_v19 = vsel %vm545_vm2, %v8234_v40, 0.0 }
 0x972   :  { %1386 = vadd.xlane.f32.xlu1 %v1385_v19 }
 0x980   :  { %1169 = vrot.lane.b32.xlu0 %v8856_v49, %s8448_s8 }
 0x983   :  { %1392 = vrot.lane.b32.xlu1 %v1217_v7, %s8445_s24 }
 0x9a7   :  { %1452 = vadd.xlane.f32.xlu1 %v1451_v12 }
 0x9e6   :  { %v1052_v51 = vpop.xlane.xlu1 %1051 }
 0x9e7   :  { %8235 = vrcp.f32 %v1052_v51 }
 0x9f1   :  { %v8236_v15 = vpop.eup %8235 }
 0x9f2   :  { %v1054_v53 = vmul.f32 %v8236_v15, %v8230_v62  ;;  %v1583_v62 = vsel %vm545_vm2, %v8741_v27, 0 }
 0x9f4   :  { %v1055_v55 = vpack.c.bf16 %v1054_v53, %v1054_v53 }
 0x9f7   :  { %v1277_v49 = vpop.xlane.xlu0 %1276 }
 0x9f8   :  { %8237 = vrcp.f32 %v1277_v49 }
 0x9fb   :  { %v1170_v14 = vpop.permute.xlu0 %1169 }
 0x9fc   :  { %v1175_v54 = vsel %vm675_vm3, %v1170_v14, 0 }
 0x9fd   :  { %7562 = vmatpush3.bf16.msra.mxu1 %v1175_v54 }
 0x9fe   :  { %7573 = vmatprep.subr.bf16.mxu1 %v8439_v61 }
 0x9ff   :  { %v1387_v10 = vpop.xlane.xlu1 %1386 }
 0xa00   :  { %8239 = vrcp.f32 %v1387_v10  ;;  %7564 = vmatmul.mubr.msk.bf16.vlgmr.msra.gmra.mrb[36].mxu1 %vm545_vm2, %v1055_v55 }
 0xa01   :  { %7574 = vmatpush3.bf16.msra.mxu1 %v1285_v17  ;;  %7575 = vmatprep.mubr.msk.bf16.mxu1 %vm8440_vm1, %v8439_v61 }
 0xa02   :  { %v8238_v29 = vpop.eup %8237  ;;  %7585 = vmatprep.subr.bf16.mxu1 %v8439_v61 }
 0xa03   :  { %v1279_v56 = vmul.f32 %v8238_v29, %v8232_v34  ;;  %v1393_v2 = vpop.permute.xlu1 %1392 }
 0xa04   :  { %v1398_v8 = vsel %vm675_vm3, %v1393_v2, 0 }
 0xa05   :  { %v1280_v6 = vpack.c.bf16 %v1279_v56, %v1279_v56 }
 0xa08   :  { %7576 = vmatmul.mubr.msk.bf16.vlgmr.msra.gmra.mrb[40].mxu1 %vm545_vm2, %v1280_v6 }
 0xa09   :  { %7586 = vmatpush3.bf16.msra.mxu1 %v1398_v8  ;;  %7587 = vmatprep.mubr.msk.bf16.mxu1 %vm8440_vm1, %v8439_v61 }
 0xa0a   :  { %v8240_v11 = vpop.eup %8239  ;;  %7599 = vmatprep.subr.bf16.mxu1 %v8439_v61 }
 0xa0b   :  { %v1389_v5 = vmul.f32 %v8240_v11, %v8234_v40 }
 0xa0d   :  { %v1390_v18 = vpack.c.bf16 %v1389_v5, %v1389_v5 }
 0xa10   :  { %7588 = vmatmul.mubr.msk.bf16.vlgmr.msra.gmra.mrb[44].mxu1 %vm545_vm2, %v1390_v18 }
 0xa11   :  { %7601 = vmatprep.mubr.msk.bf16.mxu1 %vm8440_vm1, %v8439_v61 }
 0xa12   :  { %7600 = vmatpush3.bf16.xpose.msra.mxu1 %v1583_v62 }
 0xa13   :  { %7611 = vmatprep.subr.bf16.mxu1 %v8439_v61 }
 0xa34   :  { %v1453_v19 = vpop.xlane.xlu1 %1452 }
 0xa35   :  { %v1458_v7 = vmul.f32 0.03125, %v1453_v19 }
 0xa37   :  { %v1460_v49 = vsub.f32 %v1447_v47, %v1458_v7 }
 0xa39   :  { %v1462_v55 = vmul.f32 %v1460_v49, %v1460_v49 }
 0xa3b   :  { %v1464_v10 = vsel %vm98_vm0, %v1462_v55, 0.0 }
 0xad3   :  { %v1211_v20 = vpop.f32.mrb[36].mxu1 }
 0xad4   :  { %v1212_v23 = vadd.f32 %v1211_v20, %v8893_v16  ;;  %v7565_v22 = vpop.f32.mrb[37].mxu1 }
 0xad5   :  { %v1214_v9 = vpop.f32.mrb[38].mxu1  ;;  %v7072_v22 = vld [vmem:[%s10033_s14 + $0xa] ss:$0 sm:$0xff] }
 0xad6   :  { %v7566_v28 = vpop.f32.mrb[39].mxu1 }
 0xadb   :  { %v1321_v31 = vpop.f32.mrb[40].mxu1 }
 0xadc   :  { %v1327_v33 = vadd.f32 %v1321_v31, %v1212_v23  ;;  %v7577_v34 = vpop.f32.mrb[41].mxu1 }
 0xadd   :  { %v1324_v39 = vpop.f32.mrb[42].mxu1 }
 0xade   :  { %v7578_v40 = vpop.f32.mrb[43].mxu1 }
 0xae3   :  { %v1434_v41 = vpop.f32.mrb[44].mxu1 }
 0xae4   :  { %v1440_v12 = vadd.f32 %v1434_v41, %v1327_v33  ;;  %v7589_v51 = vpop.f32.mrb[45].mxu1  ;;  %v7073_v33 = vld [vmem:[%s10033_s14 + $0xe] ss:$0 sm:$0xff] }
 0xae5   :  { %v1437_v15 = vpop.f32.mrb[46].mxu1 }
 0xae6   :  { %v1446_v53 = vadd.f32 %v7071_v13, %v1440_v12  ;;  %v7590_v14 = vpop.f32.mrb[47].mxu1  ;;  %v8184_v13 = vld [vmem:[%s10037_s6 + $0x8] sm:$0xff]   ;;  %v8966_v15 = vld [vmem:[%s10033_s14 + $0x3] ss:$0 sm:$0xff] }
 0xae8   :  { %v1448_v54 = vadd.f32 %v1446_v53, %v8615_v30  ;;  %v8183_v30 = vld [vmem:[%s10037_s6] sm:$0xff]  }
 0xae9   :  { %7592 = vmatpush3.bf16.msra.mxu0 %v8183_v30 }
 0xaea   :  { %v1454_v16 = vsel %vm98_vm0, %v1448_v54, 0.0  ;;  %7593 = vmatprep.subr.bf16.mxu0 %v8439_v61 }
 0xaeb   :  { %1455 = vadd.xlane.f32.xlu0 %v1454_v16 }
 0xaed   :  { %7594 = vmatpush3.bf16.msra.mxu0 %v8184_v13 }
 0xaee   :  { %7605 = vmatprep.subr.bf16.mxu0 %v8439_v61 }
 0xaef   :  { %1465 = vadd.xlane.f32.xlu0 %v1464_v10 }
 0xb05   :  { %1509 = vrot.lane.b32.xlu0 %v8656_v43, %s8448_s8 }
 0xb78   :  { %v1456_v17 = vpop.xlane.xlu0 %1455 }
 0xb79   :  { %v1459_v29 = vmul.f32 0.03125, %v1456_v17 }
 0xb7b   :  { %v1461_v56 = vsub.f32 %v1448_v54, %v1459_v29 }
 0xb7c   :  { %v1466_v6 = vpop.xlane.xlu0 %1465 }
 0xb7d   :  { %v1463_v2 = vmul.f32 %v1461_v56, %v1461_v56  ;;  %v1470_v8 = vmul.f32 0.03125, %v1466_v6 }
 0xb7f   :  { %v1467_v47 = vsel %vm98_vm0, %v1463_v2, 0.0  ;;  %v1472_v11 = vadd.f32 1e-05, %v1470_v8 }
 0xb80   :  { %1468 = vadd.xlane.f32.xlu1 %v1467_v47  ;;  %v1510_v12 = vpop.permute.xlu0 %1509 }
 0xb81   :  { %8241 = vrsqrt.f32 %v1472_v11 }
 0xb8b   :  { %v8242_v20 = vpop.eup %8241 }
 0xb8c   :  { %v1476_v23 = vmul.f32 %v8242_v20, %v1460_v49 }
 0xb8e   :  { %v1482_v28 = vmul.f32 %v7072_v22, %v1476_v23 }
 0xb90   :  { %v8952_v39 = vadd.f32 %v7073_v33, %v1482_v28 }
 0xb91   :  { %1643 = vrot.lane.b32.xlu1 %v8741_v27, %s8442_s0 }
 0xc0d   :  { %v1469_v5 = vpop.xlane.xlu1 %1468 }
 0xc0e   :  { %v1471_v18 = vmul.f32 0.03125, %v1469_v5 }
 0xc10   :  { %v1473_v62 = vadd.f32 1e-05, %v1471_v18 }
 0xc11   :  { %v1644_v19 = vpop.permute.xlu1 %1643 }
 0xc12   :  { %8243 = vrsqrt.f32 %v1473_v62  ;;  %v1649_v41 = vsel %vm545_vm2, %v1644_v19, 0 }
 0xc1c   :  { %v8244_v9 = vpop.eup %8243 }
 0xc1d   :  { %v1477_v31 = vmul.f32 %v8244_v9, %v1461_v56 }
 0xc1f   :  { %v1483_v34 = vmul.f32 %v7072_v22, %v1477_v31 }
 0xc21   :  { %v8954_v40 = vadd.f32 %v7073_v33, %v1483_v34 }
 0xc23   :  { %v1490_v7 = vpack.c.bf16 %v8954_v40, %v8952_v39 }
 0xc25   :  { %7596 = vmatmul.mubr.msk.bf16.vlgmr.msra.gmra.mrb[48].mxu0 %vm98_vm0, %v1490_v7 }
 0xc26   :  { %7606 = vmatpush3.bf16.xpose.msra.mxu0 %v1649_v41  ;;  %7607 = vmatprep.mubr.msk.bf16.mxu0 %vm8440_vm1, %v8439_v61 }
 0xc27   :  { %7617 = vmatprep.subr.bf16.mxu0 %v8439_v61 }
 0xcf8   :  { %v1552_v51 = vpop.f32.mrb[48].mxu0 }
 0xcf9   :  { %v1553_v49 = vadd.f32 %v1552_v51, %v1510_v12  ;;  %v7597_v53 = vpop.f32.mrb[49].mxu0 }
 0xcfa   :  { %v8968_v14 = vpop.f32.mrb[50].mxu0  ;;  %v2022_v53 = vsel %vm545_vm2, %v8753_v38, 0 }
 0xcfb   :  { %v1564_v54 = vadd.f32 %v8966_v15, %v1553_v49  ;;  %v7598_v16 = vpop.f32.mrb[51].mxu0 }
 0xcfd   :  { %v1576_v55 = vpack.c.bf16 %v1564_v54, %v1564_v54 }
 0xcff   :  { %1640 = vrot.lane.b32.xlu1 %v1576_v55, %s8442_s0  ;;  %7602 = vmatmul.mubr.msk.bf16.vlgmr.msra.gmra.mrb[48].mxu1 %vm545_vm2, %v1576_v55 }
 0xd00   :  { %7613 = vmatprep.mubr.msk.bf16.mxu1 %vm8440_vm1, %v8439_v61 }
 0xd71   :  { %v1641_v10 = vpop.permute.xlu1 %1640 }
 0xd72   :  { %7608 = vmatmul.mubr.msk.bf16.vlgmr.msra.gmra.mrb[52].mxu0 %vm545_vm2, %v1641_v10 }
 0xd73   :  { %7619 = vmatprep.mubr.msk.bf16.mxu0 %vm8440_vm1, %v8439_v61 }
 0xdd2   :  { %v1619_v17 = vpop.f32.mrb[48].mxu1 }
 0xdd3   :  { %v7603_v29 = vpop.f32.mrb[49].mxu1  ;;  %v1625_v9 = vmul.f32 0.35355338, %v1619_v17 }
 0xdd4   :  { %v1622_v56 = vpop.f32.mrb[50].mxu1 }
 0xdd5   :  { %v7604_v2 = vpop.f32.mrb[51].mxu1  ;;  %v1627_v28 = vsel %vm1626_vm4, %v1625_v9, -inf }
 0xe45   :  { %v1685_v47 = vpop.f32.mrb[52].mxu0 }
 0xe46   :  { %v1691_v30 = vmul.f32 0.35355338, %v1685_v47  ;;  %v7609_v13 = vpop.f32.mrb[53].mxu0 }
 0xe47   :  { %v1688_v6 = vpop.f32.mrb[54].mxu0 }
 0xe48   :  { %v7610_v8 = vpop.f32.mrb[55].mxu0  ;;  %v1692_v11 = vsel %vm1626_vm4, %v1691_v30, -inf }
 0xe49   :  { %1693 = vmax.xlane.f32.xlu0 %v1692_v11 }
 0xe5f   :  { %1705 = vrot.lane.b32.xlu0 %v8733_v24, %s8448_s8 }
 0xe63   :  { %1797 = vrot.lane.b32.xlu0 %v1576_v55, %s8446_s25 }
 0xe67   :  { %1908 = vrot.lane.b32.xlu0 %v1576_v55, %s8447_s26 }
 0xed6   :  { %v1694_v5 = vpop.xlane.xlu0 %1693 }
 0xed7   :  { %v1695_v18 = vsub.f32 %v1691_v30, %v1694_v5 }
 0xed9   :  { %v1696_v62 = vmul.f32 1.442695, %v1695_v18 }
 0xeda   :  { %v1706_v20 = vpop.permute.xlu0 %1705 }
 0xedb   :  { %8245 = vpow2.f32 %v1696_v62  ;;  %7612 = vmatpush3.bf16.msra.mxu1 %v1706_v20 }
 0xedc   :  { %7623 = vmatprep.subr.bf16.mxu1 %v8439_v61 }
 0xede   :  { %v1798_v12 = vpop.permute.xlu0 %1797 }
 0xee2   :  { %v1909_v49 = vpop.permute.xlu0 %1908 }
 0xee5   :  { %v8246_v23 = vpop.eup %8245 }
 0xee6   :  { %v1698_v22 = vsel %vm1626_vm4, %v8246_v23, 0.0 }
 0xee7   :  { %1699 = vadd.xlane.f32.xlu1 %v1698_v22 }
 0xef8   :  { %1799 = vrot.lane.b32.xlu1 %v8741_v27, %s8446_s25 }
 0xefc   :  { %1910 = vrot.lane.b32.xlu1 %v8741_v27, %s8447_s26 }
 0xf20   :  { %1628 = vmax.xlane.f32.xlu1 %v1627_v28 }
 0xf31   :  { %1511 = vrot.lane.b32.xlu1 %v8660_v45, %s8448_s8 }
 0xf35   :  { %1860 = vrot.lane.b32.xlu1 %v8733_v24, %s8438_s18 }
 0xf39   :  { %2081 = vrot.lane.b32.xlu1 %v8753_v38, %s8442_s0 }
 0xf74   :  { %v1700_v31 = vpop.xlane.xlu1 %1699 }
 0xf75   :  { %8247 = vrcp.f32 %v1700_v31 }
 0xf78   :  { %v1800_v19 = vpop.permute.xlu1 %1799 }
 0xf79   :  { %v1805_v27 = vsel %vm545_vm2, %v1800_v19, 0 }
 0xf7c   :  { %v1911_v41 = vpop.permute.xlu1 %1910 }
 0xf7d   :  { %v1916_v51 = vsel %vm545_vm2, %v1911_v41, 0 }
 0xf7f   :  { %v8248_v33 = vpop.eup %8247 }
 0xf80   :  { %v1702_v34 = vmul.f32 %v8248_v33, %v8246_v23 }
 0xf82   :  { %v1703_v7 = vpack.c.bf16 %v1702_v34, %v1702_v34 }
 0xf84   :  { %7614 = vmatmul.mubr.msk.bf16.vlgmr.msra.gmra.mrb[52].mxu1 %vm1626_vm4, %v1703_v7 }
 0xf85   :  { %7624 = vmatpush3.bf16.xpose.msra.mxu1 %v1805_v27  ;;  %7625 = vmatprep.mubr.msk.bf16.mxu1 %vm8440_vm1, %v8439_v61 }
 0xf86   :  { %7635 = vmatprep.subr.bf16.mxu1 %v8439_v61 }
 0xf8c   :  { %7626 = vmatmul.mubr.msk.bf16.vlgmr.msra.gmra.mrb[56].mxu1 %vm545_vm2, %v1798_v12 }
 0xf8d   :  { %7636 = vmatpush3.bf16.xpose.msra.mxu1 %v1916_v51  ;;  %7637 = vmatprep.mubr.msk.bf16.mxu1 %vm8440_vm1, %v8439_v61 }
 0xf8e   :  { %7647 = vmatprep.subr.bf16.mxu1 %v8439_v61 }
 0xf94   :  { %7638 = vmatmul.mubr.msk.bf16.vlgmr.msra.gmra.mrb[60].mxu1 %vm545_vm2, %v1909_v49 }
 0xf95   :  { %7648 = vmatpush3.bf16.xpose.msra.mxu1 %v2022_v53  ;;  %7649 = vmatprep.mubr.msk.bf16.mxu1 %vm8440_vm1, %v8439_v61 }
 0xf96   :  { %7659 = vmatprep.subr.bf16.mxu1 %v8439_v61 }
 0xfad   :  { %v1629_v54 = vpop.xlane.xlu1 %1628 }
 0xfae   :  { %v1630_v2 = vsub.f32 %v1625_v9, %v1629_v54 }
 0xfb1   :  { %v1512_v16 = vpop.permute.xlu1 %1511 }
 0xfb2   :  { %v1556_v55 = vadd.f32 %v8968_v14, %v1512_v16  ;;  %v1631_v14 = vmul.f32 1.442695, %v1630_v2 }
 0xfb4   :  { %v1565_v10 = vadd.f32 %v8966_v15, %v1556_v55  ;;  %8249 = vpow2.f32 %v1631_v14 }
 0xfb6   :  { %v9014_v17 = vpack.c.bf16 %v1565_v10, %v1565_v10 }
 0xfb8   :  { %2078 = vrot.lane.b32.xlu1 %v9014_v17, %s8442_s0  ;;  %7650 = vmatmul.mubr.msk.bf16.vlgmr.msra.gmra.mrb[64].mxu1 %vm545_vm2, %v9014_v17 }
 0xfb9   :  { %7661 = vmatprep.mubr.msk.bf16.mxu1 %vm8440_vm1, %v8439_v61 }
 0xfbe   :  { %v8250_v9 = vpop.eup %8249 }
 0xfbf   :  { %v1633_v31 = vsel %vm1626_vm4, %v8250_v9, 0.0 }
0x1057   :  { %v9022_v29 = vpop.f32.mrb[52].mxu1 }
0x1058   :  { %v7615_v56 = vpop.f32.mrb[53].mxu1 }
0x1059   :  { %v1748_v47 = vpop.f32.mrb[54].mxu1 }
0x105a   :  { %v7616_v30 = vpop.f32.mrb[55].mxu1 }
0x105f   :  { %v1841_v13 = vpop.f32.mrb[56].mxu1 }
0x1060   :  { %v1847_v15 = vmul.f32 0.35355338, %v1841_v13  ;;  %v7627_v6 = vpop.f32.mrb[57].mxu1 }
0x1061   :  { %v1844_v8 = vpop.f32.mrb[58].mxu1 }
0x1062   :  { %v7628_v11 = vpop.f32.mrb[59].mxu1  ;;  %v1848_v5 = vsel %vm1626_vm4, %v1847_v15, -inf  ;;  %v1861_v8 = vpop.permute.xlu1 %1860 }
0x1063   :  { %1849 = vmax.xlane.f32.xlu0 %v1848_v5 }
0x1067   :  { %v1952_v18 = vpop.f32.mrb[60].mxu1 }
0x1068   :  { %v1958_v62 = vmul.f32 0.35355338, %v1952_v18  ;;  %v7639_v20 = vpop.f32.mrb[61].mxu1 }
0x1069   :  { %v1955_v23 = vpop.f32.mrb[62].mxu1 }
0x106a   :  { %v7640_v22 = vpop.f32.mrb[63].mxu1  ;;  %v1959_v28 = vsel %vm1626_vm4, %v1958_v62, -inf }
0x106b   :  { %1960 = vmax.xlane.f32.xlu0 %v1959_v28 }
0x106f   :  { %1634 = vadd.xlane.f32.xlu0 %v1633_v31 }
0x108b   :  { %v9027_v33 = vpop.f32.mrb[64].mxu1 }
0x108c   :  { %v7651_v34 = vpop.f32.mrb[65].mxu1 }
0x108d   :  { %v2061_v19 = vpop.f32.mrb[66].mxu1 }
0x108e   :  { %v7652_v7 = vpop.f32.mrb[67].mxu1 }
0x10f0   :  { %v1850_v27 = vpop.xlane.xlu0 %1849 }
0x10f1   :  { %v1851_v41 = vsub.f32 %v1847_v15, %v1850_v27 }
0x10f3   :  { %v1852_v12 = vmul.f32 1.442695, %v1851_v41 }
0x10f5   :  { %8251 = vpow2.f32 %v1852_v12 }
0x10f8   :  { %v1961_v51 = vpop.xlane.xlu0 %1960 }
0x10f9   :  { %v1962_v49 = vsub.f32 %v1958_v62, %v1961_v51  ;;  %v2082_v62 = vpop.permute.xlu1 %2081 }
0x10fa   :  { %v2087_v23 = vsel %vm545_vm2, %v2082_v62, 0 }
0x10fb   :  { %v1963_v53 = vmul.f32 1.442695, %v1962_v49 }
0x10fc   :  { %v1635_v56 = vpop.xlane.xlu0 %1634 }
0x10fd   :  { %8253 = vpow2.f32 %v1963_v53  ;;  %v2079_v22 = vpop.permute.xlu1 %2078 }
0x10fe   :  { %8255 = vrcp.f32 %v1635_v56 }
0x10ff   :  { %v8252_v54 = vpop.eup %8251 }
0x1100   :  { %v1854_v16 = vsel %vm1626_vm4, %v8252_v54, 0.0 }
0x1101   :  { %1855 = vadd.xlane.f32.xlu0 %v1854_v16 }
0x1107   :  { %v8254_v55 = vpop.eup %8253 }
0x1108   :  { %v1965_v10 = vsel %vm1626_vm4, %v8254_v55, 0.0  ;;  %v8256_v47 = vpop.eup %8255 }
0x1109   :  { %1966 = vadd.xlane.f32.xlu0 %v1965_v10  ;;  %v1637_v14 = vmul.f32 %v8256_v47, %v8250_v9 }
0x110b   :  { %v1638_v15 = vpack.c.bf16 %v1637_v14, %v1637_v14  ;;  %v2064_v14 = vmul.f32 0.35355338, %v9027_v33 }
0x111f   :  { %1751 = vrot.lane.b32.xlu0 %v8733_v24, %s8445_s24 }
0x118e   :  { %v1856_v2 = vpop.xlane.xlu0 %1855 }
0x118f   :  { %8257 = vrcp.f32 %v1856_v2 }
0x1196   :  { %v1967_v30 = vpop.xlane.xlu0 %1966 }
0x1197   :  { %8259 = vrcp.f32 %v1967_v30 }
0x1199   :  { %v8258_v6 = vpop.eup %8257 }
0x119a   :  { %v1752_v13 = vpop.permute.xlu0 %1751  ;;  %v1858_v24 = vmul.f32 %v8258_v6, %v8252_v54 }
0x119b   :  { %7618 = vmatpush3.bf16.msra.mxu0 %v1752_v13  ;;  %v2065_v13 = vsel %vm1626_vm4, %v2064_v14, -inf }
0x119c   :  { %7629 = vmatprep.subr.bf16.mxu0 %v8439_v61  ;;  %v1859_v11 = vpack.c.bf16 %v1858_v24, %v1858_v24 }
0x119e   :  { %7620 = vmatmul.mubr.msk.bf16.vlgmr.msra.gmra.mrb[56].mxu0 %vm1626_vm4, %v1638_v15 }
0x119f   :  { %7630 = vmatpush3.bf16.msra.mxu0 %v1861_v8  ;;  %7631 = vmatprep.mubr.msk.bf16.mxu0 %vm8440_vm1, %v8439_v61 }
0x11a0   :  { %7641 = vmatprep.subr.bf16.mxu0 %v8439_v61 }
0x11a1   :  { %v8260_v5 = vpop.eup %8259 }
0x11a2   :  { %v1969_v18 = vmul.f32 %v8260_v5, %v8254_v55 }
0x11a4   :  { %v1970_v20 = vpack.c.bf16 %v1969_v18, %v1969_v18 }
0x11a6   :  { %7632 = vmatmul.mubr.msk.bf16.vlgmr.msra.gmra.mrb[60].mxu0 %vm1626_vm4, %v1859_v11 }
0x11a7   :  { %7642 = vmatpush3.bf16.msra.mxu0 %v8739_v26  ;;  %7643 = vmatprep.mubr.msk.bf16.mxu0 %vm8440_vm1, %v8439_v61 }
0x11a8   :  { %7653 = vmatprep.subr.bf16.mxu0 %v8439_v61 }
0x11ae   :  { %7644 = vmatmul.mubr.msk.bf16.vlgmr.msra.gmra.mrb[64].mxu0 %vm1626_vm4, %v1970_v20 }
0x11af   :  { %7655 = vmatprep.mubr.msk.bf16.mxu0 %vm8440_vm1, %v8439_v61 }
0x11b0   :  { %7654 = vmatpush3.bf16.xpose.msra.mxu0 %v2087_v23 }
0x11b1   :  { %7665 = vmatprep.subr.bf16.mxu0 %v8439_v61 }
0x11b7   :  { %7656 = vmatmul.mubr.msk.bf16.vlgmr.msra.gmra.mrb[68].mxu0 %vm545_vm2, %v2079_v22 }
0x11b8   :  { %7667 = vmatprep.mubr.msk.bf16.mxu0 %vm8440_vm1, %v8439_v61 }
0x1271   :  { %v1791_v28 = vpop.f32.mrb[56].mxu0 }
0x1272   :  { %v1792_v9 = vadd.f32 %v1791_v28, %v9022_v29  ;;  %v7621_v31 = vpop.f32.mrb[57].mxu0 }
0x1273   :  { %v1794_v34 = vpop.f32.mrb[58].mxu0 }
0x1274   :  { %v7622_v19 = vpop.f32.mrb[59].mxu0 }
0x1279   :  { %v1900_v7 = vpop.f32.mrb[60].mxu0 }
0x127a   :  { %v1906_v27 = vadd.f32 %v1900_v7, %v1792_v9  ;;  %v7633_v41 = vpop.f32.mrb[61].mxu0 }
0x127b   :  { %v1903_v12 = vpop.f32.mrb[62].mxu0 }
0x127c   :  { %v7634_v51 = vpop.f32.mrb[63].mxu0 }
0x1281   :  { %v2008_v49 = vpop.f32.mrb[64].mxu0 }
0x1282   :  { %v9052_v53 = vadd.f32 %v2008_v49, %v1906_v27  ;;  %v7645_v54 = vpop.f32.mrb[65].mxu0 }
0x1283   :  { %v2011_v16 = vpop.f32.mrb[66].mxu0 }
0x1284   :  { %v7646_v55 = vpop.f32.mrb[67].mxu0 }
0x128a   :  { %v2123_v10 = vpop.f32.mrb[68].mxu0 }
0x128b   :  { %v2129_v56 = vmul.f32 0.35355338, %v2123_v10  ;;  %v7657_v2 = vpop.f32.mrb[69].mxu0 }
0x128c   :  { %v2126_v47 = vpop.f32.mrb[70].mxu0 }
0x128d   :  { %v7658_v30 = vpop.f32.mrb[71].mxu0  ;;  %v2130_v29 = vsel %vm1626_vm4, %v2129_v56, -inf }
0x128e   :  { %2131 = vmax.xlane.f32.xlu1 %v2130_v29 }
0x129f   :  { %2143 = vrot.lane.b32.xlu1 %v8745_v35, %s8448_s8 }
0x12a3   :  { %2235 = vrot.lane.b32.xlu1 %v9014_v17, %s8446_s25 }
0x12a7   :  { %2348 = vrot.lane.b32.xlu1 %v8753_v38, %s8447_s26 }
0x12cb   :  { %2066 = vmax.xlane.f32.xlu1 %v2065_v13 }
0x131b   :  { %v2132_v15 = vpop.xlane.xlu1 %2131 }
0x131c   :  { %v2133_v6 = vsub.f32 %v2129_v56, %v2132_v15 }
0x131e   :  { %v2134_v8 = vmul.f32 1.442695, %v2133_v6 }
0x131f   :  { %v2144_v24 = vpop.permute.xlu1 %2143 }
0x1320   :  { %8261 = vpow2.f32 %v2134_v8  ;;  %7660 = vmatpush3.bf16.msra.mxu1 %v2144_v24 }
0x1321   :  { %7671 = vmatprep.subr.bf16.mxu1 %v8439_v61 }
0x1323   :  { %v2236_v33 = vpop.permute.xlu1 %2235 }
0x1327   :  { %v2349_v18 = vpop.permute.xlu1 %2348 }
0x1328   :  { %v2354_v7 = vsel %vm545_vm2, %v2349_v18, 0 }
0x132a   :  { %v8262_v11 = vpop.eup %8261 }
0x132b   :  { %v2136_v5 = vsel %vm1626_vm4, %v8262_v11, 0.0 }
0x132c   :  { %2137 = vadd.xlane.f32.xlu0 %v2136_v5 }
0x1342   :  { %2237 = vrot.lane.b32.xlu0 %v8753_v38, %s8446_s25 }
0x1346   :  { %2346 = vrot.lane.b32.xlu0 %v9014_v17, %s8447_s26 }
0x1358   :  { %v2067_v62 = vpop.xlane.xlu1 %2066 }
0x1359   :  { %v2068_v20 = vsub.f32 %v2064_v14, %v2067_v62 }
0x135b   :  { %v2069_v23 = vmul.f32 1.442695, %v2068_v20 }
0x135d   :  { %8263 = vpow2.f32 %v2069_v23 }
0x1367   :  { %v9069_v22 = vpop.eup %8263 }
0x1368   :  { %v2071_v28 = vsel %vm1626_vm4, %v9069_v22, 0.0 }
0x1369   :  { %2072 = vadd.xlane.f32.xlu1 %v2071_v28  ;;  %v7095_v28 = vld [vmem:[%s10033_s14 + $0x5] ss:$0 sm:$0xff] }
0x13b9   :  { %v2138_v9 = vpop.xlane.xlu0 %2137 }
0x13ba   :  { %8265 = vrcp.f32 %v2138_v9  ;;  %v2457_v9 = vadd.f32 %v7095_v28, %v9052_v53 }
0x13bd   :  { %v2238_v38 = vpop.permute.xlu0 %2237 }
0x13be   :  { %v2243_v17 = vsel %vm545_vm2, %v2238_v38, 0 }
0x13c1   :  { %v2347_v27 = vpop.permute.xlu0 %2346 }
0x13c4   :  { %v8266_v31 = vpop.eup %8265 }
0x13c5   :  { %v2140_v34 = vmul.f32 %v8266_v31, %v8262_v11  ;;  %v2459_v31 = vadd.f32 %v2457_v9, %v8952_v39 }
0x13c7   :  { %v2141_v19 = vpack.c.bf16 %v2140_v34, %v2140_v34  ;;  %v2463_v34 = vsel %vm98_vm0, %v2459_v31, 0.0 }
0x13c9   :  { %7662 = vmatmul.mubr.msk.bf16.vlgmr.msra.gmra.mrb[68].mxu1 %vm1626_vm4, %v2141_v19 }
0x13ca   :  { %7672 = vmatpush3.bf16.xpose.msra.mxu1 %v2243_v17  ;;  %7673 = vmatprep.mubr.msk.bf16.mxu1 %vm8440_vm1, %v8439_v61 }
0x13cb   :  { %7683 = vmatprep.subr.bf16.mxu1 %v8439_v61 }
0x13d1   :  { %7674 = vmatmul.mubr.msk.bf16.vlgmr.msra.gmra.mrb[72].mxu1 %vm545_vm2, %v2236_v33 }
0x13d2   :  { %7684 = vmatpush3.bf16.xpose.msra.mxu1 %v2354_v7  ;;  %7685 = vmatprep.mubr.msk.bf16.mxu1 %vm8440_vm1, %v8439_v61 }
0x13d3   :  { %7695 = vmatprep.subr.bf16.mxu1 %v8439_v61 }
0x13d9   :  { %7686 = vmatmul.mubr.msk.bf16.vlgmr.msra.gmra.mrb[76].mxu1 %vm545_vm2, %v2347_v27 }
0x13da   :  { %7699 = vmatprep.mubr.msk.bf16.mxu1 %vm8440_vm1, %v8439_v61 }
0x13f6   :  { %v2073_v38 = vpop.xlane.xlu1 %2072 }
0x149c   :  { %v9086_v41 = vpop.f32.mrb[68].mxu1 }
0x149d   :  { %v7663_v12 = vpop.f32.mrb[69].mxu1 }
0x149e   :  { %v2186_v51 = vpop.f32.mrb[70].mxu1 }
0x149f   :  { %v7664_v49 = vpop.f32.mrb[71].mxu1 }
0x14a4   :  { %v2279_v54 = vpop.f32.mrb[72].mxu1 }
0x14a5   :  { %v2285_v16 = vmul.f32 0.35355338, %v2279_v54  ;;  %v7675_v55 = vpop.f32.mrb[73].mxu1 }
0x14a6   :  { %v2282_v10 = vpop.f32.mrb[74].mxu1  ;;  %v2593_v55 = vsel %vm545_vm2, %v8698_v4, 0 }
0x14a7   :  { %v7676_v56 = vpop.f32.mrb[75].mxu1  ;;  %v2286_v2 = vsel %vm1626_vm4, %v2285_v16, -inf }
0x14a8   :  { %2287 = vmax.xlane.f32.xlu0 %v2286_v2 }
0x14ac   :  { %v2390_v47 = vpop.f32.mrb[76].mxu1 }
0x14ad   :  { %v2396_v30 = vmul.f32 0.35355338, %v2390_v47  ;;  %v7687_v29 = vpop.f32.mrb[77].mxu1 }
0x14ae   :  { %v2393_v14 = vpop.f32.mrb[78].mxu1 }
0x14af   :  { %v7688_v13 = vpop.f32.mrb[79].mxu1  ;;  %v2397_v15 = vsel %vm1626_vm4, %v2396_v30, -inf }
0x14b0   :  { %2398 = vmax.xlane.f32.xlu0 %v2397_v15 }
0x1535   :  { %v2288_v6 = vpop.xlane.xlu0 %2287 }
0x1536   :  { %v2289_v8 = vsub.f32 %v2285_v16, %v2288_v6 }
0x1538   :  { %v2290_v24 = vmul.f32 1.442695, %v2289_v8 }
0x153a   :  { %8267 = vpow2.f32 %v2290_v24 }
0x153d   :  { %v2399_v11 = vpop.xlane.xlu0 %2398 }
0x153e   :  { %v2400_v5 = vsub.f32 %v2396_v30, %v2399_v11 }
0x1540   :  { %v2401_v33 = vmul.f32 1.442695, %v2400_v5 }
0x1542   :  { %8269 = vpow2.f32 %v2401_v33 }
0x1543   :  { %8271 = vrcp.f32 %v2073_v38 }
0x1544   :  { %v8268_v18 = vpop.eup %8267 }
0x1545   :  { %v2292_v62 = vsel %vm1626_vm4, %v8268_v18, 0.0 }
0x1546   :  { %2293 = vadd.xlane.f32.xlu0 %v2292_v62 }
0x154c   :  { %v8270_v20 = vpop.eup %8269 }
0x154d   :  { %v2403_v23 = vsel %vm1626_vm4, %v8270_v20, 0.0  ;;  %v8272_v19 = vpop.eup %8271 }
0x154e   :  { %2404 = vadd.xlane.f32.xlu1 %v2403_v23  ;;  %v2075_v7 = vmul.f32 %v8272_v19, %v9069_v22 }
0x155c   :  { %2189 = vrot.lane.b32.xlu0 %v8745_v35, %s8445_s24 }
0x155f   :  { %2298 = vrot.lane.b32.xlu1 %v8745_v35, %s8438_s18  ;;  %v2076_v35 = vpack.c.bf16 %v2075_v7, %v2075_v7 }
0x1583   :  { %2464 = vadd.xlane.f32.xlu1 %v2463_v34 }
0x15d3   :  { %v2294_v17 = vpop.xlane.xlu0 %2293 }
0x15d4   :  { %8273 = vrcp.f32 %v2294_v17 }
0x15d7   :  { %v2190_v27 = vpop.permute.xlu0 %2189 }
0x15d8   :  { %7666 = vmatpush3.bf16.msra.mxu0 %v2190_v27 }
0x15d9   :  { %7677 = vmatprep.subr.bf16.mxu0 %v8439_v61 }
0x15db   :  { %7668 = vmatmul.mubr.msk.bf16.vlgmr.msra.gmra.mrb[72].mxu0 %vm1626_vm4, %v2076_v35  ;;  %v2405_v53 = vpop.xlane.xlu1 %2404 }
0x15dc   :  { %8275 = vrcp.f32 %v2405_v53  ;;  %7679 = vmatprep.mubr.msk.bf16.mxu0 %vm8440_vm1, %v8439_v61 }
0x15de   :  { %v8274_v39 = vpop.eup %8273 }
0x15df   :  { %v2299_v12 = vpop.permute.xlu1 %2298  ;;  %v2296_v51 = vmul.f32 %v8274_v39, %v8268_v18 }
0x15e0   :  { %7678 = vmatpush3.bf16.msra.mxu0 %v2299_v12 }
0x15e1   :  { %v2297_v49 = vpack.c.bf16 %v2296_v51, %v2296_v51  ;;  %7689 = vmatprep.subr.bf16.mxu0 %v8439_v61 }
0x15e3   :  { %7680 = vmatmul.mubr.msk.bf16.vlgmr.msra.gmra.mrb[76].mxu0 %vm1626_vm4, %v2297_v49 }
0x15e4   :  { %7690 = vmatpush3.bf16.msra.mxu0 %v8751_v37  ;;  %7691 = vmatprep.mubr.msk.bf16.mxu0 %vm8440_vm1, %v8439_v61 }
0x15e5   :  { %7703 = vmatprep.subr.bf16.mxu0 %v8439_v61 }
0x15e6   :  { %v8276_v22 = vpop.eup %8275 }
0x15e7   :  { %v2407_v54 = vmul.f32 %v8276_v22, %v8270_v20 }
0x15e9   :  { %v2408_v16 = vpack.c.bf16 %v2407_v54, %v2407_v54  ;;  %v7096_v54 = vld [vmem:[%s10033_s14 + $0xb] ss:$0 sm:$0xff] }
0x15eb   :  { %7692 = vmatmul.mubr.msk.bf16.vlgmr.msra.gmra.mrb[80].mxu0 %vm1626_vm4, %v2408_v16 }
0x15ec   :  { %7705 = vmatprep.mubr.msk.bf16.mxu0 %vm8440_vm1, %v8439_v61 }
0x15ed   :  { %7704 = vmatpush3.bf16.xpose.msra.mxu0 %v2593_v55 }
0x15ee   :  { %7715 = vmatprep.subr.bf16.mxu0 %v8439_v61 }
0x1610   :  { %v2465_v8 = vpop.xlane.xlu1 %2464 }
0x1611   :  { %v2469_v24 = vmul.f32 0.03125, %v2465_v8  ;;  %v9156_v8 = vld [vmem:[%s10033_s14 + $0x6] ss:$0 sm:$0xff] }
0x1613   :  { %v2471_v62 = vsub.f32 %v2459_v31, %v2469_v24 }
0x1615   :  { %v2473_v34 = vmul.f32 %v2471_v62, %v2471_v62 }
0x1617   :  { %v2475_v38 = vsel %vm98_vm0, %v2473_v34, 0.0 }
0x16ae   :  { %v2229_v10 = vpop.f32.mrb[72].mxu0 }
0x16af   :  { %v2230_v56 = vadd.f32 %v2229_v10, %v9086_v41  ;;  %v7669_v2 = vpop.f32.mrb[73].mxu0 }
0x16b0   :  { %v2232_v47 = vpop.f32.mrb[74].mxu0 }
0x16b1   :  { %v7670_v30 = vpop.f32.mrb[75].mxu0 }
0x16b6   :  { %v2338_v29 = vpop.f32.mrb[76].mxu0 }
0x16b7   :  { %v2344_v14 = vadd.f32 %v2338_v29, %v2230_v56  ;;  %v7681_v13 = vpop.f32.mrb[77].mxu0  ;;  %v7097_v56 = vld [vmem:[%s10033_s14 + $0xf] ss:$0 sm:$0xff] }
0x16b8   :  { %v2341_v15 = vpop.f32.mrb[78].mxu0 }
0x16b9   :  { %v7682_v6 = vpop.f32.mrb[79].mxu0 }
0x16be   :  { %v2446_v11 = vpop.f32.mrb[80].mxu0 }
0x16bf   :  { %v2452_v5 = vadd.f32 %v2446_v11, %v2344_v14  ;;  %v7693_v33 = vpop.f32.mrb[81].mxu0 }
0x16c0   :  { %v2449_v18 = vpop.f32.mrb[82].mxu0 }
0x16c1   :  { %v2458_v20 = vadd.f32 %v7095_v28, %v2452_v5  ;;  %v7694_v23 = vpop.f32.mrb[83].mxu0 }
0x16c3   :  { %v2460_v9 = vadd.f32 %v2458_v20, %v8954_v40  ;;  %v8185_v40 = vld [vmem:[%s10037_s6 + $0x10] sm:$0xff]  }
0x16c4   :  { %7696 = vmatpush3.bf16.msra.mxu1 %v8185_v40 }
0x16c5   :  { %v2466_v41 = vsel %vm98_vm0, %v2460_v9, 0.0  ;;  %7697 = vmatprep.subr.bf16.mxu1 %v8439_v61 }
0x16c6   :  { %2467 = vadd.xlane.f32.xlu0 %v2466_v41 }
0x16ca   :  { %2476 = vadd.xlane.f32.xlu0 %v2475_v38 }
0x16e0   :  { %2519 = vrot.lane.b32.xlu0 %v8656_v43, %s8438_s18  ;;  %v8186_v43 = vld [vmem:[%s10037_s6 + $0x18] sm:$0xff]  }
0x16e1   :  { %7698 = vmatpush3.bf16.msra.mxu1 %v8186_v43 }
0x16e2   :  { %7709 = vmatprep.subr.bf16.mxu1 %v8439_v61 }
0x1753   :  { %v2468_v19 = vpop.xlane.xlu0 %2467 }
0x1754   :  { %v2470_v17 = vmul.f32 0.03125, %v2468_v19 }
0x1756   :  { %v2472_v7 = vsub.f32 %v2460_v9, %v2470_v17 }
0x1757   :  { %v2477_v28 = vpop.xlane.xlu0 %2476 }
0x1758   :  { %v2474_v27 = vmul.f32 %v2472_v7, %v2472_v7  ;;  %v2481_v35 = vmul.f32 0.03125, %v2477_v28 }
0x175a   :  { %v2478_v31 = vsel %vm98_vm0, %v2474_v27, 0.0  ;;  %v2483_v53 = vadd.f32 1e-05, %v2481_v35 }
0x175b   :  { %2479 = vadd.xlane.f32.xlu1 %v2478_v31  ;;  %v2520_v15 = vpop.permute.xlu0 %2519 }
0x175c   :  { %8277 = vrsqrt.f32 %v2483_v53 }
0x1766   :  { %v8278_v49 = vpop.eup %8277 }
0x1767   :  { %v2487_v22 = vmul.f32 %v8278_v49, %v2471_v62 }
0x1769   :  { %v2493_v55 = vmul.f32 %v7096_v54, %v2487_v22 }
0x176b   :  { %v9142_v47 = vadd.f32 %v7097_v56, %v2493_v55 }
0x176c   :  { %2652 = vrot.lane.b32.xlu1 %v8698_v4, %s8442_s0 }
0x17e8   :  { %v2480_v39 = vpop.xlane.xlu1 %2479 }
0x17e9   :  { %v2482_v12 = vmul.f32 0.03125, %v2480_v39 }
0x17eb   :  { %v2484_v51 = vadd.f32 1e-05, %v2482_v12 }
0x17ec   :  { %v2653_v29 = vpop.permute.xlu1 %2652 }
0x17ed   :  { %8279 = vrsqrt.f32 %v2484_v51  ;;  %v2658_v13 = vsel %vm545_vm2, %v2653_v29, 0  ;;  %v3030_v29 = vsel %vm545_vm2, %v8696_v3, 0 }
0x17f7   :  { %v8280_v16 = vpop.eup %8279 }
0x17f8   :  { %v2488_v10 = vmul.f32 %v8280_v16, %v2472_v7 }
0x17fa   :  { %v2494_v2 = vmul.f32 %v7096_v54, %v2488_v10 }
0x17fc   :  { %v9144_v30 = vadd.f32 %v7097_v56, %v2494_v2 }
0x17fe   :  { %v2501_v14 = vpack.c.bf16 %v9144_v30, %v9142_v47 }
0x1800   :  { %7700 = vmatmul.mubr.msk.bf16.vlgmr.msra.gmra.mrb[80].mxu1 %vm98_vm0, %v2501_v14 }
0x1801   :  { %7710 = vmatpush3.bf16.xpose.msra.mxu1 %v2658_v13  ;;  %7711 = vmatprep.mubr.msk.bf16.mxu1 %vm8440_vm1, %v8439_v61 }
0x1802   :  { %7721 = vmatprep.subr.bf16.mxu1 %v8439_v61 }
0x18d3   :  { %v2562_v6 = vpop.f32.mrb[80].mxu1 }
0x18d4   :  { %v2563_v24 = vadd.f32 %v2562_v6, %v2520_v15  ;;  %v7701_v11 = vpop.f32.mrb[81].mxu1 }
0x18d5   :  { %v9158_v5 = vpop.f32.mrb[82].mxu1 }
0x18d6   :  { %v2574_v33 = vadd.f32 %v9156_v8, %v2563_v24  ;;  %v7702_v18 = vpop.f32.mrb[83].mxu1 }
0x18d8   :  { %v2586_v62 = vpack.c.bf16 %v2574_v33, %v2574_v33 }
0x18da   :  { %2649 = vrot.lane.b32.xlu1 %v2586_v62, %s8442_s0  ;;  %7706 = vmatmul.mubr.msk.bf16.vlgmr.msra.gmra.mrb[84].mxu0 %vm545_vm2, %v2586_v62 }
0x18db   :  { %7717 = vmatprep.mubr.msk.bf16.mxu0 %vm8440_vm1, %v8439_v61 }
0x194c   :  { %v2650_v20 = vpop.permute.xlu1 %2649 }
0x194d   :  { %7712 = vmatmul.mubr.msk.bf16.vlgmr.msra.gmra.mrb[84].mxu1 %vm545_vm2, %v2650_v20 }
0x194e   :  { %7722 = vmatpush3.bf16.msra.mxu1 %v8755_v42  ;;  %7723 = vmatprep.mubr.msk.bf16.mxu1 %vm8440_vm1, %v8439_v61 }
0x194f   :  { %7733 = vmatprep.subr.bf16.mxu1 %v8439_v61 }
0x19ad   :  { %v2629_v23 = vpop.f32.mrb[84].mxu0 }
0x19ae   :  { %v7707_v9 = vpop.f32.mrb[85].mxu0  ;;  %v2635_v12 = vmul.f32 0.35355338, %v2629_v23 }
0x19af   :  { %v2632_v41 = vpop.f32.mrb[86].mxu0 }
0x19b0   :  { %v7708_v34 = vpop.f32.mrb[87].mxu0  ;;  %v2636_v51 = vsel %vm1626_vm4, %v2635_v12, -inf }
0x1a20   :  { %v2694_v38 = vpop.f32.mrb[84].mxu1 }
0x1a21   :  { %v2700_v19 = vmul.f32 0.35355338, %v2694_v38  ;;  %v7713_v17 = vpop.f32.mrb[85].mxu1 }
0x1a22   :  { %v2697_v7 = vpop.f32.mrb[86].mxu1 }
0x1a23   :  { %v7714_v27 = vpop.f32.mrb[87].mxu1  ;;  %v2701_v31 = vsel %vm1626_vm4, %v2700_v19, -inf }
0x1a24   :  { %2702 = vmax.xlane.f32.xlu0 %v2701_v31 }
0x1a3a   :  { %2714 = vrot.lane.b32.xlu0 %v8755_v42, %s8445_s24 }
0x1a3e   :  { %2803 = vrot.lane.b32.xlu0 %v2586_v62, %s8446_s25 }
0x1a42   :  { %2913 = vrot.lane.b32.xlu0 %v2586_v62, %s8447_s26 }
0x1ab1   :  { %v2703_v40 = vpop.xlane.xlu0 %2702 }
0x1ab2   :  { %v2704_v43 = vsub.f32 %v2700_v19, %v2703_v40 }
0x1ab4   :  { %v2705_v28 = vmul.f32 1.442695, %v2704_v43 }
0x1ab5   :  { %v2715_v35 = vpop.permute.xlu0 %2714 }
0x1ab6   :  { %8281 = vpow2.f32 %v2705_v28  ;;  %7716 = vmatpush3.bf16.msra.mxu0 %v2715_v35 }
0x1ab7   :  { %7727 = vmatprep.subr.bf16.mxu0 %v8439_v61 }
0x1ab9   :  { %v2804_v10 = vpop.permute.xlu0 %2803 }
0x1abd   :  { %v2914_v2 = vpop.permute.xlu0 %2913 }
0x1ac0   :  { %v8282_v53 = vpop.eup %8281 }
0x1ac1   :  { %v2707_v39 = vsel %vm1626_vm4, %v8282_v53, 0.0 }
0x1ac2   :  { %2708 = vadd.xlane.f32.xlu1 %v2707_v39 }
0x1ad3   :  { %2805 = vrot.lane.b32.xlu1 %v8698_v4, %s8446_s25 }
0x1ad7   :  { %2915 = vrot.lane.b32.xlu1 %v8698_v4, %s8447_s26 }
0x1afb   :  { %2637 = vmax.xlane.f32.xlu1 %v2636_v51 }
0x1b0c   :  { %2521 = vrot.lane.b32.xlu1 %v8660_v45, %s8438_s18 }
0x1b10   :  { %2976 = vrot.lane.b32.xlu1 %v8755_v42, %s8438_s18 }
0x1b14   :  { %3089 = vrot.lane.b32.xlu1 %v8696_v3, %s8442_s0 }
0x1b4f   :  { %v2709_v49 = vpop.xlane.xlu1 %2708 }
0x1b50   :  { %8283 = vrcp.f32 %v2709_v49 }
0x1b53   :  { %v2806_v16 = vpop.permute.xlu1 %2805 }
0x1b54   :  { %v2811_v4 = vsel %vm545_vm2, %v2806_v16, 0 }
0x1b57   :  { %v2916_v45 = vpop.permute.xlu1 %2915 }
0x1b58   :  { %v2921_v56 = vsel %vm545_vm2, %v2916_v45, 0 }
0x1b5a   :  { %v8284_v22 = vpop.eup %8283 }
0x1b5b   :  { %v2711_v54 = vmul.f32 %v8284_v22, %v8282_v53 }
0x1b5d   :  { %v2712_v55 = vpack.c.bf16 %v2711_v54, %v2711_v54 }
0x1b5f   :  { %7718 = vmatmul.mubr.msk.bf16.vlgmr.msra.gmra.mrb[88].mxu0 %vm1626_vm4, %v2712_v55 }
0x1b60   :  { %7728 = vmatpush3.bf16.xpose.msra.mxu0 %v2811_v4  ;;  %7729 = vmatprep.mubr.msk.bf16.mxu0 %vm8440_vm1, %v8439_v61 }
0x1b61   :  { %7739 = vmatprep.subr.bf16.mxu0 %v8439_v61 }
0x1b67   :  { %7730 = vmatmul.mubr.msk.bf16.vlgmr.msra.gmra.mrb[92].mxu0 %vm545_vm2, %v2804_v10 }
0x1b68   :  { %7740 = vmatpush3.bf16.xpose.msra.mxu0 %v2921_v56  ;;  %7741 = vmatprep.mubr.msk.bf16.mxu0 %vm8440_vm1, %v8439_v61 }
0x1b69   :  { %7751 = vmatprep.subr.bf16.mxu0 %v8439_v61 }
0x1b6f   :  { %7742 = vmatmul.mubr.msk.bf16.vlgmr.msra.gmra.mrb[96].mxu0 %vm545_vm2, %v2914_v2 }
0x1b70   :  { %7752 = vmatpush3.bf16.xpose.msra.mxu0 %v3030_v29  ;;  %7753 = vmatprep.mubr.msk.bf16.mxu0 %vm8440_vm1, %v8439_v61 }
0x1b71   :  { %7763 = vmatprep.subr.bf16.mxu0 %v8439_v61 }
0x1b88   :  { %v2638_v14 = vpop.xlane.xlu1 %2637 }
0x1b89   :  { %v2639_v18 = vsub.f32 %v2635_v12, %v2638_v14 }
0x1b8c   :  { %v2522_v13 = vpop.permute.xlu1 %2521 }
0x1b8d   :  { %v2566_v15 = vadd.f32 %v9158_v5, %v2522_v13  ;;  %v2640_v5 = vmul.f32 1.442695, %v2639_v18 }
0x1b8f   :  { %v2575_v6 = vadd.f32 %v9156_v8, %v2566_v15  ;;  %8285 = vpow2.f32 %v2640_v5 }
0x1b90   :  { %v2977_v5 = vpop.permute.xlu1 %2976 }
0x1b91   :  { %v9206_v24 = vpack.c.bf16 %v2575_v6, %v2575_v6 }
0x1b93   :  { %3086 = vrot.lane.b32.xlu1 %v9206_v24, %s8442_s0  ;;  %7754 = vmatmul.mubr.msk.bf16.vlgmr.msra.gmra.mrb[100].mxu0 %vm545_vm2, %v9206_v24 }
0x1b94   :  { %7765 = vmatprep.mubr.msk.bf16.mxu0 %vm8440_vm1, %v8439_v61 }
0x1b99   :  { %v8286_v43 = vpop.eup %8285 }
0x1b9a   :  { %v2642_v28 = vsel %vm1626_vm4, %v8286_v43, 0.0 }
0x1c32   :  { %v9214_v11 = vpop.f32.mrb[88].mxu0 }
0x1c33   :  { %v7719_v33 = vpop.f32.mrb[89].mxu0 }
0x1c34   :  { %v2757_v62 = vpop.f32.mrb[90].mxu0 }
0x1c35   :  { %v7720_v20 = vpop.f32.mrb[91].mxu0 }
0x1c3a   :  { %v2847_v23 = vpop.f32.mrb[92].mxu0 }
0x1c3b   :  { %v2853_v8 = vmul.f32 0.35355338, %v2847_v23  ;;  %v7731_v9 = vpop.f32.mrb[93].mxu0 }
0x1c3c   :  { %v2850_v41 = vpop.f32.mrb[94].mxu0 }
0x1c3d   :  { %v7732_v34 = vpop.f32.mrb[95].mxu0  ;;  %v2854_v38 = vsel %vm1626_vm4, %v2853_v8, -inf }
0x1c3e   :  { %2855 = vmax.xlane.f32.xlu0 %v2854_v38 }
0x1c42   :  { %v2957_v19 = vpop.f32.mrb[96].mxu0 }
0x1c43   :  { %v2963_v17 = vmul.f32 0.35355338, %v2957_v19  ;;  %v7743_v7 = vpop.f32.mrb[97].mxu0 }
0x1c44   :  { %v2960_v27 = vpop.f32.mrb[98].mxu0 }
0x1c45   :  { %v7744_v31 = vpop.f32.mrb[99].mxu0  ;;  %v2964_v40 = vsel %vm1626_vm4, %v2963_v17, -inf }
0x1c46   :  { %2965 = vmax.xlane.f32.xlu0 %v2964_v40 }
0x1c4a   :  { %2643 = vadd.xlane.f32.xlu0 %v2642_v28 }
0x1c66   :  { %v9219_v35 = vpop.f32.mrb[100].mxu0 }
0x1c67   :  { %v7755_v53 = vpop.f32.mrb[101].mxu0 }
0x1c68   :  { %v3069_v39 = vpop.f32.mrb[102].mxu0 }
0x1c69   :  { %v7756_v12 = vpop.f32.mrb[103].mxu0 }
0x1ccb   :  { %v2856_v51 = vpop.xlane.xlu0 %2855 }
0x1ccc   :  { %v2857_v49 = vsub.f32 %v2853_v8, %v2856_v51  ;;  %v3090_v8 = vpop.permute.xlu1 %3089 }
0x1ccd   :  { %v3095_v41 = vsel %vm545_vm2, %v3090_v8, 0 }
0x1cce   :  { %v2858_v22 = vmul.f32 1.442695, %v2857_v49 }
0x1cd0   :  { %8287 = vpow2.f32 %v2858_v22  ;;  %v3087_v34 = vpop.permute.xlu1 %3086 }
0x1cd3   :  { %v2966_v54 = vpop.xlane.xlu0 %2965 }
0x1cd4   :  { %v2967_v16 = vsub.f32 %v2963_v17, %v2966_v54 }
0x1cd6   :  { %v2968_v55 = vmul.f32 1.442695, %v2967_v16 }
0x1cd7   :  { %v2644_v4 = vpop.xlane.xlu0 %2643 }
0x1cd8   :  { %8289 = vpow2.f32 %v2968_v55 }
0x1cd9   :  { %8291 = vrcp.f32 %v2644_v4 }
0x1cda   :  { %v8288_v45 = vpop.eup %8287 }
0x1cdb   :  { %v2860_v10 = vsel %vm1626_vm4, %v8288_v45, 0.0 }
0x1cdc   :  { %2861 = vadd.xlane.f32.xlu0 %v2860_v10  ;;  %v3072_v10 = vmul.f32 0.35355338, %v9219_v35 }
0x1ce2   :  { %v8290_v56 = vpop.eup %8289 }
0x1ce3   :  { %v8292_v2 = vpop.eup %8291  ;;  %v2970_v29 = vsel %vm1626_vm4, %v8290_v56, 0.0 }
0x1ce4   :  { %2971 = vadd.xlane.f32.xlu0 %v2970_v29  ;;  %v2646_v14 = vmul.f32 %v8292_v2, %v8286_v43 }
0x1ce6   :  { %v2647_v13 = vpack.c.bf16 %v2646_v14, %v2646_v14 }
0x1ce8   :  { %7724 = vmatmul.mubr.msk.bf16.vlgmr.msra.gmra.mrb[88].mxu1 %vm1626_vm4, %v2647_v13 }
0x1ce9   :  { %7735 = vmatprep.mubr.msk.bf16.mxu1 %vm8440_vm1, %v8439_v61 }
0x1cfa   :  { %2866 = vrot.lane.b32.xlu0 %v8755_v42, %s8448_s8 }
0x1d69   :  { %v2862_v15 = vpop.xlane.xlu0 %2861 }
0x1d6a   :  { %8293 = vrcp.f32 %v2862_v15 }
0x1d71   :  { %v2972_v6 = vpop.xlane.xlu0 %2971 }
0x1d72   :  { %8295 = vrcp.f32 %v2972_v6 }
0x1d74   :  { %v8294_v33 = vpop.eup %8293 }
0x1d75   :  { %v2867_v18 = vpop.permute.xlu0 %2866  ;;  %v2864_v62 = vmul.f32 %v8294_v33, %v8288_v45 }
0x1d76   :  { %7734 = vmatpush3.bf16.msra.mxu1 %v2867_v18 }
0x1d77   :  { %v2865_v20 = vpack.c.bf16 %v2864_v62, %v2864_v62  ;;  %7745 = vmatprep.subr.bf16.mxu1 %v8439_v61 }
0x1d79   :  { %7736 = vmatmul.mubr.msk.bf16.vlgmr.msra.gmra.mrb[92].mxu1 %vm1626_vm4, %v2865_v20 }
0x1d7a   :  { %7746 = vmatpush3.bf16.msra.mxu1 %v2977_v5  ;;  %7747 = vmatprep.mubr.msk.bf16.mxu1 %vm8440_vm1, %v8439_v61 }
0x1d7b   :  { %7757 = vmatprep.subr.bf16.mxu1 %v8439_v61 }
0x1d7c   :  { %v8296_v42 = vpop.eup %8295 }
0x1d7d   :  { %v2974_v23 = vmul.f32 %v8296_v42, %v8290_v56  ;;  %v3073_v56 = vsel %vm1626_vm4, %v3072_v10, -inf }
0x1d7f   :  { %v2975_v9 = vpack.c.bf16 %v2974_v23, %v2974_v23 }
0x1d81   :  { %7748 = vmatmul.mubr.msk.bf16.vlgmr.msra.gmra.mrb[96].mxu1 %vm1626_vm4, %v2975_v9 }
0x1d82   :  { %7759 = vmatprep.mubr.msk.bf16.mxu1 %vm8440_vm1, %v8439_v61 }
0x1d83   :  { %7758 = vmatpush3.bf16.xpose.msra.mxu1 %v3095_v41 }
0x1d84   :  { %7769 = vmatprep.subr.bf16.mxu1 %v8439_v61 }
0x1d8a   :  { %7760 = vmatmul.mubr.msk.bf16.vlgmr.msra.gmra.mrb[100].mxu1 %vm545_vm2, %v3087_v34 }
0x1d8b   :  { %7770 = vmatpush3.bf16.msra.mxu1 %v8764_v58  ;;  %7771 = vmatprep.mubr.msk.bf16.mxu1 %vm8440_vm1, %v8439_v61 }
0x1d8c   :  { %7781 = vmatprep.subr.bf16.mxu1 %v8439_v61 }
0x1dbb   :  { %v2797_v38 = vpop.f32.mrb[88].mxu1 }
0x1dbc   :  { %v2798_v19 = vadd.f32 %v2797_v38, %v9214_v11  ;;  %v7725_v17 = vpop.f32.mrb[89].mxu1 }
0x1dbd   :  { %v2800_v7 = vpop.f32.mrb[90].mxu1 }
0x1dbe   :  { %v7726_v27 = vpop.f32.mrb[91].mxu1 }
0x1e4c   :  { %v2906_v31 = vpop.f32.mrb[92].mxu1 }
0x1e4d   :  { %v2912_v40 = vadd.f32 %v2906_v31, %v2798_v19  ;;  %v7737_v43 = vpop.f32.mrb[93].mxu1 }
0x1e4e   :  { %v2909_v28 = vpop.f32.mrb[94].mxu1 }
0x1e4f   :  { %v7738_v53 = vpop.f32.mrb[95].mxu1 }
0x1e54   :  { %v3016_v39 = vpop.f32.mrb[96].mxu1 }
0x1e55   :  { %v9244_v12 = vadd.f32 %v3016_v39, %v2912_v40  ;;  %v7749_v51 = vpop.f32.mrb[97].mxu1 }
0x1e56   :  { %v3019_v49 = vpop.f32.mrb[98].mxu1 }
0x1e57   :  { %v7750_v22 = vpop.f32.mrb[99].mxu1 }
0x1e5d   :  { %v3131_v54 = vpop.f32.mrb[100].mxu1 }
0x1e5e   :  { %v3137_v16 = vmul.f32 0.35355338, %v3131_v54  ;;  %v7761_v55 = vpop.f32.mrb[101].mxu1 }
0x1e5f   :  { %v3134_v4 = vpop.f32.mrb[102].mxu1 }
0x1e60   :  { %v7762_v45 = vpop.f32.mrb[103].mxu1  ;;  %v3138_v11 = vsel %vm1626_vm4, %v3137_v16, -inf }
0x1e61   :  { %3139 = vmax.xlane.f32.xlu1 %v3138_v11 }
0x1e72   :  { %3151 = vrot.lane.b32.xlu1 %v8764_v58, %s8445_s24 }
0x1e76   :  { %3240 = vrot.lane.b32.xlu1 %v9206_v24, %s8446_s25 }
0x1e7a   :  { %3352 = vrot.lane.b32.xlu1 %v8696_v3, %s8447_s26 }
0x1e9e   :  { %3074 = vmax.xlane.f32.xlu1 %v3073_v56 }
0x1eee   :  { %v3140_v2 = vpop.xlane.xlu1 %3139 }
0x1eef   :  { %v3141_v29 = vsub.f32 %v3137_v16, %v3140_v2 }
0x1ef1   :  { %v3142_v14 = vmul.f32 1.442695, %v3141_v29 }
0x1ef2   :  { %v3152_v13 = vpop.permute.xlu1 %3151 }
0x1ef3   :  { %8297 = vpow2.f32 %v3142_v14  ;;  %7764 = vmatpush3.bf16.msra.mxu0 %v3152_v13 }
0x1ef4   :  { %7775 = vmatprep.subr.bf16.mxu0 %v8439_v61 }
0x1ef6   :  { %v3241_v35 = vpop.permute.xlu1 %3240 }
0x1efa   :  { %v3353_v33 = vpop.permute.xlu1 %3352 }
0x1efd   :  { %v8298_v15 = vpop.eup %8297 }
0x1efe   :  { %v3144_v6 = vsel %vm1626_vm4, %v8298_v15, 0.0 }
0x1eff   :  { %3145 = vadd.xlane.f32.xlu0 %v3144_v6 }
0x1f15   :  { %3242 = vrot.lane.b32.xlu0 %v8696_v3, %s8446_s25 }
0x1f19   :  { %3350 = vrot.lane.b32.xlu0 %v9206_v24, %s8447_s26  ;;  %v3358_v24 = vsel %vm545_vm2, %v3353_v33, 0 }
0x1f2b   :  { %v3075_v18 = vpop.xlane.xlu1 %3074 }
0x1f2c   :  { %v3076_v62 = vsub.f32 %v3072_v10, %v3075_v18 }
0x1f2e   :  { %v3077_v20 = vmul.f32 1.442695, %v3076_v62 }
0x1f30   :  { %8299 = vpow2.f32 %v3077_v20 }
0x1f3a   :  { %v8300_v5 = vpop.eup %8299 }
0x1f3b   :  { %v3079_v42 = vsel %vm1626_vm4, %v8300_v5, 0.0 }
0x1f3c   :  { %3080 = vadd.xlane.f32.xlu1 %v3079_v42 }
0x1f8c   :  { %v3146_v23 = vpop.xlane.xlu0 %3145 }
0x1f8d   :  { %8301 = vrcp.f32 %v3146_v23 }
0x1f90   :  { %v3243_v41 = vpop.permute.xlu0 %3242 }
0x1f91   :  { %v3248_v3 = vsel %vm545_vm2, %v3243_v41, 0 }
0x1f94   :  { %v3351_v38 = vpop.permute.xlu0 %3350 }
0x1f97   :  { %v8302_v8 = vpop.eup %8301 }
0x1f98   :  { %v3148_v9 = vmul.f32 %v8302_v8, %v8298_v15  ;;  %v7123_v8 = vld [vmem:[%s10033_s14 + $0x8] ss:$0 sm:$0xff] }
0x1f9a   :  { %v3149_v34 = vpack.c.bf16 %v3148_v9, %v3148_v9  ;;  %v3464_v9 = vadd.f32 %v7123_v8, %v9244_v12 }
0x1f9c   :  { %7766 = vmatmul.mubr.msk.bf16.vlgmr.msra.gmra.mrb[104].mxu0 %vm1626_vm4, %v3149_v34  ;;  %v3466_v41 = vadd.f32 %v3464_v9, %v9142_v47 }
0x1f9d   :  { %7776 = vmatpush3.bf16.xpose.msra.mxu0 %v3248_v3  ;;  %7777 = vmatprep.mubr.msk.bf16.mxu0 %vm8440_vm1, %v8439_v61 }
0x1f9e   :  { %7787 = vmatprep.subr.bf16.mxu0 %v8439_v61  ;;  %v3470_v34 = vsel %vm98_vm0, %v3466_v41, 0.0 }
0x1fa4   :  { %7778 = vmatmul.mubr.msk.bf16.vlgmr.msra.gmra.mrb[108].mxu0 %vm545_vm2, %v3241_v35 }
0x1fa5   :  { %7788 = vmatpush3.bf16.xpose.msra.mxu0 %v3358_v24  ;;  %7789 = vmatprep.mubr.msk.bf16.mxu0 %vm8440_vm1, %v8439_v61 }
0x1fa6   :  { %7799 = vmatprep.subr.bf16.mxu0 %v8439_v61 }
0x1fac   :  { %7790 = vmatmul.mubr.msk.bf16.vlgmr.msra.gmra.mrb[112].mxu0 %vm545_vm2, %v3351_v38 }
0x1fad   :  { %7803 = vmatprep.mubr.msk.bf16.mxu0 %vm8440_vm1, %v8439_v61 }
0x1fc9   :  { %v3081_v19 = vpop.xlane.xlu1 %3080 }
0x1fca   :  { %8303 = vrcp.f32 %v3081_v19 }
0x1fd4   :  { %v8304_v17 = vpop.eup %8303 }
0x1fd5   :  { %v3083_v7 = vmul.f32 %v8304_v17, %v8300_v5 }
0x1fd7   :  { %v3084_v27 = vpack.c.bf16 %v3083_v7, %v3083_v7 }
0x1fd9   :  { %7772 = vmatmul.mubr.msk.bf16.vlgmr.msra.gmra.mrb[104].mxu1 %vm1626_vm4, %v3084_v27 }
0x1fda   :  { %7783 = vmatprep.mubr.msk.bf16.mxu1 %vm8440_vm1, %v8439_v61 }
0x206f   :  { %v3191_v31 = vpop.f32.mrb[104].mxu0 }
0x2070   :  { %v7767_v40 = vpop.f32.mrb[105].mxu0 }
0x2071   :  { %v3194_v43 = vpop.f32.mrb[106].mxu0 }
0x2072   :  { %v7768_v28 = vpop.f32.mrb[107].mxu0 }
0x2077   :  { %v3284_v53 = vpop.f32.mrb[108].mxu0 }
0x2078   :  { %v3290_v39 = vmul.f32 0.35355338, %v3284_v53  ;;  %v7779_v51 = vpop.f32.mrb[109].mxu0 }
0x2079   :  { %v3287_v49 = vpop.f32.mrb[110].mxu0 }
0x207a   :  { %v7780_v22 = vpop.f32.mrb[111].mxu0  ;;  %v3291_v54 = vsel %vm1626_vm4, %v3290_v39, -inf }
0x207b   :  { %3292 = vmax.xlane.f32.xlu0 %v3291_v54 }
0x207f   :  { %v3394_v16 = vpop.f32.mrb[112].mxu0 }
0x2080   :  { %v3400_v55 = vmul.f32 0.35355338, %v3394_v16  ;;  %v7791_v4 = vpop.f32.mrb[113].mxu0 }
0x2081   :  { %v3397_v45 = vpop.f32.mrb[114].mxu0 }
0x2082   :  { %v7792_v11 = vpop.f32.mrb[115].mxu0  ;;  %v3401_v10 = vsel %vm1626_vm4, %v3400_v55, -inf }
0x2083   :  { %3402 = vmax.xlane.f32.xlu0 %v3401_v10 }
0x20ac   :  { %v3234_v56 = vpop.f32.mrb[104].mxu1 }
0x20ad   :  { %v3235_v2 = vadd.f32 %v3234_v56, %v3191_v31  ;;  %v7773_v29 = vpop.f32.mrb[105].mxu1 }
0x20ae   :  { %v3237_v14 = vpop.f32.mrb[106].mxu1 }
0x20af   :  { %v7774_v13 = vpop.f32.mrb[107].mxu1 }
0x2108   :  { %v3293_v15 = vpop.xlane.xlu0 %3292 }
0x2109   :  { %v3294_v6 = vsub.f32 %v3290_v39, %v3293_v15 }
0x210b   :  { %v3295_v35 = vmul.f32 1.442695, %v3294_v6 }
0x210d   :  { %8305 = vpow2.f32 %v3295_v35  ;;  %v8187_v35 = vld [vmem:[%s10038_s11] sm:$0xff]  }
0x210e   :  { %7800 = vmatpush3.bf16.msra.mxu0 %v8187_v35 }
0x210f   :  { %7801 = vmatprep.subr.bf16.mxu0 %v8439_v61 }
0x2110   :  { %v3403_v33 = vpop.xlane.xlu0 %3402 }
0x2111   :  { %v3404_v18 = vsub.f32 %v3400_v55, %v3403_v33  ;;  %v8189_v33 = vld [vmem:[%s10039_s13] sm:$0xff]  }
0x2113   :  { %v3405_v62 = vmul.f32 1.442695, %v3404_v18  ;;  %v8190_v18 = vld [vmem:[%s10039_s13 + $0x8] sm:$0xff]  }
0x2115   :  { %8307 = vpow2.f32 %v3405_v62 }
0x2117   :  { %v8306_v20 = vpop.eup %8305 }
0x2118   :  { %v3297_v5 = vsel %vm1626_vm4, %v8306_v20, 0.0 }
0x2119   :  { %3298 = vadd.xlane.f32.xlu0 %v3297_v5 }
0x211f   :  { %v8308_v42 = vpop.eup %8307 }
0x2120   :  { %v3407_v23 = vsel %vm1626_vm4, %v8308_v42, 0.0 }
0x2121   :  { %3408 = vadd.xlane.f32.xlu1 %v3407_v23 }
0x212f   :  { %3303 = vrot.lane.b32.xlu0 %v8764_v58, %s8448_s8 }
0x2132   :  { %3413 = vrot.lane.b32.xlu1 %v8764_v58, %s8438_s18 }
0x2156   :  { %3471 = vadd.xlane.f32.xlu1 %v3470_v34  ;;  %v7124_v34 = vld [vmem:[%s10033_s14 + $0xc] ss:$0 sm:$0xff] }
0x21a6   :  { %v3299_v3 = vpop.xlane.xlu0 %3298 }
0x21a7   :  { %8309 = vrcp.f32 %v3299_v3 }
0x21aa   :  { %v3304_v24 = vpop.permute.xlu0 %3303 }
0x21ab   :  { %7782 = vmatpush3.bf16.msra.mxu1 %v3304_v24 }
0x21ac   :  { %7793 = vmatprep.subr.bf16.mxu1 %v8439_v61 }
0x21ae   :  { %v3409_v38 = vpop.xlane.xlu1 %3408 }
0x21af   :  { %8311 = vrcp.f32 %v3409_v38 }
0x21b1   :  { %v8310_v58 = vpop.eup %8309 }
0x21b2   :  { %v3301_v19 = vmul.f32 %v8310_v58, %v8306_v20  ;;  %v3414_v7 = vpop.permute.xlu1 %3413  ;;  %v7125_v58 = vld [vmem:[%s10033_s14 + $0x10] ss:$0 sm:$0xff] }
0x21b4   :  { %v3302_v17 = vpack.c.bf16 %v3301_v19, %v3301_v19 }
0x21b6   :  { %7784 = vmatmul.mubr.msk.bf16.vlgmr.msra.gmra.mrb[108].mxu1 %vm1626_vm4, %v3302_v17 }
0x21b7   :  { %7794 = vmatpush3.bf16.msra.mxu1 %v3414_v7  ;;  %7795 = vmatprep.mubr.msk.bf16.mxu1 %vm8440_vm1, %v8439_v61 }
0x21b8   :  { %7807 = vmatprep.subr.bf16.mxu1 %v8439_v61 }
0x21b9   :  { %v8312_v47 = vpop.eup %8311 }
0x21ba   :  { %v3411_v12 = vmul.f32 %v8312_v47, %v8308_v42 }
0x21bc   :  { %v3412_v27 = vpack.c.bf16 %v3411_v12, %v3411_v12  ;;  %v8191_v12 = vld [vmem:[%s10039_s13 + $0x10] sm:$0xff]  }
0x21be   :  { %7796 = vmatmul.mubr.msk.bf16.vlgmr.msra.gmra.mrb[112].mxu1 %vm1626_vm4, %v3412_v27  ;;  %v8192_v27 = vld [vmem:[%s10039_s13 + $0x18] sm:$0xff]  }
0x21bf   :  { %7815 = vmatprep.mubr.msk.bf16.mxu1 %vm8440_vm1, %v8439_v61  ;;  %7808 = vmatpush3.bf16.msra.mxu1 %v8189_v33 }
0x21c0   :  { %7809 = vmatprep.subr.bf16.mxu1 %v8439_v61 }
0x21c3   :  { %7810 = vmatpush3.bf16.msra.mxu1 %v8190_v18 }
0x21c4   :  { %7811 = vmatprep.subr.bf16.mxu1 %v8439_v61 }
0x21c7   :  { %7812 = vmatpush3.bf16.msra.mxu1 %v8191_v12 }
0x21c8   :  { %7813 = vmatprep.subr.bf16.mxu1 %v8439_v61 }
0x21cb   :  { %7814 = vmatpush3.bf16.msra.mxu1 %v8192_v27 }
0x21cc   :  { %7825 = vmatprep.subr.bf16.mxu1 %v8439_v61 }
0x21e3   :  { %v3472_v39 = vpop.xlane.xlu1 %3471 }
0x21e4   :  { %v3476_v51 = vmul.f32 0.03125, %v3472_v39 }
0x21e6   :  { %v3478_v55 = vsub.f32 %v3466_v41, %v3476_v51 }
0x21e8   :  { %v3480_v56 = vmul.f32 %v3478_v55, %v3478_v55 }
0x2289   :  { %v3343_v31 = vpop.f32.mrb[108].mxu1 }
0x228a   :  { %v3349_v40 = vadd.f32 %v3343_v31, %v3235_v2  ;;  %v7785_v43 = vpop.f32.mrb[109].mxu1  ;;  %v3482_v2 = vsel %vm98_vm0, %v3480_v56, 0.0  ;;  %v7126_v31 = vld [vmem:[%s10040_s12] ss:$0 sm:$0xff] }
0x228b   :  { %v3346_v28 = vpop.f32.mrb[110].mxu1 }
0x228c   :  { %v7786_v53 = vpop.f32.mrb[111].mxu1 }
0x2291   :  { %v3453_v49 = vpop.f32.mrb[112].mxu1 }
0x2292   :  { %v3459_v22 = vadd.f32 %v3453_v49, %v3349_v40  ;;  %v7797_v54 = vpop.f32.mrb[113].mxu1 }
0x2293   :  { %v3456_v16 = vpop.f32.mrb[114].mxu1  ;;  %v7130_v54 = vld [vmem:[%s10033_s14 + $0x9] ss:$0 sm:$0xff] }
0x2294   :  { %v3465_v4 = vadd.f32 %v7123_v8, %v3459_v22  ;;  %v7798_v45 = vpop.f32.mrb[115].mxu1 }
0x2296   :  { %v3467_v11 = vadd.f32 %v3465_v4, %v9144_v30  ;;  %v8188_v30 = vld [vmem:[%s10038_s11 + $0x8] sm:$0xff]  }
0x2297   :  { %7802 = vmatpush3.bf16.msra.mxu0 %v8188_v30 }
0x2298   :  { %v3473_v10 = vsel %vm98_vm0, %v3467_v11, 0.0 }
0x2299   :  { %3474 = vadd.xlane.f32.xlu0 %v3473_v10 }
0x229d   :  { %3483 = vadd.xlane.f32.xlu0 %v3482_v2 }
0x2326   :  { %v3475_v29 = vpop.xlane.xlu0 %3474 }
0x2327   :  { %v3477_v14 = vmul.f32 0.03125, %v3475_v29 }
0x2329   :  { %v3479_v13 = vsub.f32 %v3467_v11, %v3477_v14 }
0x232a   :  { %v3484_v62 = vpop.xlane.xlu0 %3483 }
0x232b   :  { %v3481_v15 = vmul.f32 %v3479_v13, %v3479_v13  ;;  %v3488_v20 = vmul.f32 0.03125, %v3484_v62 }
0x232d   :  { %v3485_v6 = vsel %vm98_vm0, %v3481_v15, 0.0  ;;  %v3490_v5 = vadd.f32 1e-05, %v3488_v20 }
0x232e   :  { %3486 = vadd.xlane.f32.xlu1 %v3485_v6 }
0x232f   :  { %8313 = vrsqrt.f32 %v3490_v5 }
0x2339   :  { %v8314_v9 = vpop.eup %8313 }
0x233a   :  { %v3494_v41 = vmul.f32 %v8314_v9, %v3478_v55  ;;  %v8198_v9 = vld [vmem:[%s10032_s5 + $0x34] ss:$8 sps:$4 sm:$0xff]  }
0x233c   :  { %v3500_v24 = vmul.f32 %v7124_v34, %v3494_v41  ;;  %v7148_v41 = vld [vmem:[%s10033_s14 + $0x13] ss:$0 sm:$0xff] }
0x233e   :  { %v3506_v17 = vadd.f32 %v7125_v58, %v3500_v24 }
0x23bb   :  { %v3487_v42 = vpop.xlane.xlu1 %3486 }
0x23bc   :  { %v3489_v23 = vmul.f32 0.03125, %v3487_v42  ;;  %v8195_v42 = vld [vmem:[%s10032_s5 + $0x24] ss:$8 sps:$4 sm:$0xff]  }
0x23bd   :  { %3732 = vmatprep.subr.bf16.mxu0 %v8195_v42 }
0x23be   :  { %v3491_v8 = vadd.f32 1e-05, %v3489_v23  ;;  %v8193_v23 = vld [vmem:[%s10032_s5 + $0x20] ss:$8 sps:$4 sm:$0xff]  }
0x23c0   :  { %8315 = vrsqrt.f32 %v3491_v8  ;;  %v8196_v8 = vld [vmem:[%s10032_s5 + $0x30] ss:$8 sps:$4 sm:$0xff]  }
0x23ca   :  { %v8316_v3 = vpop.eup %8315 }
0x23cb   :  { %v3495_v38 = vmul.f32 %v8316_v3, %v3479_v13 }
0x23cd   :  { %v3501_v19 = vmul.f32 %v7124_v34, %v3495_v38 }
0x23cf   :  { %v3507_v7 = vadd.f32 %v7125_v58, %v3501_v19 }
0x23d1   :  { %v3508_v47 = vpack.c.bf16 %v3507_v7, %v3506_v17 }
0x23d3   :  { %7804 = vmatmul.mubr.msk.bf16.vlgmr.msra.gmra.mrb[116].mxu0 %vm98_vm0, %v3508_v47 }
0x23d4   :  { %3764 = vmatprep.mubr.bf16.mxu0 %v8437_v1  ;;  %3733 = vmatpush1.bf16.msra.mxu0 %v8193_v23 }
0x23d5   :  { %3734 = vmatprep.subr.bf16.mxu0 %v8198_v9 }
0x23d8   :  { %3735 = vmatpush1.bf16.msra.mxu0 %v8196_v8 }
0x23d9   :  { %7819 = vmatprep.subr.bf16.mxu0 %v8439_v61 }
0x24a6   :  { %v3569_v40 = vpop.f32.mrb[116].mxu0 }
0x24a7   :  { %v3570_v1 = vadd.f32 %v7126_v31, %v3569_v40  ;;  %v7805_v43 = vpop.f32.mrb[117].mxu0  ;;  %v7137_v40 = vld [vmem:[%s10033_s14 + $0x11] ss:$0 sm:$0xff] }
0x24a8   :  { %v3572_v28 = vpop.f32.mrb[118].mxu0 }
0x24a9   :  { %v3573_v53 = vadd.f32 %v7126_v31, %v3572_v28  ;;  %v7806_v39 = vpop.f32.mrb[119].mxu0  ;;  %v3576_v51 = vmax.f32 %v3570_v1, 0.0 }
0x24ab   :  { %v3577_v49 = vmax.f32 %v3573_v53, 0.0 }
0x24ad   :  { %v3578_v22 = vpack.c.bf16 %v3577_v49, %v3576_v51 }
0x24af   :  { %7816 = vmatmul.mubr.msk.bf16.vlgmr.msra.gmra.mrb[116].mxu1 %vm3616_vm5, %v3578_v22 }
0x24b0   :  { %7827 = vmatprep.mubr.msk.bf16.mxu1 %vm8440_vm1, %v8439_v61 }
0x2582   :  { %v3654_v16 = vpop.f32.mrb[116].mxu1 }
0x2583   :  { %v3655_v55 = vadd.f32 %v7130_v54, %v3654_v16  ;;  %v7817_v4 = vpop.f32.mrb[117].mxu1 }
0x2584   :  { %v3657_v45 = vpop.f32.mrb[118].mxu1 }
0x2585   :  { %v3661_v11 = vadd.f32 %v3655_v55, %v3506_v17  ;;  %v3658_v10 = vadd.f32 %v7130_v54, %v3657_v45  ;;  %v7818_v56 = vpop.f32.mrb[119].mxu1  ;;  %v7147_v54 = vld [vmem:[%s10033_s14 + $0x12] ss:$0 sm:$0xff] }
0x2587   :  { %v3662_v2 = vadd.f32 %v3658_v10, %v3507_v7  ;;  %v3665_v29 = vsel %vm98_vm0, %v3661_v11, 0.0  ;;  %v7136_v7 = vld [vmem:[%s10033_s14 + $0xd] ss:$0 sm:$0xff] }
0x2588   :  { %3666 = vadd.xlane.f32.xlu0 %v3665_v29 }
0x2589   :  { %v3668_v14 = vsel %vm98_vm0, %v3662_v2, 0.0 }
0x258a   :  { %3669 = vadd.xlane.f32.xlu1 %v3668_v14 }
0x2615   :  { %v3667_v13 = vpop.xlane.xlu0 %3666 }
0x2616   :  { %v3671_v15 = vmul.f32 0.03125, %v3667_v13 }
0x2617   :  { %v3670_v6 = vpop.xlane.xlu1 %3669 }
0x2618   :  { %v3673_v35 = vsub.f32 %v3661_v11, %v3671_v15  ;;  %v3672_v30 = vmul.f32 0.03125, %v3670_v6 }
0x261a   :  { %v3674_v33 = vsub.f32 %v3662_v2, %v3672_v30  ;;  %v3675_v18 = vmul.f32 %v3673_v35, %v3673_v35 }
0x261c   :  { %v3677_v62 = vsel %vm98_vm0, %v3675_v18, 0.0  ;;  %v3676_v20 = vmul.f32 %v3674_v33, %v3674_v33 }
0x261d   :  { %3678 = vadd.xlane.f32.xlu0 %v3677_v62 }
0x261e   :  { %v3680_v5 = vsel %vm98_vm0, %v3676_v20, 0.0 }
0x261f   :  { %3681 = vadd.xlane.f32.xlu1 %v3680_v5 }
0x2633   :  { %3790 = vrot.lane.b32.xlu0 %v7148_v41, %s8438_s18 }
0x26aa   :  { %v3679_v34 = vpop.xlane.xlu0 %3678 }
0x26ab   :  { %v3683_v3 = vmul.f32 0.03125, %v3679_v34 }
0x26ac   :  { %v3682_v24 = vpop.xlane.xlu1 %3681 }
0x26ad   :  { %v3685_v38 = vadd.f32 1e-05, %v3683_v3  ;;  %v3684_v58 = vmul.f32 0.03125, %v3682_v24 }
0x26ae   :  { %v9380_v51 = vpop.permute.xlu0 %3790 }
0x26af   :  { %8317 = vrsqrt.f32 %v3685_v38  ;;  %v3686_v19 = vadd.f32 1e-05, %v3684_v58 }
0x26b1   :  { %8319 = vrsqrt.f32 %v3686_v19 }
0x26b9   :  { %v8318_v17 = vpop.eup %8317 }
0x26ba   :  { %v3689_v47 = vmul.f32 %v8318_v17, %v3673_v35 }
0x26bb   :  { %v8320_v12 = vpop.eup %8319 }
0x26bc   :  { %v3695_v27 = vmul.f32 %v7136_v7, %v3689_v47  ;;  %v3690_v31 = vmul.f32 %v8320_v12, %v3674_v33 }
0x26be   :  { %v3696_v1 = vmul.f32 %v7136_v7, %v3690_v31  ;;  %v9371_v43 = vadd.f32 %v7137_v40, %v3695_v27 }
0x26c0   :  { %v9373_v28 = vadd.f32 %v7137_v40, %v3696_v1 }
0x26c2   :  { %v3703_v53 = vpack.c.bf16 %v9373_v28, %v9371_v43 }
0x26c4   :  { %7146 = vmatmul.mubr.msk.bf16.vlgmr.msra.gmra.mrb[120].mxu0 %vm98_vm0, %v3703_v53 }
0x26c5   :  { %7821 = vmatprep.mubr.msk.bf16.mxu0 %vm8440_vm1, %v8439_v61 }
0x2797   :  { %v3766_v39 = vpop.f32.mrb[120].mxu0 }
0x2798   :  { %v3775_v49 = vadd.f32 %v3766_v39, %v8658_v44  ;;  %v9383_v22 = vpop.f32.mrb[121].mxu0  ;;  %v9417_v41 = vpack.c.bf16 %v3766_v39, %v3766_v39 }
0x2799   :  { %v9388_v16 = vpop.f32.mrb[122].mxu0 }
0x279a   :  { %v3793_v55 = vadd.f32 %v9380_v51, %v3775_v49  ;;  %v9393_v4 = vadd.f32 %v9388_v16, %v8662_v46  ;;  %v9395_v45 = vpop.f32.mrb[123].mxu0  ;;  %v3782_v11 = vadd.f32 %v7147_v54, %v3775_v49 }
0x279c   :  { %v3797_v10 = vpack.c.bf16 %v3793_v55, %v3793_v55  ;;  %v9398_v56 = vadd.f32 %v7147_v54, %v9393_v4  ;;  %v3796_v2 = vpack.c.bf16 %v3782_v11, %v3782_v11 }
0x279e   :  { %3864 = vrot.lane.b32.xlu1 %v3797_v10, %s8441_s1 }
0x27a2   :  { %3862 = vrot.lane.b32.xlu1 %v3796_v2, %s8442_s0 }
0x2810   :  { %v3865_v29 = vpop.permute.xlu1 %3864 }
0x2811   :  { %v3870_v14 = vsel %vm545_vm2, %v3865_v29, 0 }
0x2812   :  { %7826 = vmatpush3.bf16.xpose.msra.mxu1 %v3870_v14 }
0x2813   :  { %7837 = vmatprep.subr.bf16.mxu1 %v8439_v61 }
0x2814   :  { %v3863_v13 = vpop.permute.xlu1 %3862 }
0x2819   :  { %7828 = vmatmul.mubr.msk.bf16.vlgmr.msra.gmra.mrb[120].mxu1 %vm545_vm2, %v3863_v13 }
0x281a   :  { %7839 = vmatprep.mubr.msk.bf16.mxu1 %vm8440_vm1, %v8439_v61 }
0x28ec   :  { %v3906_v15 = vpop.f32.mrb[120].mxu1 }
0x28ed   :  { %v3912_v6 = vmul.f32 0.35355338, %v3906_v15  ;;  %v7829_v35 = vpop.f32.mrb[121].mxu1 }
0x28ee   :  { %v3909_v30 = vpop.f32.mrb[122].mxu1 }
0x28ef   :  { %v7830_v33 = vpop.f32.mrb[123].mxu1  ;;  %v3913_v18 = vsel %vm545_vm2, %v3912_v6, -inf }
0x28f0   :  { %3914 = vmax.xlane.f32.xlu0 %v3913_v18 }
0x2906   :  { %3800 = vrot.lane.b32.xlu0 %v3797_v10, %s8445_s24 }
0x290a   :  { %4025 = vrot.lane.b32.xlu0 %v3797_v10, %s8443_s23 }
0x290e   :  { %4135 = vrot.lane.b32.xlu0 %v3797_v10, %s8444_s9 }
0x297d   :  { %v3915_v62 = vpop.xlane.xlu0 %3914 }
0x297e   :  { %v3916_v20 = vsub.f32 %v3912_v6, %v3915_v62 }
0x2980   :  { %v3917_v5 = vmul.f32 1.442695, %v3916_v20 }
0x2981   :  { %v3801_v42 = vpop.permute.xlu0 %3800 }
0x2982   :  { %8321 = vpow2.f32 %v3917_v5  ;;  %v3806_v23 = vsel %vm545_vm2, %v3801_v42, 0 }
0x2983   :  { %7820 = vmatpush3.bf16.xpose.msra.mxu0 %v3806_v23 }
0x2984   :  { %7831 = vmatprep.subr.bf16.mxu0 %v8439_v61 }
0x2985   :  { %v4026_v19 = vpop.permute.xlu0 %4025 }
0x2986   :  { %v4031_v7 = vsel %vm545_vm2, %v4026_v19, 0 }
0x2989   :  { %v4136_v47 = vpop.permute.xlu0 %4135 }
0x298a   :  { %7822 = vmatmul.mubr.msk.bf16.vlgmr.msra.gmra.mrb[124].mxu0 %vm545_vm2, %v3796_v2  ;;  %v4141_v27 = vsel %vm545_vm2, %v4136_v47, 0 }
0x298b   :  { %7833 = vmatprep.mubr.msk.bf16.mxu0 %vm8440_vm1, %v8439_v61 }
0x298c   :  { %v8322_v8 = vpop.eup %8321 }
0x298d   :  { %v3919_v9 = vsel %vm545_vm2, %v8322_v8, 0.0 }
0x298e   :  { %3920 = vadd.xlane.f32.xlu1 %v3919_v9 }
0x299f   :  { %3926 = vrot.lane.b32.xlu1 %v9417_v41, %s8438_s18 }
0x29a3   :  { %4023 = vrot.lane.b32.xlu1 %v3796_v2, %s8446_s25 }
0x29a7   :  { %4133 = vrot.lane.b32.xlu1 %v3796_v2, %s8447_s26 }
0x2a1b   :  { %v3921_v34 = vpop.xlane.xlu1 %3920 }
0x2a1c   :  { %8323 = vrcp.f32 %v3921_v34 }
0x2a1f   :  { %v3927_v3 = vpop.permute.xlu1 %3926 }
0x2a20   :  { %v3932_v24 = vsel %vm675_vm3, %v3927_v3, 0 }
0x2a21   :  { %7832 = vmatpush3.bf16.msra.mxu0 %v3932_v24 }
0x2a22   :  { %7843 = vmatprep.subr.bf16.mxu0 %v8439_v61 }
0x2a23   :  { %v4024_v12 = vpop.permute.xlu1 %4023 }
0x2a26   :  { %v8324_v38 = vpop.eup %8323 }
0x2a27   :  { %v3923_v58 = vmul.f32 %v8324_v38, %v8322_v8  ;;  %v4134_v31 = vpop.permute.xlu1 %4133 }
0x2a29   :  { %v3924_v17 = vpack.c.bf16 %v3923_v58, %v3923_v58 }
0x2a2b   :  { %7834 = vmatmul.mubr.msk.bf16.vlgmr.msra.gmra.mrb[128].mxu0 %vm545_vm2, %v3924_v17 }
0x2a2c   :  { %7844 = vmatpush3.bf16.xpose.msra.mxu0 %v4031_v7  ;;  %7845 = vmatprep.mubr.msk.bf16.mxu0 %vm8440_vm1, %v8439_v61 }
0x2a2d   :  { %7855 = vmatprep.subr.bf16.mxu0 %v8439_v61 }
0x2a33   :  { %7846 = vmatmul.mubr.msk.bf16.vlgmr.msra.gmra.mrb[132].mxu0 %vm545_vm2, %v4024_v12 }
0x2a34   :  { %7856 = vmatpush3.bf16.xpose.msra.mxu0 %v4141_v27  ;;  %7857 = vmatprep.mubr.msk.bf16.mxu0 %vm8440_vm1, %v8439_v61 }
0x2a35   :  { %7867 = vmatprep.subr.bf16.mxu0 %v8439_v61 }
0x2a3b   :  { %7858 = vmatmul.mubr.msk.bf16.vlgmr.msra.gmra.mrb[136].mxu0 %vm545_vm2, %v4134_v31  ;;  %v3794_v31 = vadd.f32 %v9380_v51, %v9393_v4 }
0x2a3c   :  { %7869 = vmatprep.mubr.msk.bf16.mxu0 %vm8440_vm1, %v8439_v61 }
0x2a5d   :  { %v3842_v40 = vpop.f32.mrb[124].mxu0 }
0x2a5e   :  { %v3848_v1 = vmul.f32 0.35355338, %v3842_v40  ;;  %v7823_v53 = vpop.f32.mrb[125].mxu0  ;;  %v9450_v40 = vpack.c.bf16 %v3794_v31, %v3794_v31 }
0x2a5f   :  { %v3845_v39 = vpop.f32.mrb[126].mxu0  ;;  %v4022_v53 = vpack.c.bf16 %v9383_v22, %v9383_v22 }
0x2a60   :  { %v7824_v49 = vpop.f32.mrb[127].mxu0  ;;  %v3849_v54 = vsel %vm545_vm2, %v3848_v1, -inf }
0x2a61   :  { %3850 = vmax.xlane.f32.xlu0 %v3849_v54 }
0x2aee   :  { %v3851_v55 = vpop.xlane.xlu0 %3850 }
0x2aef   :  { %v3852_v2 = vsub.f32 %v3848_v1, %v3851_v55  ;;  %v9456_v1 = vpack.c.bf16 %v9398_v56, %v9398_v56 }
0x2af1   :  { %v3853_v13 = vmul.f32 1.442695, %v3852_v2 }
0x2af3   :  { %8325 = vpow2.f32 %v3853_v13 }
0x2afd   :  { %v8326_v9 = vpop.eup %8325 }
0x2afe   :  { %v9439_v11 = vpop.f32.mrb[128].mxu0  ;;  %v3855_v34 = vsel %vm545_vm2, %v8326_v9, 0.0 }
0x2aff   :  { %v7835_v10 = vpop.f32.mrb[129].mxu0 }
0x2b00   :  { %v3971_v29 = vpop.f32.mrb[130].mxu0  ;;  %v4090_v10 = vsel %vm675_vm3, %v4022_v53, 0 }
0x2b01   :  { %v7836_v14 = vpop.f32.mrb[131].mxu0 }
0x2b06   :  { %v4067_v15 = vpop.f32.mrb[132].mxu0 }
0x2b07   :  { %v4073_v6 = vmul.f32 0.35355338, %v4067_v15  ;;  %v7847_v35 = vpop.f32.mrb[133].mxu0 }
0x2b08   :  { %v4070_v30 = vpop.f32.mrb[134].mxu0 }
0x2b09   :  { %v7848_v33 = vpop.f32.mrb[135].mxu0  ;;  %v4074_v18 = vsel %vm545_vm2, %v4073_v6, -inf }
0x2b0a   :  { %4075 = vmax.xlane.f32.xlu1 %v4074_v18 }
0x2b0e   :  { %v4177_v62 = vpop.f32.mrb[136].mxu0 }
0x2b0f   :  { %v4183_v20 = vmul.f32 0.35355338, %v4177_v62  ;;  %v7859_v5 = vpop.f32.mrb[137].mxu0 }
0x2b10   :  { %v4180_v42 = vpop.f32.mrb[138].mxu0 }
0x2b11   :  { %v7860_v23 = vpop.f32.mrb[139].mxu0  ;;  %v4184_v8 = vsel %vm545_vm2, %v4183_v20, -inf }
0x2b12   :  { %4185 = vmax.xlane.f32.xlu0 %v4184_v8 }
0x2b16   :  { %3856 = vadd.xlane.f32.xlu0 %v3855_v34 }
0x2b97   :  { %v4076_v3 = vpop.xlane.xlu1 %4075 }
0x2b98   :  { %v4077_v24 = vsub.f32 %v4073_v6, %v4076_v3 }
0x2b9a   :  { %v4078_v38 = vmul.f32 1.442695, %v4077_v24 }
0x2b9c   :  { %8327 = vpow2.f32 %v4078_v38 }
0x2b9f   :  { %v4186_v58 = vpop.xlane.xlu0 %4185 }
0x2ba0   :  { %v4187_v19 = vsub.f32 %v4183_v20, %v4186_v58 }
0x2ba2   :  { %v4188_v17 = vmul.f32 1.442695, %v4187_v19 }
0x2ba3   :  { %v3857_v51 = vpop.xlane.xlu0 %3856 }
0x2ba4   :  { %8329 = vpow2.f32 %v4188_v17 }
0x2ba5   :  { %8331 = vrcp.f32 %v3857_v51 }
0x2ba6   :  { %v8328_v7 = vpop.eup %8327 }
0x2ba7   :  { %v4080_v47 = vsel %vm545_vm2, %v8328_v7, 0.0 }
0x2ba8   :  { %4081 = vadd.xlane.f32.xlu1 %v4080_v47 }
0x2bae   :  { %v8330_v12 = vpop.eup %8329 }
0x2baf   :  { %v4190_v27 = vsel %vm545_vm2, %v8330_v12, 0.0  ;;  %v8332_v4 = vpop.eup %8331 }
0x2bb0   :  { %4191 = vadd.xlane.f32.xlu0 %v4190_v27  ;;  %v3859_v39 = vmul.f32 %v8332_v4, %v8326_v9 }
0x2bb2   :  { %v3860_v56 = vpack.c.bf16 %v3859_v39, %v3859_v39 }
0x2bb9   :  { %3974 = vrot.lane.b32.xlu1 %v9417_v41, %s8448_s8 }
0x2bbd   :  { %4314 = vrot.lane.b32.xlu1 %v9450_v40, %s8441_s1 }
0x2bc1   :  { %4312 = vrot.lane.b32.xlu1 %v9456_v1, %s8442_s0 }
0x2bc6   :  { %4197 = vrot.lane.b32.xlu0 %v4022_v53, %s8445_s24 }
0x2c35   :  { %v4082_v41 = vpop.xlane.xlu1 %4081 }
0x2c36   :  { %8333 = vrcp.f32 %v4082_v41 }
0x2c39   :  { %v3975_v49 = vpop.permute.xlu1 %3974 }
0x2c3a   :  { %v3980_v54 = vsel %vm675_vm3, %v3975_v49, 0 }
0x2c3b   :  { %7838 = vmatpush3.bf16.msra.mxu1 %v3980_v54 }
0x2c3c   :  { %7849 = vmatprep.subr.bf16.mxu1 %v8439_v61 }
0x2c3d   :  { %v4192_v55 = vpop.xlane.xlu0 %4191  ;;  %v4315_v30 = vpop.permute.xlu1 %4314 }
0x2c3e   :  { %8335 = vrcp.f32 %v4192_v55  ;;  %7840 = vmatmul.mubr.msk.bf16.vlgmr.msra.gmra.mrb[124].mxu1 %vm545_vm2, %v3860_v56  ;;  %v4320_v33 = vsel %vm545_vm2, %v4315_v30, 0 }
0x2c3f   :  { %7850 = vmatpush3.bf16.msra.mxu1 %v4090_v10  ;;  %7851 = vmatprep.mubr.msk.bf16.mxu1 %vm8440_vm1, %v8439_v61 }
0x2c40   :  { %v8334_v22 = vpop.eup %8333  ;;  %7861 = vmatprep.subr.bf16.mxu1 %v8439_v61 }
0x2c41   :  { %v4084_v2 = vmul.f32 %v8334_v22, %v8328_v7  ;;  %v4198_v29 = vpop.permute.xlu0 %4197  ;;  %v4313_v18 = vpop.permute.xlu1 %4312 }
0x2c42   :  { %v4203_v13 = vsel %vm675_vm3, %v4198_v29, 0 }
0x2c43   :  { %v4085_v14 = vpack.c.bf16 %v4084_v2, %v4084_v2 }
0x2c46   :  { %7852 = vmatmul.mubr.msk.bf16.vlgmr.msra.gmra.mrb[128].mxu1 %vm545_vm2, %v4085_v14 }
0x2c47   :  { %7862 = vmatpush3.bf16.msra.mxu1 %v4203_v13  ;;  %7863 = vmatprep.mubr.msk.bf16.mxu1 %vm8440_vm1, %v8439_v61 }
0x2c48   :  { %v8336_v15 = vpop.eup %8335  ;;  %7873 = vmatprep.subr.bf16.mxu1 %v8439_v61 }
0x2c49   :  { %v4194_v6 = vmul.f32 %v8336_v15, %v8330_v12 }
0x2c4b   :  { %v4195_v35 = vpack.c.bf16 %v4194_v6, %v4194_v6 }
0x2c4e   :  { %7864 = vmatmul.mubr.msk.bf16.vlgmr.msra.gmra.mrb[132].mxu1 %vm545_vm2, %v4195_v35 }
0x2c4f   :  { %7875 = vmatprep.mubr.msk.bf16.mxu1 %vm8440_vm1, %v8439_v61 }
0x2c50   :  { %7874 = vmatpush3.bf16.xpose.msra.mxu1 %v4320_v33 }
0x2c51   :  { %7885 = vmatprep.subr.bf16.mxu1 %v8439_v61 }
0x2c57   :  { %7876 = vmatmul.mubr.msk.bf16.vlgmr.msra.gmra.mrb[136].mxu1 %vm545_vm2, %v4313_v18 }
0x2c58   :  { %7887 = vmatprep.mubr.msk.bf16.mxu1 %vm8440_vm1, %v8439_v61 }
0x2d11   :  { %v4016_v62 = vpop.f32.mrb[124].mxu1 }
0x2d12   :  { %v4017_v20 = vadd.f32 %v4016_v62, %v9439_v11  ;;  %v7841_v5 = vpop.f32.mrb[125].mxu1 }
0x2d13   :  { %v4019_v42 = vpop.f32.mrb[126].mxu1 }
0x2d14   :  { %v7842_v23 = vpop.f32.mrb[127].mxu1 }
0x2d19   :  { %v4126_v8 = vpop.f32.mrb[128].mxu1 }
0x2d1a   :  { %v4132_v9 = vadd.f32 %v4126_v8, %v4017_v20  ;;  %v7853_v34 = vpop.f32.mrb[129].mxu1 }
0x2d1b   :  { %v4129_v3 = vpop.f32.mrb[130].mxu1 }
0x2d1c   :  { %v7854_v24 = vpop.f32.mrb[131].mxu1 }
0x2d21   :  { %v4239_v38 = vpop.f32.mrb[132].mxu1 }
0x2d22   :  { %v9484_v58 = vadd.f32 %v4239_v38, %v4132_v9  ;;  %v7865_v19 = vpop.f32.mrb[133].mxu1 }
0x2d23   :  { %v4242_v17 = vpop.f32.mrb[134].mxu1 }
0x2d24   :  { %v7866_v7 = vpop.f32.mrb[135].mxu1 }
0x2d2a   :  { %v4356_v47 = vpop.f32.mrb[136].mxu1 }
0x2d2b   :  { %v4362_v12 = vmul.f32 0.35355338, %v4356_v47  ;;  %v7877_v27 = vpop.f32.mrb[137].mxu1 }
0x2d2c   :  { %v4359_v31 = vpop.f32.mrb[138].mxu1 }
0x2d2d   :  { %v7878_v53 = vpop.f32.mrb[139].mxu1  ;;  %v4363_v11 = vsel %vm545_vm2, %v4362_v12, -inf }
0x2d2e   :  { %4364 = vmax.xlane.f32.xlu0 %v4363_v11 }
0x2d44   :  { %4250 = vrot.lane.b32.xlu0 %v9450_v40, %s8445_s24 }
0x2d48   :  { %4475 = vrot.lane.b32.xlu0 %v9450_v40, %s8443_s23 }
0x2d4c   :  { %4585 = vrot.lane.b32.xlu0 %v9450_v40, %s8444_s9  ;;  %v9502_v40 = vpack.c.bf16 %v9388_v16, %v9388_v16 }
0x2dbb   :  { %v4365_v51 = vpop.xlane.xlu0 %4364 }
0x2dbc   :  { %v4366_v4 = vsub.f32 %v4362_v12, %v4365_v51 }
0x2dbe   :  { %v4367_v41 = vmul.f32 1.442695, %v4366_v4 }
0x2dbf   :  { %v4251_v39 = vpop.permute.xlu0 %4250 }
0x2dc0   :  { %8337 = vpow2.f32 %v4367_v41  ;;  %v4256_v49 = vsel %vm545_vm2, %v4251_v39, 0 }
0x2dc1   :  { %7868 = vmatpush3.bf16.xpose.msra.mxu0 %v4256_v49 }
0x2dc2   :  { %7879 = vmatprep.subr.bf16.mxu0 %v8439_v61 }
0x2dc3   :  { %v4476_v29 = vpop.permute.xlu0 %4475 }
0x2dc4   :  { %v4481_v13 = vsel %vm545_vm2, %v4476_v29, 0 }
0x2dc8   :  { %7870 = vmatmul.mubr.msk.bf16.vlgmr.msra.gmra.mrb[140].mxu0 %vm545_vm2, %v9456_v1 }
0x2dc9   :  { %7881 = vmatprep.mubr.msk.bf16.mxu0 %vm8440_vm1, %v8439_v61 }
0x2dca   :  { %v8338_v54 = vpop.eup %8337 }
0x2dcb   :  { %v4369_v56 = vsel %vm545_vm2, %v8338_v54, 0.0 }
0x2dcc   :  { %4370 = vadd.xlane.f32.xlu1 %v4369_v56 }
0x2ddd   :  { %4376 = vrot.lane.b32.xlu1 %v9502_v40, %s8438_s18 }
0x2de1   :  { %4473 = vrot.lane.b32.xlu1 %v9456_v1, %s8446_s25 }
0x2de5   :  { %4583 = vrot.lane.b32.xlu1 %v9456_v1, %s8447_s26  ;;  %v4586_v1 = vpop.permute.xlu0 %4585 }
0x2de6   :  { %v4591_v6 = vsel %vm545_vm2, %v4586_v1, 0  ;;  %v9541_v1 = vld [vmem:[%s10033_s14 + $0x14] ss:$0 sm:$0xff] }
0x2e59   :  { %v4371_v55 = vpop.xlane.xlu1 %4370 }
0x2e5a   :  { %8339 = vrcp.f32 %v4371_v55 }
0x2e5d   :  { %v4377_v10 = vpop.permute.xlu1 %4376 }
0x2e5e   :  { %v4382_v22 = vsel %vm675_vm3, %v4377_v10, 0 }
0x2e5f   :  { %7880 = vmatpush3.bf16.msra.mxu0 %v4382_v22 }
0x2e60   :  { %7891 = vmatprep.subr.bf16.mxu0 %v8439_v61 }
0x2e61   :  { %v4474_v15 = vpop.permute.xlu1 %4473 }
0x2e64   :  { %v8340_v2 = vpop.eup %8339 }
0x2e65   :  { %v4373_v16 = vmul.f32 %v8340_v2, %v8338_v54  ;;  %v4584_v35 = vpop.permute.xlu1 %4583 }
0x2e67   :  { %v4374_v14 = vpack.c.bf16 %v4373_v16, %v4373_v16 }
0x2e69   :  { %7882 = vmatmul.mubr.msk.bf16.vlgmr.msra.gmra.mrb[144].mxu0 %vm545_vm2, %v4374_v14 }
0x2e6a   :  { %7892 = vmatpush3.bf16.xpose.msra.mxu0 %v4481_v13  ;;  %7893 = vmatprep.mubr.msk.bf16.mxu0 %vm8440_vm1, %v8439_v61  ;;  %v4472_v13 = vpack.c.bf16 %v9395_v45, %v9395_v45 }
0x2e6b   :  { %7903 = vmatprep.subr.bf16.mxu0 %v8439_v61 }
0x2e71   :  { %7894 = vmatmul.mubr.msk.bf16.vlgmr.msra.gmra.mrb[148].mxu0 %vm545_vm2, %v4474_v15  ;;  %v4700_v15 = vadd.f32 %v9541_v1, %v9484_v58  ;;  %v4540_v58 = vsel %vm675_vm3, %v4472_v13, 0 }
0x2e72   :  { %7904 = vmatpush3.bf16.xpose.msra.mxu0 %v4591_v6  ;;  %7905 = vmatprep.mubr.msk.bf16.mxu0 %vm8440_vm1, %v8439_v61 }
0x2e73   :  { %7915 = vmatprep.subr.bf16.mxu0 %v8439_v61  ;;  %v4702_v6 = vadd.f32 %v4700_v15, %v9371_v43 }
0x2e79   :  { %7906 = vmatmul.mubr.msk.bf16.vlgmr.msra.gmra.mrb[152].mxu0 %vm545_vm2, %v4584_v35  ;;  %v4706_v35 = vsel %vm98_vm0, %v4702_v6, 0.0 }
0x2e7a   :  { %7919 = vmatprep.mubr.msk.bf16.mxu0 %vm8440_vm1, %v8439_v61 }
0x2e9b   :  { %v4292_v30 = vpop.f32.mrb[140].mxu0 }
0x2e9c   :  { %v4298_v33 = vmul.f32 0.35355338, %v4292_v30  ;;  %v7871_v18 = vpop.f32.mrb[141].mxu0 }
0x2e9d   :  { %v4295_v62 = vpop.f32.mrb[142].mxu0 }
0x2e9e   :  { %v7872_v20 = vpop.f32.mrb[143].mxu0  ;;  %v4299_v5 = vsel %vm545_vm2, %v4298_v33, -inf }
0x2e9f   :  { %4300 = vmax.xlane.f32.xlu0 %v4299_v5 }
0x2f2c   :  { %v4301_v42 = vpop.xlane.xlu0 %4300 }
0x2f2d   :  { %v4302_v9 = vsub.f32 %v4298_v33, %v4301_v42 }
0x2f2f   :  { %v4303_v24 = vmul.f32 1.442695, %v4302_v9 }
0x2f31   :  { %8341 = vpow2.f32 %v4303_v24 }
0x2f3b   :  { %v8342_v41 = vpop.eup %8341 }
0x2f3c   :  { %v9526_v23 = vpop.f32.mrb[144].mxu0  ;;  %v4305_v39 = vsel %vm545_vm2, %v8342_v41, 0.0 }
0x2f3d   :  { %v7883_v8 = vpop.f32.mrb[145].mxu0 }
0x2f3e   :  { %v4421_v34 = vpop.f32.mrb[146].mxu0 }
0x2f3f   :  { %v7884_v3 = vpop.f32.mrb[147].mxu0 }
0x2f44   :  { %v4517_v38 = vpop.f32.mrb[148].mxu0 }
0x2f45   :  { %v4523_v19 = vmul.f32 0.35355338, %v4517_v38  ;;  %v7895_v17 = vpop.f32.mrb[149].mxu0 }
0x2f46   :  { %v4520_v7 = vpop.f32.mrb[150].mxu0 }
0x2f47   :  { %v7896_v47 = vpop.f32.mrb[151].mxu0  ;;  %v4524_v12 = vsel %vm545_vm2, %v4523_v19, -inf }
0x2f48   :  { %4525 = vmax.xlane.f32.xlu1 %v4524_v12 }
0x2f4c   :  { %v4627_v27 = vpop.f32.mrb[152].mxu0 }
0x2f4d   :  { %v4633_v31 = vmul.f32 0.35355338, %v4627_v27  ;;  %v7907_v53 = vpop.f32.mrb[153].mxu0  ;;  %v7176_v27 = vld [vmem:[%s10033_s14 + $0x16] ss:$0 sm:$0xff] }
0x2f4e   :  { %v4630_v11 = vpop.f32.mrb[154].mxu0 }
0x2f4f   :  { %v7908_v51 = vpop.f32.mrb[155].mxu0  ;;  %v4634_v4 = vsel %vm545_vm2, %v4633_v31, -inf }
0x2f50   :  { %4635 = vmax.xlane.f32.xlu0 %v4634_v4 }
0x2f54   :  { %4306 = vadd.xlane.f32.xlu0 %v4305_v39 }
0x2fd5   :  { %v4526_v49 = vpop.xlane.xlu1 %4525 }
0x2fd6   :  { %v4527_v54 = vsub.f32 %v4523_v19, %v4526_v49 }
0x2fd8   :  { %v4528_v56 = vmul.f32 1.442695, %v4527_v54 }
0x2fda   :  { %8343 = vpow2.f32 %v4528_v56 }
0x2fdd   :  { %v4636_v55 = vpop.xlane.xlu0 %4635 }
0x2fde   :  { %v4637_v10 = vsub.f32 %v4633_v31, %v4636_v55 }
0x2fe0   :  { %v4638_v22 = vmul.f32 1.442695, %v4637_v10 }
0x2fe1   :  { %v4307_v30 = vpop.xlane.xlu0 %4306 }
0x2fe2   :  { %8345 = vpow2.f32 %v4638_v22 }
0x2fe3   :  { %8347 = vrcp.f32 %v4307_v30 }
0x2fe4   :  { %v8344_v2 = vpop.eup %8343 }
0x2fe5   :  { %v4530_v16 = vsel %vm545_vm2, %v8344_v2, 0.0 }
0x2fe6   :  { %4531 = vadd.xlane.f32.xlu1 %v4530_v16 }
0x2fec   :  { %v8346_v29 = vpop.eup %8345 }
0x2fed   :  { %v4640_v14 = vsel %vm545_vm2, %v8346_v29, 0.0 }
0x2fee   :  { %4641 = vadd.xlane.f32.xlu0 %v4640_v14 }
0x2ff7   :  { %4424 = vrot.lane.b32.xlu1 %v9502_v40, %s8448_s8  ;;  %v8348_v40 = vpop.eup %8347 }
0x2ff8   :  { %v4309_v45 = vmul.f32 %v8348_v40, %v8342_v41 }
0x2ffa   :  { %v4310_v20 = vpack.c.bf16 %v4309_v45, %v4309_v45 }
0x3004   :  { %4647 = vrot.lane.b32.xlu0 %v4472_v13, %s8445_s24 }
0x301b   :  { %4707 = vadd.xlane.f32.xlu1 %v4706_v35 }
0x3073   :  { %v4532_v33 = vpop.xlane.xlu1 %4531 }
0x3074   :  { %8349 = vrcp.f32 %v4532_v33 }
0x3077   :  { %v4425_v18 = vpop.permute.xlu1 %4424 }
0x3078   :  { %v4430_v62 = vsel %vm675_vm3, %v4425_v18, 0 }
0x3079   :  { %7886 = vmatpush3.bf16.msra.mxu1 %v4430_v62 }
0x307a   :  { %7897 = vmatprep.subr.bf16.mxu1 %v8439_v61 }
0x307b   :  { %v4642_v5 = vpop.xlane.xlu0 %4641 }
0x307c   :  { %8351 = vrcp.f32 %v4642_v5  ;;  %7888 = vmatmul.mubr.msk.bf16.vlgmr.msra.gmra.mrb[140].mxu1 %vm545_vm2, %v4310_v20 }
0x307d   :  { %7898 = vmatpush3.bf16.msra.mxu1 %v4540_v58  ;;  %7899 = vmatprep.mubr.msk.bf16.mxu1 %vm8440_vm1, %v8439_v61 }
0x307e   :  { %v8350_v43 = vpop.eup %8349  ;;  %7909 = vmatprep.subr.bf16.mxu1 %v8439_v61 }
0x307f   :  { %v4534_v42 = vmul.f32 %v8350_v43, %v8344_v2  ;;  %v4648_v8 = vpop.permute.xlu0 %4647 }
0x3080   :  { %v4653_v34 = vsel %vm675_vm3, %v4648_v8, 0 }
0x3081   :  { %v4535_v9 = vpack.c.bf16 %v4534_v42, %v4534_v42 }
0x3084   :  { %7900 = vmatmul.mubr.msk.bf16.vlgmr.msra.gmra.mrb[144].mxu1 %vm545_vm2, %v4535_v9  ;;  %v7166_v9 = vld [vmem:[%s10033_s14 + $0x1c] ss:$0 sm:$0xff] }
0x3085   :  { %7910 = vmatpush3.bf16.msra.mxu1 %v4653_v34  ;;  %7911 = vmatprep.mubr.msk.bf16.mxu1 %vm8440_vm1, %v8439_v61 }
0x3086   :  { %v8352_v3 = vpop.eup %8351  ;;  %7923 = vmatprep.subr.bf16.mxu1 %v8439_v61 }
0x3087   :  { %v4644_v24 = vmul.f32 %v8352_v3, %v8346_v29 }
0x3089   :  { %v4645_v38 = vpack.c.bf16 %v4644_v24, %v4644_v24 }
0x308c   :  { %7912 = vmatmul.mubr.msk.bf16.vlgmr.msra.gmra.mrb[148].mxu1 %vm545_vm2, %v4645_v38  ;;  %v7167_v38 = vld [vmem:[%s10033_s14 + $0x20] ss:$0 sm:$0xff] }
0x308d   :  { %7925 = vmatprep.mubr.msk.bf16.mxu1 %vm8440_vm1, %v8439_v61 }
0x30a8   :  { %v4708_v19 = vpop.xlane.xlu1 %4707 }
0x30a9   :  { %v4712_v17 = vmul.f32 0.03125, %v4708_v19 }
0x30ab   :  { %v4714_v7 = vsub.f32 %v4702_v6, %v4712_v17 }
0x30ad   :  { %v4716_v47 = vmul.f32 %v4714_v7, %v4714_v7 }
0x30af   :  { %v4718_v12 = vsel %vm98_vm0, %v4716_v47, 0.0 }
0x30b0   :  { %4719 = vadd.xlane.f32.xlu1 %v4718_v12 }
0x30c1   :  { %4827 = vrot.lane.b32.xlu1 %v7176_v27, %s8438_s18 }
0x313d   :  { %v4720_v31 = vpop.xlane.xlu1 %4719 }
0x313e   :  { %v4724_v62 = vmul.f32 0.03125, %v4720_v31 }
0x3140   :  { %v4726_v20 = vadd.f32 1e-05, %v4724_v62 }
0x3141   :  { %v4828_v53 = vpop.permute.xlu1 %4827 }
0x3142   :  { %v4830_v11 = vadd.f32 %v4828_v53, %v8731_v21  ;;  %v4831_v51 = vadd.f32 %v4828_v53, %v8735_v25  ;;  %v4832_v4 = vadd.f32 %v4828_v53, %v8743_v32  ;;  %v4833_v41 = vadd.f32 %v4828_v53, %v8747_v36 }
0x3143   :  { %8353 = vrsqrt.f32 %v4726_v20 }
0x3144   :  { %v9571_v39 = vpack.c.bf16 %v4831_v51, %v4830_v11  ;;  %v9573_v49 = vpack.c.bf16 %v4833_v41, %v4832_v4  ;;  %v9612_v11 = vld [vmem:[%s10033_s14 + $0x15] ss:$0 sm:$0xff] }
0x3146   :  { %4902 = vrot.lane.b32.xlu1 %v9571_v39, %s8441_s1 }
0x314d   :  { %v8354_v42 = vpop.eup %8353 }
0x314e   :  { %v4730_v8 = vmul.f32 %v8354_v42, %v4714_v7 }
0x314f   :  { %v4466_v54 = vpop.f32.mrb[140].mxu1 }
0x3150   :  { %v4467_v56 = vadd.f32 %v4466_v54, %v9526_v23  ;;  %v7889_v55 = vpop.f32.mrb[141].mxu1  ;;  %v4736_v3 = vmul.f32 %v7166_v9, %v4730_v8 }
0x3151   :  { %v4469_v10 = vpop.f32.mrb[142].mxu1 }
0x3152   :  { %v7890_v22 = vpop.f32.mrb[143].mxu1  ;;  %v9598_v17 = vadd.f32 %v7167_v38, %v4736_v3 }
0x3157   :  { %v4576_v21 = vpop.f32.mrb[144].mxu1 }
0x3158   :  { %v4582_v2 = vadd.f32 %v4576_v21, %v4467_v56  ;;  %v7901_v25 = vpop.f32.mrb[145].mxu1 }
0x3159   :  { %v4579_v16 = vpop.f32.mrb[146].mxu1 }
0x315a   :  { %v7902_v32 = vpop.f32.mrb[147].mxu1 }
0x315f   :  { %v4689_v29 = vpop.f32.mrb[148].mxu1 }
0x3160   :  { %v4695_v36 = vadd.f32 %v4689_v29, %v4582_v2  ;;  %v7913_v14 = vpop.f32.mrb[149].mxu1 }
0x3161   :  { %v4692_v13 = vpop.f32.mrb[150].mxu1 }
0x3162   :  { %v4701_v15 = vadd.f32 %v9541_v1, %v4695_v36  ;;  %v7914_v6 = vpop.f32.mrb[151].mxu1  ;;  %v8199_v1 = vld [vmem:[%s10037_s6 + $0x20] sm:$0xff]  }
0x3163   :  { %7916 = vmatpush3.bf16.msra.mxu0 %v8199_v1 }
0x3164   :  { %v4703_v35 = vadd.f32 %v4701_v15, %v9373_v28  ;;  %7917 = vmatprep.subr.bf16.mxu0 %v8439_v61  ;;  %v8200_v28 = vld [vmem:[%s10037_s6 + $0x28] sm:$0xff]  }
0x3166   :  { %v4709_v30 = vsel %vm98_vm0, %v4703_v35, 0.0 }
0x3167   :  { %4710 = vadd.xlane.f32.xlu0 %v4709_v30  ;;  %7918 = vmatpush3.bf16.msra.mxu0 %v8200_v28 }
0x3168   :  { %7929 = vmatprep.subr.bf16.mxu0 %v8439_v61 }
0x31b8   :  { %v4903_v12 = vpop.permute.xlu1 %4902 }
0x31b9   :  { %v4908_v27 = vsel %vm545_vm2, %v4903_v12, 0 }
0x31f4   :  { %v4711_v23 = vpop.xlane.xlu0 %4710 }
0x31f5   :  { %v4713_v40 = vmul.f32 0.03125, %v4711_v23 }
0x31f7   :  { %v4715_v33 = vsub.f32 %v4703_v35, %v4713_v40 }
0x31f9   :  { %v4717_v45 = vmul.f32 %v4715_v33, %v4715_v33 }
0x31fb   :  { %v4721_v18 = vsel %vm98_vm0, %v4717_v45, 0.0 }
0x31fc   :  { %4722 = vadd.xlane.f32.xlu0 %v4721_v18 }
0x3212   :  { %4764 = vrot.lane.b32.xlu0 %v8658_v44, %s8448_s8 }
0x3289   :  { %v4723_v5 = vpop.xlane.xlu0 %4722 }
0x328a   :  { %v4725_v58 = vmul.f32 0.03125, %v4723_v5 }
0x328c   :  { %v4727_v43 = vadd.f32 1e-05, %v4725_v58 }
0x328d   :  { %v4765_v31 = vpop.permute.xlu0 %4764 }
0x328e   :  { %8355 = vrsqrt.f32 %v4727_v43 }
0x3298   :  { %v8356_v34 = vpop.eup %8355 }
0x3299   :  { %v4731_v24 = vmul.f32 %v8356_v34, %v4715_v33 }
0x329b   :  { %v4737_v19 = vmul.f32 %v7166_v9, %v4731_v24 }
0x329d   :  { %v9600_v47 = vadd.f32 %v7167_v38, %v4737_v19 }
0x329f   :  { %v4744_v7 = vpack.c.bf16 %v9600_v47, %v9598_v17 }
0x32a1   :  { %7920 = vmatmul.mubr.msk.bf16.vlgmr.msra.gmra.mrb[156].mxu0 %vm98_vm0, %v4744_v7 }
0x32a2   :  { %7930 = vmatpush3.bf16.xpose.msra.mxu0 %v4908_v27  ;;  %7931 = vmatprep.mubr.msk.bf16.mxu0 %vm8440_vm1, %v8439_v61 }
0x32a3   :  { %7941 = vmatprep.subr.bf16.mxu0 %v8439_v61 }
0x3374   :  { %v4807_v53 = vpop.f32.mrb[156].mxu0 }
0x3375   :  { %v4808_v51 = vadd.f32 %v4807_v53, %v4765_v31  ;;  %v7921_v4 = vpop.f32.mrb[157].mxu0 }
0x3376   :  { %v9614_v41 = vpop.f32.mrb[158].mxu0 }
0x3377   :  { %v4819_v54 = vadd.f32 %v9612_v11, %v4808_v51  ;;  %v7922_v56 = vpop.f32.mrb[159].mxu0 }
0x3379   :  { %v4835_v55 = vpack.c.bf16 %v4819_v54, %v4819_v54 }
0x337b   :  { %4900 = vrot.lane.b32.xlu1 %v4835_v55, %s8442_s0 }
0x33ed   :  { %v4901_v10 = vpop.permute.xlu1 %4900 }
0x33ee   :  { %7932 = vmatmul.mubr.msk.bf16.vlgmr.msra.gmra.mrb[160].mxu0 %vm545_vm2, %v4901_v10 }
0x33ef   :  { %7943 = vmatprep.mubr.msk.bf16.mxu0 %vm8440_vm1, %v8439_v61 }
0x34c1   :  { %v4944_v22 = vpop.f32.mrb[160].mxu0 }
0x34c2   :  { %v4950_v21 = vmul.f32 0.35355338, %v4944_v22  ;;  %v7933_v2 = vpop.f32.mrb[161].mxu0 }
0x34c3   :  { %v4947_v25 = vpop.f32.mrb[162].mxu0 }
0x34c4   :  { %v7934_v16 = vpop.f32.mrb[163].mxu0  ;;  %v4951_v32 = vsel %vm1626_vm4, %v4950_v21, -inf }
0x34c5   :  { %4952 = vmax.xlane.f32.xlu0 %v4951_v32 }
0x34db   :  { %4838 = vrot.lane.b32.xlu0 %v9571_v39, %s8445_s24 }
0x34df   :  { %5059 = vrot.lane.b32.xlu0 %v9571_v39, %s8443_s23 }
0x34e3   :  { %5166 = vrot.lane.b32.xlu0 %v9571_v39, %s8444_s9 }
0x3552   :  { %v4953_v29 = vpop.xlane.xlu0 %4952 }
0x3553   :  { %v4954_v36 = vsub.f32 %v4950_v21, %v4953_v29 }
0x3555   :  { %v4955_v14 = vmul.f32 1.442695, %v4954_v36 }
0x3556   :  { %v4839_v13 = vpop.permute.xlu0 %4838 }
0x3557   :  { %8357 = vpow2.f32 %v4955_v14  ;;  %v4844_v15 = vsel %vm545_vm2, %v4839_v13, 0 }
0x3558   :  { %7924 = vmatpush3.bf16.xpose.msra.mxu1 %v4844_v15 }
0x3559   :  { %7935 = vmatprep.subr.bf16.mxu1 %v8439_v61 }
0x355a   :  { %v5060_v33 = vpop.permute.xlu0 %5059 }
0x355b   :  { %v5065_v18 = vsel %vm545_vm2, %v5060_v33, 0 }
0x355e   :  { %v5167_v1 = vpop.permute.xlu0 %5166 }
0x355f   :  { %7926 = vmatmul.mubr.msk.bf16.vlgmr.msra.gmra.mrb[152].mxu1 %vm545_vm2, %v4835_v55  ;;  %v5172_v62 = vsel %vm545_vm2, %v5167_v1, 0 }
0x3560   :  { %7937 = vmatprep.mubr.msk.bf16.mxu1 %vm8440_vm1, %v8439_v61 }
0x3561   :  { %v8358_v6 = vpop.eup %8357 }
0x3562   :  { %v4957_v35 = vsel %vm1626_vm4, %v8358_v6, 0.0 }
0x3563   :  { %4958 = vadd.xlane.f32.xlu1 %v4957_v35 }
0x3574   :  { %4964 = vrot.lane.b32.xlu1 %v8739_v26, %s8438_s18 }
0x3578   :  { %5057 = vrot.lane.b32.xlu1 %v4835_v55, %s8446_s25 }
0x357c   :  { %5164 = vrot.lane.b32.xlu1 %v4835_v55, %s8447_s26 }
0x35f0   :  { %v4959_v39 = vpop.xlane.xlu1 %4958 }
0x35f1   :  { %8359 = vrcp.f32 %v4959_v39 }
0x35f4   :  { %v4965_v30 = vpop.permute.xlu1 %4964 }
0x35f5   :  { %7936 = vmatpush3.bf16.msra.mxu1 %v4965_v30 }
0x35f6   :  { %7947 = vmatprep.subr.bf16.mxu1 %v8439_v61 }
0x35f8   :  { %v5058_v28 = vpop.permute.xlu1 %5057 }
0x35fb   :  { %v8360_v23 = vpop.eup %8359 }
0x35fc   :  { %v4961_v40 = vmul.f32 %v8360_v23, %v8358_v6  ;;  %v5165_v20 = vpop.permute.xlu1 %5164 }
0x35fe   :  { %v4962_v45 = vpack.c.bf16 %v4961_v40, %v4961_v40 }
0x3600   :  { %7938 = vmatmul.mubr.msk.bf16.vlgmr.msra.gmra.mrb[156].mxu1 %vm1626_vm4, %v4962_v45 }
0x3601   :  { %7948 = vmatpush3.bf16.xpose.msra.mxu1 %v5065_v18  ;;  %7949 = vmatprep.mubr.msk.bf16.mxu1 %vm8440_vm1, %v8439_v61 }
0x3602   :  { %7959 = vmatprep.subr.bf16.mxu1 %v8439_v61 }
0x3608   :  { %7950 = vmatmul.mubr.msk.bf16.vlgmr.msra.gmra.mrb[160].mxu1 %vm545_vm2, %v5058_v28 }
0x3609   :  { %7960 = vmatpush3.bf16.xpose.msra.mxu1 %v5172_v62  ;;  %7961 = vmatprep.mubr.msk.bf16.mxu1 %vm8440_vm1, %v8439_v61 }
0x360a   :  { %7971 = vmatprep.subr.bf16.mxu1 %v8439_v61 }
0x3610   :  { %7962 = vmatmul.mubr.msk.bf16.vlgmr.msra.gmra.mrb[164].mxu1 %vm545_vm2, %v5165_v20 }
0x3611   :  { %7973 = vmatprep.mubr.msk.bf16.mxu1 %vm8440_vm1, %v8439_v61 }
0x3632   :  { %v4880_v5 = vpop.f32.mrb[152].mxu1 }
0x3633   :  { %v4886_v58 = vmul.f32 0.35355338, %v4880_v5  ;;  %v7927_v43 = vpop.f32.mrb[153].mxu1 }
0x3634   :  { %v4883_v42 = vpop.f32.mrb[154].mxu1 }
0x3635   :  { %v7928_v8 = vpop.f32.mrb[155].mxu1  ;;  %v4887_v9 = vsel %vm1626_vm4, %v4886_v58, -inf }
0x3636   :  { %4888 = vmax.xlane.f32.xlu0 %v4887_v9 }
0x36c3   :  { %v4889_v34 = vpop.xlane.xlu0 %4888 }
0x36c4   :  { %v4890_v3 = vsub.f32 %v4886_v58, %v4889_v34 }
0x36c6   :  { %v4891_v24 = vmul.f32 1.442695, %v4890_v3 }
0x36c8   :  { %8361 = vpow2.f32 %v4891_v24 }
0x36d2   :  { %v8362_v56 = vpop.eup %8361 }
0x36d3   :  { %v9653_v38 = vpop.f32.mrb[156].mxu1  ;;  %v4893_v55 = vsel %vm1626_vm4, %v8362_v56, 0.0 }
0x36d4   :  { %v7939_v19 = vpop.f32.mrb[157].mxu1 }
0x36d5   :  { %v5007_v12 = vpop.f32.mrb[158].mxu1 }
0x36d6   :  { %v7940_v7 = vpop.f32.mrb[159].mxu1 }
0x36db   :  { %v5101_v27 = vpop.f32.mrb[160].mxu1 }
0x36dc   :  { %v5107_v31 = vmul.f32 0.35355338, %v5101_v27  ;;  %v7951_v53 = vpop.f32.mrb[161].mxu1 }
0x36dd   :  { %v5104_v51 = vpop.f32.mrb[162].mxu1 }
0x36de   :  { %v7952_v4 = vpop.f32.mrb[163].mxu1  ;;  %v5108_v54 = vsel %vm1626_vm4, %v5107_v31, -inf }
0x36df   :  { %5109 = vmax.xlane.f32.xlu1 %v5108_v54 }
0x36e3   :  { %v5208_v10 = vpop.f32.mrb[164].mxu1  ;;  %4894 = vadd.xlane.f32.xlu1 %v4893_v55 }
0x36e4   :  { %v5214_v22 = vmul.f32 0.35355338, %v5208_v10  ;;  %v7963_v21 = vpop.f32.mrb[165].mxu1 }
0x36e5   :  { %v5211_v2 = vpop.f32.mrb[166].mxu1 }
0x36e6   :  { %v7964_v25 = vpop.f32.mrb[167].mxu1  ;;  %v5215_v16 = vsel %vm1626_vm4, %v5214_v22, -inf }
0x36e7   :  { %5216 = vmax.xlane.f32.xlu0 %v5215_v16 }
0x36fd   :  { %4766 = vrot.lane.b32.xlu0 %v8662_v46, %s8448_s8 }
0x3701   :  { %5228 = vrot.lane.b32.xlu0 %v8666_v52, %s8445_s24 }
0x3705   :  { %5342 = vrot.lane.b32.xlu0 %v9573_v49, %s8441_s1 }
0x376c   :  { %v5110_v32 = vpop.xlane.xlu1 %5109 }
0x376d   :  { %v5111_v29 = vsub.f32 %v5107_v31, %v5110_v32 }
0x376f   :  { %v5112_v36 = vmul.f32 1.442695, %v5111_v29 }
0x3770   :  { %v4895_v18 = vpop.xlane.xlu1 %4894 }
0x3771   :  { %8363 = vpow2.f32 %v5112_v36 }
0x3774   :  { %v5217_v14 = vpop.xlane.xlu0 %5216 }
0x3775   :  { %v5218_v13 = vsub.f32 %v5214_v22, %v5217_v14 }
0x3777   :  { %v5219_v15 = vmul.f32 1.442695, %v5218_v13 }
0x3778   :  { %v4767_v6 = vpop.permute.xlu0 %4766 }
0x3779   :  { %8365 = vpow2.f32 %v5219_v15  ;;  %v4811_v35 = vadd.f32 %v9614_v41, %v4767_v6 }
0x377a   :  { %8367 = vrcp.f32 %v4895_v18 }
0x377b   :  { %v8364_v39 = vpop.eup %8363  ;;  %v4820_v30 = vadd.f32 %v9612_v11, %v4811_v35 }
0x377c   :  { %v5114_v23 = vsel %vm1626_vm4, %v8364_v39, 0.0  ;;  %v5229_v42 = vpop.permute.xlu0 %5228 }
0x377d   :  { %v9667_v40 = vpack.c.bf16 %v4820_v30, %v4820_v30  ;;  %5115 = vadd.xlane.f32.xlu1 %v5114_v23 }
0x377f   :  { %5340 = vrot.lane.b32.xlu0 %v9667_v40, %s8442_s0 }
0x3780   :  { %v5343_v9 = vpop.permute.xlu0 %5342 }
0x3781   :  { %v5348_v34 = vsel %vm545_vm2, %v5343_v9, 0 }
0x3783   :  { %v8366_v33 = vpop.eup %8365 }
0x3784   :  { %v5221_v45 = vsel %vm1626_vm4, %v8366_v33, 0.0  ;;  %v8368_v11 = vpop.eup %8367 }
0x3785   :  { %5222 = vadd.xlane.f32.xlu1 %v5221_v45  ;;  %v4897_v28 = vmul.f32 %v8368_v11, %v8362_v56 }
0x3787   :  { %v4898_v20 = vpack.c.bf16 %v4897_v28, %v4897_v28 }
0x3796   :  { %5010 = vrot.lane.b32.xlu1 %v8739_v26, %s8448_s8 }
0x37f1   :  { %v5341_v3 = vpop.permute.xlu0 %5340 }
0x380a   :  { %v5116_v41 = vpop.xlane.xlu1 %5115 }
0x380b   :  { %8369 = vrcp.f32 %v5116_v41 }
0x3812   :  { %v5223_v1 = vpop.xlane.xlu1 %5222 }
0x3813   :  { %8371 = vrcp.f32 %v5223_v1 }
0x3815   :  { %v8370_v5 = vpop.eup %8369 }
0x3816   :  { %v5011_v62 = vpop.permute.xlu1 %5010  ;;  %v5118_v26 = vmul.f32 %v8370_v5, %v8364_v39 }
0x3817   :  { %7942 = vmatpush3.bf16.msra.mxu0 %v5011_v62 }
0x3818   :  { %7953 = vmatprep.subr.bf16.mxu0 %v8439_v61  ;;  %v5119_v58 = vpack.c.bf16 %v5118_v26, %v5118_v26 }
0x381a   :  { %7944 = vmatmul.mubr.msk.bf16.vlgmr.msra.gmra.mrb[164].mxu0 %vm1626_vm4, %v4898_v20 }
0x381b   :  { %7954 = vmatpush3.bf16.msra.mxu0 %v8666_v52  ;;  %7955 = vmatprep.mubr.msk.bf16.mxu0 %vm8440_vm1, %v8439_v61 }
0x381c   :  { %7965 = vmatprep.subr.bf16.mxu0 %v8439_v61 }
0x381d   :  { %v8372_v43 = vpop.eup %8371 }
0x381e   :  { %v5225_v8 = vmul.f32 %v8372_v43, %v8366_v33 }
0x3820   :  { %v5226_v52 = vpack.c.bf16 %v5225_v8, %v5225_v8 }
0x3822   :  { %7956 = vmatmul.mubr.msk.bf16.vlgmr.msra.gmra.mrb[168].mxu0 %vm1626_vm4, %v5119_v58 }
0x3823   :  { %7966 = vmatpush3.bf16.msra.mxu0 %v5229_v42  ;;  %7967 = vmatprep.mubr.msk.bf16.mxu0 %vm8440_vm1, %v8439_v61 }
0x3824   :  { %7977 = vmatprep.subr.bf16.mxu0 %v8439_v61 }
0x382a   :  { %7968 = vmatmul.mubr.msk.bf16.vlgmr.msra.gmra.mrb[172].mxu0 %vm1626_vm4, %v5226_v52 }
0x382b   :  { %7979 = vmatprep.mubr.msk.bf16.mxu0 %vm8440_vm1, %v8439_v61 }
0x382c   :  { %7978 = vmatpush3.bf16.xpose.msra.mxu0 %v5348_v34 }
0x382d   :  { %7989 = vmatprep.subr.bf16.mxu0 %v8439_v61 }
0x3833   :  { %7980 = vmatmul.mubr.msk.bf16.vlgmr.msra.gmra.mrb[176].mxu0 %vm545_vm2, %v5341_v3 }
0x3834   :  { %7991 = vmatprep.mubr.msk.bf16.mxu0 %vm8440_vm1, %v8439_v61 }
0x38ed   :  { %v5050_v24 = vpop.f32.mrb[164].mxu0 }
0x38ee   :  { %v5051_v19 = vadd.f32 %v5050_v24, %v9653_v38  ;;  %v7945_v12 = vpop.f32.mrb[165].mxu0 }
0x38ef   :  { %v5053_v7 = vpop.f32.mrb[166].mxu0 }
0x38f0   :  { %v7946_v27 = vpop.f32.mrb[167].mxu0 }
0x38f5   :  { %v5157_v31 = vpop.f32.mrb[168].mxu0 }
0x38f6   :  { %v5163_v53 = vadd.f32 %v5157_v31, %v5051_v19  ;;  %v7957_v51 = vpop.f32.mrb[169].mxu0 }
0x38f7   :  { %v5160_v4 = vpop.f32.mrb[170].mxu0 }
0x38f8   :  { %v7958_v54 = vpop.f32.mrb[171].mxu0 }
0x38fd   :  { %v5268_v56 = vpop.f32.mrb[172].mxu0 }
0x38fe   :  { %v9693_v55 = vadd.f32 %v5268_v56, %v5163_v53  ;;  %v7969_v10 = vpop.f32.mrb[173].mxu0 }
0x38ff   :  { %v5271_v22 = vpop.f32.mrb[174].mxu0 }
0x3900   :  { %v7970_v21 = vpop.f32.mrb[175].mxu0 }
0x3906   :  { %v5384_v2 = vpop.f32.mrb[176].mxu0 }
0x3907   :  { %v5390_v25 = vmul.f32 0.35355338, %v5384_v2  ;;  %v7981_v16 = vpop.f32.mrb[177].mxu0 }
0x3908   :  { %v5387_v32 = vpop.f32.mrb[178].mxu0 }
0x3909   :  { %v7982_v29 = vpop.f32.mrb[179].mxu0  ;;  %v5391_v38 = vsel %vm1626_vm4, %v5390_v25, -inf }
0x390a   :  { %5392 = vmax.xlane.f32.xlu1 %v5391_v38 }
0x391b   :  { %5404 = vrot.lane.b32.xlu1 %v8751_v37, %s8438_s18 }
0x391f   :  { %5499 = vrot.lane.b32.xlu1 %v9573_v49, %s8443_s23 }
0x3923   :  { %5606 = vrot.lane.b32.xlu1 %v9573_v49, %s8444_s9 }
0x3997   :  { %v5393_v36 = vpop.xlane.xlu1 %5392 }
0x3998   :  { %v5394_v14 = vsub.f32 %v5390_v25, %v5393_v36 }
0x399a   :  { %v5395_v13 = vmul.f32 1.442695, %v5394_v14 }
0x399b   :  { %v5405_v33 = vpop.permute.xlu1 %5404 }
0x399c   :  { %8373 = vpow2.f32 %v5395_v13 }
0x399f   :  { %v5500_v45 = vpop.permute.xlu1 %5499 }
0x39a0   :  { %v5505_v41 = vsel %vm545_vm2, %v5500_v45, 0 }
0x39a6   :  { %v8374_v15 = vpop.eup %8373 }
0x39a7   :  { %v5397_v6 = vsel %vm1626_vm4, %v8374_v15, 0.0 }
0x39a8   :  { %5398 = vadd.xlane.f32.xlu0 %v5397_v6 }
0x39be   :  { %5278 = vrot.lane.b32.xlu0 %v9573_v49, %s8445_s24 }
0x39c2   :  { %5497 = vrot.lane.b32.xlu0 %v9667_v40, %s8446_s25 }
0x39c6   :  { %5604 = vrot.lane.b32.xlu0 %v9667_v40, %s8447_s26 }
0x3a35   :  { %v5399_v35 = vpop.xlane.xlu0 %5398 }
0x3a36   :  { %8375 = vrcp.f32 %v5399_v35  ;;  %v7193_v35 = vld [vmem:[%s10033_s14 + $0x17] ss:$0 sm:$0xff] }
0x3a39   :  { %v5279_v39 = vpop.permute.xlu0 %5278 }
0x3a3a   :  { %v5284_v30 = vsel %vm545_vm2, %v5279_v39, 0  ;;  %v5719_v39 = vadd.f32 %v7193_v35, %v9693_v55 }
0x3a3b   :  { %7972 = vmatpush3.bf16.xpose.msra.mxu1 %v5284_v30 }
0x3a3c   :  { %7983 = vmatprep.subr.bf16.mxu1 %v8439_v61  ;;  %v5721_v30 = vadd.f32 %v5719_v39, %v9598_v17 }
0x3a3d   :  { %v5498_v11 = vpop.permute.xlu0 %5497 }
0x3a40   :  { %v8376_v23 = vpop.eup %8375 }
0x3a41   :  { %v5401_v49 = vmul.f32 %v8376_v23, %v8374_v15  ;;  %v5605_v28 = vpop.permute.xlu0 %5604  ;;  %v5725_v23 = vsel %vm98_vm0, %v5721_v30, 0.0 }
0x3a42   :  { %7974 = vmatmul.mubr.msk.bf16.vlgmr.msra.gmra.mrb[168].mxu1 %vm545_vm2, %v9667_v40  ;;  %v5607_v40 = vpop.permute.xlu1 %5606 }
0x3a43   :  { %7984 = vmatpush3.bf16.msra.mxu1 %v5405_v33  ;;  %7985 = vmatprep.mubr.msk.bf16.mxu1 %vm8440_vm1, %v8439_v61  ;;  %v5402_v18 = vpack.c.bf16 %v5401_v49, %v5401_v49  ;;  %v5612_v1 = vsel %vm545_vm2, %v5607_v40, 0 }
0x3a44   :  { %7995 = vmatprep.subr.bf16.mxu1 %v8439_v61 }
0x3a4a   :  { %7986 = vmatmul.mubr.msk.bf16.vlgmr.msra.gmra.mrb[172].mxu1 %vm1626_vm4, %v5402_v18 }
0x3a4b   :  { %7997 = vmatprep.mubr.msk.bf16.mxu1 %vm8440_vm1, %v8439_v61 }
0x3a4c   :  { %7996 = vmatpush3.bf16.xpose.msra.mxu1 %v5505_v41 }
0x3a4d   :  { %8007 = vmatprep.subr.bf16.mxu1 %v8439_v61 }
0x3a53   :  { %7998 = vmatmul.mubr.msk.bf16.vlgmr.msra.gmra.mrb[176].mxu1 %vm545_vm2, %v5498_v11 }
0x3a54   :  { %8008 = vmatpush3.bf16.xpose.msra.mxu1 %v5612_v1  ;;  %8009 = vmatprep.mubr.msk.bf16.mxu1 %vm8440_vm1, %v8439_v61 }
0x3a55   :  { %8019 = vmatprep.subr.bf16.mxu1 %v8439_v61 }
0x3a5b   :  { %8010 = vmatmul.mubr.msk.bf16.vlgmr.msra.gmra.mrb[180].mxu1 %vm545_vm2, %v5605_v28 }
0x3a5c   :  { %8023 = vmatprep.mubr.msk.bf16.mxu1 %vm8440_vm1, %v8439_v61 }
0x3b15   :  { %v5320_v62 = vpop.f32.mrb[168].mxu1 }
0x3b16   :  { %v5326_v20 = vmul.f32 0.35355338, %v5320_v62  ;;  %v7975_v5 = vpop.f32.mrb[169].mxu1 }
0x3b17   :  { %v5323_v26 = vpop.f32.mrb[170].mxu1 }
0x3b18   :  { %v7976_v58 = vpop.f32.mrb[171].mxu1  ;;  %v5327_v43 = vsel %vm1626_vm4, %v5326_v20, -inf }
0x3b19   :  { %5328 = vmax.xlane.f32.xlu1 %v5327_v43 }
0x3b1d   :  { %v9730_v42 = vpop.f32.mrb[172].mxu1 }
0x3b1e   :  { %v7987_v8 = vpop.f32.mrb[173].mxu1 }
0x3b1f   :  { %v5447_v9 = vpop.f32.mrb[174].mxu1 }
0x3b20   :  { %v7988_v52 = vpop.f32.mrb[175].mxu1 }
0x3b26   :  { %v5541_v34 = vpop.f32.mrb[176].mxu1 }
0x3b27   :  { %v5547_v3 = vmul.f32 0.35355338, %v5541_v34  ;;  %v7999_v24 = vpop.f32.mrb[177].mxu1 }
0x3b28   :  { %v5544_v19 = vpop.f32.mrb[178].mxu1 }
0x3b29   :  { %v8000_v12 = vpop.f32.mrb[179].mxu1  ;;  %v5548_v7 = vsel %vm1626_vm4, %v5547_v3, -inf }
0x3b2a   :  { %5549 = vmax.xlane.f32.xlu0 %v5548_v7 }
0x3b2e   :  { %v5648_v27 = vpop.f32.mrb[180].mxu1 }
0x3b2f   :  { %v5654_v31 = vmul.f32 0.35355338, %v5648_v27  ;;  %v8011_v53 = vpop.f32.mrb[181].mxu1 }
0x3b30   :  { %v5651_v51 = vpop.f32.mrb[182].mxu1 }
0x3b31   :  { %v8012_v4 = vpop.f32.mrb[183].mxu1  ;;  %v5655_v54 = vsel %vm1626_vm4, %v5654_v31, -inf }
0x3b32   :  { %5656 = vmax.xlane.f32.xlu0 %v5655_v54 }
0x3ba6   :  { %v5329_v56 = vpop.xlane.xlu1 %5328 }
0x3ba7   :  { %v5330_v10 = vsub.f32 %v5326_v20, %v5329_v56 }
0x3ba9   :  { %v5331_v22 = vmul.f32 1.442695, %v5330_v10 }
0x3bab   :  { %8377 = vpow2.f32 %v5331_v22  ;;  %v7204_v22 = vld [vmem:[%s10033_s14 + $0x19] ss:$0 sm:$0xff] }
0x3bb5   :  { %v8378_v21 = vpop.eup %8377 }
0x3bb6   :  { %v5333_v2 = vsel %vm1626_vm4, %v8378_v21, 0.0 }
0x3bb7   :  { %v5550_v25 = vpop.xlane.xlu0 %5549  ;;  %5334 = vadd.xlane.f32.xlu1 %v5333_v2 }
0x3bb8   :  { %v5551_v16 = vsub.f32 %v5547_v3, %v5550_v25 }
0x3bba   :  { %v5552_v32 = vmul.f32 1.442695, %v5551_v16 }
0x3bbc   :  { %8379 = vpow2.f32 %v5552_v32 }
0x3bbf   :  { %v5657_v29 = vpop.xlane.xlu0 %5656 }
0x3bc0   :  { %v5658_v38 = vsub.f32 %v5654_v31, %v5657_v29 }
0x3bc2   :  { %v5659_v36 = vmul.f32 1.442695, %v5658_v38 }
0x3bc4   :  { %8381 = vpow2.f32 %v5659_v36 }
0x3bc6   :  { %v8380_v14 = vpop.eup %8379 }
0x3bc7   :  { %v5554_v13 = vsel %vm1626_vm4, %v8380_v14, 0.0 }
0x3bc8   :  { %5555 = vadd.xlane.f32.xlu0 %v5554_v13 }
0x3bce   :  { %v8382_v15 = vpop.eup %8381 }
0x3bcf   :  { %v5661_v6 = vsel %vm1626_vm4, %v8382_v15, 0.0 }
0x3bd0   :  { %5662 = vadd.xlane.f32.xlu1 %v5661_v6 }
0x3bde   :  { %5450 = vrot.lane.b32.xlu0 %v8751_v37, %s8448_s8 }
0x3be1   :  { %5668 = vrot.lane.b32.xlu1 %v8664_v50, %s8445_s24 }
0x3c05   :  { %5726 = vadd.xlane.f32.xlu1 %v5725_v23 }
0x3c44   :  { %v5335_v33 = vpop.xlane.xlu1 %5334 }
0x3c45   :  { %8383 = vrcp.f32 %v5335_v33  ;;  %v7194_v33 = vld [vmem:[%s10033_s14 + $0x1d] ss:$0 sm:$0xff] }
0x3c4f   :  { %v8384_v49 = vpop.eup %8383 }
0x3c50   :  { %v5337_v37 = vmul.f32 %v8384_v49, %v8378_v21 }
0x3c52   :  { %v5338_v41 = vpack.c.bf16 %v5337_v37, %v5337_v37 }
0x3c55   :  { %v5556_v45 = vpop.xlane.xlu0 %5555 }
0x3c56   :  { %8385 = vrcp.f32 %v5556_v45 }
0x3c59   :  { %v5451_v18 = vpop.permute.xlu0 %5450 }
0x3c5a   :  { %7990 = vmatpush3.bf16.msra.mxu0 %v5451_v18 }
0x3c5b   :  { %8001 = vmatprep.subr.bf16.mxu0 %v8439_v61 }
0x3c5d   :  { %7992 = vmatmul.mubr.msk.bf16.vlgmr.msra.gmra.mrb[180].mxu0 %vm1626_vm4, %v5338_v41  ;;  %v5663_v40 = vpop.xlane.xlu1 %5662  ;;  %v7195_v41 = vld [vmem:[%s10033_s14 + $0x21] ss:$0 sm:$0xff] }
0x3c5e   :  { %8387 = vrcp.f32 %v5663_v40  ;;  %8002 = vmatpush3.bf16.msra.mxu0 %v8664_v50  ;;  %8003 = vmatprep.mubr.msk.bf16.mxu0 %vm8440_vm1, %v8439_v61 }
0x3c5f   :  { %8013 = vmatprep.subr.bf16.mxu0 %v8439_v61 }
0x3c60   :  { %v8386_v17 = vpop.eup %8385 }
0x3c61   :  { %v5558_v55 = vmul.f32 %v8386_v17, %v8380_v14  ;;  %v5669_v1 = vpop.permute.xlu1 %5668 }
0x3c63   :  { %v5559_v11 = vpack.c.bf16 %v5558_v55, %v5558_v55 }
0x3c65   :  { %8004 = vmatmul.mubr.msk.bf16.vlgmr.msra.gmra.mrb[184].mxu0 %vm1626_vm4, %v5559_v11 }
0x3c66   :  { %8014 = vmatpush3.bf16.msra.mxu0 %v5669_v1  ;;  %8015 = vmatprep.mubr.msk.bf16.mxu0 %vm8440_vm1, %v8439_v61 }
0x3c67   :  { %8027 = vmatprep.subr.bf16.mxu0 %v8439_v61 }
0x3c68   :  { %v8388_v28 = vpop.eup %8387 }
0x3c69   :  { %v5665_v62 = vmul.f32 %v8388_v28, %v8382_v15 }
0x3c6b   :  { %v5666_v50 = vpack.c.bf16 %v5665_v62, %v5665_v62 }
0x3c6d   :  { %8016 = vmatmul.mubr.msk.bf16.vlgmr.msra.gmra.mrb[188].mxu0 %vm1626_vm4, %v5666_v50  ;;  %v9809_v50 = vld [vmem:[%s10033_s14 + $0x18] ss:$0 sm:$0xff] }
0x3c6e   :  { %8029 = vmatprep.mubr.msk.bf16.mxu0 %vm8440_vm1, %v8439_v61 }
0x3c92   :  { %v5727_v24 = vpop.xlane.xlu1 %5726 }
0x3c93   :  { %v5731_v19 = vmul.f32 0.03125, %v5727_v24 }
0x3c95   :  { %v5733_v53 = vsub.f32 %v5721_v30, %v5731_v19 }
0x3c97   :  { %v5735_v56 = vmul.f32 %v5733_v53, %v5733_v53 }
0x3c99   :  { %v5737_v10 = vsel %vm98_vm0, %v5735_v56, 0.0 }
0x3d30   :  { %v5490_v20 = vpop.f32.mrb[180].mxu0 }
0x3d31   :  { %v5491_v5 = vadd.f32 %v5490_v20, %v9730_v42  ;;  %v7993_v26 = vpop.f32.mrb[181].mxu0 }
0x3d32   :  { %v5493_v58 = vpop.f32.mrb[182].mxu0 }
0x3d33   :  { %v7994_v43 = vpop.f32.mrb[183].mxu0 }
0x3d38   :  { %v5597_v8 = vpop.f32.mrb[184].mxu0 }
0x3d39   :  { %v5603_v9 = vadd.f32 %v5597_v8, %v5491_v5  ;;  %v8005_v52 = vpop.f32.mrb[185].mxu0 }
0x3d3a   :  { %v5600_v34 = vpop.f32.mrb[186].mxu0 }
0x3d3b   :  { %v8006_v3 = vpop.f32.mrb[187].mxu0 }
0x3d40   :  { %v5708_v12 = vpop.f32.mrb[188].mxu0 }
0x3d41   :  { %v5714_v7 = vadd.f32 %v5708_v12, %v5603_v9  ;;  %v8017_v27 = vpop.f32.mrb[189].mxu0 }
0x3d42   :  { %v5711_v31 = vpop.f32.mrb[190].mxu0 }
0x3d43   :  { %v5720_v51 = vadd.f32 %v7193_v35, %v5714_v7  ;;  %v8018_v4 = vpop.f32.mrb[191].mxu0 }
0x3d45   :  { %v5722_v54 = vadd.f32 %v5720_v51, %v9600_v47 }
0x3d47   :  { %v5728_v42 = vsel %vm98_vm0, %v5722_v54, 0.0 }
0x3d48   :  { %5729 = vadd.xlane.f32.xlu0 %v5728_v42 }
0x3d4c   :  { %5738 = vadd.xlane.f32.xlu0 %v5737_v10 }
0x3d62   :  { %5844 = vrot.lane.b32.xlu0 %v7204_v22, %s8438_s18 }
0x3dd5   :  { %v5730_v21 = vpop.xlane.xlu0 %5729 }
0x3dd6   :  { %v5732_v2 = vmul.f32 0.03125, %v5730_v21 }
0x3dd8   :  { %v5734_v25 = vsub.f32 %v5722_v54, %v5732_v2 }
0x3dd9   :  { %v5739_v16 = vpop.xlane.xlu0 %5738 }
0x3dda   :  { %v5736_v32 = vmul.f32 %v5734_v25, %v5734_v25 }
0x3ddc   :  { %v5740_v47 = vsel %vm98_vm0, %v5736_v32, 0.0 }
0x3ddd   :  { %5741 = vadd.xlane.f32.xlu1 %v5740_v47  ;;  %v5845_v29 = vpop.permute.xlu0 %5844 }
0x3dde   :  { %v5847_v38 = vadd.f32 %v5845_v29, %v8681_v59  ;;  %v5848_v36 = vadd.f32 %v5845_v29, %v8688_v63  ;;  %v5849_v14 = vadd.f32 %v8678_v57, %v5845_v29  ;;  %v5850_v13 = vadd.f32 %v8683_v60, %v5845_v29  ;;  %v8201_v59 = vld [vmem:[%s10037_s6 + $0x30] sm:$0xff]   ;;  %v8202_v57 = vld [vmem:[%s10037_s6 + $0x38] sm:$0xff]  }
0x3ddf   :  { %8020 = vmatpush3.bf16.msra.mxu1 %v8201_v59  ;;  %v5743_v60 = vmul.f32 0.03125, %v5739_v16 }
0x3de0   :  { %v9773_v15 = vpack.c.bf16 %v5848_v36, %v5847_v38  ;;  %v9775_v6 = vpack.c.bf16 %v5850_v13, %v5849_v14  ;;  %8021 = vmatprep.subr.bf16.mxu1 %v8439_v61 }
0x3de1   :  { %v5745_v63 = vadd.f32 1e-05, %v5743_v60 }
0x3de3   :  { %8022 = vmatpush3.bf16.msra.mxu1 %v8202_v57  ;;  %8389 = vrsqrt.f32 %v5745_v63 }
0x3de4   :  { %8033 = vmatprep.subr.bf16.mxu1 %v8439_v61 }
0x3ded   :  { %v8390_v30 = vpop.eup %8389 }
0x3dee   :  { %5781 = vrot.lane.b32.xlu1 %v8658_v44, %s8438_s18  ;;  %v5749_v23 = vmul.f32 %v8390_v30, %v5733_v53 }
0x3df0   :  { %v5755_v37 = vmul.f32 %v7194_v33, %v5749_v23 }
0x3df2   :  { %5920 = vrot.lane.b32.xlu1 %v9773_v15, %s8441_s1  ;;  %v9795_v17 = vadd.f32 %v7195_v41, %v5755_v37 }
0x3e6a   :  { %v5742_v44 = vpop.xlane.xlu1 %5741 }
0x3e6b   :  { %v5744_v35 = vmul.f32 0.03125, %v5742_v44 }
0x3e6d   :  { %v5746_v39 = vadd.f32 1e-05, %v5744_v35 }
0x3e6e   :  { %v5782_v45 = vpop.permute.xlu1 %5781 }
0x3e6f   :  { %8391 = vrsqrt.f32 %v5746_v39 }
0x3e72   :  { %v5921_v11 = vpop.permute.xlu1 %5920 }
0x3e73   :  { %v5926_v28 = vsel %vm545_vm2, %v5921_v11, 0 }
0x3e79   :  { %v8392_v49 = vpop.eup %8391 }
0x3e7a   :  { %v5750_v18 = vmul.f32 %v8392_v49, %v5734_v25 }
0x3e7c   :  { %v5756_v40 = vmul.f32 %v7194_v33, %v5750_v18 }
0x3e7e   :  { %v9797_v55 = vadd.f32 %v7195_v41, %v5756_v40 }
0x3e80   :  { %v5763_v1 = vpack.c.bf16 %v9797_v55, %v9795_v17 }
0x3e82   :  { %8024 = vmatmul.mubr.msk.bf16.vlgmr.msra.gmra.mrb[184].mxu1 %vm98_vm0, %v5763_v1 }
0x3e83   :  { %8034 = vmatpush3.bf16.xpose.msra.mxu1 %v5926_v28  ;;  %8035 = vmatprep.mubr.msk.bf16.mxu1 %vm8440_vm1, %v8439_v61 }
0x3e84   :  { %8045 = vmatprep.subr.bf16.mxu1 %v8439_v61 }
0x3f55   :  { %v5824_v62 = vpop.f32.mrb[184].mxu1 }
0x3f56   :  { %v5825_v20 = vadd.f32 %v5824_v62, %v5782_v45  ;;  %v8025_v5 = vpop.f32.mrb[185].mxu1 }
0x3f57   :  { %v9811_v26 = vpop.f32.mrb[186].mxu1 }
0x3f58   :  { %v5836_v58 = vadd.f32 %v9809_v50, %v5825_v20  ;;  %v8026_v43 = vpop.f32.mrb[187].mxu1 }
0x3f5a   :  { %v5852_v8 = vpack.c.bf16 %v5836_v58, %v5836_v58 }
0x3f5c   :  { %5918 = vrot.lane.b32.xlu0 %v5852_v8, %s8442_s0 }
0x3fce   :  { %v5919_v9 = vpop.permute.xlu0 %5918 }
0x3fcf   :  { %8036 = vmatmul.mubr.msk.bf16.vlgmr.msra.gmra.mrb[188].mxu1 %vm545_vm2, %v5919_v9 }
0x3fd0   :  { %8046 = vmatpush3.bf16.msra.mxu1 %v8757_v48  ;;  %8047 = vmatprep.mubr.msk.bf16.mxu1 %vm8440_vm1, %v8439_v61 }
0x3fd1   :  { %8057 = vmatprep.subr.bf16.mxu1 %v8439_v61 }
0x40a2   :  { %v5962_v52 = vpop.f32.mrb[188].mxu1 }
0x40a3   :  { %v5968_v34 = vmul.f32 0.35355338, %v5962_v52  ;;  %v8037_v3 = vpop.f32.mrb[189].mxu1 }
0x40a4   :  { %v5965_v24 = vpop.f32.mrb[190].mxu1 }
0x40a5   :  { %v8038_v19 = vpop.f32.mrb[191].mxu1  ;;  %v5969_v12 = vsel %vm1626_vm4, %v5968_v34, -inf }
0x40a6   :  { %5970 = vmax.xlane.f32.xlu1 %v5969_v12 }
0x40b7   :  { %5982 = vrot.lane.b32.xlu1 %v8757_v48, %s8445_s24 }
0x40bb   :  { %6073 = vrot.lane.b32.xlu1 %v9773_v15, %s8443_s23 }
0x40bf   :  { %6183 = vrot.lane.b32.xlu1 %v9773_v15, %s8444_s9 }
0x4133   :  { %v5971_v7 = vpop.xlane.xlu1 %5970 }
0x4134   :  { %v5972_v27 = vsub.f32 %v5968_v34, %v5971_v7 }
0x4136   :  { %v5973_v31 = vmul.f32 1.442695, %v5972_v27 }
0x4137   :  { %v5983_v10 = vpop.permute.xlu1 %5982 }
0x4138   :  { %8393 = vpow2.f32 %v5973_v31 }
0x413b   :  { %v6074_v21 = vpop.permute.xlu1 %6073 }
0x413c   :  { %v6079_v25 = vsel %vm545_vm2, %v6074_v21, 0 }
0x413f   :  { %v6184_v16 = vpop.permute.xlu1 %6183 }
0x4140   :  { %v6189_v47 = vsel %vm545_vm2, %v6184_v16, 0 }
0x4142   :  { %v8394_v53 = vpop.eup %8393 }
0x4143   :  { %v5975_v51 = vsel %vm1626_vm4, %v8394_v53, 0.0 }
0x4144   :  { %5976 = vadd.xlane.f32.xlu0 %v5975_v51 }
0x415a   :  { %5856 = vrot.lane.b32.xlu0 %v9773_v15, %s8445_s24 }
0x415e   :  { %6071 = vrot.lane.b32.xlu0 %v5852_v8, %s8446_s25 }
0x4162   :  { %6181 = vrot.lane.b32.xlu0 %v5852_v8, %s8447_s26 }
0x41d1   :  { %v5977_v4 = vpop.xlane.xlu0 %5976 }
0x41d2   :  { %8395 = vrcp.f32 %v5977_v4 }
0x41d5   :  { %v5857_v54 = vpop.permute.xlu0 %5856 }
0x41d6   :  { %v5862_v42 = vsel %vm545_vm2, %v5857_v54, 0 }
0x41d7   :  { %8028 = vmatpush3.bf16.xpose.msra.mxu0 %v5862_v42 }
0x41d8   :  { %8039 = vmatprep.subr.bf16.mxu0 %v8439_v61 }
0x41d9   :  { %v6072_v32 = vpop.permute.xlu0 %6071 }
0x41dc   :  { %v8396_v56 = vpop.eup %8395 }
0x41dd   :  { %v5979_v22 = vmul.f32 %v8396_v56, %v8394_v53  ;;  %v6182_v29 = vpop.permute.xlu0 %6181 }
0x41de   :  { %8030 = vmatmul.mubr.msk.bf16.vlgmr.msra.gmra.mrb[192].mxu0 %vm545_vm2, %v5852_v8 }
0x41df   :  { %8040 = vmatpush3.bf16.msra.mxu0 %v5983_v10  ;;  %8041 = vmatprep.mubr.msk.bf16.mxu0 %vm8440_vm1, %v8439_v61  ;;  %v5980_v2 = vpack.c.bf16 %v5979_v22, %v5979_v22 }
0x41e0   :  { %8051 = vmatprep.subr.bf16.mxu0 %v8439_v61 }
0x41e6   :  { %8042 = vmatmul.mubr.msk.bf16.vlgmr.msra.gmra.mrb[196].mxu0 %vm1626_vm4, %v5980_v2 }
0x41e7   :  { %8053 = vmatprep.mubr.msk.bf16.mxu0 %vm8440_vm1, %v8439_v61 }
0x41e8   :  { %8052 = vmatpush3.bf16.xpose.msra.mxu0 %v6079_v25 }
0x41e9   :  { %8063 = vmatprep.subr.bf16.mxu0 %v8439_v61 }
0x41ef   :  { %8054 = vmatmul.mubr.msk.bf16.vlgmr.msra.gmra.mrb[200].mxu0 %vm545_vm2, %v6072_v32 }
0x41f0   :  { %8064 = vmatpush3.bf16.xpose.msra.mxu0 %v6189_v47  ;;  %8065 = vmatprep.mubr.msk.bf16.mxu0 %vm8440_vm1, %v8439_v61 }
0x41f1   :  { %8075 = vmatprep.subr.bf16.mxu0 %v8439_v61 }
0x41f7   :  { %8066 = vmatmul.mubr.msk.bf16.vlgmr.msra.gmra.mrb[204].mxu0 %vm545_vm2, %v6182_v29 }
0x41f8   :  { %8077 = vmatprep.mubr.msk.bf16.mxu0 %vm8440_vm1, %v8439_v61 }
0x42b1   :  { %v5898_v38 = vpop.f32.mrb[192].mxu0 }
0x42b2   :  { %v5904_v36 = vmul.f32 0.35355338, %v5898_v38  ;;  %v8031_v14 = vpop.f32.mrb[193].mxu0 }
0x42b3   :  { %v5901_v13 = vpop.f32.mrb[194].mxu0 }
0x42b4   :  { %v8032_v15 = vpop.f32.mrb[195].mxu0  ;;  %v5905_v59 = vsel %vm1626_vm4, %v5904_v36, -inf }
0x42b5   :  { %5906 = vmax.xlane.f32.xlu1 %v5905_v59 }
0x42b9   :  { %v9852_v57 = vpop.f32.mrb[196].mxu0 }
0x42ba   :  { %v8043_v60 = vpop.f32.mrb[197].mxu0 }
0x42bb   :  { %v6025_v63 = vpop.f32.mrb[198].mxu0 }
0x42bc   :  { %v8044_v44 = vpop.f32.mrb[199].mxu0 }
0x42c2   :  { %v6115_v35 = vpop.f32.mrb[200].mxu0 }
0x42c3   :  { %v6121_v39 = vmul.f32 0.35355338, %v6115_v35  ;;  %v8055_v30 = vpop.f32.mrb[201].mxu0 }
0x42c4   :  { %v6118_v23 = vpop.f32.mrb[202].mxu0 }
0x42c5   :  { %v8056_v33 = vpop.f32.mrb[203].mxu0  ;;  %v6122_v49 = vsel %vm1626_vm4, %v6121_v39, -inf }
0x42c6   :  { %5783 = vrot.lane.b32.xlu1 %v8662_v46, %s8438_s18  ;;  %6123 = vmax.xlane.f32.xlu0 %v6122_v49 }
0x42ca   :  { %6244 = vrot.lane.b32.xlu1 %v8757_v48, %s8438_s18  ;;  %v6225_v45 = vpop.f32.mrb[204].mxu0 }
0x42cb   :  { %v6231_v37 = vmul.f32 0.35355338, %v6225_v45  ;;  %v8067_v18 = vpop.f32.mrb[205].mxu0 }
0x42cc   :  { %v6228_v41 = vpop.f32.mrb[206].mxu0 }
0x42cd   :  { %v8068_v40 = vpop.f32.mrb[207].mxu0  ;;  %v6232_v11 = vsel %vm1626_vm4, %v6231_v37, -inf }
0x42ce   :  { %6359 = vrot.lane.b32.xlu1 %v9775_v6, %s8441_s1  ;;  %6233 = vmax.xlane.f32.xlu0 %v6232_v11 }
0x4342   :  { %v5907_v1 = vpop.xlane.xlu1 %5906 }
0x4343   :  { %v5908_v28 = vsub.f32 %v5904_v36, %v5907_v1 }
0x4345   :  { %v5909_v62 = vmul.f32 1.442695, %v5908_v28 }
0x4346   :  { %v5784_v20 = vpop.permute.xlu1 %5783 }
0x4347   :  { %8397 = vpow2.f32 %v5909_v62  ;;  %v5828_v46 = vadd.f32 %v9811_v26, %v5784_v20 }
0x4349   :  { %v5837_v5 = vadd.f32 %v9809_v50, %v5828_v46 }
0x434b   :  { %v9864_v58 = vpack.c.bf16 %v5837_v5, %v5837_v5 }
0x434d   :  { %6357 = vrot.lane.b32.xlu1 %v9864_v58, %s8442_s0 }
0x4351   :  { %v8398_v43 = vpop.eup %8397 }
0x4352   :  { %v5911_v8 = vsel %vm1626_vm4, %v8398_v43, 0.0 }
0x4353   :  { %v6124_v9 = vpop.xlane.xlu0 %6123  ;;  %5912 = vadd.xlane.f32.xlu0 %v5911_v8 }
0x4354   :  { %v6125_v52 = vsub.f32 %v6121_v39, %v6124_v9 }
0x4356   :  { %v6126_v34 = vmul.f32 1.442695, %v6125_v52 }
0x4358   :  { %8399 = vpow2.f32 %v6126_v34 }
0x435b   :  { %v6234_v3 = vpop.xlane.xlu0 %6233 }
0x435c   :  { %v6235_v24 = vsub.f32 %v6231_v37, %v6234_v3 }
0x435e   :  { %v6236_v19 = vmul.f32 1.442695, %v6235_v24 }
0x4360   :  { %8401 = vpow2.f32 %v6236_v19 }
0x4362   :  { %v8400_v26 = vpop.eup %8399 }
0x4363   :  { %v6128_v50 = vsel %vm1626_vm4, %v8400_v26, 0.0 }
0x4364   :  { %6129 = vadd.xlane.f32.xlu0 %v6128_v50 }
0x436a   :  { %v8402_v12 = vpop.eup %8401 }
0x436b   :  { %v6238_v7 = vsel %vm1626_vm4, %v8402_v12, 0.0 }
0x436c   :  { %6239 = vadd.xlane.f32.xlu0 %v6238_v7 }
0x4382   :  { %6134 = vrot.lane.b32.xlu0 %v8757_v48, %s8448_s8  ;;  %v6245_v48 = vpop.permute.xlu1 %6244 }
0x4386   :  { %v6360_v25 = vpop.permute.xlu1 %6359 }
0x4387   :  { %v6365_v32 = vsel %vm545_vm2, %v6360_v25, 0 }
0x43bf   :  { %v6358_v47 = vpop.permute.xlu1 %6357 }
0x43e0   :  { %v5913_v27 = vpop.xlane.xlu0 %5912 }
0x43e1   :  { %8403 = vrcp.f32 %v5913_v27 }
0x43eb   :  { %v8404_v31 = vpop.eup %8403 }
0x43ec   :  { %v5915_v53 = vmul.f32 %v8404_v31, %v8398_v43 }
0x43ee   :  { %v5916_v51 = vpack.c.bf16 %v5915_v53, %v5915_v53 }
0x43f0   :  { %8048 = vmatmul.mubr.msk.bf16.vlgmr.msra.gmra.mrb[192].mxu1 %vm1626_vm4, %v5916_v51 }
0x43f1   :  { %v6130_v4 = vpop.xlane.xlu0 %6129  ;;  %8059 = vmatprep.mubr.msk.bf16.mxu1 %vm8440_vm1, %v8439_v61 }
0x43f2   :  { %8405 = vrcp.f32 %v6130_v4 }
0x43f9   :  { %v6240_v54 = vpop.xlane.xlu0 %6239 }
0x43fa   :  { %8407 = vrcp.f32 %v6240_v54 }
0x43fc   :  { %v8406_v42 = vpop.eup %8405 }
0x43fd   :  { %v6132_v56 = vmul.f32 %v8406_v42, %v8400_v26  ;;  %v6135_v10 = vpop.permute.xlu0 %6134 }
0x43fe   :  { %8058 = vmatpush3.bf16.msra.mxu1 %v6135_v10 }
0x43ff   :  { %v6133_v22 = vpack.c.bf16 %v6132_v56, %v6132_v56  ;;  %8069 = vmatprep.subr.bf16.mxu1 %v8439_v61 }
0x4401   :  { %8060 = vmatmul.mubr.msk.bf16.vlgmr.msra.gmra.mrb[196].mxu1 %vm1626_vm4, %v6133_v22 }
0x4402   :  { %8070 = vmatpush3.bf16.msra.mxu1 %v6245_v48  ;;  %8071 = vmatprep.mubr.msk.bf16.mxu1 %vm8440_vm1, %v8439_v61 }
0x4403   :  { %8081 = vmatprep.subr.bf16.mxu1 %v8439_v61 }
0x4404   :  { %v8408_v21 = vpop.eup %8407 }
0x4405   :  { %v6242_v2 = vmul.f32 %v8408_v21, %v8402_v12 }
0x4407   :  { %v6243_v16 = vpack.c.bf16 %v6242_v2, %v6242_v2 }
0x4409   :  { %8072 = vmatmul.mubr.msk.bf16.vlgmr.msra.gmra.mrb[200].mxu1 %vm1626_vm4, %v6243_v16 }
0x440a   :  { %8083 = vmatprep.mubr.msk.bf16.mxu1 %vm8440_vm1, %v8439_v61 }
0x440b   :  { %8082 = vmatpush3.bf16.xpose.msra.mxu1 %v6365_v32 }
0x440c   :  { %8093 = vmatprep.subr.bf16.mxu1 %v8439_v61 }
0x4412   :  { %8084 = vmatmul.mubr.msk.bf16.vlgmr.msra.gmra.mrb[204].mxu1 %vm545_vm2, %v6358_v47 }
0x4413   :  { %8094 = vmatpush3.bf16.msra.mxu1 %v8766_v0  ;;  %8095 = vmatprep.mubr.msk.bf16.mxu1 %vm8440_vm1, %v8439_v61 }
0x4414   :  { %8105 = vmatprep.subr.bf16.mxu1 %v8439_v61 }
0x44c3   :  { %v6065_v29 = vpop.f32.mrb[192].mxu1 }
0x44c4   :  { %v6066_v38 = vadd.f32 %v6065_v29, %v9852_v57  ;;  %v8049_v36 = vpop.f32.mrb[193].mxu1 }
0x44c5   :  { %v6068_v14 = vpop.f32.mrb[194].mxu1 }
0x44c6   :  { %v8050_v13 = vpop.f32.mrb[195].mxu1 }
0x44d4   :  { %v6174_v15 = vpop.f32.mrb[196].mxu1 }
0x44d5   :  { %v6180_v59 = vadd.f32 %v6174_v15, %v6066_v38  ;;  %v8061_v60 = vpop.f32.mrb[197].mxu1 }
0x44d6   :  { %v6177_v63 = vpop.f32.mrb[198].mxu1 }
0x44d7   :  { %v8062_v44 = vpop.f32.mrb[199].mxu1 }
0x44dc   :  { %v6284_v35 = vpop.f32.mrb[200].mxu1 }
0x44dd   :  { %v9892_v39 = vadd.f32 %v6284_v35, %v6180_v59  ;;  %v8073_v30 = vpop.f32.mrb[201].mxu1 }
0x44de   :  { %v6287_v23 = vpop.f32.mrb[202].mxu1 }
0x44df   :  { %v8074_v33 = vpop.f32.mrb[203].mxu1 }
0x44e5   :  { %v6401_v49 = vpop.f32.mrb[204].mxu1 }
0x44e6   :  { %v6407_v45 = vmul.f32 0.35355338, %v6401_v49  ;;  %v8085_v37 = vpop.f32.mrb[205].mxu1 }
0x44e7   :  { %v6404_v18 = vpop.f32.mrb[206].mxu1 }
0x44e8   :  { %v8086_v41 = vpop.f32.mrb[207].mxu1  ;;  %v6408_v57 = vsel %vm1626_vm4, %v6407_v45, -inf }
0x44e9   :  { %6409 = vmax.xlane.f32.xlu1 %v6408_v57 }
0x44fa   :  { %6295 = vrot.lane.b32.xlu1 %v9775_v6, %s8445_s24 }
0x44fe   :  { %6512 = vrot.lane.b32.xlu1 %v9775_v6, %s8443_s23 }
0x4502   :  { %6510 = vrot.lane.b32.xlu1 %v9864_v58, %s8446_s25 }
0x4506   :  { %6620 = vrot.lane.b32.xlu1 %v9864_v58, %s8447_s26 }
0x4576   :  { %v6410_v40 = vpop.xlane.xlu1 %6409 }
0x4577   :  { %v6411_v11 = vsub.f32 %v6407_v45, %v6410_v40  ;;  %v7221_v40 = vld [vmem:[%s10033_s14 + $0x1a] ss:$0 sm:$0xff] }
0x4579   :  { %v6412_v1 = vmul.f32 1.442695, %v6411_v11  ;;  %v6734_v11 = vadd.f32 %v7221_v40, %v9892_v39 }
0x457a   :  { %v6296_v28 = vpop.permute.xlu1 %6295 }
0x457b   :  { %8409 = vpow2.f32 %v6412_v1  ;;  %v6301_v62 = vsel %vm545_vm2, %v6296_v28, 0  ;;  %v6736_v1 = vadd.f32 %v6734_v11, %v9795_v17  ;;  %v8208_v11 = vld [vmem:[%s10039_s13 + $0x38] sm:$0xff]  }
0x457c   :  { %8076 = vmatpush3.bf16.xpose.msra.mxu0 %v6301_v62 }
0x457d   :  { %8087 = vmatprep.subr.bf16.mxu0 %v8439_v61  ;;  %v6740_v28 = vsel %vm98_vm0, %v6736_v1, 0.0 }
0x457e   :  { %v6513_v9 = vpop.permute.xlu1 %6512 }
0x457f   :  { %v6518_v34 = vsel %vm545_vm2, %v6513_v9, 0 }
0x4582   :  { %v6511_v3 = vpop.permute.xlu1 %6510 }
0x4583   :  { %8078 = vmatmul.mubr.msk.bf16.vlgmr.msra.gmra.mrb[208].mxu0 %vm545_vm2, %v9864_v58 }
0x4584   :  { %8089 = vmatprep.mubr.msk.bf16.mxu0 %vm8440_vm1, %v8439_v61 }
0x4585   :  { %v8410_v20 = vpop.eup %8409 }
0x4586   :  { %v6414_v46 = vsel %vm1626_vm4, %v8410_v20, 0.0  ;;  %v6621_v19 = vpop.permute.xlu1 %6620 }
0x4587   :  { %6415 = vadd.xlane.f32.xlu0 %v6414_v46 }
0x459d   :  { %6421 = vrot.lane.b32.xlu0 %v8766_v0, %s8445_s24 }
0x45a1   :  { %6622 = vrot.lane.b32.xlu0 %v9775_v6, %s8444_s9 }
0x4614   :  { %v6416_v5 = vpop.xlane.xlu0 %6415 }
0x4615   :  { %8411 = vrcp.f32 %v6416_v5 }
0x4618   :  { %v6422_v43 = vpop.permute.xlu0 %6421 }
0x4619   :  { %8088 = vmatpush3.bf16.msra.mxu0 %v6422_v43 }
0x461a   :  { %8099 = vmatprep.subr.bf16.mxu0 %v8439_v61 }
0x461c   :  { %v6623_v6 = vpop.permute.xlu0 %6622 }
0x461d   :  { %v6628_v24 = vsel %vm545_vm2, %v6623_v6, 0 }
0x461f   :  { %v8412_v58 = vpop.eup %8411 }
0x4620   :  { %v6418_v8 = vmul.f32 %v8412_v58, %v8410_v20 }
0x4622   :  { %v6419_v52 = vpack.c.bf16 %v6418_v8, %v6418_v8 }
0x4624   :  { %8090 = vmatmul.mubr.msk.bf16.vlgmr.msra.gmra.mrb[212].mxu0 %vm1626_vm4, %v6419_v52 }
0x4625   :  { %8100 = vmatpush3.bf16.xpose.msra.mxu0 %v6518_v34  ;;  %8101 = vmatprep.mubr.msk.bf16.mxu0 %vm8440_vm1, %v8439_v61 }
0x4626   :  { %8111 = vmatprep.subr.bf16.mxu0 %v8439_v61 }
0x462c   :  { %8102 = vmatmul.mubr.msk.bf16.vlgmr.msra.gmra.mrb[216].mxu0 %vm545_vm2, %v6511_v3 }
0x462d   :  { %8112 = vmatpush3.bf16.xpose.msra.mxu0 %v6628_v24  ;;  %8113 = vmatprep.mubr.msk.bf16.mxu0 %vm8440_vm1, %v8439_v61 }
0x462e   :  { %8123 = vmatprep.subr.bf16.mxu0 %v8439_v61 }
0x4634   :  { %8114 = vmatmul.mubr.msk.bf16.vlgmr.msra.gmra.mrb[220].mxu0 %vm545_vm2, %v6621_v19 }
0x4635   :  { %8127 = vmatprep.mubr.msk.bf16.mxu0 %vm8440_vm1, %v8439_v61 }
0x4656   :  { %v6337_v26 = vpop.f32.mrb[208].mxu0 }
0x4657   :  { %v6343_v50 = vmul.f32 0.35355338, %v6337_v26  ;;  %v8079_v12 = vpop.f32.mrb[209].mxu0 }
0x4658   :  { %v6340_v7 = vpop.f32.mrb[210].mxu0 }
0x4659   :  { %v8080_v27 = vpop.f32.mrb[211].mxu0  ;;  %v6344_v31 = vsel %vm1626_vm4, %v6343_v50, -inf }
0x465a   :  { %6345 = vmax.xlane.f32.xlu0 %v6344_v31 }
0x46e7   :  { %v6346_v53 = vpop.xlane.xlu0 %6345 }
0x46e8   :  { %v6347_v54 = vsub.f32 %v6343_v50, %v6346_v53 }
0x46ea   :  { %v6348_v10 = vmul.f32 1.442695, %v6347_v54 }
0x46ec   :  { %8413 = vpow2.f32 %v6348_v10 }
0x46f6   :  { %v8414_v13 = vpop.eup %8413 }
0x46f7   :  { %v9929_v51 = vpop.f32.mrb[212].mxu0  ;;  %v6350_v15 = vsel %vm1626_vm4, %v8414_v13, 0.0 }
0x46f8   :  { %v8091_v4 = vpop.f32.mrb[213].mxu0 }
0x46f9   :  { %v6464_v42 = vpop.f32.mrb[214].mxu0 }
0x46fa   :  { %v8092_v56 = vpop.f32.mrb[215].mxu0 }
0x46ff   :  { %v6554_v22 = vpop.f32.mrb[216].mxu0 }
0x4700   :  { %v6560_v48 = vmul.f32 0.35355338, %v6554_v22  ;;  %v8103_v21 = vpop.f32.mrb[217].mxu0 }
0x4701   :  { %v6557_v2 = vpop.f32.mrb[218].mxu0 }
0x4702   :  { %v8104_v25 = vpop.f32.mrb[219].mxu0  ;;  %v6561_v16 = vsel %vm1626_vm4, %v6560_v48, -inf }
0x4703   :  { %6562 = vmax.xlane.f32.xlu1 %v6561_v16 }
0x4707   :  { %v6664_v32 = vpop.f32.mrb[220].mxu0 }
0x4708   :  { %v6670_v47 = vmul.f32 0.35355338, %v6664_v32  ;;  %v8115_v29 = vpop.f32.mrb[221].mxu0 }
0x4709   :  { %v6667_v38 = vpop.f32.mrb[222].mxu0  ;;  %v8203_v29 = vld [vmem:[%s10038_s11 + $0x10] sm:$0xff]  }
0x470a   :  { %v8116_v36 = vpop.f32.mrb[223].mxu0  ;;  %v6671_v14 = vsel %vm1626_vm4, %v6670_v47, -inf  ;;  %8124 = vmatpush3.bf16.msra.mxu0 %v8203_v29  ;;  %v8204_v38 = vld [vmem:[%s10038_s11 + $0x18] sm:$0xff]   ;;  %v7248_v29 = vld [vmem:[%s10033_s14 + $0x23] ss:$0 sm:$0xff] }
0x470b   :  { %6672 = vmax.xlane.f32.xlu0 %v6671_v14  ;;  %8125 = vmatprep.subr.bf16.mxu0 %v8439_v61  ;;  %v8206_v36 = vld [vmem:[%s10039_s13 + $0x28] sm:$0xff]  }
0x470e   :  { %8126 = vmatpush3.bf16.msra.mxu0 %v8204_v38 }
0x470f   :  { %6351 = vadd.xlane.f32.xlu0 %v6350_v15 }
0x4790   :  { %v6563_v59 = vpop.xlane.xlu1 %6562 }
0x4791   :  { %v6564_v60 = vsub.f32 %v6560_v48, %v6563_v59 }
0x4793   :  { %v6565_v63 = vmul.f32 1.442695, %v6564_v60 }
0x4795   :  { %8415 = vpow2.f32 %v6565_v63 }
0x4798   :  { %v6673_v44 = vpop.xlane.xlu0 %6672 }
0x4799   :  { %v6674_v35 = vsub.f32 %v6670_v47, %v6673_v44 }
0x479b   :  { %v6675_v30 = vmul.f32 1.442695, %v6674_v35 }
0x479c   :  { %v6352_v23 = vpop.xlane.xlu0 %6351 }
0x479d   :  { %8417 = vpow2.f32 %v6675_v30  ;;  %v7222_v30 = vld [vmem:[%s10033_s14 + $0x1e] ss:$0 sm:$0xff] }
0x479e   :  { %8419 = vrcp.f32 %v6352_v23 }
0x479f   :  { %v8416_v33 = vpop.eup %8415 }
0x47a0   :  { %v6567_v49 = vsel %vm1626_vm4, %v8416_v33, 0.0 }
0x47a1   :  { %6568 = vadd.xlane.f32.xlu1 %v6567_v49 }
0x47a7   :  { %v8418_v45 = vpop.eup %8417 }
0x47a8   :  { %v8420_v37 = vpop.eup %8419  ;;  %v6677_v18 = vsel %vm1626_vm4, %v8418_v45, 0.0 }
0x47a9   :  { %v6354_v41 = vmul.f32 %v8420_v37, %v8414_v13  ;;  %6678 = vadd.xlane.f32.xlu0 %v6677_v18 }
0x47ab   :  { %v6355_v57 = vpack.c.bf16 %v6354_v41, %v6354_v41 }
0x47ad   :  { %8096 = vmatmul.mubr.msk.bf16.vlgmr.msra.gmra.mrb[208].mxu1 %vm1626_vm4, %v6355_v57 }
0x47ae   :  { %8107 = vmatprep.mubr.msk.bf16.mxu1 %vm8440_vm1, %v8439_v61 }
0x47b2   :  { %6573 = vrot.lane.b32.xlu1 %v8766_v0, %s8448_s8 }
0x47bf   :  { %6683 = vrot.lane.b32.xlu0 %v8766_v0, %s8438_s18 }
0x47d6   :  { %6741 = vadd.xlane.f32.xlu1 %v6740_v28 }
0x482e   :  { %v6569_v62 = vpop.xlane.xlu1 %6568 }
0x482f   :  { %8421 = vrcp.f32 %v6569_v62 }
0x4832   :  { %v6574_v20 = vpop.permute.xlu1 %6573 }
0x4833   :  { %8106 = vmatpush3.bf16.msra.mxu1 %v6574_v20 }
0x4834   :  { %8117 = vmatprep.subr.bf16.mxu1 %v8439_v61 }
0x4836   :  { %v6679_v46 = vpop.xlane.xlu0 %6678 }
0x4837   :  { %8423 = vrcp.f32 %v6679_v46 }
0x4839   :  { %v8422_v0 = vpop.eup %8421 }
0x483a   :  { %v6571_v5 = vmul.f32 %v8422_v0, %v8416_v33  ;;  %v6684_v58 = vpop.permute.xlu0 %6683 }
0x483c   :  { %v6572_v43 = vpack.c.bf16 %v6571_v5, %v6571_v5 }
0x483e   :  { %8108 = vmatmul.mubr.msk.bf16.vlgmr.msra.gmra.mrb[212].mxu1 %vm1626_vm4, %v6572_v43 }
0x483f   :  { %8118 = vmatpush3.bf16.msra.mxu1 %v6684_v58  ;;  %8119 = vmatprep.mubr.msk.bf16.mxu1 %vm8440_vm1, %v8439_v61 }
0x4840   :  { %8131 = vmatprep.subr.bf16.mxu1 %v8439_v61 }
0x4841   :  { %v8424_v17 = vpop.eup %8423 }
0x4842   :  { %v6681_v39 = vmul.f32 %v8424_v17, %v8418_v45  ;;  %v7223_v45 = vld [vmem:[%s10033_s14 + $0x22] ss:$0 sm:$0xff] }
0x4844   :  { %v6682_v8 = vpack.c.bf16 %v6681_v39, %v6681_v39 }
0x4846   :  { %8120 = vmatmul.mubr.msk.bf16.vlgmr.msra.gmra.mrb[216].mxu1 %vm1626_vm4, %v6682_v8 }
0x4847   :  { %8139 = vmatprep.mubr.msk.bf16.mxu1 %vm8440_vm1, %v8439_v61 }
0x4863   :  { %v6742_v9 = vpop.xlane.xlu1 %6741 }
0x4864   :  { %v6746_v52 = vmul.f32 0.03125, %v6742_v9 }
0x4866   :  { %v6748_v34 = vsub.f32 %v6736_v1, %v6746_v52  ;;  %v7229_v1 = vld [vmem:[%s10040_s12 + $0x1] ss:$0 sm:$0xff] }
0x4868   :  { %v6750_v6 = vmul.f32 %v6748_v34, %v6748_v34 }
0x486a   :  { %v6752_v3 = vsel %vm98_vm0, %v6750_v6, 0.0 }
0x486b   :  { %6753 = vadd.xlane.f32.xlu1 %v6752_v3 }
0x4880   :  { %v6504_v24 = vpop.f32.mrb[208].mxu1 }
0x4881   :  { %v6505_v19 = vadd.f32 %v6504_v24, %v9929_v51  ;;  %v8097_v26 = vpop.f32.mrb[209].mxu1 }
0x4882   :  { %v6507_v50 = vpop.f32.mrb[210].mxu1 }
0x4883   :  { %v8098_v12 = vpop.f32.mrb[211].mxu1 }
0x48f8   :  { %v6754_v14 = vpop.xlane.xlu1 %6753 }
0x48f9   :  { %v6758_v13 = vmul.f32 0.03125, %v6754_v14 }
0x48fb   :  { %v6760_v15 = vadd.f32 1e-05, %v6758_v13 }
0x48fd   :  { %8425 = vrsqrt.f32 %v6760_v15 }
0x4907   :  { %v8426_v44 = vpop.eup %8425 }
0x4908   :  { %v6764_v35 = vmul.f32 %v8426_v44, %v6748_v34 }
0x490a   :  { %v6770_v33 = vmul.f32 %v7222_v30, %v6764_v35 }
0x490c   :  { %v6776_v18 = vadd.f32 %v7223_v45, %v6770_v33 }
0x4911   :  { %v6613_v7 = vpop.f32.mrb[212].mxu1 }
0x4912   :  { %v6619_v27 = vadd.f32 %v6613_v7, %v6505_v19  ;;  %v8109_v31 = vpop.f32.mrb[213].mxu1 }
0x4913   :  { %v6616_v53 = vpop.f32.mrb[214].mxu1 }
0x4914   :  { %v8110_v4 = vpop.f32.mrb[215].mxu1 }
0x4919   :  { %v6723_v54 = vpop.f32.mrb[216].mxu1 }
0x491a   :  { %v6729_v42 = vadd.f32 %v6723_v54, %v6619_v27  ;;  %v8121_v56 = vpop.f32.mrb[217].mxu1 }
0x491b   :  { %v6726_v10 = vpop.f32.mrb[218].mxu1 }
0x491c   :  { %v6735_v22 = vadd.f32 %v7221_v40, %v6729_v42  ;;  %v8122_v48 = vpop.f32.mrb[219].mxu1  ;;  %v8207_v40 = vld [vmem:[%s10039_s13 + $0x30] sm:$0xff]  }
0x491e   :  { %v6737_v21 = vadd.f32 %v6735_v22, %v9797_v55  ;;  %v8205_v55 = vld [vmem:[%s10039_s13 + $0x20] sm:$0xff]  }
0x491f   :  { %8132 = vmatpush3.bf16.msra.mxu1 %v8205_v55 }
0x4920   :  { %v6743_v2 = vsel %vm98_vm0, %v6737_v21, 0.0  ;;  %8133 = vmatprep.subr.bf16.mxu1 %v8439_v61 }
0x4921   :  { %6744 = vadd.xlane.f32.xlu0 %v6743_v2 }
0x4923   :  { %8134 = vmatpush3.bf16.msra.mxu1 %v8206_v36 }
0x4924   :  { %8135 = vmatprep.subr.bf16.mxu1 %v8439_v61 }
0x4927   :  { %8136 = vmatpush3.bf16.msra.mxu1 %v8207_v40 }
0x4928   :  { %8137 = vmatprep.subr.bf16.mxu1 %v8439_v61  ;;  %v7241_v61 = vld [vmem:[%s10033_s14 + $0x1b] ss:$0 sm:$0xff] }
0x492b   :  { %8138 = vmatpush3.bf16.msra.mxu1 %v8208_v11 }
0x49ae   :  { %v6745_v51 = vpop.xlane.xlu0 %6744 }
0x49af   :  { %v6747_v25 = vmul.f32 0.03125, %v6745_v51 }
0x49b1   :  { %v6749_v16 = vsub.f32 %v6737_v21, %v6747_v25 }
0x49b3   :  { %v6751_v32 = vmul.f32 %v6749_v16, %v6749_v16 }
0x49b5   :  { %v6755_v47 = vsel %vm98_vm0, %v6751_v32, 0.0 }
0x49b6   :  { %6756 = vadd.xlane.f32.xlu0 %v6755_v47 }
0x4a43   :  { %v6757_v59 = vpop.xlane.xlu0 %6756 }
0x4a44   :  { %v6759_v60 = vmul.f32 0.03125, %v6757_v59 }
0x4a46   :  { %v6761_v63 = vadd.f32 1e-05, %v6759_v60 }
0x4a48   :  { %8427 = vrsqrt.f32 %v6761_v63 }
0x4a52   :  { %v8428_v23 = vpop.eup %8427 }
0x4a53   :  { %v6765_v49 = vmul.f32 %v8428_v23, %v6749_v16  ;;  %v7247_v16 = vld [vmem:[%s10033_s14 + $0x1f] ss:$0 sm:$0xff] }
0x4a55   :  { %v6771_v37 = vmul.f32 %v7222_v30, %v6765_v49 }
0x4a57   :  { %v6777_v41 = vadd.f32 %v7223_v45, %v6771_v37 }
0x4a59   :  { %v6778_v57 = vpack.c.bf16 %v6777_v41, %v6776_v18 }
0x4a5b   :  { %8128 = vmatmul.mubr.msk.bf16.vlgmr.msra.gmra.mrb[224].mxu0 %vm98_vm0, %v6778_v57 }
0x4b2e   :  { %v6841_v28 = vpop.f32.mrb[224].mxu0 }
0x4b2f   :  { %v6842_v62 = vadd.f32 %v7229_v1, %v6841_v28  ;;  %v8129_v20 = vpop.f32.mrb[225].mxu0 }
0x4b30   :  { %v6844_v46 = vpop.f32.mrb[226].mxu0 }
0x4b31   :  { %v6845_v0 = vadd.f32 %v7229_v1, %v6844_v46  ;;  %v8130_v5 = vpop.f32.mrb[227].mxu0  ;;  %v6848_v43 = vmax.f32 %v6842_v62, 0.0  ;;  %v7249_v62 = vld [vmem:[%s10033_s14 + $0x24] ss:$0 sm:$0xff] }
0x4b33   :  { %v6849_v58 = vmax.f32 %v6845_v0, 0.0  ;;  %v7250_v0 = vld [vmem:[%s10033_s14 + $0x25] ss:$0 sm:$0xff] }
0x4b35   :  { %v6850_v17 = vpack.c.bf16 %v6849_v58, %v6848_v43 }
0x4b37   :  { %8140 = vmatmul.mubr.msk.bf16.vlgmr.msra.gmra.mrb[220].mxu1 %vm3616_vm5, %v6850_v17 }
0x4c0a   :  { %v6926_v39 = vpop.f32.mrb[220].mxu1 }
0x4c0b   :  { %v6927_v8 = vadd.f32 %v7241_v61, %v6926_v39  ;;  %v8141_v9 = vpop.f32.mrb[221].mxu1 }
0x4c0c   :  { %v6929_v52 = vpop.f32.mrb[222].mxu1 }
0x4c0d   :  { %v6933_v34 = vadd.f32 %v6927_v8, %v6776_v18  ;;  %v6930_v6 = vadd.f32 %v7241_v61, %v6929_v52  ;;  %v8142_v3 = vpop.f32.mrb[223].mxu1 }
0x4c0f   :  { %v6934_v24 = vadd.f32 %v6930_v6, %v6777_v41  ;;  %v6937_v19 = vsel %vm98_vm0, %v6933_v34, 0.0 }
0x4c10   :  { %6938 = vadd.xlane.f32.xlu1 %v6937_v19 }
0x4c11   :  { %v6940_v26 = vsel %vm98_vm0, %v6934_v24, 0.0 }
0x4c12   :  { %6941 = vadd.xlane.f32.xlu0 %v6940_v26 }
0x4c9d   :  { %v6939_v50 = vpop.xlane.xlu1 %6938 }
0x4c9e   :  { %v6943_v12 = vmul.f32 0.03125, %v6939_v50 }
0x4c9f   :  { %v6942_v7 = vpop.xlane.xlu0 %6941 }
0x4ca0   :  { %v6945_v27 = vsub.f32 %v6933_v34, %v6943_v12  ;;  %v6944_v31 = vmul.f32 0.03125, %v6942_v7 }
0x4ca2   :  { %v6946_v53 = vsub.f32 %v6934_v24, %v6944_v31  ;;  %v6947_v4 = vmul.f32 %v6945_v27, %v6945_v27 }
0x4ca4   :  { %v6949_v54 = vsel %vm98_vm0, %v6947_v4, 0.0  ;;  %v6948_v42 = vmul.f32 %v6946_v53, %v6946_v53 }
0x4ca5   :  { %6950 = vadd.xlane.f32.xlu1 %v6949_v54 }
0x4ca6   :  { %v6952_v56 = vsel %vm98_vm0, %v6948_v42, 0.0 }
0x4ca7   :  { %6953 = vadd.xlane.f32.xlu0 %v6952_v56 }
0x4d32   :  { %v6951_v10 = vpop.xlane.xlu1 %6950 }
0x4d33   :  { %v6955_v22 = vmul.f32 0.03125, %v6951_v10 }
0x4d34   :  { %v6954_v48 = vpop.xlane.xlu0 %6953 }
0x4d35   :  { %v6957_v21 = vadd.f32 1e-05, %v6955_v22  ;;  %v6956_v2 = vmul.f32 0.03125, %v6954_v48 }
0x4d37   :  { %8429 = vrsqrt.f32 %v6957_v21  ;;  %v6958_v51 = vadd.f32 1e-05, %v6956_v2 }
0x4d39   :  { %8431 = vrsqrt.f32 %v6958_v51 }
0x4d41   :  { %v8430_v25 = vpop.eup %8429 }
0x4d42   :  { %v6961_v32 = vmul.f32 %v8430_v25, %v6945_v27 }
0x4d43   :  { %v8432_v47 = vpop.eup %8431 }
0x4d44   :  { %v6967_v38 = vmul.f32 %v7247_v16, %v6961_v32  ;;  %v6962_v55 = vmul.f32 %v8432_v47, %v6946_v53 }
0x4d46   :  { %v6973_v36 = vadd.f32 %v7248_v29, %v6967_v38  ;;  %v6968_v14 = vmul.f32 %v7247_v16, %v6962_v55 }
0x4d48   :  { %v6977_v13 = vsel %vm98_vm0, %v6973_v36, 0.0  ;;  %v6974_v15 = vadd.f32 %v7248_v29, %v6968_v14 }
0x4d49   :  { %6978 = vadd.xlane.f32.xlu1 %v6977_v13 }
0x4d4a   :  { %v6980_v59 = vsel %vm98_vm0, %v6974_v15, 0.0 }
0x4d4b   :  { %6981 = vadd.xlane.f32.xlu0 %v6980_v59 }
0x4dd6   :  { %v6979_v60 = vpop.xlane.xlu1 %6978 }
0x4dd7   :  { %v6983_v63 = vmul.f32 0.03125, %v6979_v60 }
0x4dd8   :  { %v6982_v44 = vpop.xlane.xlu0 %6981 }
0x4dd9   :  { %v6985_v35 = vsub.f32 %v6973_v36, %v6983_v63  ;;  %v6984_v30 = vmul.f32 0.03125, %v6982_v44 }
0x4ddb   :  { %v6986_v23 = vsub.f32 %v6974_v15, %v6984_v30  ;;  %v6987_v33 = vmul.f32 %v6985_v35, %v6985_v35 }
0x4ddd   :  { %v6989_v49 = vsel %vm98_vm0, %v6987_v33, 0.0  ;;  %v6988_v45 = vmul.f32 %v6986_v23, %v6986_v23 }
0x4dde   :  { %6990 = vadd.xlane.f32.xlu1 %v6989_v49 }
0x4ddf   :  { %v6992_v37 = vsel %vm98_vm0, %v6988_v45, 0.0 }
0x4de0   :  { %6993 = vadd.xlane.f32.xlu0 %v6992_v37 }
0x4e6b   :  { %v6991_v18 = vpop.xlane.xlu1 %6990 }
0x4e6c   :  { %v6995_v41 = vmul.f32 0.03125, %v6991_v18 }
0x4e6d   :  { %v6994_v57 = vpop.xlane.xlu0 %6993 }
0x4e6e   :  { %v6997_v40 = vadd.f32 1e-05, %v6995_v41  ;;  %v6996_v11 = vmul.f32 0.03125, %v6994_v57 }
0x4e70   :  { %8433 = vrsqrt.f32 %v6997_v40  ;;  %v6998_v1 = vadd.f32 1e-05, %v6996_v11 }
0x4e72   :  { %8435 = vrsqrt.f32 %v6998_v1 }
0x4e7a   :  { %v8434_v28 = vpop.eup %8433 }
0x4e7b   :  { %v7001_v20 = vmul.f32 %v8434_v28, %v6985_v35 }
0x4e7c   :  { %v8436_v46 = vpop.eup %8435 }
0x4e7d   :  { %v7007_v5 = vmul.f32 %v7249_v62, %v7001_v20  ;;  %v7002_v43 = vmul.f32 %v8436_v46, %v6986_v23 }
0x4e7f   :  { %v7013_v58 = vadd.f32 %v7250_v0, %v7007_v5  ;;  %v7008_v17 = vmul.f32 %v7249_v62, %v7002_v43 }
0x4e81   :  { %v7015_v61 = vsel %vm98_vm0, %v7013_v58, 0.0  ;;  %v7014_v39 = vadd.f32 %v7250_v0, %v7008_v17 }
0x4e82   :  { %7017 = vst [vmem:[%s10041_s15] sm:$0xff] %v7015_v61 }
0x4e83   :  { %v7016_v8 = vsel %vm98_vm0, %v7014_v39, 0.0 }
0x4e84   :  { %7018 = vst [vmem:[%s10041_s15 + $0x8] sm:$0xff] %v7016_v8 }

</bundles_post_ra>
